<compile_context>
chip_gen: v7x
topology: tpu7x:2x2x1
jax: 0.10.0
libtpu: 0.0.40
codegen_flags: <defaults>
</compile_context>

<pallas_src>
import functools

import jax
import jax.numpy as jnp
from jax import lax
from jax.experimental import pallas as pl
from jax.experimental.pallas import tpu as pltpu

BN_EPS = 1e-5
LANE = 128
MXU_DTYPE = jnp.bfloat16          # MXU inputs; accumulation stays f32.
VMEM_LIMIT = 32 * 1024 * 1024     # safe on v5e/v6e/v7x; blocks below are << this.


# ----------------------------- small host-side helpers --------------------------------

def _ceil_to(v, m):
    return (v + m - 1) // m * m


def _pad_last(a, to):
    pad = to - a.shape[-1]
    if pad == 0:
        return a
    return jnp.pad(a, [(0, 0)] * (a.ndim - 1) + [(0, pad)])


def _row_tile(m, target=512):
    """Largest divisor of m that is a multiple of 8 and <= target (else m itself)."""
    for t in range(min(target, m), 7, -1):
        if m % t == 0 and t % 8 == 0:
            return t
    return m


def _cparams(sem):
    return pltpu.CompilerParams(dimension_semantics=sem,
                                vmem_limit_bytes=VMEM_LIMIT)


def _bn_scale_shift(psum, psumsq, count, gamma, beta, c_pad):
    """Fold training-mode batch statistics into a per-channel FMA: y*scale + shift."""
    s = jnp.sum(psum.reshape(-1, c_pad), axis=0)
    ss = jnp.sum(psumsq.reshape(-1, c_pad), axis=0)
    mean = s / count
    # TODO(synk): E[x^2]-E[x]^2 can cancel for large-mean activations; use a second
    # (y-mean) reduction pass if that regime matters.
    var = jnp.maximum(ss / count - mean * mean, 0.0)
    scale = _pad_last(gamma, c_pad) * lax.rsqrt(var + BN_EPS)
    shift = _pad_last(beta, c_pad) - mean * scale
    return scale.reshape(1, c_pad), shift.reshape(1, c_pad)


# ------------------- phase-1 kernels: conv (+SE scale) + partial BN stats -------------

def _make_expand_conv_kernel(oh, ow, ksize, cin_pad, cout_pad):
    """3x3 groups=1 conv for one image: sum of ksize^2 shifted [oh*ow,Cin]@[Cin,OC]
    MXU dots (im2col fused into the kernel), plus per-image channel sum / sumsq."""
    def kernel(x_ref, w_ref, y_ref, s_ref, ss_ref):
        acc = jnp.zeros((oh * ow, cout_pad), jnp.float32)
        for i in range(ksize):
            for j in range(ksize):
                xt = x_ref[0, i:i + oh, j:j + ow, :]        # bf16 (oh, ow, cin_pad)
                xt = xt.reshape(oh * ow, cin_pad)
                acc = acc + jnp.dot(xt, w_ref[i * ksize + j],
                                    preferred_element_type=jnp.float32)
        y_ref[...] = acc
        s_ref[0] = jnp.sum(acc, axis=0, keepdims=True)
        ss_ref[0] = jnp.sum(acc * acc, axis=0, keepdims=True)
    return kernel


def _make_depthwise_conv_kernel(oh, ow, ksize, stride, c_pad):
    """Depthwise (groups=C) conv for one image: ksize^2 shifted VPU multiply-adds."""
    def kernel(x_ref, w_ref, y_ref, s_ref, ss_ref):
        acc = jnp.zeros((oh, ow, c_pad), jnp.float32)
        for i in range(ksize):
            for j in range(ksize):
                if stride == 1:
                    xt = x_ref[0, i:i + oh, j:j + ow, :]
                else:  # not exercised by the demo (stride=1), kept for generality
                    xt = x_ref[0, pl.ds(i, oh, stride), pl.ds(j, ow, stride), :]
                acc = acc + xt * w_ref[i * ksize + j]
        acc2 = acc.reshape(oh * ow, c_pad)
        y_ref[...] = acc2
        s_ref[0] = jnp.sum(acc2, axis=0, keepdims=True)
        ss_ref[0] = jnp.sum(acc2 * acc2, axis=0, keepdims=True)
    return kernel


def _make_project_kernel(mxu_dtype):
    """(x * se_gate) @ W 1x1 projection (bf16 MXU / f32 acc) + partial BN stats."""
    def kernel(x_ref, se_ref, w_ref, y_ref, s_ref, ss_ref):
        xs = x_ref[0] * se_ref[0]                           # f32 (tm, hid_pad)
        y = jnp.dot(xs.astype(mxu_dtype), w_ref[...],
                    preferred_element_type=jnp.float32)
        y_ref[0] = y
        s_ref[0, 0] = jnp.sum(y, axis=0, keepdims=True)
        ss_ref[0, 0] = jnp.sum(y * y, axis=0, keepdims=True)
    return kernel


# ------------- phase-2 kernels: per-channel FMA (+SiLU / +pool / +residual) -----------

def _make_affine_kernel(apply_silu):
    def kernel(y_ref, sc_ref, sh_ref, o_ref):
        z = y_ref[...] * sc_ref[...] + sh_ref[...]
        if apply_silu:
            z = z * jax.nn.sigmoid(z)
        o_ref[...] = z
    return kernel


def _make_affine_silu_pool_kernel(ohw):
    inv = 1.0 / float(ohw)
    def kernel(y_ref, sc_ref, sh_ref, o_ref, pool_ref):
        z = y_ref[...] * sc_ref[...] + sh_ref[...]
        z = z * jax.nn.sigmoid(z)
        o_ref[...] = z
        pool_ref[0] = jnp.sum(z, axis=0, keepdims=True) * inv
    return kernel


def _residual_affine_kernel(y_ref, sc_ref, sh_ref, r_ref, o_ref):
    # BN affine (scale/shift already carry the stochastic-depth keep scale) + residual.
    o_ref[0] = y_ref[0] * sc_ref[0] + sh_ref[0] + r_ref[0]


def _affine_pass(y, scale, shift, *, silu):
    m, c = y.shape
    tm = _row_tile(m)
    return pl.pallas_call(
        _make_affine_kernel(silu),
        out_shape=jax.ShapeDtypeStruct((m, c), jnp.float32),
        grid=(m // tm,),
        in_specs=[pl.BlockSpec((tm, c), lambda i: (i, 0)),
                  pl.BlockSpec((1, c), lambda i: (0, 0)),
                  pl.BlockSpec((1, c), lambda i: (0, 0))],
        out_specs=pl.BlockSpec((tm, c), lambda i: (i, 0)),
        compiler_params=_cparams(("parallel",)),
    )(y, scale, shift)


# ------------------------------------ forward ------------------------------------------

@functools.partial(jax.jit,
                   static_argnames=("kernel_size", "stride", "padding", "expand_ratio"))
def inverted_residual_forward(x, params, sd_scale, *,
                              kernel_size, stride, padding, expand_ratio):
    """InvertedResidualBlock forward (training-mode BN batch stats; training-mode
    stochastic depth via host-supplied per-sample keep scale).  x: [N,Cin,H,W] f32."""
    n, cin, h, w = x.shape
    hidden = cin * expand_ratio
    oc = params["w_pw"].shape[0]
    expand = cin != hidden
    use_residual = (cin == oc) and (stride == 1)

    cin_pad = _ceil_to(cin, LANE)
    hid_pad = _ceil_to(hidden, LANE)
    oc_pad = _ceil_to(oc, LANE)

    # single NCHW -> NHWC transpose (channels on the lane axis from here on).
    x_nhwc = jnp.transpose(x, (0, 2, 3, 1)).astype(jnp.float32)

    # ============================ stage 1: expand CNNBlock =============================
    if expand:
        xp = _pad_last(x_nhwc, cin_pad)
        xp = jnp.pad(xp, [(0, 0), (1, 1), (1, 1), (0, 0)]).astype(MXU_DTYPE)
        hp1, wp1 = h + 2, w + 2
        # [hidden, cin, 3, 3] -> per-tap [9, cin_pad, hid_pad] (bf16)
        w_exp = jnp.transpose(params["w_exp"], (2, 3, 1, 0)).reshape(9, cin, hidden)
        w_exp = jnp.pad(w_exp, [(0, 0), (0, cin_pad - cin),
                                (0, hid_pad - hidden)]).astype(MXU_DTYPE)
        m1 = n * h * w
        y1, s1, ss1 = pl.pallas_call(
            _make_expand_conv_kernel(h, w, 3, cin_pad, hid_pad),
            out_shape=(jax.ShapeDtypeStruct((m1, hid_pad), jnp.float32),
                       jax.ShapeDtypeStruct((n, 1, hid_pad), jnp.float32),
                       jax.ShapeDtypeStruct((n, 1, hid_pad), jnp.float32)),
            grid=(n,),
            in_specs=[pl.BlockSpec((1, hp1, wp1, cin_pad), lambda b: (b, 0, 0, 0)),
                      pl.BlockSpec((9, cin_pad, hid_pad), lambda b: (0, 0, 0))],
            out_specs=(pl.BlockSpec((h * w, hid_pad), lambda b: (b, 0)),
                       pl.BlockSpec((1, 1, hid_pad), lambda b: (b, 0, 0)),
                       pl.BlockSpec((1, 1, hid_pad), lambda b: (b, 0, 0))),
            compiler_params=_cparams(("parallel",)),
            cost_estimate=pl.CostEstimate(
                flops=2 * m1 * 9 * cin_pad * hid_pad, transcendentals=0,
                bytes_accessed=xp.size * 2 + w_exp.size * 2
                + (m1 + 2 * n) * hid_pad * 4),
        )(xp, w_exp)
        sc1, sh1 = _bn_scale_shift(s1, ss1, m1, params["g1"], params["b1"], hid_pad)
        a_img = _affine_pass(y1, sc1, sh1, silu=True).reshape(n, h, w, hid_pad)
    else:
        a_img = _pad_last(x_nhwc, hid_pad)                  # hidden == cin

    # ========================== stage 2: depthwise CNNBlock ============================
    oh = (h + 2 * padding - kernel_size) // stride + 1
    ow = (w + 2 * padding - kernel_size) // stride + 1
    ohw = oh * ow
    m2 = n * ohw
    # TODO(synk): the spatial halo pad is a host-side HBM round trip; for large images
    # fold it into the depthwise kernel's DMA instead.
    ap = jnp.pad(a_img, [(0, 0), (padding, padding), (padding, padding), (0, 0)])
    hp2, wp2 = h + 2 * padding, w + 2 * padding
    kk = kernel_size * kernel_size
    w_dw = jnp.transpose(params["w_dw"][:, 0], (1, 2, 0)).reshape(kk, 1, 1, hidden)
    w_dw = _pad_last(w_dw, hid_pad).astype(jnp.float32)
    y2, s2, ss2 = pl.pallas_call(
        _make_depthwise_conv_kernel(oh, ow, kernel_size, stride, hid_pad),
        out_shape=(jax.ShapeDtypeStruct((m2, hid_pad), jnp.float32),
                   jax.ShapeDtypeStruct((n, 1, hid_pad), jnp.float32),
                   jax.ShapeDtypeStruct((n, 1, hid_pad), jnp.float32)),
        grid=(n,),
        in_specs=[pl.BlockSpec((1, hp2, wp2, hid_pad), lambda b: (b, 0, 0, 0)),
                  pl.BlockSpec((kk, 1, 1, hid_pad), lambda b: (0, 0, 0, 0))],
        out_specs=(pl.BlockSpec((ohw, hid_pad), lambda b: (b, 0)),
                   pl.BlockSpec((1, 1, hid_pad), lambda b: (b, 0, 0)),
                   pl.BlockSpec((1, 1, hid_pad), lambda b: (b, 0, 0))),
        compiler_params=_cparams(("parallel",)),
    )(ap, w_dw)
    sc2, sh2 = _bn_scale_shift(s2, ss2, m2, params["g2"], params["b2"], hid_pad)
    # phase 2: BN affine + SiLU, fused with the SqueezeExcitation global average pool.
    d, pooled = pl.pallas_call(
        _make_affine_silu_pool_kernel(ohw),
        out_shape=(jax.ShapeDtypeStruct((m2, hid_pad), jnp.float32),
                   jax.ShapeDtypeStruct((n, 1, hid_pad), jnp.float32)),
        grid=(n,),
        in_specs=[pl.BlockSpec((ohw, hid_pad), lambda b: (b, 0)),
                  pl.BlockSpec((1, hid_pad), lambda b: (0, 0)),
                  pl.BlockSpec((1, hid_pad), lambda b: (0, 0))],
        out_specs=(pl.BlockSpec((ohw, hid_pad), lambda b: (b, 0)),
                   pl.BlockSpec((1, 1, hid_pad), lambda b: (b, 0, 0))),
        compiler_params=_cparams(("parallel",)),
    )(y2, sc2, sh2)

    # ===================== stage 3: SqueezeExcitation gate (tiny) ======================
    # TODO(synk): the [N, reduced] SE MLP is left to XLA (negligible work).
    pooled = pooled.reshape(n, hid_pad)[:, :hidden]
    se_h = jax.nn.silu(pooled @ params["w_se1"].reshape(-1, hidden).T + params["b_se1"])
    se = jax.nn.sigmoid(se_h @ params["w_se2"].reshape(hidden, -1).T + params["b_se2"])
    se = _pad_last(se, hid_pad).reshape(n, 1, hid_pad)

    # =================== stage 4: 1x1 projection conv + BatchNorm ======================
    w_pw = params["w_pw"].reshape(oc, hidden).T
    w_pw = jnp.pad(w_pw, [(0, hid_pad - hidden), (0, oc_pad - oc)]).astype(MXU_DTYPE)
    tm = _row_tile(ohw)
    t_blocks = ohw // tm
    d3 = d.reshape(n, ohw, hid_pad)
    y4, s4, ss4 = pl.pallas_call(
        _make_project_kernel(MXU_DTYPE),
        out_shape=(jax.ShapeDtypeStruct((n, ohw, oc_pad), jnp.float32),
                   jax.ShapeDtypeStruct((n, t_blocks, 1, oc_pad), jnp.float32),
                   jax.ShapeDtypeStruct((n, t_blocks, 1, oc_pad), jnp.float32)),
        grid=(n, t_blocks),
        in_specs=[pl.BlockSpec((1, tm, hid_pad), lambda b, t: (b, t, 0)),
                  pl.BlockSpec((1, 1, hid_pad), lambda b, t: (b, 0, 0)),
                  pl.BlockSpec((hid_pad, oc_pad), lambda b, t: (0, 0))],
        out_specs=(pl.BlockSpec((1, tm, oc_pad), lambda b, t: (b, t, 0)),
                   pl.BlockSpec((1, 1, 1, oc_pad), lambda b, t: (b, t, 0, 0)),
                   pl.BlockSpec((1, 1, 1, oc_pad), lambda b, t: (b, t, 0, 0))),
        compiler_params=_cparams(("parallel", "parallel")),
        cost_estimate=pl.CostEstimate(
            flops=2 * m2 * hid_pad * oc_pad, transcendentals=0,
            bytes_accessed=d3.size * 4 + se.size * 4 + w_pw.size * 2
            + (m2 + 2 * n * t_blocks) * oc_pad * 4),
    )(d3, se, w_pw)
    sc4, sh4 = _bn_scale_shift(s4, ss4, m2, params["g3"], params["b3"], oc_pad)

    # ============ stage 5: BN affine (+ stochastic depth + residual add) ===============
    if use_residual:
        sc4b = sd_scale.reshape(n, 1, 1) * sc4.reshape(1, 1, oc_pad)
        sh4b = sd_scale.reshape(n, 1, 1) * sh4.reshape(1, 1, oc_pad)
        res = _pad_last(x_nhwc, oc_pad).reshape(n, ohw, oc_pad)
        out = pl.pallas_call(
            _residual_affine_kernel,
            out_shape=jax.ShapeDtypeStruct((n, ohw, oc_pad), jnp.float32),
            grid=(n, t_blocks),
            in_specs=[pl.BlockSpec((1, tm, oc_pad), lambda b, t: (b, t, 0)),
                      pl.BlockSpec((1, 1, oc_pad), lambda b, t: (b, 0, 0)),
                      pl.BlockSpec((1, 1, oc_pad), lambda b, t: (b, 0, 0)),
                      pl.BlockSpec((1, tm, oc_pad), lambda b, t: (b, t, 0))],
            out_specs=pl.BlockSpec((1, tm, oc_pad), lambda b, t: (b, t, 0)),
            compiler_params=_cparams(("parallel", "parallel")),
        )(y4, sc4b, sh4b, res)
    else:
        out = _affine_pass(y4.reshape(m2, oc_pad), sc4, sh4, silu=False)
        out = out.reshape(n, ohw, oc_pad)

    out = out[:, :, :oc].reshape(n, oh, ow, oc)
    return jnp.transpose(out, (0, 3, 1, 2))                 # back to NCHW


# ----------------------------- pure-JAX reference --------------------------------------

def _reference(x, p, sd_scale, *, kernel_size, stride, padding, expand_ratio,
               mxu_dtype=MXU_DTYPE):
    """Module forward in XLA, mirroring the kernel's bf16-MXU-input / f32-accumulate
    numerical contract (elementwise math stays f32)."""
    n, cin, h, w = x.shape
    hidden = cin * expand_ratio
    oc = p["w_pw"].shape[0]
    use_residual = (cin == oc) and (stride == 1)

    def bn(y, g, b):
        mean = jnp.mean(y, axis=(0, 2, 3), keepdims=True)
        var = jnp.mean((y - mean) ** 2, axis=(0, 2, 3), keepdims=True)
        return ((y - mean) * lax.rsqrt(var + BN_EPS) * g.reshape(1, -1, 1, 1)
                + b.reshape(1, -1, 1, 1))

    a = x
    if expand_ratio != 1:
        y = lax.conv_general_dilated(
            x.astype(mxu_dtype), p["w_exp"].astype(mxu_dtype), (1, 1),
            [(1, 1), (1, 1)], dimension_numbers=("NCHW", "OIHW", "NCHW"),
            preferred_element_type=jnp.float32)
        a = jax.nn.silu(bn(y, p["g1"], p["b1"]))
    y = lax.conv_general_dilated(
        a, p["w_dw"], (stride, stride), [(padding, padding), (padding, padding)],
        dimension_numbers=("NCHW", "OIHW", "NCHW"), feature_group_count=hidden)
    d = jax.nn.silu(bn(y, p["g2"], p["b2"]))
    pooled = jnp.mean(d, axis=(2, 3))
    se_h = jax.nn.silu(pooled @ p["w_se1"].reshape(-1, hidden).T + p["b_se1"])
    se = jax.nn.sigmoid(se_h @ p["w_se2"].reshape(hidden, -1).T + p["b_se2"])
    d = d * se[:, :, None, None]
    y = lax.conv_general_dilated(
        d.astype(mxu_dtype), p["w_pw"].astype(mxu_dtype), (1, 1), [(0, 0), (0, 0)],
        dimension_numbers=("NCHW", "OIHW", "NCHW"),
        preferred_element_type=jnp.float32)
    y = bn(y, p["g3"], p["b3"])
    if use_residual:
        y = y * sd_scale.reshape(n, 1, 1, 1) + x
    return y


if __name__ == "__main__":
    # InvertedResidualBlock(in=8, out=8, kernel_size=3, stride=1, padding=1,
    #                       expand_ratio=4, reduction=4) on a 2x8x16x16 input:
    # exercises expand conv, depthwise conv, SE, projection+BN, stochastic depth,
    # and the residual add.
    N, CIN, H, W = 2, 8, 16, 16
    OC, KS, STRIDE, PAD = 8, 3, 1, 1
    EXPAND_RATIO, REDUCTION, SURVIVAL_PROB = 4, 4, 0.8
    HIDDEN = CIN * EXPAND_RATIO
    REDUCED = int(CIN / REDUCTION)

    keys = jax.random.split(jax.random.PRNGKey(0), 16)
    x = jax.random.normal(keys[0], (N, CIN, H, W), jnp.float32)
    params = {
        "w_exp": 0.1 * jax.random.normal(keys[1], (HIDDEN, CIN, 3, 3), jnp.float32),
        "g1": 1.0 + 0.1 * jax.random.normal(keys[2], (HIDDEN,), jnp.float32),
        "b1": 0.1 * jax.random.normal(keys[3], (HIDDEN,), jnp.float32),
        "w_dw": 0.1 * jax.random.normal(keys[4], (HIDDEN, 1, KS, KS), jnp.float32),
        "g2": 1.0 + 0.1 * jax.random.normal(keys[5], (HIDDEN,), jnp.float32),
        "b2": 0.1 * jax.random.normal(keys[6], (HIDDEN,), jnp.float32),
        "w_se1": 0.1 * jax.random.normal(keys[7], (REDUCED, HIDDEN, 1, 1), jnp.float32),
        "b_se1": 0.1 * jax.random.normal(keys[8], (REDUCED,), jnp.float32),
        "w_se2": 0.1 * jax.random.normal(keys[9], (HIDDEN, REDUCED, 1, 1), jnp.float32),
        "b_se2": 0.1 * jax.random.normal(keys[10], (HIDDEN,), jnp.float32),
        "w_pw": 0.1 * jax.random.normal(keys[11], (OC, HIDDEN, 1, 1), jnp.float32),
        "g3": 1.0 + 0.1 * jax.random.normal(keys[12], (OC,), jnp.float32),
        "b3": 0.1 * jax.random.normal(keys[13], (OC,), jnp.float32),
    }
    # Training-mode stochastic depth; the Bernoulli draw is done host-side (seeded)
    # so the Pallas path and the reference share exactly the same mask.
    keep = jax.random.uniform(keys[14], (N,)) < SURVIVAL_PROB
    sd_scale = keep.astype(jnp.float32) / SURVIVAL_PROB

    out = inverted_residual_forward(x, params, sd_scale, kernel_size=KS,
                                    stride=STRIDE, padding=PAD,
                                    expand_ratio=EXPAND_RATIO)
    out = jax.block_until_ready(out)

    ref = _reference(x, params, sd_scale, kernel_size=KS, stride=STRIDE, padding=PAD,
                     expand_ratio=EXPAND_RATIO)
    assert out.shape == (N, OC, H, W), out.shape
    err = float(jnp.max(jnp.abs(out - ref)))
    assert err < 5e-3, f"max abs err {err}"
    print("KERNEL_OK")
</pallas_src>

<mosaic_0001>
module attributes {stable_mosaic.version = 11 : i64} {
  func.func @kernel(%arg0: i32, %arg1: memref<512x128xf32, #tpu.memory_space<vmem>>, %arg2: memref<1x128xf32, #tpu.memory_space<vmem>>, %arg3: memref<1x128xf32, #tpu.memory_space<vmem>>, %arg4: memref<512x128xf32, #tpu.memory_space<vmem>>) attributes {dimension_semantics = [#tpu.dimension_semantics<parallel>], iteration_bounds = array<i64: 1>, scalar_prefetch = 0 : i64, scratch_operands = 0 : i64, tpu.core_type = #tpu.core_type<tc>, window_params = [{transform_indices = @transform_0, window_bounds = array<i64: 512, 128>}, {pipeline_mode = #tpu.pipeline_mode<synchronous>, transform_indices = @transform_1, window_bounds = array<i64: 1, 128>}, {pipeline_mode = #tpu.pipeline_mode<synchronous>, transform_indices = @transform_2, window_bounds = array<i64: 1, 128>}, {transform_indices = @transform_3, window_bounds = array<i64: 512, 128>}]} {
    %c0 = arith.constant 0 : index
    %c0_0 = arith.constant 0 : index
    %0 = vector.load %arg1[%c0, %c0_0] : memref<512x128xf32, #tpu.memory_space<vmem>>, vector<512x128xf32>
    %c0_1 = arith.constant 0 : index
    %c0_2 = arith.constant 0 : index
    %1 = vector.load %arg2[%c0_1, %c0_2] : memref<1x128xf32, #tpu.memory_space<vmem>>, vector<1x128xf32>
    %2 = vector.broadcast %1 : vector<1x128xf32> to vector<512x128xf32>
    %3 = arith.mulf %0, %2 : vector<512x128xf32>
    %c0_3 = arith.constant 0 : index
    %c0_4 = arith.constant 0 : index
    %4 = vector.load %arg3[%c0_3, %c0_4] : memref<1x128xf32, #tpu.memory_space<vmem>>, vector<1x128xf32>
    %5 = vector.broadcast %4 : vector<1x128xf32> to vector<512x128xf32>
    %6 = arith.addf %3, %5 : vector<512x128xf32>
    %7 = arith.negf %6 : vector<512x128xf32>
    %8 = math.exp %7 : vector<512x128xf32>
    %cst = arith.constant 1.000000e+00 : f32
    %9 = vector.broadcast %cst : f32 to vector<512x128xf32>
    %10 = arith.addf %9, %8 : vector<512x128xf32>
    %11 = arith.divf %9, %10 : vector<512x128xf32>
    %12 = arith.mulf %6, %11 : vector<512x128xf32>
    %c0_5 = arith.constant 0 : index
    %c0_6 = arith.constant 0 : index
    %13 = vector.load %arg4[%c0_5, %c0_6] : memref<512x128xf32, #tpu.memory_space<vmem>>, vector<512x128xf32>
    tpu.vector_store %arg4[%c0_5, %c0_6], %12 {strides = array<i32>} : memref<512x128xf32, #tpu.memory_space<vmem>>, vector<512x128xf32>,
    return
  }
  func.func @transform_0(%arg0: i32) -> (i32, i32) {
    %c0_i32 = arith.constant 0 : i32
    %c0_i32_0 = arith.constant 0 : i32
    return %arg0, %c0_i32 : i32, i32
  }
  func.func @transform_1(%arg0: i32) -> (i32, i32) {
    %c0_i32 = arith.constant 0 : i32
    %c0_i32_0 = arith.constant 0 : i32
    %c0_i32_1 = arith.constant 0 : i32
    return %c0_i32, %c0_i32_0 : i32, i32
  }
  func.func @transform_2(%arg0: i32) -> (i32, i32) {
    %c0_i32 = arith.constant 0 : i32
    %c0_i32_0 = arith.constant 0 : i32
    %c0_i32_1 = arith.constant 0 : i32
    return %c0_i32, %c0_i32_0 : i32, i32
  }
  func.func @transform_3(%arg0: i32) -> (i32, i32) {
    %c0_i32 = arith.constant 0 : i32
    %c0_i32_0 = arith.constant 0 : i32
    return %arg0, %c0_i32 : i32, i32
  }
}

module attributes {stable_mosaic.version = 11 : i64} {
  func.func @kernel(%arg0: i32, %arg1: memref<1x18x18x128xbf16, #tpu.memory_space<vmem>>, %arg2: memref<9x128x128xbf16, #tpu.memory_space<vmem>>, %arg3: memref<256x128xf32, #tpu.memory_space<vmem>>, %arg4: memref<1x1x128xf32, #tpu.memory_space<vmem>>, %arg5: memref<1x1x128xf32, #tpu.memory_space<vmem>>) attributes {dimension_semantics = [#tpu.dimension_semantics<parallel>], iteration_bounds = array<i64: 2>, scalar_prefetch = 0 : i64, scratch_operands = 0 : i64, tpu.core_type = #tpu.core_type<tc>, window_params = [{transform_indices = @transform_0, window_bounds = array<i64: 1, 18, 18, 128>}, {pipeline_mode = #tpu.pipeline_mode<synchronous>, transform_indices = @transform_1, window_bounds = array<i64: 9, 128, 128>}, {transform_indices = @transform_2, window_bounds = array<i64: 256, 128>}, {transform_indices = @transform_3, window_bounds = array<i64: 1, 1, 128>}, {transform_indices = @transform_4, window_bounds = array<i64: 1, 1, 128>}]} {
    %cst = arith.constant 0.000000e+00 : f32
    %0 = vector.broadcast %cst : f32 to vector<256x128xf32>
    %c0 = arith.constant 0 : index
    %c0_0 = arith.constant 0 : index
    %c0_1 = arith.constant 0 : index
    %c0_2 = arith.constant 0 : index
    %1 = vector.load %arg1[%c0, %c0_0, %c0_1, %c0_2] : memref<1x18x18x128xbf16, #tpu.memory_space<vmem>>, vector<1x16x16x128xbf16>
    %2 = vector.shape_cast %1 : vector<1x16x16x128xbf16> to vector<16x16x128xbf16>
    %3 = vector.shape_cast %2 : vector<16x16x128xbf16> to vector<256x128xbf16>
    %c0_3 = arith.constant 0 : index
    %c0_4 = arith.constant 0 : index
    %c0_5 = arith.constant 0 : index
    %4 = vector.load %arg2[%c0_3, %c0_4, %c0_5] : memref<9x128x128xbf16, #tpu.memory_space<vmem>>, vector<1x128x128xbf16>
    %5 = vector.shape_cast %4 : vector<1x128x128xbf16> to vector<128x128xbf16>
    %cst_6 = arith.constant dense<0.000000e+00> : vector<256x128xf32>
    %6 = tpu.matmul %3, %5, %cst_6 {dimension_numbers = #tpu.dot_dimension_numbers<[1], [0], [0], [1], [0, 0, 1, 1], [], []>} : vector<256x128xbf16>, vector<128x128xbf16>, vector<256x128xf32> -> vector<256x128xf32>
    %7 = arith.addf %0, %6 : vector<256x128xf32>
    %c0_7 = arith.constant 0 : index
    %c0_8 = arith.constant 0 : index
    %c1 = arith.constant 1 : index
    %c0_9 = arith.constant 0 : index
    %8 = vector.load %arg1[%c0_7, %c0_8, %c1, %c0_9] : memref<1x18x18x128xbf16, #tpu.memory_space<vmem>>, vector<1x16x16x128xbf16>
    %9 = vector.shape_cast %8 : vector<1x16x16x128xbf16> to vector<16x16x128xbf16>
    %10 = vector.shape_cast %9 : vector<16x16x128xbf16> to vector<256x128xbf16>
    %c1_10 = arith.constant 1 : index
    %c0_11 = arith.constant 0 : index
    %c0_12 = arith.constant 0 : index
    %11 = vector.load %arg2[%c1_10, %c0_11, %c0_12] : memref<9x128x128xbf16, #tpu.memory_space<vmem>>, vector<1x128x128xbf16>
    %12 = vector.shape_cast %11 : vector<1x128x128xbf16> to vector<128x128xbf16>
    %cst_13 = arith.constant dense<0.000000e+00> : vector<256x128xf32>
    %13 = tpu.matmul %10, %12, %cst_13 {dimension_numbers = #tpu.dot_dimension_numbers<[1], [0], [0], [1], [0, 0, 1, 1], [], []>} : vector<256x128xbf16>, vector<128x128xbf16>, vector<256x128xf32> -> vector<256x128xf32>
    %14 = arith.addf %7, %13 : vector<256x128xf32>
    %c0_14 = arith.constant 0 : index
    %c0_15 = arith.constant 0 : index
    %c2 = arith.constant 2 : index
    %c0_16 = arith.constant 0 : index
    %15 = vector.load %arg1[%c0_14, %c0_15, %c2, %c0_16] : memref<1x18x18x128xbf16, #tpu.memory_space<vmem>>, vector<1x16x16x128xbf16>
    %16 = vector.shape_cast %15 : vector<1x16x16x128xbf16> to vector<16x16x128xbf16>
    %17 = vector.shape_cast %16 : vector<16x16x128xbf16> to vector<256x128xbf16>
    %c2_17 = arith.constant 2 : index
    %c0_18 = arith.constant 0 : index
    %c0_19 = arith.constant 0 : index
    %18 = vector.load %arg2[%c2_17, %c0_18, %c0_19] : memref<9x128x128xbf16, #tpu.memory_space<vmem>>, vector<1x128x128xbf16>
    %19 = vector.shape_cast %18 : vector<1x128x128xbf16> to vector<128x128xbf16>
    %cst_20 = arith.constant dense<0.000000e+00> : vector<256x128xf32>
    %20 = tpu.matmul %17, %19, %cst_20 {dimension_numbers = #tpu.dot_dimension_numbers<[1], [0], [0], [1], [0, 0, 1, 1], [], []>} : vector<256x128xbf16>, vector<128x128xbf16>, vector<256x128xf32> -> vector<256x128xf32>
    %21 = arith.addf %14, %20 : vector<256x128xf32>
    %c0_21 = arith.constant 0 : index
    %c1_22 = arith.constant 1 : index
    %c0_23 = arith.constant 0 : index
    %c0_24 = arith.constant 0 : index
    %22 = vector.load %arg1[%c0_21, %c1_22, %c0_23, %c0_24] : memref<1x18x18x128xbf16, #tpu.memory_space<vmem>>, vector<1x16x16x128xbf16>
    %23 = vector.shape_cast %22 : vector<1x16x16x128xbf16> to vector<16x16x128xbf16>
    %24 = vector.shape_cast %23 : vector<16x16x128xbf16> to vector<256x128xbf16>
    %c3 = arith.constant 3 : index
    %c0_25 = arith.constant 0 : index
    %c0_26 = arith.constant 0 : index
    %25 = vector.load %arg2[%c3, %c0_25, %c0_26] : memref<9x128x128xbf16, #tpu.memory_space<vmem>>, vector<1x128x128xbf16>
    %26 = vector.shape_cast %25 : vector<1x128x128xbf16> to vector<128x128xbf16>
    %cst_27 = arith.constant dense<0.000000e+00> : vector<256x128xf32>
    %27 = tpu.matmul %24, %26, %cst_27 {dimension_numbers = #tpu.dot_dimension_numbers<[1], [0], [0], [1], [0, 0, 1, 1], [], []>} : vector<256x128xbf16>, vector<128x128xbf16>, vector<256x128xf32> -> vector<256x128xf32>
    %28 = arith.addf %21, %27 : vector<256x128xf32>
    %c0_28 = arith.constant 0 : index
    %c1_29 = arith.constant 1 : index
    %c1_30 = arith.constant 1 : index
    %c0_31 = arith.constant 0 : index
    %29 = vector.load %arg1[%c0_28, %c1_29, %c1_30, %c0_31] : memref<1x18x18x128xbf16, #tpu.memory_space<vmem>>, vector<1x16x16x128xbf16>
    %30 = vector.shape_cast %29 : vector<1x16x16x128xbf16> to vector<16x16x128xbf16>
    %31 = vector.shape_cast %30 : vector<16x16x128xbf16> to vector<256x128xbf16>
    %c4 = arith.constant 4 : index
    %c0_32 = arith.constant 0 : index
    %c0_33 = arith.constant 0 : index
    %32 = vector.load %arg2[%c4, %c0_32, %c0_33] : memref<9x128x128xbf16, #tpu.memory_space<vmem>>, vector<1x128x128xbf16>
    %33 = vector.shape_cast %32 : vector<1x128x128xbf16> to vector<128x128xbf16>
    %cst_34 = arith.constant dense<0.000000e+00> : vector<256x128xf32>
    %34 = tpu.matmul %31, %33, %cst_34 {dimension_numbers = #tpu.dot_dimension_numbers<[1], [0], [0], [1], [0, 0, 1, 1], [], []>} : vector<256x128xbf16>, vector<128x128xbf16>, vector<256x128xf32> -> vector<256x128xf32>
    %35 = arith.addf %28, %34 : vector<256x128xf32>
    %c0_35 = arith.constant 0 : index
    %c1_36 = arith.constant 1 : index
    %c2_37 = arith.constant 2 : index
    %c0_38 = arith.constant 0 : index
    %36 = vector.load %arg1[%c0_35, %c1_36, %c2_37, %c0_38] : memref<1x18x18x128xbf16, #tpu.memory_space<vmem>>, vector<1x16x16x128xbf16>
    %37 = vector.shape_cast %36 : vector<1x16x16x128xbf16> to vector<16x16x128xbf16>
    %38 = vector.shape_cast %37 : vector<16x16x128xbf16> to vector<256x128xbf16>
    %c5 = arith.constant 5 : index
    %c0_39 = arith.constant 0 : index
    %c0_40 = arith.constant 0 : index
    %39 = vector.load %arg2[%c5, %c0_39, %c0_40] : memref<9x128x128xbf16, #tpu.memory_space<vmem>>, vector<1x128x128xbf16>
    %40 = vector.shape_cast %39 : vector<1x128x128xbf16> to vector<128x128xbf16>
    %cst_41 = arith.constant dense<0.000000e+00> : vector<256x128xf32>
    %41 = tpu.matmul %38, %40, %cst_41 {dimension_numbers = #tpu.dot_dimension_numbers<[1], [0], [0], [1], [0, 0, 1, 1], [], []>} : vector<256x128xbf16>, vector<128x128xbf16>, vector<256x128xf32> -> vector<256x128xf32>
    %42 = arith.addf %35, %41 : vector<256x128xf32>
    %c0_42 = arith.constant 0 : index
    %c2_43 = arith.constant 2 : index
    %c0_44 = arith.constant 0 : index
    %c0_45 = arith.constant 0 : index
    %43 = vector.load %arg1[%c0_42, %c2_43, %c0_44, %c0_45] : memref<1x18x18x128xbf16, #tpu.memory_space<vmem>>, vector<1x16x16x128xbf16>
    %44 = vector.shape_cast %43 : vector<1x16x16x128xbf16> to vector<16x16x128xbf16>
    %45 = vector.shape_cast %44 : vector<16x16x128xbf16> to vector<256x128xbf16>
    %c6 = arith.constant 6 : index
    %c0_46 = arith.constant 0 : index
    %c0_47 = arith.constant 0 : index
    %46 = vector.load %arg2[%c6, %c0_46, %c0_47] : memref<9x128x128xbf16, #tpu.memory_space<vmem>>, vector<1x128x128xbf16>
    %47 = vector.shape_cast %46 : vector<1x128x128xbf16> to vector<128x128xbf16>
    %cst_48 = arith.constant dense<0.000000e+00> : vector<256x128xf32>
    %48 = tpu.matmul %45, %47, %cst_48 {dimension_numbers = #tpu.dot_dimension_numbers<[1], [0], [0], [1], [0, 0, 1, 1], [], []>} : vector<256x128xbf16>, vector<128x128xbf16>, vector<256x128xf32> -> vector<256x128xf32>
    %49 = arith.addf %42, %48 : vector<256x128xf32>
    %c0_49 = arith.constant 0 : index
    %c2_50 = arith.constant 2 : index
    %c1_51 = arith.constant 1 : index
    %c0_52 = arith.constant 0 : index
    %50 = vector.load %arg1[%c0_49, %c2_50, %c1_51, %c0_52] : memref<1x18x18x128xbf16, #tpu.memory_space<vmem>>, vector<1x16x16x128xbf16>
    %51 = vector.shape_cast %50 : vector<1x16x16x128xbf16> to vector<16x16x128xbf16>
    %52 = vector.shape_cast %51 : vector<16x16x128xbf16> to vector<256x128xbf16>
    %c7 = arith.constant 7 : index
    %c0_53 = arith.constant 0 : index
    %c0_54 = arith.constant 0 : index
    %53 = vector.load %arg2[%c7, %c0_53, %c0_54] : memref<9x128x128xbf16, #tpu.memory_space<vmem>>, vector<1x128x128xbf16>
    %54 = vector.shape_cast %53 : vector<1x128x128xbf16> to vector<128x128xbf16>
    %cst_55 = arith.constant dense<0.000000e+00> : vector<256x128xf32>
    %55 = tpu.matmul %52, %54, %cst_55 {dimension_numbers = #tpu.dot_dimension_numbers<[1], [0], [0], [1], [0, 0, 1, 1], [], []>} : vector<256x128xbf16>, vector<128x128xbf16>, vector<256x128xf32> -> vector<256x128xf32>
    %56 = arith.addf %49, %55 : vector<256x128xf32>
    %c0_56 = arith.constant 0 : index
    %c2_57 = arith.constant 2 : index
    %c2_58 = arith.constant 2 : index
    %c0_59 = arith.constant 0 : index
    %57 = vector.load %arg1[%c0_56, %c2_57, %c2_58, %c0_59] : memref<1x18x18x128xbf16, #tpu.memory_space<vmem>>, vector<1x16x16x128xbf16>
    %58 = vector.shape_cast %57 : vector<1x16x16x128xbf16> to vector<16x16x128xbf16>
    %59 = vector.shape_cast %58 : vector<16x16x128xbf16> to vector<256x128xbf16>
    %c8 = arith.constant 8 : index
    %c0_60 = arith.constant 0 : index
    %c0_61 = arith.constant 0 : index
    %60 = vector.load %arg2[%c8, %c0_60, %c0_61] : memref<9x128x128xbf16, #tpu.memory_space<vmem>>, vector<1x128x128xbf16>
    %61 = vector.shape_cast %60 : vector<1x128x128xbf16> to vector<128x128xbf16>
    %cst_62 = arith.constant dense<0.000000e+00> : vector<256x128xf32>
    %62 = tpu.matmul %59, %61, %cst_62 {dimension_numbers = #tpu.dot_dimension_numbers<[1], [0], [0], [1], [0, 0, 1, 1], [], []>} : vector<256x128xbf16>, vector<128x128xbf16>, vector<256x128xf32> -> vector<256x128xf32>
    %63 = arith.addf %56, %62 : vector<256x128xf32>
    %c0_63 = arith.constant 0 : index
    %c0_64 = arith.constant 0 : index
    %64 = vector.load %arg3[%c0_63, %c0_64] : memref<256x128xf32, #tpu.memory_space<vmem>>, vector<256x128xf32>
    tpu.vector_store %arg3[%c0_63, %c0_64], %63 {strides = array<i32>} : memref<256x128xf32, #tpu.memory_space<vmem>>, vector<256x128xf32>,
    %cst_65 = arith.constant dense<0.000000e+00> : vector<128xf32>
    %65 = vector.multi_reduction <add>, %63, %cst_65 [0] : vector<256x128xf32> to vector<128xf32>
    %66 = vector.shape_cast %65 : vector<128xf32> to vector<1x128xf32>
    %c0_66 = arith.constant 0 : index
    %c0_67 = arith.constant 0 : index
    %c0_68 = arith.constant 0 : index
    %67 = vector.load %arg4[%c0_66, %c0_67, %c0_68] : memref<1x1x128xf32, #tpu.memory_space<vmem>>, vector<1x1x128xf32>
    %68 = vector.shape_cast %67 : vector<1x1x128xf32> to vector<1x128xf32>
    %69 = vector.shape_cast %66 : vector<1x128xf32> to vector<1x1x128xf32>
    tpu.vector_store %arg4[%c0_66, %c0_67, %c0_68], %69 {strides = array<i32>} : memref<1x1x128xf32, #tpu.memory_space<vmem>>, vector<1x1x128xf32>,
    %70 = arith.mulf %63, %63 : vector<256x128xf32>
    %cst_69 = arith.constant dense<0.000000e+00> : vector<128xf32>
    %71 = vector.multi_reduction <add>, %70, %cst_69 [0] : vector<256x128xf32> to vector<128xf32>
    %72 = vector.shape_cast %71 : vector<128xf32> to vector<1x128xf32>
    %c0_70 = arith.constant 0 : index
    %c0_71 = arith.constant 0 : index
    %c0_72 = arith.constant 0 : index
    %73 = vector.load %arg5[%c0_70, %c0_71, %c0_72] : memref<1x1x128xf32, #tpu.memory_space<vmem>>, vector<1x1x128xf32>
    %74 = vector.shape_cast %73 : vector<1x1x128xf32> to vector<1x128xf32>
    %75 = vector.shape_cast %72 : vector<1x128xf32> to vector<1x1x128xf32>
    tpu.vector_store %arg5[%c0_70, %c0_71, %c0_72], %75 {strides = array<i32>} : memref<1x1x128xf32, #tpu.memory_space<vmem>>, vector<1x1x128xf32>,
    return
  }
  func.func @transform_0(%arg0: i32) -> (i32, i32, i32, i32) {
    %c0_i32 = arith.constant 0 : i32
    %c0_i32_0 = arith.constant 0 : i32
    %c0_i32_1 = arith.constant 0 : i32
    %c0_i32_2 = arith.constant 0 : i32
    return %arg0, %c0_i32, %c0_i32_0, %c0_i32_1 : i32, i32, i32, i32
  }
  func.func @transform_1(%arg0: i32) -> (i32, i32, i32) {
    %c0_i32 = arith.constant 0 : i32
    %c0_i32_0 = arith.constant 0 : i32
    %c0_i32_1 = arith.constant 0 : i32
    %c0_i32_2 = arith.constant 0 : i32
    return %c0_i32, %c0_i32_0, %c0_i32_1 : i32, i32, i32
  }
  func.func @transform_2(%arg0: i32) -> (i32, i32) {
    %c0_i32 = arith.constant 0 : i32
    %c0_i32_0 = arith.constant 0 : i32
    return %arg0, %c0_i32 : i32, i32
  }
  func.func @transform_3(%arg0: i32) -> (i32, i32, i32) {
    %c0_i32 = arith.constant 0 : i32
    %c0_i32_0 = arith.constant 0 : i32
    %c0_i32_1 = arith.constant 0 : i32
    return %arg0, %c0_i32, %c0_i32_0 : i32, i32, i32
  }
  func.func @transform_4(%arg0: i32) -> (i32, i32, i32) {
    %c0_i32 = arith.constant 0 : i32
    %c0_i32_0 = arith.constant 0 : i32
    %c0_i32_1 = arith.constant 0 : i32
    return %arg0, %c0_i32, %c0_i32_0 : i32, i32, i32
  }
}

module attributes {stable_mosaic.version = 11 : i64} {
  func.func @kernel(%arg0: i32, %arg1: memref<1x18x18x128xf32, #tpu.memory_space<vmem>>, %arg2: memref<9x1x1x128xf32, #tpu.memory_space<vmem>>, %arg3: memref<256x128xf32, #tpu.memory_space<vmem>>, %arg4: memref<1x1x128xf32, #tpu.memory_space<vmem>>, %arg5: memref<1x1x128xf32, #tpu.memory_space<vmem>>) attributes {dimension_semantics = [#tpu.dimension_semantics<parallel>], iteration_bounds = array<i64: 2>, scalar_prefetch = 0 : i64, scratch_operands = 0 : i64, tpu.core_type = #tpu.core_type<tc>, window_params = [{transform_indices = @transform_0, window_bounds = array<i64: 1, 18, 18, 128>}, {pipeline_mode = #tpu.pipeline_mode<synchronous>, transform_indices = @transform_1, window_bounds = array<i64: 9, 1, 1, 128>}, {transform_indices = @transform_2, window_bounds = array<i64: 256, 128>}, {transform_indices = @transform_3, window_bounds = array<i64: 1, 1, 128>}, {transform_indices = @transform_4, window_bounds = array<i64: 1, 1, 128>}]} {
    %cst = arith.constant 0.000000e+00 : f32
    %0 = vector.broadcast %cst : f32 to vector<16x16x128xf32>
    %c0 = arith.constant 0 : index
    %c0_0 = arith.constant 0 : index
    %c0_1 = arith.constant 0 : index
    %c0_2 = arith.constant 0 : index
    %1 = vector.load %arg1[%c0, %c0_0, %c0_1, %c0_2] : memref<1x18x18x128xf32, #tpu.memory_space<vmem>>, vector<1x16x16x128xf32>
    %2 = vector.shape_cast %1 : vector<1x16x16x128xf32> to vector<16x16x128xf32>
    %c0_3 = arith.constant 0 : index
    %c0_4 = arith.constant 0 : index
    %c0_5 = arith.constant 0 : index
    %c0_6 = arith.constant 0 : index
    %3 = vector.load %arg2[%c0_3, %c0_4, %c0_5, %c0_6] : memref<9x1x1x128xf32, #tpu.memory_space<vmem>>, vector<1x1x1x128xf32>
    %4 = vector.shape_cast %3 : vector<1x1x1x128xf32> to vector<1x1x128xf32>
    %5 = vector.broadcast %4 : vector<1x1x128xf32> to vector<16x16x128xf32>
    %6 = arith.mulf %2, %5 : vector<16x16x128xf32>
    %7 = arith.addf %0, %6 : vector<16x16x128xf32>
    %c0_7 = arith.constant 0 : index
    %c0_8 = arith.constant 0 : index
    %c1 = arith.constant 1 : index
    %c0_9 = arith.constant 0 : index
    %8 = vector.load %arg1[%c0_7, %c0_8, %c1, %c0_9] : memref<1x18x18x128xf32, #tpu.memory_space<vmem>>, vector<1x16x16x128xf32>
    %9 = vector.shape_cast %8 : vector<1x16x16x128xf32> to vector<16x16x128xf32>
    %c1_10 = arith.constant 1 : index
    %c0_11 = arith.constant 0 : index
    %c0_12 = arith.constant 0 : index
    %c0_13 = arith.constant 0 : index
    %10 = vector.load %arg2[%c1_10, %c0_11, %c0_12, %c0_13] : memref<9x1x1x128xf32, #tpu.memory_space<vmem>>, vector<1x1x1x128xf32>
    %11 = vector.shape_cast %10 : vector<1x1x1x128xf32> to vector<1x1x128xf32>
    %12 = vector.broadcast %11 : vector<1x1x128xf32> to vector<16x16x128xf32>
    %13 = arith.mulf %9, %12 : vector<16x16x128xf32>
    %14 = arith.addf %7, %13 : vector<16x16x128xf32>
    %c0_14 = arith.constant 0 : index
    %c0_15 = arith.constant 0 : index
    %c2 = arith.constant 2 : index
    %c0_16 = arith.constant 0 : index
    %15 = vector.load %arg1[%c0_14, %c0_15, %c2, %c0_16] : memref<1x18x18x128xf32, #tpu.memory_space<vmem>>, vector<1x16x16x128xf32>
    %16 = vector.shape_cast %15 : vector<1x16x16x128xf32> to vector<16x16x128xf32>
    %c2_17 = arith.constant 2 : index
    %c0_18 = arith.constant 0 : index
    %c0_19 = arith.constant 0 : index
    %c0_20 = arith.constant 0 : index
    %17 = vector.load %arg2[%c2_17, %c0_18, %c0_19, %c0_20] : memref<9x1x1x128xf32, #tpu.memory_space<vmem>>, vector<1x1x1x128xf32>
    %18 = vector.shape_cast %17 : vector<1x1x1x128xf32> to vector<1x1x128xf32>
    %19 = vector.broadcast %18 : vector<1x1x128xf32> to vector<16x16x128xf32>
    %20 = arith.mulf %16, %19 : vector<16x16x128xf32>
    %21 = arith.addf %14, %20 : vector<16x16x128xf32>
    %c0_21 = arith.constant 0 : index
    %c1_22 = arith.constant 1 : index
    %c0_23 = arith.constant 0 : index
    %c0_24 = arith.constant 0 : index
    %22 = vector.load %arg1[%c0_21, %c1_22, %c0_23, %c0_24] : memref<1x18x18x128xf32, #tpu.memory_space<vmem>>, vector<1x16x16x128xf32>
    %23 = vector.shape_cast %22 : vector<1x16x16x128xf32> to vector<16x16x128xf32>
    %c3 = arith.constant 3 : index
    %c0_25 = arith.constant 0 : index
    %c0_26 = arith.constant 0 : index
    %c0_27 = arith.constant 0 : index
    %24 = vector.load %arg2[%c3, %c0_25, %c0_26, %c0_27] : memref<9x1x1x128xf32, #tpu.memory_space<vmem>>, vector<1x1x1x128xf32>
    %25 = vector.shape_cast %24 : vector<1x1x1x128xf32> to vector<1x1x128xf32>
    %26 = vector.broadcast %25 : vector<1x1x128xf32> to vector<16x16x128xf32>
    %27 = arith.mulf %23, %26 : vector<16x16x128xf32>
    %28 = arith.addf %21, %27 : vector<16x16x128xf32>
    %c0_28 = arith.constant 0 : index
    %c1_29 = arith.constant 1 : index
    %c1_30 = arith.constant 1 : index
    %c0_31 = arith.constant 0 : index
    %29 = vector.load %arg1[%c0_28, %c1_29, %c1_30, %c0_31] : memref<1x18x18x128xf32, #tpu.memory_space<vmem>>, vector<1x16x16x128xf32>
    %30 = vector.shape_cast %29 : vector<1x16x16x128xf32> to vector<16x16x128xf32>
    %c4 = arith.constant 4 : index
    %c0_32 = arith.constant 0 : index
    %c0_33 = arith.constant 0 : index
    %c0_34 = arith.constant 0 : index
    %31 = vector.load %arg2[%c4, %c0_32, %c0_33, %c0_34] : memref<9x1x1x128xf32, #tpu.memory_space<vmem>>, vector<1x1x1x128xf32>
    %32 = vector.shape_cast %31 : vector<1x1x1x128xf32> to vector<1x1x128xf32>
    %33 = vector.broadcast %32 : vector<1x1x128xf32> to vector<16x16x128xf32>
    %34 = arith.mulf %30, %33 : vector<16x16x128xf32>
    %35 = arith.addf %28, %34 : vector<16x16x128xf32>
    %c0_35 = arith.constant 0 : index
    %c1_36 = arith.constant 1 : index
    %c2_37 = arith.constant 2 : index
    %c0_38 = arith.constant 0 : index
    %36 = vector.load %arg1[%c0_35, %c1_36, %c2_37, %c0_38] : memref<1x18x18x128xf32, #tpu.memory_space<vmem>>, vector<1x16x16x128xf32>
    %37 = vector.shape_cast %36 : vector<1x16x16x128xf32> to vector<16x16x128xf32>
    %c5 = arith.constant 5 : index
    %c0_39 = arith.constant 0 : index
    %c0_40 = arith.constant 0 : index
    %c0_41 = arith.constant 0 : index
    %38 = vector.load %arg2[%c5, %c0_39, %c0_40, %c0_41] : memref<9x1x1x128xf32, #tpu.memory_space<vmem>>, vector<1x1x1x128xf32>
    %39 = vector.shape_cast %38 : vector<1x1x1x128xf32> to vector<1x1x128xf32>
    %40 = vector.broadcast %39 : vector<1x1x128xf32> to vector<16x16x128xf32>
    %41 = arith.mulf %37, %40 : vector<16x16x128xf32>
    %42 = arith.addf %35, %41 : vector<16x16x128xf32>
    %c0_42 = arith.constant 0 : index
    %c2_43 = arith.constant 2 : index
    %c0_44 = arith.constant 0 : index
    %c0_45 = arith.constant 0 : index
    %43 = vector.load %arg1[%c0_42, %c2_43, %c0_44, %c0_45] : memref<1x18x18x128xf32, #tpu.memory_space<vmem>>, vector<1x16x16x128xf32>
    %44 = vector.shape_cast %43 : vector<1x16x16x128xf32> to vector<16x16x128xf32>
    %c6 = arith.constant 6 : index
    %c0_46 = arith.constant 0 : index
    %c0_47 = arith.constant 0 : index
    %c0_48 = arith.constant 0 : index
    %45 = vector.load %arg2[%c6, %c0_46, %c0_47, %c0_48] : memref<9x1x1x128xf32, #tpu.memory_space<vmem>>, vector<1x1x1x128xf32>
    %46 = vector.shape_cast %45 : vector<1x1x1x128xf32> to vector<1x1x128xf32>
    %47 = vector.broadcast %46 : vector<1x1x128xf32> to vector<16x16x128xf32>
    %48 = arith.mulf %44, %47 : vector<16x16x128xf32>
    %49 = arith.addf %42, %48 : vector<16x16x128xf32>
    %c0_49 = arith.constant 0 : index
    %c2_50 = arith.constant 2 : index
    %c1_51 = arith.constant 1 : index
    %c0_52 = arith.constant 0 : index
    %50 = vector.load %arg1[%c0_49, %c2_50, %c1_51, %c0_52] : memref<1x18x18x128xf32, #tpu.memory_space<vmem>>, vector<1x16x16x128xf32>
    %51 = vector.shape_cast %50 : vector<1x16x16x128xf32> to vector<16x16x128xf32>
    %c7 = arith.constant 7 : index
    %c0_53 = arith.constant 0 : index
    %c0_54 = arith.constant 0 : index
    %c0_55 = arith.constant 0 : index
    %52 = vector.load %arg2[%c7, %c0_53, %c0_54, %c0_55] : memref<9x1x1x128xf32, #tpu.memory_space<vmem>>, vector<1x1x1x128xf32>
    %53 = vector.shape_cast %52 : vector<1x1x1x128xf32> to vector<1x1x128xf32>
    %54 = vector.broadcast %53 : vector<1x1x128xf32> to vector<16x16x128xf32>
    %55 = arith.mulf %51, %54 : vector<16x16x128xf32>
    %56 = arith.addf %49, %55 : vector<16x16x128xf32>
    %c0_56 = arith.constant 0 : index
    %c2_57 = arith.constant 2 : index
    %c2_58 = arith.constant 2 : index
    %c0_59 = arith.constant 0 : index
    %57 = vector.load %arg1[%c0_56, %c2_57, %c2_58, %c0_59] : memref<1x18x18x128xf32, #tpu.memory_space<vmem>>, vector<1x16x16x128xf32>
    %58 = vector.shape_cast %57 : vector<1x16x16x128xf32> to vector<16x16x128xf32>
    %c8 = arith.constant 8 : index
    %c0_60 = arith.constant 0 : index
    %c0_61 = arith.constant 0 : index
    %c0_62 = arith.constant 0 : index
    %59 = vector.load %arg2[%c8, %c0_60, %c0_61, %c0_62] : memref<9x1x1x128xf32, #tpu.memory_space<vmem>>, vector<1x1x1x128xf32>
    %60 = vector.shape_cast %59 : vector<1x1x1x128xf32> to vector<1x1x128xf32>
    %61 = vector.broadcast %60 : vector<1x1x128xf32> to vector<16x16x128xf32>
    %62 = arith.mulf %58, %61 : vector<16x16x128xf32>
    %63 = arith.addf %56, %62 : vector<16x16x128xf32>
    %64 = vector.shape_cast %63 : vector<16x16x128xf32> to vector<256x128xf32>
    %c0_63 = arith.constant 0 : index
    %c0_64 = arith.constant 0 : index
    %65 = vector.load %arg3[%c0_63, %c0_64] : memref<256x128xf32, #tpu.memory_space<vmem>>, vector<256x128xf32>
    tpu.vector_store %arg3[%c0_63, %c0_64], %64 {strides = array<i32>} : memref<256x128xf32, #tpu.memory_space<vmem>>, vector<256x128xf32>,
    %cst_65 = arith.constant dense<0.000000e+00> : vector<128xf32>
    %66 = vector.multi_reduction <add>, %64, %cst_65 [0] : vector<256x128xf32> to vector<128xf32>
    %67 = vector.shape_cast %66 : vector<128xf32> to vector<1x128xf32>
    %c0_66 = arith.constant 0 : index
    %c0_67 = arith.constant 0 : index
    %c0_68 = arith.constant 0 : index
    %68 = vector.load %arg4[%c0_66, %c0_67, %c0_68] : memref<1x1x128xf32, #tpu.memory_space<vmem>>, vector<1x1x128xf32>
    %69 = vector.shape_cast %68 : vector<1x1x128xf32> to vector<1x128xf32>
    %70 = vector.shape_cast %67 : vector<1x128xf32> to vector<1x1x128xf32>
    tpu.vector_store %arg4[%c0_66, %c0_67, %c0_68], %70 {strides = array<i32>} : memref<1x1x128xf32, #tpu.memory_space<vmem>>, vector<1x1x128xf32>,
    %71 = arith.mulf %64, %64 : vector<256x128xf32>
    %cst_69 = arith.constant dense<0.000000e+00> : vector<128xf32>
    %72 = vector.multi_reduction <add>, %71, %cst_69 [0] : vector<256x128xf32> to vector<128xf32>
    %73 = vector.shape_cast %72 : vector<128xf32> to vector<1x128xf32>
    %c0_70 = arith.constant 0 : index
    %c0_71 = arith.constant 0 : index
    %c0_72 = arith.constant 0 : index
    %74 = vector.load %arg5[%c0_70, %c0_71, %c0_72] : memref<1x1x128xf32, #tpu.memory_space<vmem>>, vector<1x1x128xf32>
    %75 = vector.shape_cast %74 : vector<1x1x128xf32> to vector<1x128xf32>
    %76 = vector.shape_cast %73 : vector<1x128xf32> to vector<1x1x128xf32>
    tpu.vector_store %arg5[%c0_70, %c0_71, %c0_72], %76 {strides = array<i32>} : memref<1x1x128xf32, #tpu.memory_space<vmem>>, vector<1x1x128xf32>,
    return
  }
  func.func @transform_0(%arg0: i32) -> (i32, i32, i32, i32) {
    %c0_i32 = arith.constant 0 : i32
    %c0_i32_0 = arith.constant 0 : i32
    %c0_i32_1 = arith.constant 0 : i32
    %c0_i32_2 = arith.constant 0 : i32
    return %arg0, %c0_i32, %c0_i32_0, %c0_i32_1 : i32, i32, i32, i32
  }
  func.func @transform_1(%arg0: i32) -> (i32, i32, i32, i32) {
    %c0_i32 = arith.constant 0 : i32
    %c0_i32_0 = arith.constant 0 : i32
    %c0_i32_1 = arith.constant 0 : i32
    %c0_i32_2 = arith.constant 0 : i32
    %c0_i32_3 = arith.constant 0 : i32
    return %c0_i32, %c0_i32_0, %c0_i32_1, %c0_i32_2 : i32, i32, i32, i32
  }
  func.func @transform_2(%arg0: i32) -> (i32, i32) {
    %c0_i32 = arith.constant 0 : i32
    %c0_i32_0 = arith.constant 0 : i32
    return %arg0, %c0_i32 : i32, i32
  }
  func.func @transform_3(%arg0: i32) -> (i32, i32, i32) {
    %c0_i32 = arith.constant 0 : i32
    %c0_i32_0 = arith.constant 0 : i32
    %c0_i32_1 = arith.constant 0 : i32
    return %arg0, %c0_i32, %c0_i32_0 : i32, i32, i32
  }
  func.func @transform_4(%arg0: i32) -> (i32, i32, i32) {
    %c0_i32 = arith.constant 0 : i32
    %c0_i32_0 = arith.constant 0 : i32
    %c0_i32_1 = arith.constant 0 : i32
    return %arg0, %c0_i32, %c0_i32_0 : i32, i32, i32
  }
}

module attributes {stable_mosaic.version = 11 : i64} {
  func.func @kernel(%arg0: i32, %arg1: memref<256x128xf32, #tpu.memory_space<vmem>>, %arg2: memref<1x128xf32, #tpu.memory_space<vmem>>, %arg3: memref<1x128xf32, #tpu.memory_space<vmem>>, %arg4: memref<256x128xf32, #tpu.memory_space<vmem>>, %arg5: memref<1x1x128xf32, #tpu.memory_space<vmem>>) attributes {dimension_semantics = [#tpu.dimension_semantics<parallel>], iteration_bounds = array<i64: 2>, scalar_prefetch = 0 : i64, scratch_operands = 0 : i64, tpu.core_type = #tpu.core_type<tc>, window_params = [{transform_indices = @transform_0, window_bounds = array<i64: 256, 128>}, {pipeline_mode = #tpu.pipeline_mode<synchronous>, transform_indices = @transform_1, window_bounds = array<i64: 1, 128>}, {pipeline_mode = #tpu.pipeline_mode<synchronous>, transform_indices = @transform_2, window_bounds = array<i64: 1, 128>}, {transform_indices = @transform_3, window_bounds = array<i64: 256, 128>}, {transform_indices = @transform_4, window_bounds = array<i64: 1, 1, 128>}]} {
    %c0 = arith.constant 0 : index
    %c0_0 = arith.constant 0 : index
    %0 = vector.load %arg1[%c0, %c0_0] : memref<256x128xf32, #tpu.memory_space<vmem>>, vector<256x128xf32>
    %c0_1 = arith.constant 0 : index
    %c0_2 = arith.constant 0 : index
    %1 = vector.load %arg2[%c0_1, %c0_2] : memref<1x128xf32, #tpu.memory_space<vmem>>, vector<1x128xf32>
    %2 = vector.broadcast %1 : vector<1x128xf32> to vector<256x128xf32>
    %3 = arith.mulf %0, %2 : vector<256x128xf32>
    %c0_3 = arith.constant 0 : index
    %c0_4 = arith.constant 0 : index
    %4 = vector.load %arg3[%c0_3, %c0_4] : memref<1x128xf32, #tpu.memory_space<vmem>>, vector<1x128xf32>
    %5 = vector.broadcast %4 : vector<1x128xf32> to vector<256x128xf32>
    %6 = arith.addf %3, %5 : vector<256x128xf32>
    %7 = arith.negf %6 : vector<256x128xf32>
    %8 = math.exp %7 : vector<256x128xf32>
    %cst = arith.constant 1.000000e+00 : f32
    %9 = vector.broadcast %cst : f32 to vector<256x128xf32>
    %10 = arith.addf %9, %8 : vector<256x128xf32>
    %11 = arith.divf %9, %10 : vector<256x128xf32>
    %12 = arith.mulf %6, %11 : vector<256x128xf32>
    %c0_5 = arith.constant 0 : index
    %c0_6 = arith.constant 0 : index
    %13 = vector.load %arg4[%c0_5, %c0_6] : memref<256x128xf32, #tpu.memory_space<vmem>>, vector<256x128xf32>
    tpu.vector_store %arg4[%c0_5, %c0_6], %12 {strides = array<i32>} : memref<256x128xf32, #tpu.memory_space<vmem>>, vector<256x128xf32>,
    %cst_7 = arith.constant dense<0.000000e+00> : vector<128xf32>
    %14 = vector.multi_reduction <add>, %12, %cst_7 [0] : vector<256x128xf32> to vector<128xf32>
    %15 = vector.shape_cast %14 : vector<128xf32> to vector<1x128xf32>
    %cst_8 = arith.constant 3.906250e-03 : f32
    %16 = vector.broadcast %cst_8 : f32 to vector<1x128xf32>
    %17 = arith.mulf %15, %16 : vector<1x128xf32>
    %c0_9 = arith.constant 0 : index
    %c0_10 = arith.constant 0 : index
    %c0_11 = arith.constant 0 : index
    %18 = vector.load %arg5[%c0_9, %c0_10, %c0_11] : memref<1x1x128xf32, #tpu.memory_space<vmem>>, vector<1x1x128xf32>
    %19 = vector.shape_cast %18 : vector<1x1x128xf32> to vector<1x128xf32>
    %20 = vector.shape_cast %17 : vector<1x128xf32> to vector<1x1x128xf32>
    tpu.vector_store %arg5[%c0_9, %c0_10, %c0_11], %20 {strides = array<i32>} : memref<1x1x128xf32, #tpu.memory_space<vmem>>, vector<1x1x128xf32>,
    return
  }
  func.func @transform_0(%arg0: i32) -> (i32, i32) {
    %c0_i32 = arith.constant 0 : i32
    %c0_i32_0 = arith.constant 0 : i32
    return %arg0, %c0_i32 : i32, i32
  }
  func.func @transform_1(%arg0: i32) -> (i32, i32) {
    %c0_i32 = arith.constant 0 : i32
    %c0_i32_0 = arith.constant 0 : i32
    %c0_i32_1 = arith.constant 0 : i32
    return %c0_i32, %c0_i32_0 : i32, i32
  }
  func.func @transform_2(%arg0: i32) -> (i32, i32) {
    %c0_i32 = arith.constant 0 : i32
    %c0_i32_0 = arith.constant 0 : i32
    %c0_i32_1 = arith.constant 0 : i32
    return %c0_i32, %c0_i32_0 : i32, i32
  }
  func.func @transform_3(%arg0: i32) -> (i32, i32) {
    %c0_i32 = arith.constant 0 : i32
    %c0_i32_0 = arith.constant 0 : i32
    return %arg0, %c0_i32 : i32, i32
  }
  func.func @transform_4(%arg0: i32) -> (i32, i32, i32) {
    %c0_i32 = arith.constant 0 : i32
    %c0_i32_0 = arith.constant 0 : i32
    %c0_i32_1 = arith.constant 0 : i32
    return %arg0, %c0_i32, %c0_i32_0 : i32, i32, i32
  }
}

module attributes {stable_mosaic.version = 11 : i64} {
  func.func @kernel(%arg0: i32, %arg1: i32, %arg2: memref<1x256x128xf32, #tpu.memory_space<vmem>>, %arg3: memref<1x1x128xf32, #tpu.memory_space<vmem>>, %arg4: memref<128x128xbf16, #tpu.memory_space<vmem>>, %arg5: memref<1x256x128xf32, #tpu.memory_space<vmem>>, %arg6: memref<1x1x1x128xf32, #tpu.memory_space<vmem>>, %arg7: memref<1x1x1x128xf32, #tpu.memory_space<vmem>>) attributes {dimension_semantics = [#tpu.dimension_semantics<parallel>, #tpu.dimension_semantics<parallel>], iteration_bounds = array<i64: 2, 1>, scalar_prefetch = 0 : i64, scratch_operands = 0 : i64, tpu.core_type = #tpu.core_type<tc>, window_params = [{transform_indices = @transform_0, window_bounds = array<i64: 1, 256, 128>}, {transform_indices = @transform_1, window_bounds = array<i64: 1, 1, 128>}, {pipeline_mode = #tpu.pipeline_mode<synchronous>, transform_indices = @transform_2, window_bounds = array<i64: 128, 128>}, {transform_indices = @transform_3, window_bounds = array<i64: 1, 256, 128>}, {transform_indices = @transform_4, window_bounds = array<i64: 1, 1, 1, 128>}, {transform_indices = @transform_5, window_bounds = array<i64: 1, 1, 1, 128>}]} {
    %c0 = arith.constant 0 : index
    %c0_0 = arith.constant 0 : index
    %c0_1 = arith.constant 0 : index
    %0 = vector.load %arg2[%c0, %c0_0, %c0_1] : memref<1x256x128xf32, #tpu.memory_space<vmem>>, vector<1x256x128xf32>
    %1 = vector.shape_cast %0 : vector<1x256x128xf32> to vector<256x128xf32>
    %c0_2 = arith.constant 0 : index
    %c0_3 = arith.constant 0 : index
    %c0_4 = arith.constant 0 : index
    %2 = vector.load %arg3[%c0_2, %c0_3, %c0_4] : memref<1x1x128xf32, #tpu.memory_space<vmem>>, vector<1x1x128xf32>
    %3 = vector.shape_cast %2 : vector<1x1x128xf32> to vector<1x128xf32>
    %4 = vector.broadcast %3 : vector<1x128xf32> to vector<256x128xf32>
    %5 = arith.mulf %1, %4 : vector<256x128xf32>
    %6 = arith.truncf %5 : vector<256x128xf32> to vector<256x128xbf16>
    %c0_5 = arith.constant 0 : index
    %c0_6 = arith.constant 0 : index
    %7 = vector.load %arg4[%c0_5, %c0_6] : memref<128x128xbf16, #tpu.memory_space<vmem>>, vector<128x128xbf16>
    %cst = arith.constant dense<0.000000e+00> : vector<256x128xf32>
    %8 = tpu.matmul %6, %7, %cst {dimension_numbers = #tpu.dot_dimension_numbers<[1], [0], [0], [1], [0, 0, 1, 1], [], []>} : vector<256x128xbf16>, vector<128x128xbf16>, vector<256x128xf32> -> vector<256x128xf32>
    %c0_7 = arith.constant 0 : index
    %c0_8 = arith.constant 0 : index
    %c0_9 = arith.constant 0 : index
    %9 = vector.load %arg5[%c0_7, %c0_8, %c0_9] : memref<1x256x128xf32, #tpu.memory_space<vmem>>, vector<1x256x128xf32>
    %10 = vector.shape_cast %9 : vector<1x256x128xf32> to vector<256x128xf32>
    %11 = vector.shape_cast %8 : vector<256x128xf32> to vector<1x256x128xf32>
    tpu.vector_store %arg5[%c0_7, %c0_8, %c0_9], %11 {strides = array<i32>} : memref<1x256x128xf32, #tpu.memory_space<vmem>>, vector<1x256x128xf32>,
    %cst_10 = arith.constant dense<0.000000e+00> : vector<128xf32>
    %12 = vector.multi_reduction <add>, %8, %cst_10 [0] : vector<256x128xf32> to vector<128xf32>
    %13 = vector.shape_cast %12 : vector<128xf32> to vector<1x128xf32>
    %c0_11 = arith.constant 0 : index
    %c0_12 = arith.constant 0 : index
    %c0_13 = arith.constant 0 : index
    %c0_14 = arith.constant 0 : index
    %14 = vector.load %arg6[%c0_11, %c0_12, %c0_13, %c0_14] : memref<1x1x1x128xf32, #tpu.memory_space<vmem>>, vector<1x1x1x128xf32>
    %15 = vector.shape_cast %14 : vector<1x1x1x128xf32> to vector<1x128xf32>
    %16 = vector.shape_cast %13 : vector<1x128xf32> to vector<1x1x1x128xf32>
    tpu.vector_store %arg6[%c0_11, %c0_12, %c0_13, %c0_14], %16 {strides = array<i32>} : memref<1x1x1x128xf32, #tpu.memory_space<vmem>>, vector<1x1x1x128xf32>,
    %17 = arith.mulf %8, %8 : vector<256x128xf32>
    %cst_15 = arith.constant dense<0.000000e+00> : vector<128xf32>
    %18 = vector.multi_reduction <add>, %17, %cst_15 [0] : vector<256x128xf32> to vector<128xf32>
    %19 = vector.shape_cast %18 : vector<128xf32> to vector<1x128xf32>
    %c0_16 = arith.constant 0 : index
    %c0_17 = arith.constant 0 : index
    %c0_18 = arith.constant 0 : index
    %c0_19 = arith.constant 0 : index
    %20 = vector.load %arg7[%c0_16, %c0_17, %c0_18, %c0_19] : memref<1x1x1x128xf32, #tpu.memory_space<vmem>>, vector<1x1x1x128xf32>
    %21 = vector.shape_cast %20 : vector<1x1x1x128xf32> to vector<1x128xf32>
    %22 = vector.shape_cast %19 : vector<1x128xf32> to vector<1x1x1x128xf32>
    tpu.vector_store %arg7[%c0_16, %c0_17, %c0_18, %c0_19], %22 {strides = array<i32>} : memref<1x1x1x128xf32, #tpu.memory_space<vmem>>, vector<1x1x1x128xf32>,
    return
  }
  func.func @transform_0(%arg0: i32, %arg1: i32) -> (i32, i32, i32) {
    %c0_i32 = arith.constant 0 : i32
    %c0_i32_0 = arith.constant 0 : i32
    return %arg0, %arg1, %c0_i32 : i32, i32, i32
  }
  func.func @transform_1(%arg0: i32, %arg1: i32) -> (i32, i32, i32) {
    %c0_i32 = arith.constant 0 : i32
    %c0_i32_0 = arith.constant 0 : i32
    %c0_i32_1 = arith.constant 0 : i32
    return %arg0, %c0_i32, %c0_i32_0 : i32, i32, i32
  }
  func.func @transform_2(%arg0: i32, %arg1: i32) -> (i32, i32) {
    %c0_i32 = arith.constant 0 : i32
    %c0_i32_0 = arith.constant 0 : i32
    %c0_i32_1 = arith.constant 0 : i32
    return %c0_i32, %c0_i32_0 : i32, i32
  }
  func.func @transform_3(%arg0: i32, %arg1: i32) -> (i32, i32, i32) {
    %c0_i32 = arith.constant 0 : i32
    %c0_i32_0 = arith.constant 0 : i32
    return %arg0, %arg1, %c0_i32 : i32, i32, i32
  }
  func.func @transform_4(%arg0: i32, %arg1: i32) -> (i32, i32, i32, i32) {
    %c0_i32 = arith.constant 0 : i32
    %c0_i32_0 = arith.constant 0 : i32
    %c0_i32_1 = arith.constant 0 : i32
    return %arg0, %arg1, %c0_i32, %c0_i32_0 : i32, i32, i32, i32
  }
  func.func @transform_5(%arg0: i32, %arg1: i32) -> (i32, i32, i32, i32) {
    %c0_i32 = arith.constant 0 : i32
    %c0_i32_0 = arith.constant 0 : i32
    %c0_i32_1 = arith.constant 0 : i32
    return %arg0, %arg1, %c0_i32, %c0_i32_0 : i32, i32, i32, i32
  }
}

module attributes {stable_mosaic.version = 11 : i64} {
  func.func @_residual_affine_kernel(%arg0: i32, %arg1: i32, %arg2: memref<1x256x128xf32, #tpu.memory_space<vmem>>, %arg3: memref<1x1x128xf32, #tpu.memory_space<vmem>>, %arg4: memref<1x1x128xf32, #tpu.memory_space<vmem>>, %arg5: memref<1x256x128xf32, #tpu.memory_space<vmem>>, %arg6: memref<1x256x128xf32, #tpu.memory_space<vmem>>) attributes {dimension_semantics = [#tpu.dimension_semantics<parallel>, #tpu.dimension_semantics<parallel>], iteration_bounds = array<i64: 2, 1>, scalar_prefetch = 0 : i64, scratch_operands = 0 : i64, tpu.core_type = #tpu.core_type<tc>, window_params = [{transform_indices = @transform_0, window_bounds = array<i64: 1, 256, 128>}, {transform_indices = @transform_1, window_bounds = array<i64: 1, 1, 128>}, {transform_indices = @transform_2, window_bounds = array<i64: 1, 1, 128>}, {transform_indices = @transform_3, window_bounds = array<i64: 1, 256, 128>}, {transform_indices = @transform_4, window_bounds = array<i64: 1, 256, 128>}]} {
    %c0 = arith.constant 0 : index
    %c0_0 = arith.constant 0 : index
    %c0_1 = arith.constant 0 : index
    %0 = vector.load %arg2[%c0, %c0_0, %c0_1] : memref<1x256x128xf32, #tpu.memory_space<vmem>>, vector<1x256x128xf32>
    %1 = vector.shape_cast %0 : vector<1x256x128xf32> to vector<256x128xf32>
    %c0_2 = arith.constant 0 : index
    %c0_3 = arith.constant 0 : index
    %c0_4 = arith.constant 0 : index
    %2 = vector.load %arg3[%c0_2, %c0_3, %c0_4] : memref<1x1x128xf32, #tpu.memory_space<vmem>>, vector<1x1x128xf32>
    %3 = vector.shape_cast %2 : vector<1x1x128xf32> to vector<1x128xf32>
    %4 = vector.broadcast %3 : vector<1x128xf32> to vector<256x128xf32>
    %5 = arith.mulf %1, %4 : vector<256x128xf32>
    %c0_5 = arith.constant 0 : index
    %c0_6 = arith.constant 0 : index
    %c0_7 = arith.constant 0 : index
    %6 = vector.load %arg4[%c0_5, %c0_6, %c0_7] : memref<1x1x128xf32, #tpu.memory_space<vmem>>, vector<1x1x128xf32>
    %7 = vector.shape_cast %6 : vector<1x1x128xf32> to vector<1x128xf32>
    %8 = vector.broadcast %7 : vector<1x128xf32> to vector<256x128xf32>
    %9 = arith.addf %5, %8 : vector<256x128xf32>
    %c0_8 = arith.constant 0 : index
    %c0_9 = arith.constant 0 : index
    %c0_10 = arith.constant 0 : index
    %10 = vector.load %arg5[%c0_8, %c0_9, %c0_10] : memref<1x256x128xf32, #tpu.memory_space<vmem>>, vector<1x256x128xf32>
    %11 = vector.shape_cast %10 : vector<1x256x128xf32> to vector<256x128xf32>
    %12 = arith.addf %9, %11 : vector<256x128xf32>
    %c0_11 = arith.constant 0 : index
    %c0_12 = arith.constant 0 : index
    %c0_13 = arith.constant 0 : index
    %13 = vector.load %arg6[%c0_11, %c0_12, %c0_13] : memref<1x256x128xf32, #tpu.memory_space<vmem>>, vector<1x256x128xf32>
    %14 = vector.shape_cast %13 : vector<1x256x128xf32> to vector<256x128xf32>
    %15 = vector.shape_cast %12 : vector<256x128xf32> to vector<1x256x128xf32>
    tpu.vector_store %arg6[%c0_11, %c0_12, %c0_13], %15 {strides = array<i32>} : memref<1x256x128xf32, #tpu.memory_space<vmem>>, vector<1x256x128xf32>,
    return
  }
  func.func @transform_0(%arg0: i32, %arg1: i32) -> (i32, i32, i32) {
    %c0_i32 = arith.constant 0 : i32
    %c0_i32_0 = arith.constant 0 : i32
    return %arg0, %arg1, %c0_i32 : i32, i32, i32
  }
  func.func @transform_1(%arg0: i32, %arg1: i32) -> (i32, i32, i32) {
    %c0_i32 = arith.constant 0 : i32
    %c0_i32_0 = arith.constant 0 : i32
    %c0_i32_1 = arith.constant 0 : i32
    return %arg0, %c0_i32, %c0_i32_0 : i32, i32, i32
  }
  func.func @transform_2(%arg0: i32, %arg1: i32) -> (i32, i32, i32) {
    %c0_i32 = arith.constant 0 : i32
    %c0_i32_0 = arith.constant 0 : i32
    %c0_i32_1 = arith.constant 0 : i32
    return %arg0, %c0_i32, %c0_i32_0 : i32, i32, i32
  }
  func.func @transform_3(%arg0: i32, %arg1: i32) -> (i32, i32, i32) {
    %c0_i32 = arith.constant 0 : i32
    %c0_i32_0 = arith.constant 0 : i32
    return %arg0, %arg1, %c0_i32 : i32, i32, i32
  }
  func.func @transform_4(%arg0: i32, %arg1: i32) -> (i32, i32, i32) {
    %c0_i32 = arith.constant 0 : i32
    %c0_i32_0 = arith.constant 0 : i32
    return %arg0, %arg1, %c0_i32 : i32, i32, i32
  }
}

</mosaic_0001>

<bundles_post_ra>
// kernel: inverted_residual_forward.7
= control target key start
LH: loop header
LB: loop body
LE: loop exit
PB: predicated region body
PF: predicated region fallthrough
CT: control target
= control target key end

     0   :  { %s1858_s0 = inlined_call_operand.vmem [shape: f32[512,128], index: 0, kind: input, shape index: {}]   ;;  %s1859_s1 = inlined_call_operand.vmem [shape: f32[1,128], index: 1, kind: input, shape index: {}]   ;;  %s1860_s2 = inlined_call_operand.vmem [shape: f32[1,128], index: 2, kind: input, shape index: {}]   ;;  %s1861_s3 = inlined_call_operand.vmem [shape: f32[512,128], index: 3, kind: output, shape index: {}]  }
   0x1   :  { %v14_v0 = vld [vmem:[%s1858_s0] sm:$0xff]  ;;  %v15_v4 = vld [vmem:[%s1858_s0 + $0x8] sm:$0xff]  ;;  %v16_v5 = vld [vmem:[%s1858_s0 + $0x10] sm:$0xff] }
   0x2   :  { %v1086_v1 = vld [vmem:[%s1859_s1] ss:$0 sm:$0xff]  ;;  %v17_v6 = vld [vmem:[%s1858_s0 + $0x18] sm:$0xff]  ;;  %v19_v11 = vld [vmem:[%s1858_s0 + $0x28] sm:$0xff] }
   0x3   :  { %v1091_v2 = vld [vmem:[%s1860_s2] ss:$0 sm:$0xff]  ;;  %v85_v3 = vmul.f32 %v1086_v1, %v14_v0  ;;  %v86_v7 = vmul.f32 %v1086_v1, %v15_v4  ;;  %v87_v8 = vmul.f32 %v1086_v1, %v16_v5  ;;  %v88_v9 = vmul.f32 %v1086_v1, %v17_v6  ;;  %v20_v12 = vld [vmem:[%s1858_s0 + $0x30] sm:$0xff]  ;;  %v21_v17 = vld [vmem:[%s1858_s0 + $0x38] sm:$0xff] }
   0x4   :  { %v18_v10 = vld [vmem:[%s1858_s0 + $0x20] sm:$0xff]  ;;  %v90_v15 = vmul.f32 %v1086_v1, %v19_v11  ;;  %v91_v16 = vmul.f32 %v1086_v1, %v20_v12  ;;  %v92_v21 = vmul.f32 %v1086_v1, %v21_v17  ;;  %v23_v23 = vld [vmem:[%s1858_s0 + $0x48] sm:$0xff]  ;;  %v24_v28 = vld [vmem:[%s1858_s0 + $0x50] sm:$0xff] }
   0x5   :  { %v1116_v13 = vadd.f32 %v1091_v2, %v85_v3  ;;  %v89_v14 = vmul.f32 %v1086_v1, %v18_v10  ;;  %v1125_v18 = vadd.f32 %v1091_v2, %v86_v7  ;;  %v1128_v19 = vadd.f32 %v1091_v2, %v87_v8  ;;  %v22_v22 = vld [vmem:[%s1858_s0 + $0x40] sm:$0xff]  ;;  %v25_v29 = vld [vmem:[%s1858_s0 + $0x58] sm:$0xff]  ;;  %v27_v53 = vld [vmem:[%s1858_s0 + $0x68] sm:$0xff] }
   0x6   :  { %v1131_v20 = vadd.f32 %v1091_v2, %v88_v9  ;;  %v1145_v26 = vadd.f32 %v1091_v2, %v90_v15  ;;  %v1148_v27 = vadd.f32 %v1091_v2, %v91_v16  ;;  %v26_v30 = vld [vmem:[%s1858_s0 + $0x60] sm:$0xff]  ;;  %v1163_v34 = vadd.f32 %v1091_v2, %v92_v21  ;;  %v28_v55 = vld [vmem:[%s1858_s0 + $0x70] sm:$0xff]  ;;  %v29_v58 = vld [vmem:[%s1858_s0 + $0x78] sm:$0xff] }
   0x7   :  { %v738_v24 = vmul.f32 -1.442695, %v1116_v13  ;;  %v1142_v25 = vadd.f32 %v1091_v2, %v89_v14  ;;  %v739_v31 = vmul.f32 -1.442695, %v1125_v18  ;;  %v740_v32 = vmul.f32 -1.442695, %v1128_v19 }
   0x8   :  { %v741_v33 = vmul.f32 -1.442695, %v1131_v20  ;;  %v743_v36 = vmul.f32 -1.442695, %v1145_v26  ;;  %v744_v37 = vmul.f32 -1.442695, %v1148_v27  ;;  %v93_v38 = vmul.f32 %v1086_v1, %v22_v22 }
   0x9   :  { %802 = vpow2.f32 %v738_v24  ;;  %v742_v35 = vmul.f32 -1.442695, %v1142_v25  ;;  %v94_v39 = vmul.f32 %v1086_v1, %v23_v23  ;;  %v95_v40 = vmul.f32 %v1086_v1, %v24_v28  ;;  %v30_v61 = vld [vmem:[%s1858_s0 + $0x80] sm:$0xff]  ;;  %v31_v3 = vld [vmem:[%s1858_s0 + $0x88] sm:$0xff]  ;;  %v32_v7 = vld [vmem:[%s1858_s0 + $0x90] sm:$0xff] }
   0xa   :  { %804 = vpow2.f32 %v739_v31  ;;  %v96_v41 = vmul.f32 %v1086_v1, %v25_v29  ;;  %v97_v42 = vmul.f32 %v1086_v1, %v26_v30  ;;  %v745_v43 = vmul.f32 -1.442695, %v1163_v34  ;;  %v33_v23 = vld [vmem:[%s1858_s0 + $0x98] sm:$0xff] }
   0xb   :  { %806 = vpow2.f32 %v740_v32  ;;  %v1175_v44 = vadd.f32 %v1091_v2, %v93_v38  ;;  %v1178_v45 = vadd.f32 %v1091_v2, %v94_v39  ;;  %v1181_v46 = vadd.f32 %v1091_v2, %v95_v40  ;;  %v35_v40 = vld [vmem:[%s1858_s0 + $0xa8] sm:$0xff] }
   0xc   :  { %808 = vpow2.f32 %v741_v33  ;;  %v1184_v47 = vadd.f32 %v1091_v2, %v96_v41  ;;  %v1187_v48 = vadd.f32 %v1091_v2, %v97_v42  ;;  %v98_v57 = vmul.f32 %v1086_v1, %v27_v53 }
   0xd   :  { %810 = vpow2.f32 %v742_v35  ;;  %v746_v49 = vmul.f32 -1.442695, %v1175_v44  ;;  %v747_v50 = vmul.f32 -1.442695, %v1178_v45  ;;  %v748_v51 = vmul.f32 -1.442695, %v1181_v46 }
   0xe   :  { %812 = vpow2.f32 %v743_v36  ;;  %v749_v52 = vmul.f32 -1.442695, %v1184_v47  ;;  %v750_v54 = vmul.f32 -1.442695, %v1187_v48  ;;  %v99_v0 = vmul.f32 %v1086_v1, %v28_v55  ;;  %v34_v35 = vld [vmem:[%s1858_s0 + $0xa0] sm:$0xff]  ;;  %v37_v55 = vld [vmem:[%s1858_s0 + $0xb8] sm:$0xff] }
   0xf   :  { %814 = vpow2.f32 %v744_v37  ;;  %v100_v6 = vmul.f32 %v1086_v1, %v29_v58  ;;  %v1216_v10 = vadd.f32 %v1091_v2, %v98_v57  ;;  %v101_v11 = vmul.f32 %v1086_v1, %v30_v61 }
  0x10   :  { %816 = vpow2.f32 %v745_v43  ;;  %v102_v15 = vmul.f32 %v1086_v1, %v31_v3  ;;  %v1221_v21 = vadd.f32 %v1091_v2, %v99_v0  ;;  %v103_v22 = vmul.f32 %v1086_v1, %v32_v7  ;;  %v39_v3 = vld [vmem:[%s1858_s0 + $0xc8] sm:$0xff] }
  0x11   :  { %818 = vpow2.f32 %v746_v49  ;;  %v1228_v29 = vadd.f32 %v1091_v2, %v100_v6  ;;  %v751_v32 = vmul.f32 -1.442695, %v1216_v10  ;;  %v1232_v33 = vadd.f32 %v1091_v2, %v101_v11 }
  0x12   :  { %820 = vpow2.f32 %v747_v50  ;;  %v1238_v38 = vadd.f32 %v1091_v2, %v102_v15  ;;  %v104_v39 = vmul.f32 %v1086_v1, %v33_v23  ;;  %v752_v43 = vmul.f32 -1.442695, %v1221_v21  ;;  %v36_v50 = vld [vmem:[%s1858_s0 + $0xb0] sm:$0xff] }
  0x13   :  { %v803_v56 = vpop.eup %802  ;;  %822 = vpow2.f32 %v748_v51  ;;  %v1246_v49 = vadd.f32 %v1091_v2, %v103_v22  ;;  %v753_v53 = vmul.f32 -1.442695, %v1228_v29  ;;  %v754_v58 = vmul.f32 -1.442695, %v1232_v33 }
  0x14   :  { %v805_v59 = vpop.eup %804  ;;  %v412_v60 = vadd.f32 1.0, %v803_v56  ;;  %824 = vpow2.f32 %v749_v52  ;;  %v107_v0 = vmul.f32 %v1086_v1, %v36_v50  ;;  %v1268_v6 = vadd.f32 %v1091_v2, %v104_v39 }
  0x15   :  { %v807_v62 = vpop.eup %806  ;;  %v413_v63 = vadd.f32 1.0, %v805_v59  ;;  %826 = vpow2.f32 %v750_v54  ;;  %v105_v54 = vmul.f32 %v1086_v1, %v34_v35  ;;  %v106_v59 = vmul.f32 %v1086_v1, %v35_v40 }
  0x16   :  { %v809_v4 = vpop.eup %808  ;;  %828 = vrcp.f32 %v412_v60  ;;  %v414_v5 = vadd.f32 1.0, %v807_v62  ;;  %v38_v60 = vld [vmem:[%s1858_s0 + $0xc0] sm:$0xff]  ;;  %v108_v7 = vmul.f32 %v1086_v1, %v37_v55  ;;  %v756_v22 = vmul.f32 -1.442695, %v1246_v49 }
  0x17   :  { %v811_v8 = vpop.eup %810  ;;  %830 = vrcp.f32 %v413_v63  ;;  %v415_v9 = vadd.f32 1.0, %v809_v4  ;;  %v755_v63 = vmul.f32 -1.442695, %v1238_v38  ;;  %v1273_v11 = vadd.f32 %v1091_v2, %v105_v54 }
  0x18   :  { %v813_v12 = vpop.eup %812  ;;  %832 = vrcp.f32 %v414_v5  ;;  %v416_v14 = vadd.f32 1.0, %v811_v8  ;;  %v1281_v15 = vadd.f32 %v1091_v2, %v106_v59  ;;  %v1290_v23 = vadd.f32 %v1091_v2, %v107_v0 }
  0x19   :  { %v815_v16 = vpop.eup %814  ;;  %834 = vrcp.f32 %v415_v9  ;;  %v417_v17 = vadd.f32 1.0, %v813_v12  ;;  %v109_v12 = vmul.f32 %v1086_v1, %v38_v60  ;;  %v43_v60 = vld [vmem:[%s1858_s0 + $0xe8] sm:$0xff] }
  0x1a   :  { %v817_v24 = vpop.eup %816  ;;  %836 = vrcp.f32 %v416_v14  ;;  %v418_v28 = vadd.f32 1.0, %v815_v16  ;;  %v110_v16 = vmul.f32 %v1086_v1, %v39_v3 }
  0x1b   :  { %v819_v30 = vpop.eup %818  ;;  %838 = vrcp.f32 %v417_v17  ;;  %v419_v31 = vadd.f32 1.0, %v817_v24  ;;  %v1306_v35 = vadd.f32 %v1091_v2, %v109_v12 }
  0x1c   :  { %v821_v36 = vpop.eup %820  ;;  %840 = vrcp.f32 %v418_v28  ;;  %v420_v37 = vadd.f32 1.0, %v819_v30  ;;  %v757_v28 = vmul.f32 -1.442695, %v1268_v6  ;;  %v1298_v30 = vadd.f32 %v1091_v2, %v108_v7 }
  0x1d   :  { %v823_v41 = vpop.eup %822  ;;  %842 = vrcp.f32 %v419_v31  ;;  %v421_v42 = vadd.f32 1.0, %v821_v36  ;;  %v1314_v39 = vadd.f32 %v1091_v2, %v110_v16  ;;  %v114_v7 = vmul.f32 %v1086_v1, %v43_v60 }
  0x1e   :  { %v825_v51 = vpop.eup %824  ;;  %844 = vrcp.f32 %v420_v37  ;;  %v422_v52 = vadd.f32 1.0, %v823_v41  ;;  %v759_v37 = vmul.f32 -1.442695, %v1281_v15  ;;  %v760_v41 = vmul.f32 -1.442695, %v1290_v23 }
  0x1f   :  { %v827_v56 = vpop.eup %826  ;;  %846 = vrcp.f32 %v421_v42  ;;  %v423_v57 = vadd.f32 1.0, %v825_v51  ;;  %v762_v51 = vmul.f32 -1.442695, %v1306_v35  ;;  %v763_v54 = vmul.f32 -1.442695, %v1314_v39 }
  0x20   :  { %v829_v61 = vpop.eup %828  ;;  %848 = vrcp.f32 %v422_v52  ;;  %v424_v62 = vadd.f32 1.0, %v827_v56  ;;  %v40_v52 = vld [vmem:[%s1858_s0 + $0xd0] sm:$0xff] }
  0x21   :  { %v831_v4 = vpop.eup %830  ;;  %v604_v5 = vmul.f32 %v829_v61, %v1116_v13  ;;  %850 = vrcp.f32 %v423_v57  ;;  %v42_v57 = vld [vmem:[%s1858_s0 + $0xe0] sm:$0xff]  ;;  %v111_v59 = vmul.f32 %v1086_v1, %v40_v52 }
  0x22   :  { %v833_v8 = vpop.eup %832  ;;  %v605_v9 = vmul.f32 %v831_v4, %v1125_v18  ;;  %852 = vrcp.f32 %v424_v62  ;;  %v113_v3 = vmul.f32 %v1086_v1, %v42_v57  ;;  %v50_v57 = vld [vmem:[%s1858_s0 + $0x120] sm:$0xff] }
  0x23   :  { %v835_v14 = vpop.eup %834  ;;  %668 = vst [vmem:[%s1861_s3] sm:$0xff] %v604_v5  ;;  %v606_v13 = vmul.f32 %v833_v8, %v1128_v19  ;;  %854 = vpow2.f32 %v751_v32  ;;  %v758_v32 = vmul.f32 -1.442695, %v1273_v11  ;;  %v1370_v12 = vadd.f32 %v1091_v2, %v111_v59 }
  0x24   :  { %v837_v18 = vpop.eup %836  ;;  %669 = vst [vmem:[%s1861_s3 + $0x8] sm:$0xff] %v605_v9  ;;  %v607_v17 = vmul.f32 %v835_v14, %v1131_v20  ;;  %856 = vpow2.f32 %v752_v43  ;;  %v761_v43 = vmul.f32 -1.442695, %v1298_v30 }
  0x25   :  { %v839_v19 = vpop.eup %838  ;;  %670 = vst [vmem:[%s1861_s3 + $0x10] sm:$0xff] %v606_v13  ;;  %v608_v24 = vmul.f32 %v837_v18, %v1142_v25  ;;  %858 = vpow2.f32 %v753_v53 }
  0x26   :  { %v841_v20 = vpop.eup %840  ;;  %671 = vst [vmem:[%s1861_s3 + $0x18] sm:$0xff] %v607_v17  ;;  %v609_v31 = vmul.f32 %v839_v19, %v1145_v26  ;;  %860 = vpow2.f32 %v754_v58  ;;  %v1377_v19 = vadd.f32 %v1091_v2, %v113_v3 }
  0x27   :  { %v843_v25 = vpop.eup %842  ;;  %672 = vst [vmem:[%s1861_s3 + $0x20] sm:$0xff] %v608_v24  ;;  %v610_v36 = vmul.f32 %v841_v20, %v1148_v27  ;;  %862 = vpow2.f32 %v755_v63  ;;  %v45_v24 = vld [vmem:[%s1858_s0 + $0xf8] sm:$0xff] }
  0x28   :  { %v845_v26 = vpop.eup %844  ;;  %673 = vst [vmem:[%s1861_s3 + $0x28] sm:$0xff] %v609_v31  ;;  %v611_v40 = vmul.f32 %v843_v25, %v1163_v34  ;;  %864 = vpow2.f32 %v756_v22  ;;  %v1383_v31 = vadd.f32 %v1091_v2, %v114_v7  ;;  %v766_v52 = vmul.f32 -1.442695, %v1377_v19 }
  0x29   :  { %v847_v42 = vpop.eup %846  ;;  %674 = vst [vmem:[%s1861_s3 + $0x30] sm:$0xff] %v610_v36  ;;  %v612_v27 = vmul.f32 %v845_v26, %v1175_v44  ;;  %866 = vpow2.f32 %v757_v28  ;;  %v121_v7 = vmul.f32 %v1086_v1, %v50_v57 }
  0x2a   :  { %v849_v50 = vpop.eup %848  ;;  %675 = vst [vmem:[%s1861_s3 + $0x38] sm:$0xff] %v611_v40  ;;  %v613_v34 = vmul.f32 %v847_v42, %v1178_v45  ;;  %868 = vpow2.f32 %v758_v32  ;;  %v41_v45 = vld [vmem:[%s1858_s0 + $0xd8] sm:$0xff]  ;;  %v46_v32 = vld [vmem:[%s1858_s0 + $0x100] sm:$0xff]  ;;  %v47_v40 = vld [vmem:[%s1858_s0 + $0x108] sm:$0xff] }
  0x2b   :  { %v851_v53 = vpop.eup %850  ;;  %676 = vst [vmem:[%s1861_s3 + $0x40] sm:$0xff] %v612_v27  ;;  %v614_v44 = vmul.f32 %v849_v50, %v1181_v46  ;;  %870 = vpow2.f32 %v759_v37  ;;  %v112_v62 = vmul.f32 %v1086_v1, %v41_v45  ;;  %v764_v37 = vmul.f32 -1.442695, %v1370_v12  ;;  %v48_v50 = vld [vmem:[%s1858_s0 + $0x110] sm:$0xff] }
  0x2c   :  { %v853_v55 = vpop.eup %852  ;;  %677 = vst [vmem:[%s1861_s3 + $0x48] sm:$0xff] %v613_v34  ;;  %v615_v56 = vmul.f32 %v851_v53, %v1184_v47  ;;  %872 = vpow2.f32 %v760_v41  ;;  %v117_v53 = vmul.f32 %v1086_v1, %v46_v32  ;;  %v119_v60 = vmul.f32 %v1086_v1, %v48_v50 }
  0x2d   :  { %v855_v46 = vpop.eup %854  ;;  %678 = vst [vmem:[%s1861_s3 + $0x50] sm:$0xff] %v614_v44  ;;  %v616_v58 = vmul.f32 %v853_v55, %v1187_v48  ;;  %874 = vpow2.f32 %v761_v43  ;;  %v44_v48 = vld [vmem:[%s1858_s0 + $0xf0] sm:$0xff]  ;;  %v1374_v18 = vadd.f32 %v1091_v2, %v112_v62  ;;  %v116_v43 = vmul.f32 %v1086_v1, %v45_v24  ;;  %v49_v44 = vld [vmem:[%s1858_s0 + $0x118] sm:$0xff] }
  0x2e   :  { %v857_v47 = vpop.eup %856  ;;  %679 = vst [vmem:[%s1861_s3 + $0x58] sm:$0xff] %v615_v56  ;;  %v425_v61 = vadd.f32 1.0, %v855_v46  ;;  %876 = vpow2.f32 %v762_v51  ;;  %v115_v14 = vmul.f32 %v1086_v1, %v44_v48  ;;  %v767_v55 = vmul.f32 -1.442695, %v1383_v31 }
  0x2f   :  { %v859_v63 = vpop.eup %858  ;;  %680 = vst [vmem:[%s1861_s3 + $0x60] sm:$0xff] %v616_v58  ;;  %v426_v0 = vadd.f32 1.0, %v857_v47  ;;  %878 = vpow2.f32 %v763_v54  ;;  %v765_v27 = vmul.f32 -1.442695, %v1374_v18  ;;  %v118_v56 = vmul.f32 %v1086_v1, %v47_v40  ;;  %v51_v47 = vld [vmem:[%s1858_s0 + $0x128] sm:$0xff] }
  0x30   :  { %v861_v4 = vpop.eup %860  ;;  %880 = vrcp.f32 %v425_v61  ;;  %v427_v5 = vadd.f32 1.0, %v859_v63  ;;  %v1390_v26 = vadd.f32 %v1091_v2, %v115_v14  ;;  %v1416_v48 = vadd.f32 %v1091_v2, %v116_v43 }
  0x31   :  { %v863_v8 = vpop.eup %862  ;;  %882 = vrcp.f32 %v426_v0  ;;  %v428_v9 = vadd.f32 1.0, %v861_v4  ;;  %v120_v63 = vmul.f32 %v1086_v1, %v49_v44  ;;  %v52_v0 = vld [vmem:[%s1858_s0 + $0x130] sm:$0xff]  ;;  %v1429_v14 = vadd.f32 %v1091_v2, %v118_v56 }
  0x32   :  { %v865_v13 = vpop.eup %864  ;;  %884 = vrcp.f32 %v427_v5  ;;  %v429_v16 = vadd.f32 1.0, %v863_v8  ;;  %v768_v59 = vmul.f32 -1.442695, %v1390_v26  ;;  %v1424_v5 = vadd.f32 %v1091_v2, %v117_v53 }
  0x33   :  { %v867_v17 = vpop.eup %866  ;;  %886 = vrcp.f32 %v428_v9  ;;  %v430_v22 = vadd.f32 1.0, %v865_v13  ;;  %v122_v13 = vmul.f32 %v1086_v1, %v51_v47  ;;  %v771_v40 = vmul.f32 -1.442695, %v1429_v14 }
  0x34   :  { %v869_v28 = vpop.eup %868  ;;  %888 = vrcp.f32 %v429_v16  ;;  %v431_v20 = vadd.f32 1.0, %v867_v17  ;;  %v1437_v17 = vadd.f32 %v1091_v2, %v119_v60  ;;  %v56_v60 = vld [vmem:[%s1858_s0 + $0x150] sm:$0xff] }
  0x35   :  { %v871_v25 = vpop.eup %870  ;;  %890 = vrcp.f32 %v430_v22  ;;  %v432_v36 = vadd.f32 1.0, %v869_v28  ;;  %v123_v22 = vmul.f32 %v1086_v1, %v52_v0  ;;  %v769_v28 = vmul.f32 -1.442695, %v1416_v48 }
  0x36   :  { %v873_v41 = vpop.eup %872  ;;  %892 = vrcp.f32 %v431_v20  ;;  %v433_v42 = vadd.f32 1.0, %v871_v25  ;;  %v1446_v20 = vadd.f32 %v1091_v2, %v120_v63  ;;  %v770_v25 = vmul.f32 -1.442695, %v1424_v5 }
  0x37   :  { %v875_v34 = vpop.eup %874  ;;  %894 = vrcp.f32 %v432_v36  ;;  %v434_v51 = vadd.f32 1.0, %v873_v41  ;;  %v1454_v36 = vadd.f32 %v1091_v2, %v121_v7  ;;  %v1462_v41 = vadd.f32 %v1091_v2, %v122_v13 }
  0x38   :  { %v877_v54 = vpop.eup %876  ;;  %896 = vrcp.f32 %v433_v42  ;;  %v435_v45 = vadd.f32 1.0, %v875_v34  ;;  %v1470_v43 = vadd.f32 %v1091_v2, %v123_v22  ;;  %v773_v34 = vmul.f32 -1.442695, %v1446_v20 }
  0x39   :  { %v879_v46 = vpop.eup %878  ;;  %898 = vrcp.f32 %v434_v51  ;;  %v436_v58 = vadd.f32 1.0, %v877_v54  ;;  %v775_v44 = vmul.f32 -1.442695, %v1462_v41  ;;  %v53_v54 = vld [vmem:[%s1858_s0 + $0x138] sm:$0xff]  ;;  %v127_v7 = vmul.f32 %v1086_v1, %v56_v60 }
  0x3a   :  { %v881_v61 = vpop.eup %880  ;;  %900 = vrcp.f32 %v435_v45  ;;  %v437_v62 = vadd.f32 1.0, %v879_v46  ;;  %v55_v46 = vld [vmem:[%s1858_s0 + $0x148] sm:$0xff] }
  0x3b   :  { %v883_v3 = vpop.eup %882  ;;  %v617_v4 = vmul.f32 %v881_v61, %v1216_v10  ;;  %902 = vrcp.f32 %v436_v58  ;;  %v126_v0 = vmul.f32 %v1086_v1, %v55_v46  ;;  %v63_v46 = vld [vmem:[%s1858_s0 + $0x188] sm:$0xff] }
  0x3c   :  { %v885_v8 = vpop.eup %884  ;;  %v618_v9 = vmul.f32 %v883_v3, %v1221_v21  ;;  %904 = vrcp.f32 %v437_v62 }
  0x3d   :  { %v887_v16 = vpop.eup %886  ;;  %681 = vst [vmem:[%s1861_s3 + $0x68] sm:$0xff] %v617_v4  ;;  %v619_v10 = vmul.f32 %v885_v8, %v1228_v29  ;;  %906 = vpow2.f32 %v764_v37 }
  0x3e   :  { %v889_v21 = vpop.eup %888  ;;  %682 = vst [vmem:[%s1861_s3 + $0x70] sm:$0xff] %v618_v9  ;;  %v620_v24 = vmul.f32 %v887_v16, %v1232_v33  ;;  %908 = vpow2.f32 %v765_v27  ;;  %v772_v27 = vmul.f32 -1.442695, %v1437_v17 }
  0x3f   :  { %v891_v29 = vpop.eup %890  ;;  %683 = vst [vmem:[%s1861_s3 + $0x78] sm:$0xff] %v619_v10  ;;  %v621_v32 = vmul.f32 %v889_v21, %v1238_v38  ;;  %910 = vpow2.f32 %v766_v52  ;;  %v774_v52 = vmul.f32 -1.442695, %v1454_v36 }
  0x40   :  { %v893_v33 = vpop.eup %892  ;;  %684 = vst [vmem:[%s1861_s3 + $0x80] sm:$0xff] %v620_v24  ;;  %v622_v37 = vmul.f32 %v891_v29, %v1246_v49  ;;  %912 = vpow2.f32 %v767_v55  ;;  %v776_v55 = vmul.f32 -1.442695, %v1470_v43  ;;  %v1533_v29 = vadd.f32 %v1091_v2, %v126_v0 }
  0x41   :  { %v895_v38 = vpop.eup %894  ;;  %685 = vst [vmem:[%s1861_s3 + $0x88] sm:$0xff] %v621_v32  ;;  %v623_v42 = vmul.f32 %v893_v33, %v1268_v6  ;;  %914 = vpow2.f32 %v768_v59  ;;  %v124_v59 = vmul.f32 %v1086_v1, %v53_v54  ;;  %v58_v32 = vld [vmem:[%s1858_s0 + $0x160] sm:$0xff] }
  0x42   :  { %v897_v49 = vpop.eup %896  ;;  %686 = vst [vmem:[%s1861_s3 + $0x90] sm:$0xff] %v622_v37  ;;  %v624_v50 = vmul.f32 %v895_v38, %v1273_v11  ;;  %916 = vpow2.f32 %v769_v28  ;;  %v1539_v37 = vadd.f32 %v1091_v2, %v127_v7  ;;  %v779_v54 = vmul.f32 -1.442695, %v1533_v29 }
  0x43   :  { %v899_v51 = vpop.eup %898  ;;  %687 = vst [vmem:[%s1861_s3 + $0x98] sm:$0xff] %v623_v42  ;;  %v625_v6 = vmul.f32 %v897_v49, %v1281_v15  ;;  %918 = vpow2.f32 %v770_v25  ;;  %v1526_v13 = vadd.f32 %v1091_v2, %v124_v59  ;;  %v134_v7 = vmul.f32 %v1086_v1, %v63_v46  ;;  %v68_v46 = vld [vmem:[%s1858_s0 + $0x1b0] sm:$0xff] }
  0x44   :  { %v901_v53 = vpop.eup %900  ;;  %688 = vst [vmem:[%s1861_s3 + $0xa0] sm:$0xff] %v624_v50  ;;  %v626_v11 = vmul.f32 %v899_v51, %v1290_v23  ;;  %920 = vpow2.f32 %v771_v40  ;;  %v54_v23 = vld [vmem:[%s1858_s0 + $0x140] sm:$0xff]  ;;  %v59_v40 = vld [vmem:[%s1858_s0 + $0x168] sm:$0xff]  ;;  %v60_v50 = vld [vmem:[%s1858_s0 + $0x170] sm:$0xff] }
  0x45   :  { %v903_v45 = vpop.eup %902  ;;  %689 = vst [vmem:[%s1861_s3 + $0xa8] sm:$0xff] %v625_v6  ;;  %v627_v15 = vmul.f32 %v901_v53, %v1298_v30  ;;  %922 = vpow2.f32 %v772_v27  ;;  %v125_v61 = vmul.f32 %v1086_v1, %v54_v23  ;;  %v777_v27 = vmul.f32 -1.442695, %v1526_v13  ;;  %v61_v53 = vld [vmem:[%s1858_s0 + $0x178] sm:$0xff] }
  0x46   :  { %v905_v56 = vpop.eup %904  ;;  %690 = vst [vmem:[%s1861_s3 + $0xb0] sm:$0xff] %v626_v11  ;;  %v628_v57 = vmul.f32 %v903_v45, %v1306_v35  ;;  %924 = vpow2.f32 %v773_v34  ;;  %v130_v45 = vmul.f32 %v1086_v1, %v59_v40  ;;  %v132_v60 = vmul.f32 %v1086_v1, %v61_v53 }
  0x47   :  { %v907_v30 = vpop.eup %906  ;;  %691 = vst [vmem:[%s1861_s3 + $0xb8] sm:$0xff] %v627_v15  ;;  %v629_v58 = vmul.f32 %v905_v56, %v1314_v39  ;;  %926 = vpow2.f32 %v774_v52  ;;  %v57_v39 = vld [vmem:[%s1858_s0 + $0x158] sm:$0xff]  ;;  %v1530_v21 = vadd.f32 %v1091_v2, %v125_v61  ;;  %v129_v52 = vmul.f32 %v1086_v1, %v58_v32  ;;  %v62_v15 = vld [vmem:[%s1858_s0 + $0x180] sm:$0xff] }
  0x48   :  { %v909_v35 = vpop.eup %908  ;;  %692 = vst [vmem:[%s1861_s3 + $0xc0] sm:$0xff] %v628_v57  ;;  %v438_v47 = vadd.f32 1.0, %v907_v30  ;;  %928 = vpow2.f32 %v775_v44  ;;  %v128_v16 = vmul.f32 %v1086_v1, %v57_v39  ;;  %v780_v56 = vmul.f32 -1.442695, %v1539_v37 }
  0x49   :  { %v911_v62 = vpop.eup %910  ;;  %693 = vst [vmem:[%s1861_s3 + $0xc8] sm:$0xff] %v629_v58  ;;  %v439_v63 = vadd.f32 1.0, %v909_v35  ;;  %930 = vpow2.f32 %v776_v55  ;;  %v778_v6 = vmul.f32 -1.442695, %v1530_v21  ;;  %v131_v57 = vmul.f32 %v1086_v1, %v60_v50  ;;  %v64_v35 = vld [vmem:[%s1858_s0 + $0x190] sm:$0xff] }
  0x4a   :  { %v913_v3 = vpop.eup %912  ;;  %932 = vrcp.f32 %v438_v47  ;;  %v440_v4 = vadd.f32 1.0, %v911_v62  ;;  %v1546_v49 = vadd.f32 %v1091_v2, %v128_v16  ;;  %v1572_v39 = vadd.f32 %v1091_v2, %v129_v52 }
  0x4b   :  { %v915_v8 = vpop.eup %914  ;;  %934 = vrcp.f32 %v439_v63  ;;  %v441_v9 = vadd.f32 1.0, %v913_v3  ;;  %v133_v62 = vmul.f32 %v1086_v1, %v62_v15  ;;  %v65_v63 = vld [vmem:[%s1858_s0 + $0x198] sm:$0xff]  ;;  %v1585_v16 = vadd.f32 %v1091_v2, %v131_v57  ;;  %v66_v15 = vld [vmem:[%s1858_s0 + $0x1a0] sm:$0xff] }
  0x4c   :  { %v917_v10 = vpop.eup %916  ;;  %936 = vrcp.f32 %v440_v4  ;;  %v442_v22 = vadd.f32 1.0, %v915_v8  ;;  %v781_v59 = vmul.f32 -1.442695, %v1546_v49  ;;  %v1580_v4 = vadd.f32 %v1091_v2, %v130_v45 }
  0x4d   :  { %v919_v24 = vpop.eup %918  ;;  %938 = vrcp.f32 %v441_v9  ;;  %v443_v28 = vadd.f32 1.0, %v917_v10  ;;  %v135_v10 = vmul.f32 %v1086_v1, %v64_v35  ;;  %v784_v50 = vmul.f32 -1.442695, %v1585_v16 }
  0x4e   :  { %v921_v25 = vpop.eup %920  ;;  %940 = vrcp.f32 %v442_v22  ;;  %v444_v33 = vadd.f32 1.0, %v919_v24  ;;  %v1593_v24 = vadd.f32 %v1091_v2, %v132_v60 }
  0x4f   :  { %v923_v38 = vpop.eup %922  ;;  %942 = vrcp.f32 %v443_v28  ;;  %v445_v42 = vadd.f32 1.0, %v921_v25  ;;  %v136_v28 = vmul.f32 %v1086_v1, %v65_v63  ;;  %v782_v25 = vmul.f32 -1.442695, %v1572_v39 }
  0x50   :  { %v925_v34 = vpop.eup %924  ;;  %944 = vrcp.f32 %v444_v33  ;;  %v446_v51 = vadd.f32 1.0, %v923_v38  ;;  %v1602_v33 = vadd.f32 %v1091_v2, %v133_v62  ;;  %v783_v38 = vmul.f32 -1.442695, %v1580_v4 }
  0x51   :  { %v927_v11 = vpop.eup %926  ;;  %946 = vrcp.f32 %v445_v42  ;;  %v447_v44 = vadd.f32 1.0, %v925_v34  ;;  %v1610_v42 = vadd.f32 %v1091_v2, %v134_v7  ;;  %v1618_v34 = vadd.f32 %v1091_v2, %v135_v10 }
  0x52   :  { %v929_v55 = vpop.eup %928  ;;  %948 = vrcp.f32 %v446_v51  ;;  %v448_v23 = vadd.f32 1.0, %v927_v11  ;;  %v1626_v52 = vadd.f32 %v1091_v2, %v136_v28  ;;  %v786_v11 = vmul.f32 -1.442695, %v1602_v33 }
  0x53   :  { %v931_v30 = vpop.eup %930  ;;  %950 = vrcp.f32 %v447_v44  ;;  %v449_v58 = vadd.f32 1.0, %v929_v55  ;;  %v787_v2 = vmul.f32 -1.442695, %v1610_v42  ;;  %v788_v45 = vmul.f32 -1.442695, %v1618_v34 }
  0x54   :  { %v933_v47 = vpop.eup %932  ;;  %952 = vrcp.f32 %v448_v23  ;;  %v450_v61 = vadd.f32 1.0, %v931_v30  ;;  %v789_v23 = vmul.f32 -1.442695, %v1626_v52 }
  0x55   :  { %v935_v0 = vpop.eup %934  ;;  %v630_v3 = vmul.f32 %v933_v47, %v1370_v12  ;;  %954 = vrcp.f32 %v449_v58  ;;  %v137_v58 = vmul.f32 %v1086_v1, %v66_v15 }
  0x56   :  { %v937_v8 = vpop.eup %936  ;;  %v631_v9 = vmul.f32 %v935_v0, %v1374_v18  ;;  %956 = vrcp.f32 %v450_v61  ;;  %v139_v61 = vmul.f32 %v1086_v1, %v68_v46 }
  0x57   :  { %v939_v22 = vpop.eup %938  ;;  %694 = vst [vmem:[%s1861_s3 + $0xd0] sm:$0xff] %v630_v3  ;;  %v632_v12 = vmul.f32 %v937_v8, %v1377_v19  ;;  %958 = vpow2.f32 %v777_v27  ;;  %v1681_v8 = vld [vmem:[%s1860_s2] ss:$0 sm:$0xff] }
  0x58   :  { %v941_v18 = vpop.eup %940  ;;  %695 = vst [vmem:[%s1861_s3 + $0xd8] sm:$0xff] %v631_v9  ;;  %v633_v32 = vmul.f32 %v939_v22, %v1383_v31  ;;  %960 = vpow2.f32 %v778_v6  ;;  %v785_v6 = vmul.f32 -1.442695, %v1593_v24  ;;  %v1684_v9 = vadd.f32 %v1681_v8, %v137_v58 }
  0x59   :  { %v943_v19 = vpop.eup %942  ;;  %696 = vst [vmem:[%s1861_s3 + $0xe0] sm:$0xff] %v632_v12  ;;  %v634_v40 = vmul.f32 %v941_v18, %v1390_v26  ;;  %962 = vpow2.f32 %v779_v54 }
  0x5a   :  { %v945_v31 = vpop.eup %944  ;;  %697 = vst [vmem:[%s1861_s3 + $0xe8] sm:$0xff] %v633_v32  ;;  %v635_v27 = vmul.f32 %v943_v19, %v1416_v48  ;;  %964 = vpow2.f32 %v780_v56  ;;  %v1693_v32 = vadd.f32 %v1681_v8, %v139_v61 }
  0x5b   :  { %v947_v26 = vpop.eup %946  ;;  %698 = vst [vmem:[%s1861_s3 + $0xf0] sm:$0xff] %v634_v40  ;;  %v636_v51 = vmul.f32 %v945_v31, %v1424_v5  ;;  %966 = vpow2.f32 %v781_v59  ;;  %v69_v59 = vld [vmem:[%s1858_s0 + $0x1b8] sm:$0xff]  ;;  %v72_v31 = vld [vmem:[%s1858_s0 + $0x1d0] sm:$0xff] }
  0x5c   :  { %v949_v48 = vpop.eup %948  ;;  %699 = vst [vmem:[%s1861_s3 + $0xf8] sm:$0xff] %v635_v27  ;;  %v637_v53 = vmul.f32 %v947_v26, %v1429_v14  ;;  %968 = vpow2.f32 %v782_v25  ;;  %v140_v0 = vmul.f32 %v1086_v1, %v69_v59  ;;  %v71_v25 = vld [vmem:[%s1858_s0 + $0x1c8] sm:$0xff]  ;;  %v790_v26 = vmul.f32 -1.442695, %v1684_v9  ;;  %v77_v59 = vld [vmem:[%s1858_s0 + $0x1f8] sm:$0xff] }
  0x5d   :  { %v951_v44 = vpop.eup %950  ;;  %700 = vst [vmem:[%s1861_s3 + $0x100] sm:$0xff] %v636_v51  ;;  %v638_v5 = vmul.f32 %v949_v48, %v1437_v17  ;;  %970 = vpow2.f32 %v783_v38  ;;  %v1059_v51 = vld [vmem:[%s1859_s1] ss:$0 sm:$0xff]  ;;  %v73_v48 = vld [vmem:[%s1858_s0 + $0x1d8] sm:$0xff] }
  0x5e   :  { %v953_v54 = vpop.eup %952  ;;  %701 = vst [vmem:[%s1861_s3 + $0x108] sm:$0xff] %v637_v53  ;;  %v639_v14 = vmul.f32 %v951_v44, %v1446_v20  ;;  %972 = vpow2.f32 %v784_v50  ;;  %v67_v20 = vld [vmem:[%s1858_s0 + $0x1a8] sm:$0xff]  ;;  %v1699_v38 = vadd.f32 %v1681_v8, %v140_v0  ;;  %v143_v15 = vmul.f32 %v1059_v51, %v72_v31 }
  0x5f   :  { %v955_v55 = vpop.eup %954  ;;  %702 = vst [vmem:[%s1861_s3 + $0x110] sm:$0xff] %v638_v5  ;;  %v640_v17 = vmul.f32 %v953_v54, %v1454_v36  ;;  %974 = vpow2.f32 %v785_v6  ;;  %v138_v35 = vmul.f32 %v1086_v1, %v67_v20  ;;  %v70_v1 = vld [vmem:[%s1858_s0 + $0x1c0] sm:$0xff]  ;;  %v142_v5 = vmul.f32 %v1059_v51, %v71_v25 }
  0x60   :  { %v957_v56 = vpop.eup %956  ;;  %703 = vst [vmem:[%s1861_s3 + $0x118] sm:$0xff] %v639_v14  ;;  %v641_v57 = vmul.f32 %v955_v55, %v1462_v41  ;;  %976 = vpow2.f32 %v786_v11  ;;  %v141_v6 = vmul.f32 %v1059_v51, %v70_v1  ;;  %v75_v55 = vld [vmem:[%s1858_s0 + $0x1e8] sm:$0xff]  ;;  %v793_v20 = vmul.f32 -1.442695, %v1699_v38 }
  0x61   :  { %v959_v36 = vpop.eup %958  ;;  %704 = vst [vmem:[%s1861_s3 + $0x120] sm:$0xff] %v640_v17  ;;  %v642_v30 = vmul.f32 %v957_v56, %v1470_v43  ;;  %978 = vpow2.f32 %v787_v2  ;;  %v1687_v12 = vadd.f32 %v1681_v8, %v138_v35  ;;  %v74_v2 = vld [vmem:[%s1858_s0 + $0x1e0] sm:$0xff]  ;;  %v144_v56 = vmul.f32 %v1059_v51, %v73_v48 }
  0x62   :  { %v961_v41 = vpop.eup %960  ;;  %705 = vst [vmem:[%s1861_s3 + $0x128] sm:$0xff] %v641_v57  ;;  %v451_v60 = vadd.f32 1.0, %v959_v36  ;;  %980 = vpow2.f32 %v788_v45  ;;  %v792_v45 = vmul.f32 -1.442695, %v1693_v32  ;;  %v76_v57 = vld [vmem:[%s1858_s0 + $0x1f0] sm:$0xff]  ;;  %v145_v58 = vmul.f32 %v1059_v51, %v74_v2 }
  0x63   :  { %v963_v47 = vpop.eup %962  ;;  %706 = vst [vmem:[%s1861_s3 + $0x130] sm:$0xff] %v642_v30  ;;  %v452_v43 = vadd.f32 1.0, %v961_v41  ;;  %982 = vpow2.f32 %v789_v23  ;;  %v791_v44 = vmul.f32 -1.442695, %v1687_v12  ;;  %v1724_v30 = vadd.f32 %v1681_v8, %v141_v6 }
  0x64   :  { %v965_v62 = vpop.eup %964  ;;  %984 = vrcp.f32 %v451_v60  ;;  %v453_v63 = vadd.f32 1.0, %v963_v47  ;;  %v1730_v35 = vadd.f32 %v1681_v8, %v142_v5  ;;  %v146_v47 = vmul.f32 %v1059_v51, %v75_v55 }
  0x65   :  { %v967_v3 = vpop.eup %966  ;;  %986 = vrcp.f32 %v452_v43  ;;  %v454_v7 = vadd.f32 1.0, %v965_v62  ;;  %v1734_v62 = vadd.f32 %v1681_v8, %v143_v15  ;;  %v794_v1 = vmul.f32 -1.442695, %v1724_v30 }
  0x66   :  { %v969_v10 = vpop.eup %968  ;;  %988 = vrcp.f32 %v453_v63  ;;  %v455_v22 = vadd.f32 1.0, %v967_v3  ;;  %v147_v63 = vmul.f32 %v1059_v51, %v76_v57  ;;  %v795_v25 = vmul.f32 -1.442695, %v1730_v35 }
  0x67   :  { %v971_v28 = vpop.eup %970  ;;  %990 = vrcp.f32 %v454_v7  ;;  %v456_v18 = vadd.f32 1.0, %v969_v10  ;;  %v1738_v7 = vadd.f32 %v1681_v8, %v144_v56  ;;  %v148_v10 = vmul.f32 %v1059_v51, %v77_v59 }
  0x68   :  { %v973_v19 = vpop.eup %972  ;;  %992 = vrcp.f32 %v455_v22  ;;  %v457_v40 = vadd.f32 1.0, %v971_v28  ;;  %v1746_v28 = vadd.f32 %v1681_v8, %v145_v58  ;;  %v796_v31 = vmul.f32 -1.442695, %v1734_v62 }
  0x69   :  { %v975_v27 = vpop.eup %974  ;;  %994 = vrcp.f32 %v456_v18  ;;  %v458_v50 = vadd.f32 1.0, %v973_v19  ;;  %v1754_v19 = vadd.f32 %v1681_v8, %v146_v47  ;;  %v1770_v51 = vadd.f32 %v1681_v8, %v148_v10 }
  0x6a   :  { %v977_v53 = vpop.eup %976  ;;  %996 = vrcp.f32 %v457_v40  ;;  %v459_v11 = vadd.f32 1.0, %v975_v27  ;;  %v1762_v27 = vadd.f32 %v1681_v8, %v147_v63  ;;  %v798_v48 = vmul.f32 -1.442695, %v1746_v28 }
  0x6b   :  { %v979_v54 = vpop.eup %978  ;;  %998 = vrcp.f32 %v458_v50  ;;  %v460_v14 = vadd.f32 1.0, %v977_v53  ;;  %v799_v8 = vmul.f32 -1.442695, %v1754_v19  ;;  %v801_v2 = vmul.f32 -1.442695, %v1770_v51 }
  0x6c   :  { %v981_v17 = vpop.eup %980  ;;  %1000 = vrcp.f32 %v459_v11  ;;  %v461_v23 = vadd.f32 1.0, %v979_v54 }
  0x6d   :  { %v983_v46 = vpop.eup %982  ;;  %1002 = vrcp.f32 %v460_v14  ;;  %v462_v36 = vadd.f32 1.0, %v981_v17 }
  0x6e   :  { %v985_v41 = vpop.eup %984  ;;  %1004 = vrcp.f32 %v461_v23  ;;  %v463_v60 = vadd.f32 1.0, %v983_v46 }
  0x6f   :  { %v987_v43 = vpop.eup %986  ;;  %v643_v61 = vmul.f32 %v985_v41, %v1526_v13  ;;  %1006 = vrcp.f32 %v462_v36 }
  0x70   :  { %v989_v0 = vpop.eup %988  ;;  %v644_v3 = vmul.f32 %v987_v43, %v1530_v21  ;;  %1008 = vrcp.f32 %v463_v60 }
  0x71   :  { %v991_v22 = vpop.eup %990  ;;  %707 = vst [vmem:[%s1861_s3 + $0x138] sm:$0xff] %v643_v61  ;;  %v645_v13 = vmul.f32 %v989_v0, %v1533_v29  ;;  %1010 = vpow2.f32 %v790_v26  ;;  %v797_v26 = vmul.f32 -1.442695, %v1738_v7 }
  0x72   :  { %v993_v18 = vpop.eup %992  ;;  %708 = vst [vmem:[%s1861_s3 + $0x140] sm:$0xff] %v644_v3  ;;  %v646_v21 = vmul.f32 %v991_v22, %v1539_v37  ;;  %1012 = vpow2.f32 %v791_v44  ;;  %v800_v44 = vmul.f32 -1.442695, %v1762_v27 }
  0x73   :  { %v995_v29 = vpop.eup %994  ;;  %709 = vst [vmem:[%s1861_s3 + $0x148] sm:$0xff] %v645_v13  ;;  %v647_v40 = vmul.f32 %v993_v18, %v1546_v49  ;;  %1014 = vpow2.f32 %v792_v45 }
  0x74   :  { %v997_v37 = vpop.eup %996  ;;  %710 = vst [vmem:[%s1861_s3 + $0x150] sm:$0xff] %v646_v21  ;;  %v648_v50 = vmul.f32 %v995_v29, %v1572_v39  ;;  %1016 = vpow2.f32 %v793_v20 }
  0x75   :  { %v999_v49 = vpop.eup %998  ;;  %711 = vst [vmem:[%s1861_s3 + $0x158] sm:$0xff] %v647_v40  ;;  %v649_v6 = vmul.f32 %v997_v37, %v1580_v4  ;;  %1018 = vpow2.f32 %v794_v1 }
  0x76   :  { %v1001_v53 = vpop.eup %1000  ;;  %712 = vst [vmem:[%s1861_s3 + $0x160] sm:$0xff] %v648_v50  ;;  %v650_v39 = vmul.f32 %v999_v49, %v1585_v16  ;;  %1020 = vpow2.f32 %v795_v25 }
  0x77   :  { %v1003_v11 = vpop.eup %1002  ;;  %713 = vst [vmem:[%s1861_s3 + $0x168] sm:$0xff] %v649_v6  ;;  %v651_v4 = vmul.f32 %v1001_v53, %v1593_v24  ;;  %1022 = vpow2.f32 %v796_v31 }
  0x78   :  { %v1005_v5 = vpop.eup %1004  ;;  %714 = vst [vmem:[%s1861_s3 + $0x170] sm:$0xff] %v650_v39  ;;  %v652_v16 = vmul.f32 %v1003_v11, %v1602_v33  ;;  %1024 = vpow2.f32 %v797_v26 }
  0x79   :  { %v1007_v54 = vpop.eup %1006  ;;  %715 = vst [vmem:[%s1861_s3 + $0x178] sm:$0xff] %v651_v4  ;;  %v653_v24 = vmul.f32 %v1005_v5, %v1610_v42  ;;  %1026 = vpow2.f32 %v798_v48 }
  0x7a   :  { %v1009_v14 = vpop.eup %1008  ;;  %716 = vst [vmem:[%s1861_s3 + $0x180] sm:$0xff] %v652_v16  ;;  %v654_v45 = vmul.f32 %v1007_v54, %v1618_v34  ;;  %1028 = vpow2.f32 %v799_v8 }
  0x7b   :  { %v1011_v33 = vpop.eup %1010  ;;  %717 = vst [vmem:[%s1861_s3 + $0x188] sm:$0xff] %v653_v24  ;;  %v655_v15 = vmul.f32 %v1009_v14, %v1626_v52  ;;  %1030 = vpow2.f32 %v800_v44 }
  0x7c   :  { %v1013_v55 = vpop.eup %1012  ;;  %718 = vst [vmem:[%s1861_s3 + $0x190] sm:$0xff] %v654_v45  ;;  %v464_v42 = vadd.f32 1.0, %v1011_v33  ;;  %1032 = vpow2.f32 %v801_v2 }
  0x7d   :  { %v1015_v17 = vpop.eup %1014  ;;  %719 = vst [vmem:[%s1861_s3 + $0x198] sm:$0xff] %v655_v15  ;;  %v465_v34 = vadd.f32 1.0, %v1013_v55 }
  0x7e   :  { %v1017_v23 = vpop.eup %1016  ;;  %1034 = vrcp.f32 %v464_v42  ;;  %v466_v20 = vadd.f32 1.0, %v1015_v17 }
  0x7f   :  { %v1019_v56 = vpop.eup %1018  ;;  %1036 = vrcp.f32 %v465_v34  ;;  %v467_v52 = vadd.f32 1.0, %v1017_v23 }
  0x80   :  { %v1021_v57 = vpop.eup %1020  ;;  %1038 = vrcp.f32 %v466_v20  ;;  %v468_v46 = vadd.f32 1.0, %v1019_v56 }
  0x81   :  { %v1023_v36 = vpop.eup %1022  ;;  %1040 = vrcp.f32 %v467_v52  ;;  %v469_v58 = vadd.f32 1.0, %v1021_v57 }
  0x82   :  { %v1025_v59 = vpop.eup %1024  ;;  %1042 = vrcp.f32 %v468_v46  ;;  %v470_v41 = vadd.f32 1.0, %v1023_v36 }
  0x83   :  { %v1027_v60 = vpop.eup %1026  ;;  %1044 = vrcp.f32 %v469_v58  ;;  %v471_v47 = vadd.f32 1.0, %v1025_v59 }
  0x84   :  { %v1029_v43 = vpop.eup %1028  ;;  %1046 = vrcp.f32 %v470_v41  ;;  %v472_v61 = vadd.f32 1.0, %v1027_v60 }
  0x85   :  { %v1031_v63 = vpop.eup %1030  ;;  %1048 = vrcp.f32 %v471_v47  ;;  %v473_v0 = vadd.f32 1.0, %v1029_v43 }
  0x86   :  { %v1033_v3 = vpop.eup %1032  ;;  %1050 = vrcp.f32 %v472_v61  ;;  %v474_v10 = vadd.f32 1.0, %v1031_v63 }
  0x87   :  { %1052 = vrcp.f32 %v473_v0  ;;  %v475_v22 = vadd.f32 1.0, %v1033_v3 }
  0x88   :  { %v1035_v13 = vpop.eup %1034  ;;  %1054 = vrcp.f32 %v474_v10 }
  0x89   :  { %v1037_v1 = vpop.eup %1036  ;;  %v656_v18 = vmul.f32 %v1035_v13, %v1684_v9  ;;  %1056 = vrcp.f32 %v475_v22 }
  0x8a   :  { %v1039_v21 = vpop.eup %1038  ;;  %v657_v25 = vmul.f32 %v1037_v1, %v1687_v12 }
  0x8b   :  { %v1041_v29 = vpop.eup %1040  ;;  %720 = vst [vmem:[%s1861_s3 + $0x1a0] sm:$0xff] %v656_v18  ;;  %v658_v40 = vmul.f32 %v1039_v21, %v1693_v32 }
  0x8c   :  { %v1043_v31 = vpop.eup %1042  ;;  %721 = vst [vmem:[%s1861_s3 + $0x1a8] sm:$0xff] %v657_v25  ;;  %v659_v37 = vmul.f32 %v1041_v29, %v1699_v38 }
  0x8d   :  { %v1045_v50 = vpop.eup %1044  ;;  %722 = vst [vmem:[%s1861_s3 + $0x1b0] sm:$0xff] %v658_v40  ;;  %v660_v9 = vmul.f32 %v1043_v31, %v1724_v30 }
  0x8e   :  { %v1047_v12 = vpop.eup %1046  ;;  %723 = vst [vmem:[%s1861_s3 + $0x1b8] sm:$0xff] %v659_v37  ;;  %v661_v32 = vmul.f32 %v1045_v50, %v1730_v35 }
  0x8f   :  { %v1049_v26 = vpop.eup %1048  ;;  %724 = vst [vmem:[%s1861_s3 + $0x1c0] sm:$0xff] %v660_v9  ;;  %v662_v38 = vmul.f32 %v1047_v12, %v1734_v62 }
  0x90   :  { %v1051_v49 = vpop.eup %1050  ;;  %725 = vst [vmem:[%s1861_s3 + $0x1c8] sm:$0xff] %v661_v32  ;;  %v663_v30 = vmul.f32 %v1049_v26, %v1738_v7 }
  0x91   :  { %v1053_v6 = vpop.eup %1052  ;;  %726 = vst [vmem:[%s1861_s3 + $0x1d0] sm:$0xff] %v662_v38  ;;  %v664_v35 = vmul.f32 %v1051_v49, %v1746_v28 }
  0x92   :  { %v1055_v48 = vpop.eup %1054  ;;  %727 = vst [vmem:[%s1861_s3 + $0x1d8] sm:$0xff] %v663_v30  ;;  %v665_v62 = vmul.f32 %v1053_v6, %v1754_v19 }
  0x93   :  { %v1057_v53 = vpop.eup %1056  ;;  %728 = vst [vmem:[%s1861_s3 + $0x1e0] sm:$0xff] %v664_v35  ;;  %v666_v7 = vmul.f32 %v1055_v48, %v1762_v27 }
  0x94   :  { %729 = vst [vmem:[%s1861_s3 + $0x1e8] sm:$0xff] %v665_v62  ;;  %v667_v28 = vmul.f32 %v1057_v53, %v1770_v51 }
  0x95   :  { %730 = vst [vmem:[%s1861_s3 + $0x1f0] sm:$0xff] %v666_v7 }
  0x96   :  { %731 = vst [vmem:[%s1861_s3 + $0x1f8] sm:$0xff] %v667_v28 }

// kernel: inverted_residual_forward.9
= control target key start
LH: loop header
LB: loop body
LE: loop exit
PB: predicated region body
PF: predicated region fallthrough
CT: control target
= control target key end

     0   :  { %s910_s15 = smov 0   ;;  %s1216_s0 = inlined_call_operand.vmem [shape: f32[512,128], index: 0, kind: input, shape index: {}]   ;;  %s1217_s1 = inlined_call_operand.vmem [shape: f32[1,128], index: 1, kind: input, shape index: {}]   ;;  %s1218_s2 = inlined_call_operand.vmem [shape: f32[1,128], index: 2, kind: input, shape index: {}]   ;;  %s1219_s3 = inlined_call_operand.vmem [shape: f32[512,128], index: 3, kind: output, shape index: {0}]   ;;  %s1220_s4 = inlined_call_operand.vmem [shape: f32[2,1,128], index: 4, kind: output, shape index: {1}]  }
   0x1 LB: > { %s916_s16 = sadd.s32 4294967295, %s883_s15   ;;  %p700_p0 = scmp.ge.s32.totalorder %s883_s15, 1  ;;  %s883_s15 = sphi %s910_s15, %s15_s15  }
   0x2   : > { %p166_p1 = scmp.lt.s32.totalorder %s883_s15, 3 }
   0x4   : > { %p167_p2 = pnand %p700_p0, %p166_p1 }
   0x5   : > { %s701_s17 = sshll.u32 (!%p167_p2), %s916_s16, 5  ;;  %v927_v0 = vld [vmem:[%s1217_s1] ss:$0 sm:$0xff] (!%p167_p2)  ;;  %p207_p4 = scmp.lt.s32.totalorder (!%p167_p2), %s916_s16, 1 }
   0x6   : > { %170 = sbr.rel (%p167_p2) target bundleno = 128 (0x80), region = 32  ;;  %p196_p3 = scmp.lt.s32.totalorder (!%p167_p2), %s701_s17, 63  ;;  %v939_v1 = vld [vmem:[%s1218_s2] ss:$0 sm:$0xff] (!%p167_p2) }
   0xd   : > { %s1222_s17 = smov (!%p196_p3, %s701_s17), 63  ;;  %s1224_s16 = smov (!%p207_p4, %s916_s16), 1 }
   0xe   : > { %s702_s18 = sshll.u32 %s1222_s17, 3  ;;  %s209_s5 = scalar_lea.vmem %s1220_s4, %s1224_s16 }
   0xf   : > { %s934_s23 = scalar_lea.vmem %s1216_s0, %s702_s18  ;;  %s1071_s28 = scalar_lea.vmem %s1219_s3, %s702_s18 }
  0x10   : > { %v210_v2 = vld [vmem:[%s934_s23] sm:$0xff]  ;;  %v211_v3 = vld [vmem:[%s934_s23 + $0x8] sm:$0xff]  ;;  %v212_v4 = vld [vmem:[%s934_s23 + $0x10] sm:$0xff] }
  0x11   : > { %v249_v5 = vmul.f32 %v927_v0, %v210_v2  ;;  %v250_v6 = vmul.f32 %v927_v0, %v211_v3  ;;  %v251_v7 = vmul.f32 %v927_v0, %v212_v4  ;;  %v213_v8 = vld [vmem:[%s934_s23 + $0x18] sm:$0xff]  ;;  %v214_v9 = vld [vmem:[%s934_s23 + $0x20] sm:$0xff]  ;;  %v215_v10 = vld [vmem:[%s934_s23 + $0x28] sm:$0xff] }
  0x12   : > { %v252_v11 = vmul.f32 %v927_v0, %v213_v8  ;;  %v253_v12 = vmul.f32 %v927_v0, %v214_v9  ;;  %v254_v13 = vmul.f32 %v927_v0, %v215_v10  ;;  %v216_v14 = vld [vmem:[%s934_s23 + $0x30] sm:$0xff]  ;;  %v217_v15 = vld [vmem:[%s934_s23 + $0x38] sm:$0xff]  ;;  %v218_v20 = vld [vmem:[%s934_s23 + $0x40] sm:$0xff] }
  0x13   : > { %v956_v16 = vadd.f32 %v939_v1, %v249_v5  ;;  %v959_v17 = vadd.f32 %v939_v1, %v250_v6  ;;  %v962_v18 = vadd.f32 %v939_v1, %v251_v7  ;;  %v255_v19 = vmul.f32 %v927_v0, %v216_v14  ;;  %v219_v25 = vld [vmem:[%s934_s23 + $0x48] sm:$0xff]  ;;  %v220_v26 = vld [vmem:[%s934_s23 + $0x50] sm:$0xff]  ;;  %v221_v27 = vld [vmem:[%s934_s23 + $0x58] sm:$0xff] }
  0x14   : > { %v967_v21 = vadd.f32 %v939_v1, %v252_v11  ;;  %v970_v22 = vadd.f32 %v939_v1, %v253_v12  ;;  %v973_v23 = vadd.f32 %v939_v1, %v254_v13  ;;  %v256_v24 = vmul.f32 %v927_v0, %v217_v15  ;;  %v222_v35 = vld [vmem:[%s934_s23 + $0x60] sm:$0xff]  ;;  %v223_v53 = vld [vmem:[%s934_s23 + $0x68] sm:$0xff]  ;;  %v224_v55 = vld [vmem:[%s934_s23 + $0x70] sm:$0xff] }
  0x15   : > { %v707_v28 = vmul.f32 -1.442695, %v956_v16  ;;  %v708_v29 = vmul.f32 -1.442695, %v959_v17  ;;  %v709_v30 = vmul.f32 -1.442695, %v962_v18  ;;  %v983_v31 = vadd.f32 %v939_v1, %v255_v19 }
  0x16   : > { %v710_v32 = vmul.f32 -1.442695, %v967_v21  ;;  %v711_v33 = vmul.f32 -1.442695, %v970_v22  ;;  %v988_v34 = vadd.f32 %v939_v1, %v256_v24  ;;  %v712_v36 = vmul.f32 -1.442695, %v973_v23 }
  0x17   : > { %749 = vpow2.f32 %v707_v28  ;;  %v257_v37 = vmul.f32 %v927_v0, %v218_v20  ;;  %v258_v38 = vmul.f32 %v927_v0, %v219_v25  ;;  %v713_v39 = vmul.f32 -1.442695, %v983_v31  ;;  %v225_v56 = vld [vmem:[%s934_s23 + $0x78] sm:$0xff]  ;;  %v226_v59 = vld [vmem:[%s934_s23 + $0x80] sm:$0xff]  ;;  %v227_v63 = vld [vmem:[%s934_s23 + $0x88] sm:$0xff] }
  0x18   : > { %751 = vpow2.f32 %v708_v29  ;;  %v259_v40 = vmul.f32 %v927_v0, %v220_v26  ;;  %v260_v41 = vmul.f32 %v927_v0, %v221_v27  ;;  %v261_v44 = vmul.f32 %v927_v0, %v222_v35  ;;  %v228_v5 = vld [vmem:[%s934_s23 + $0x90] sm:$0xff]  ;;  %v229_v13 = vld [vmem:[%s934_s23 + $0x98] sm:$0xff] }
  0x19   : > { %753 = vpow2.f32 %v709_v30  ;;  %v998_v42 = vadd.f32 %v939_v1, %v257_v37  ;;  %v1001_v43 = vadd.f32 %v939_v1, %v258_v38  ;;  %v714_v45 = vmul.f32 -1.442695, %v988_v34 }
  0x1a   : > { %755 = vpow2.f32 %v710_v32  ;;  %v1006_v46 = vadd.f32 %v939_v1, %v259_v40  ;;  %v1009_v47 = vadd.f32 %v939_v1, %v260_v41  ;;  %v1013_v49 = vadd.f32 %v939_v1, %v261_v44  ;;  %v230_v32 = vld [vmem:[%s934_s23 + $0xa0] sm:$0xff]  ;;  %v231_v44 = vld [vmem:[%s934_s23 + $0xa8] sm:$0xff] }
  0x1b   : > { %757 = vpow2.f32 %v711_v33  ;;  %v715_v48 = vmul.f32 -1.442695, %v998_v42  ;;  %v716_v50 = vmul.f32 -1.442695, %v1001_v43  ;;  %v262_v58 = vmul.f32 %v927_v0, %v223_v53 }
  0x1c   : > { %759 = vpow2.f32 %v712_v36  ;;  %v717_v51 = vmul.f32 -1.442695, %v1006_v46  ;;  %v718_v52 = vmul.f32 -1.442695, %v1009_v47  ;;  %v719_v54 = vmul.f32 -1.442695, %v1013_v49 }
  0x1d   : > { %761 = vpow2.f32 %v713_v39  ;;  %v263_v62 = vmul.f32 %v927_v0, %v224_v55  ;;  %v264_v4 = vmul.f32 %v927_v0, %v225_v56  ;;  %v265_v8 = vmul.f32 %v927_v0, %v226_v59 }
  0x1e   : > { %763 = vpow2.f32 %v714_v45  ;;  %v1030_v11 = vadd.f32 %v939_v1, %v262_v58  ;;  %v266_v12 = vmul.f32 %v927_v0, %v227_v63  ;;  %v267_v20 = vmul.f32 %v927_v0, %v228_v5  ;;  %v235_v5 = vld [vmem:[%s934_s23 + $0xc8] sm:$0xff] }
  0x1f   : > { %765 = vpow2.f32 %v715_v48  ;;  %v1035_v19 = vadd.f32 %v939_v1, %v263_v62  ;;  %v1039_v26 = vadd.f32 %v939_v1, %v264_v4  ;;  %v1042_v29 = vadd.f32 %v939_v1, %v265_v8  ;;  %v234_v62 = vld [vmem:[%s934_s23 + $0xc0] sm:$0xff] }
  0x20   : > { %767 = vpow2.f32 %v716_v50  ;;  %v268_v30 = vmul.f32 %v927_v0, %v229_v13  ;;  %v720_v36 = vmul.f32 -1.442695, %v1030_v11  ;;  %v1048_v37 = vadd.f32 %v939_v1, %v266_v12 }
  0x21   : > { %v750_v57 = vpop.eup %749  ;;  %769 = vpow2.f32 %v717_v51  ;;  %v721_v40 = vmul.f32 -1.442695, %v1035_v19  ;;  %v1052_v41 = vadd.f32 %v939_v1, %v267_v20  ;;  %v722_v50 = vmul.f32 -1.442695, %v1039_v26 }
  0x22   : > { %v752_v60 = vpop.eup %751  ;;  %v416_v61 = vadd.f32 1.0, %v750_v57  ;;  %771 = vpow2.f32 %v718_v52  ;;  %v269_v51 = vmul.f32 %v927_v0, %v230_v32  ;;  %v232_v52 = vld [vmem:[%s934_s23 + $0xb0] sm:$0xff]  ;;  %v723_v55 = vmul.f32 -1.442695, %v1042_v29  ;;  %v233_v57 = vld [vmem:[%s934_s23 + $0xb8] sm:$0xff] }
  0x23   : > { %v754_v2 = vpop.eup %753  ;;  %v417_v3 = vadd.f32 1.0, %v752_v60  ;;  %773 = vpow2.f32 %v719_v54  ;;  %v1060_v56 = vadd.f32 %v939_v1, %v268_v30  ;;  %v724_v60 = vmul.f32 -1.442695, %v1048_v37 }
  0x24   : > { %v756_v6 = vpop.eup %755  ;;  %775 = vrcp.f32 %v416_v61  ;;  %v418_v7 = vadd.f32 1.0, %v754_v2  ;;  %v270_v61 = vmul.f32 %v927_v0, %v231_v44  ;;  %v271_v4 = vmul.f32 %v927_v0, %v232_v52 }
  0x25   : > { %v758_v9 = vpop.eup %757  ;;  %777 = vrcp.f32 %v417_v3  ;;  %v419_v10 = vadd.f32 1.0, %v756_v6  ;;  %v725_v3 = vmul.f32 -1.442695, %v1052_v41  ;;  %v1078_v8 = vadd.f32 %v939_v1, %v269_v51 }
  0x26   : > { %v760_v14 = vpop.eup %759  ;;  %779 = vrcp.f32 %v418_v7  ;;  %v420_v15 = vadd.f32 1.0, %v758_v9  ;;  %v272_v9 = vmul.f32 %v927_v0, %v233_v57  ;;  %v726_v13 = vmul.f32 -1.442695, %v1060_v56 }
  0x27   : > { %v762_v24 = vpop.eup %761  ;;  %781 = vrcp.f32 %v419_v10  ;;  %v421_v25 = vadd.f32 1.0, %v760_v14  ;;  %v273_v14 = vmul.f32 %v927_v0, %v234_v62  ;;  %v1087_v20 = vadd.f32 %v939_v1, %v270_v61 }
  0x28   : > { %v764_v27 = vpop.eup %763  ;;  %783 = vrcp.f32 %v420_v15  ;;  %v422_v28 = vadd.f32 1.0, %v762_v24  ;;  %v274_v24 = vmul.f32 %v927_v0, %v235_v5  ;;  %v727_v32 = vmul.f32 -1.442695, %v1078_v8 }
  0x29   : > { %v766_v33 = vpop.eup %765  ;;  %785 = vrcp.f32 %v421_v25  ;;  %v423_v35 = vadd.f32 1.0, %v764_v27 }
  0x2a   : > { %v768_v38 = vpop.eup %767  ;;  %787 = vrcp.f32 %v422_v28  ;;  %v424_v39 = vadd.f32 1.0, %v766_v33  ;;  %v1093_v28 = vadd.f32 %v939_v1, %v271_v4  ;;  %v1099_v33 = vadd.f32 %v939_v1, %v272_v9  ;;  %v237_v4 = vld [vmem:[%s934_s23 + $0xd8] sm:$0xff] }
  0x2b   : > { %v770_v45 = vpop.eup %769  ;;  %789 = vrcp.f32 %v423_v35  ;;  %v425_v48 = vadd.f32 1.0, %v768_v38  ;;  %v1104_v38 = vadd.f32 %v939_v1, %v273_v14  ;;  %v1110_v44 = vadd.f32 %v939_v1, %v274_v24 }
  0x2c   : > { %v772_v53 = vpop.eup %771  ;;  %791 = vrcp.f32 %v424_v39  ;;  %v426_v54 = vadd.f32 1.0, %v770_v45  ;;  %v730_v52 = vmul.f32 -1.442695, %v1099_v33  ;;  %v276_v14 = vmul.f32 %v927_v0, %v237_v4 }
  0x2d   : > { %v774_v58 = vpop.eup %773  ;;  %793 = vrcp.f32 %v425_v48  ;;  %v427_v59 = vadd.f32 1.0, %v772_v53 }
  0x2e   : > { %v776_v63 = vpop.eup %775  ;;  %795 = vrcp.f32 %v426_v54  ;;  %v428_v2 = vadd.f32 1.0, %v774_v58 }
  0x2f   : > { %v778_v6 = vpop.eup %777  ;;  %v512_v7 = vmul.f32 %v776_v63, %v956_v16  ;;  %797 = vrcp.f32 %v427_v59 }
  0x30   : > { %v780_v10 = vpop.eup %779  ;;  %v513_v12 = vmul.f32 %v778_v6, %v959_v17  ;;  %799 = vrcp.f32 %v428_v2 }
  0x31   : > { %v782_v15 = vpop.eup %781  ;;  %544 = vst [vmem:[%s1071_s28] sm:$0xff] %v512_v7  ;;  %v514_v16 = vmul.f32 %v780_v10, %v962_v18  ;;  %801 = vpow2.f32 %v720_v36  ;;  %v238_v10 = vld [vmem:[%s934_s23 + $0xe0] sm:$0xff] }
  0x32   : > { %v784_v25 = vpop.eup %783  ;;  %545 = vst [vmem:[%s1071_s28 + $0x8] sm:$0xff] %v513_v12  ;;  %v576_v17 = vadd.f32 %v513_v12, %v512_v7  ;;  %v515_v27 = vmul.f32 %v782_v15, %v967_v21  ;;  %803 = vpow2.f32 %v721_v40  ;;  %v728_v40 = vmul.f32 -1.442695, %v1087_v20  ;;  %v239_v15 = vld [vmem:[%s934_s23 + $0xe8] sm:$0xff] }
  0x33   : > { %v786_v30 = vpop.eup %785  ;;  %546 = vst [vmem:[%s1071_s28 + $0x10] sm:$0xff] %v514_v16  ;;  %v516_v18 = vmul.f32 %v784_v25, %v970_v22  ;;  %805 = vpow2.f32 %v722_v50  ;;  %v729_v50 = vmul.f32 -1.442695, %v1093_v28 }
  0x34   : > { %v788_v35 = vpop.eup %787  ;;  %v577_v36 = vadd.f32 %v576_v17, %v514_v16  ;;  %547 = vst [vmem:[%s1071_s28 + $0x18] sm:$0xff] %v515_v27  ;;  %v517_v21 = vmul.f32 %v786_v30, %v973_v23  ;;  %807 = vpow2.f32 %v723_v55  ;;  %v240_v17 = vld [vmem:[%s934_s23 + $0xf0] sm:$0xff] }
  0x35   : > { %v790_v39 = vpop.eup %789  ;;  %548 = vst [vmem:[%s1071_s28 + $0x20] sm:$0xff] %v516_v18  ;;  %v518_v22 = vmul.f32 %v788_v35, %v983_v31  ;;  %809 = vpow2.f32 %v724_v60  ;;  %v241_v35 = vld [vmem:[%s934_s23 + $0xf8] sm:$0xff] }
  0x36   : > { %v792_v45 = vpop.eup %791  ;;  %v578_v48 = vadd.f32 %v577_v36, %v515_v27  ;;  %549 = vst [vmem:[%s1071_s28 + $0x28] sm:$0xff] %v517_v21  ;;  %v519_v23 = vmul.f32 %v790_v39, %v988_v34  ;;  %811 = vpow2.f32 %v725_v3  ;;  %v731_v34 = vmul.f32 -1.442695, %v1104_v38 }
  0x37   : > { %v794_v51 = vpop.eup %793  ;;  %550 = vst [vmem:[%s1071_s28 + $0x30] sm:$0xff] %v518_v22  ;;  %v520_v31 = vmul.f32 %v792_v45, %v998_v42  ;;  %813 = vpow2.f32 %v726_v13  ;;  %v732_v42 = vmul.f32 -1.442695, %v1110_v44 }
  0x38   : > { %v796_v53 = vpop.eup %795  ;;  %v579_v54 = vadd.f32 %v578_v48, %v516_v18  ;;  %551 = vst [vmem:[%s1071_s28 + $0x38] sm:$0xff] %v519_v23  ;;  %v521_v55 = vmul.f32 %v794_v51, %v1001_v43  ;;  %815 = vpow2.f32 %v727_v32  ;;  %v236_v43 = vld [vmem:[%s934_s23 + $0xd0] sm:$0xff]  ;;  %v277_v32 = vmul.f32 %v927_v0, %v238_v10 }
  0x39   : > { %v798_v57 = vpop.eup %797  ;;  %552 = vst [vmem:[%s1071_s28 + $0x40] sm:$0xff] %v520_v31  ;;  %v522_v58 = vmul.f32 %v796_v53, %v1006_v46  ;;  %817 = vpow2.f32 %v728_v40  ;;  %v275_v6 = vmul.f32 %v927_v0, %v236_v43  ;;  %v1147_v48 = vadd.f32 %v939_v1, %v276_v14 }
  0x3a   : > { %v800_v59 = vpop.eup %799  ;;  %v580_v60 = vadd.f32 %v579_v54, %v517_v21  ;;  %553 = vst [vmem:[%s1071_s28 + $0x48] sm:$0xff] %v521_v55  ;;  %v523_v61 = vmul.f32 %v798_v57, %v1009_v47  ;;  %819 = vpow2.f32 %v729_v50 }
  0x3b   : > { %v802_v62 = vpop.eup %801  ;;  %554 = vst [vmem:[%s1071_s28 + $0x50] sm:$0xff] %v522_v58  ;;  %v1129_v63 = vmul.f32 %v800_v59, %v1013_v49  ;;  %821 = vpow2.f32 %v730_v52  ;;  %v1141_v18 = vadd.f32 %v939_v1, %v275_v6  ;;  %v280_v52 = vmul.f32 %v927_v0, %v241_v35 }
  0x3c   : > { %v804_v46 = vpop.eup %803  ;;  %v581_v2 = vadd.f32 %v580_v60, %v518_v22  ;;  %555 = vst [vmem:[%s1071_s28 + $0x58] sm:$0xff] %v523_v61  ;;  %v429_v3 = vadd.f32 1.0, %v802_v62  ;;  %823 = vpow2.f32 %v731_v34  ;;  %v278_v22 = vmul.f32 %v927_v0, %v239_v15 }
  0x3d   : > { %v806_v5 = vpop.eup %805  ;;  %556 = vst [vmem:[%s1071_s28 + $0x60] sm:$0xff] %v1129_v63  ;;  %v430_v47 = vadd.f32 1.0, %v804_v46  ;;  %825 = vpow2.f32 %v732_v42  ;;  %v1153_v34 = vadd.f32 %v939_v1, %v277_v32 }
  0x3e   : > { %v808_v7 = vpop.eup %807  ;;  %v582_v49 = vadd.f32 %v581_v2, %v519_v23  ;;  %827 = vrcp.f32 %v429_v3  ;;  %v431_v9 = vadd.f32 1.0, %v806_v5  ;;  %v279_v23 = vmul.f32 %v927_v0, %v240_v17 }
  0x3f   : > { %v810_v12 = vpop.eup %809  ;;  %829 = vrcp.f32 %v430_v47  ;;  %v432_v13 = vadd.f32 1.0, %v808_v7  ;;  %v1156_v60 = vadd.f32 %v939_v1, %v278_v22  ;;  %v734_v0 = vmul.f32 -1.442695, %v1147_v48 }
  0x40   : > { %v812_v16 = vpop.eup %811  ;;  %v583_v24 = vadd.f32 %v582_v49, %v520_v31  ;;  %831 = vrcp.f32 %v431_v9  ;;  %v433_v25 = vadd.f32 1.0, %v810_v12  ;;  %v1160_v62 = vadd.f32 %v939_v1, %v279_v23 }
  0x41   : > { %v814_v27 = vpop.eup %813  ;;  %833 = vrcp.f32 %v432_v13  ;;  %v434_v30 = vadd.f32 1.0, %v812_v16  ;;  %v735_v47 = vmul.f32 -1.442695, %v1153_v34  ;;  %v736_v49 = vmul.f32 -1.442695, %v1156_v60 }
  0x42   : > { %v816_v36 = vpop.eup %815  ;;  %v584_v21 = vadd.f32 %v583_v24, %v521_v55  ;;  %835 = vrcp.f32 %v433_v25  ;;  %v435_v39 = vadd.f32 1.0, %v814_v27  ;;  %v733_v55 = vmul.f32 -1.442695, %v1141_v18 }
  0x43   : > { %v818_v40 = vpop.eup %817  ;;  %837 = vrcp.f32 %v434_v30  ;;  %v436_v45 = vadd.f32 1.0, %v816_v36  ;;  %v737_v10 = vmul.f32 -1.442695, %v1160_v62 }
  0x44   : > { %v820_v50 = vpop.eup %819  ;;  %v585_v51 = vadd.f32 %v584_v21, %v522_v58  ;;  %839 = vrcp.f32 %v435_v39  ;;  %v437_v31 = vadd.f32 1.0, %v818_v40 }
  0x45   : > { %v822_v53 = vpop.eup %821  ;;  %841 = vrcp.f32 %v436_v45  ;;  %v438_v54 = vadd.f32 1.0, %v820_v50 }
  0x46   : > { %v824_v57 = vpop.eup %823  ;;  %v586_v42 = vadd.f32 %v585_v51, %v523_v61  ;;  %843 = vrcp.f32 %v437_v31  ;;  %v439_v59 = vadd.f32 1.0, %v822_v53  ;;  %v1164_v61 = vadd.f32 %v939_v1, %v280_v52 }
  0x47   : > { %v826_v58 = vpop.eup %825  ;;  %845 = vrcp.f32 %v438_v54  ;;  %v440_v43 = vadd.f32 1.0, %v824_v57 }
  0x48   : > { %v828_v46 = vpop.eup %827  ;;  %v587_v2 = vadd.f32 %v586_v42, %v1129_v63  ;;  %847 = vrcp.f32 %v439_v59  ;;  %v441_v3 = vadd.f32 1.0, %v826_v58 }
  0x49   : > { %v830_v4 = vpop.eup %829  ;;  %v525_v5 = vmul.f32 %v828_v46, %v1030_v11  ;;  %849 = vrcp.f32 %v440_v43 }
  0x4a   : > { %v832_v6 = vpop.eup %831  ;;  %v526_v7 = vmul.f32 %v830_v4, %v1035_v19  ;;  %851 = vrcp.f32 %v441_v3  ;;  %v738_v19 = vmul.f32 -1.442695, %v1164_v61 }
  0x4b   : > { %v834_v63 = vpop.eup %833  ;;  %557 = vst [vmem:[%s1071_s28 + $0x68] sm:$0xff] %v525_v5  ;;  %v588_v9 = vadd.f32 %v587_v2, %v525_v5  ;;  %v527_v1 = vmul.f32 %v832_v6, %v1039_v26  ;;  %853 = vpow2.f32 %v733_v55 }
  0x4c   : > { %v836_v11 = vpop.eup %835  ;;  %558 = vst [vmem:[%s1071_s28 + $0x70] sm:$0xff] %v526_v7  ;;  %v528_v12 = vmul.f32 %v834_v63, %v1042_v29  ;;  %855 = vpow2.f32 %v734_v0 }
  0x4d   : > { %v838_v13 = vpop.eup %837  ;;  %v589_v14 = vadd.f32 %v588_v9, %v526_v7  ;;  %559 = vst [vmem:[%s1071_s28 + $0x78] sm:$0xff] %v527_v1  ;;  %v529_v15 = vmul.f32 %v836_v11, %v1048_v37  ;;  %857 = vpow2.f32 %v735_v47 }
  0x4e   : > { %v840_v26 = vpop.eup %839  ;;  %560 = vst [vmem:[%s1071_s28 + $0x80] sm:$0xff] %v528_v12  ;;  %v530_v16 = vmul.f32 %v838_v13, %v1052_v41  ;;  %859 = vpow2.f32 %v736_v49 }
  0x4f   : > { %v842_v24 = vpop.eup %841  ;;  %v590_v25 = vadd.f32 %v589_v14, %v527_v1  ;;  %561 = vst [vmem:[%s1071_s28 + $0x88] sm:$0xff] %v529_v15  ;;  %v531_v29 = vmul.f32 %v840_v26, %v1060_v56  ;;  %861 = vpow2.f32 %v737_v10 }
  0x50   : > { %v844_v17 = vpop.eup %843  ;;  %562 = vst [vmem:[%s1071_s28 + $0x90] sm:$0xff] %v530_v16  ;;  %v532_v37 = vmul.f32 %v842_v24, %v1078_v8  ;;  %863 = vpow2.f32 %v738_v19 }
  0x51   : > { %v846_v27 = vpop.eup %845  ;;  %v591_v30 = vadd.f32 %v590_v25, %v528_v12  ;;  %563 = vst [vmem:[%s1071_s28 + $0x98] sm:$0xff] %v531_v29  ;;  %v533_v41 = vmul.f32 %v844_v17, %v1087_v20 }
  0x52   : > { %v848_v32 = vpop.eup %847  ;;  %564 = vst [vmem:[%s1071_s28 + $0xa0] sm:$0xff] %v532_v37  ;;  %v534_v35 = vmul.f32 %v846_v27, %v1093_v28 }
  0x53   : > { %v850_v36 = vpop.eup %849  ;;  %v592_v56 = vadd.f32 %v591_v30, %v529_v15  ;;  %565 = vst [vmem:[%s1071_s28 + $0xa8] sm:$0xff] %v533_v41  ;;  %v535_v21 = vmul.f32 %v848_v32, %v1099_v33 }
  0x54   : > { %v852_v39 = vpop.eup %851  ;;  %566 = vst [vmem:[%s1071_s28 + $0xb0] sm:$0xff] %v534_v35  ;;  %v536_v8 = vmul.f32 %v850_v36, %v1104_v38 }
  0x55   : > { %v854_v22 = vpop.eup %853  ;;  %v593_v40 = vadd.f32 %v592_v56, %v530_v16  ;;  %567 = vst [vmem:[%s1071_s28 + $0xb8] sm:$0xff] %v535_v21  ;;  %v537_v20 = vmul.f32 %v852_v39, %v1110_v44 }
  0x56   : > { %v856_v45 = vpop.eup %855  ;;  %568 = vst [vmem:[%s1071_s28 + $0xc0] sm:$0xff] %v536_v8  ;;  %v442_v23 = vadd.f32 1.0, %v854_v22 }
  0x57   : > { %v858_v50 = vpop.eup %857  ;;  %v594_v28 = vadd.f32 %v593_v40, %v531_v29  ;;  %569 = vst [vmem:[%s1071_s28 + $0xc8] sm:$0xff] %v537_v20  ;;  %v443_v51 = vadd.f32 1.0, %v856_v45 }
  0x58   : > { %v860_v31 = vpop.eup %859  ;;  %865 = vrcp.f32 %v442_v23  ;;  %v444_v52 = vadd.f32 1.0, %v858_v50 }
  0x59   : > { %v862_v33 = vpop.eup %861  ;;  %v595_v53 = vadd.f32 %v594_v28, %v532_v37  ;;  %867 = vrcp.f32 %v443_v51  ;;  %v445_v54 = vadd.f32 1.0, %v860_v31 }
  0x5a   : > { %v864_v38 = vpop.eup %863  ;;  %869 = vrcp.f32 %v444_v52  ;;  %v446_v55 = vadd.f32 1.0, %v862_v33 }
  0x5b   : > { %v596_v57 = vadd.f32 %v595_v53, %v533_v41  ;;  %871 = vrcp.f32 %v445_v54  ;;  %v447_v44 = vadd.f32 1.0, %v864_v38 }
  0x5c   : > { %873 = vrcp.f32 %v446_v55 }
  0x5d   : > { %v597_v42 = vadd.f32 %v596_v57, %v534_v35  ;;  %875 = vrcp.f32 %v447_v44 }
  0x5f   : > { %v598_v59 = vadd.f32 %v597_v42, %v535_v21 }
  0x61   : > { %v599_v58 = vadd.f32 %v598_v59, %v536_v8 }
  0x62   : > { %v866_v43 = vpop.eup %865 }
  0x63   : > { %v868_v0 = vpop.eup %867  ;;  %v600_v46 = vadd.f32 %v599_v58, %v537_v20  ;;  %v538_v2 = vmul.f32 %v866_v43, %v1141_v18 }
  0x64   : > { %v870_v3 = vpop.eup %869  ;;  %v539_v4 = vmul.f32 %v868_v0, %v1147_v48 }
  0x65   : > { %v872_v5 = vpop.eup %871  ;;  %570 = vst [vmem:[%s1071_s28 + $0xd0] sm:$0xff] %v538_v2  ;;  %v601_v47 = vadd.f32 %v600_v46, %v538_v2  ;;  %v540_v6 = vmul.f32 %v870_v3, %v1153_v34 }
  0x66   : > { %v874_v7 = vpop.eup %873  ;;  %571 = vst [vmem:[%s1071_s28 + $0xd8] sm:$0xff] %v539_v4  ;;  %v541_v49 = vmul.f32 %v872_v5, %v1156_v60 }
  0x67   : > { %v876_v63 = vpop.eup %875  ;;  %v602_v9 = vadd.f32 %v601_v47, %v539_v4  ;;  %572 = vst [vmem:[%s1071_s28 + $0xe0] sm:$0xff] %v540_v6  ;;  %v542_v18 = vmul.f32 %v874_v7, %v1160_v62 }
  0x68   : > { %573 = vst [vmem:[%s1071_s28 + $0xe8] sm:$0xff] %v541_v49  ;;  %v543_v48 = vmul.f32 %v876_v63, %v1164_v61 }
  0x69   : > { %v603_v1 = vadd.f32 %v602_v9, %v540_v6  ;;  %574 = vst [vmem:[%s1071_s28 + $0xf0] sm:$0xff] %v542_v18 }
  0x6a   : > { %575 = vst [vmem:[%s1071_s28 + $0xf8] sm:$0xff] %v543_v48 }
  0x6b   : > { %v604_v10 = vadd.f32 %v603_v1, %v541_v49 }
  0x6d   : > { %v605_v11 = vadd.f32 %v604_v10, %v542_v18 }
  0x6f   : > { %v606_v34 = vadd.f32 %v605_v11, %v543_v48 }
  0x71   : > { %v607_v12 = vrot.slane %v606_v34, 4 }
  0x73   : > { %v608_v19 = vadd.f32 %v607_v12, %v606_v34 }
  0x75   : > { %v609_v13 = vrot.slane %v608_v19, 2 }
  0x77   : > { %v610_v60 = vadd.f32 %v609_v13, %v608_v19 }
  0x79   : > { %v611_v14 = vrot.slane %v610_v60, 1 }
  0x7b   : > { %v612_v15 = vadd.f32 %v611_v14, %v610_v60 }
  0x7d   : > { %v613_v62 = vmul.f32 0.00390625, %v612_v15 }
  0x7f   : > { %614 = vst [vmem:[%s209_s5] sm:$0x1] %v613_v62 }
  0x80 PF: > { %s15_s15 = sadd.s32 1, %s883_s15  }
  0x81   : > { %p12_p5 = scmp.ge.s32.totalorder %s15_s15, 4  }
  0x83   :  { %14 = sbr.rel (!%p12_p5) target bundleno = 1 (0x1), region = 74 }

// kernel: inverted_residual_forward.8
= control target key start
LH: loop header
LB: loop body
LE: loop exit
PB: predicated region body
PF: predicated region fallthrough
CT: control target
= control target key end

     0   :  { %s1669_s15 = smov 0   ;;  %s2502_s0 = inlined_call_operand.vmem [shape: f32[2,18,18,128], index: 0, kind: input, shape index: {}]   ;;  %s2503_s1 = inlined_call_operand.vmem [shape: f32[9,1,1,128], index: 1, kind: input, shape index: {}]   ;;  %s2504_s2 = inlined_call_operand.vmem [shape: f32[512,128], index: 2, kind: output, shape index: {0}]   ;;  %s2505_s3 = inlined_call_operand.vmem [shape: f32[2,1,128], index: 3, kind: output, shape index: {1}]   ;;  %s2506_s4 = inlined_call_operand.vmem [shape: f32[2,1,128], index: 4, kind: output, shape index: {2}]  }
   0x1 LB: > { %s1675_s16 = sadd.s32 4294967295, %s1642_s15   ;;  %p1403_p0 = scmp.ge.s32.totalorder %s1642_s15, 1  ;;  %s1642_s15 = sphi %s1669_s15, %s15_s15  }
   0x2   : > { %p167_p1 = scmp.lt.s32.totalorder %s1642_s15, 3 }
   0x4   : > { %p168_p2 = pnand %p1403_p0, %p167_p1 }
   0x5   : > { %p199_p3 = scmp.lt.s32.totalorder (!%p168_p2), %s1675_s16, 1  ;;  %v1687_v0 = vld [vmem:[%s2503_s1] ss:$0 sm:$0xff] (!%p168_p2)  ;;  %v1692_v1 = vld [vmem:[%s2503_s1 + $0x1] ss:$0 sm:$0xff] (!%p168_p2)  ;;  %s1405_s10 = sshll.u32 (!%p168_p2), %s1675_s16, 5 }
   0x6   : > { %171 = sbr.rel (%p168_p2) target bundleno = 202 (0xca), region = 28  ;;  %v1697_v2 = vld [vmem:[%s2503_s1 + $0x2] ss:$0 sm:$0xff] (!%p168_p2)  ;;  %v1707_v3 = vld [vmem:[%s2503_s1 + $0x3] ss:$0 sm:$0xff] (!%p168_p2)  ;;  %p1759_p4 = scmp.lt.s32.totalorder (!%p168_p2), %s1405_s10, 63 }
   0x7   : > { %v1712_v4 = vld [vmem:[%s2503_s1 + $0x4] ss:$0 sm:$0xff] (!%p168_p2)  ;;  %v1720_v8 = vld [vmem:[%s2503_s1 + $0x5] ss:$0 sm:$0xff] (!%p168_p2)  ;;  %v1730_v14 = vld [vmem:[%s2503_s1 + $0x6] ss:$0 sm:$0xff] (!%p168_p2) }
   0x8   : > { %v1737_v16 = vld [vmem:[%s2503_s1 + $0x7] ss:$0 sm:$0xff] (!%p168_p2)  ;;  %v1742_v17 = vld [vmem:[%s2503_s1 + $0x8] ss:$0 sm:$0xff] (!%p168_p2) }
   0xd   : > { %s1681_s17 = scalar_select %p199_p3, %s1675_s16, 1 }
   0xe   : > { %s2509_s10 = smov (!%p1759_p4, %s1405_s10), 63 }
   0xf   : > { %s1618_s18 = smul.u32 432, %s1681_s17  ;;  %s1406_s16 = sshll.u32 %s2509_s10, 3 }
  0x10   : > { %s1825_s21 = scalar_lea.vmem %s2504_s2, %s1406_s16  ;;  %s212_s16 = scalar_lea.vmem %s2505_s3, %s1681_s17 }
  0x11   : > { %s1702_s27 = scalar_lea.vmem %s2502_s0, %s1618_s18 }
  0x12   : > { %v216_v5 = vld [vmem:[%s1702_s27] sm:$0xff]  ;;  %v1412_v12 = vld [vmem:[%s1702_s27 + $0x18] sm:$0xff]  ;;  %v217_v21 = vld [vmem:[%s1702_s27 + $0x8] sm:$0xff] }
  0x13   : > { %v319_v6 = vld [vmem:[%s1702_s27 + $0x1] sm:$0xff]  ;;  %v255_v9 = vmul.f32 %v1687_v0, %v216_v5  ;;  %v1446_v13 = vld [vmem:[%s1702_s27 + $0x19] sm:$0xff]  ;;  %v568_v19 = vmul.f32 %v1707_v3, %v1412_v12  ;;  %v320_v22 = vld [vmem:[%s1702_s27 + $0x9] sm:$0xff]  ;;  %v257_v24 = vmul.f32 %v1412_v12, %v1687_v0  ;;  %v256_v27 = vmul.f32 %v1687_v0, %v217_v21 }
  0x14   : > { %v423_v7 = vld [vmem:[%s1702_s27 + $0x2] sm:$0xff]  ;;  %v359_v10 = vmul.f32 %v1692_v1, %v319_v6  ;;  %v1480_v15 = vld [vmem:[%s1702_s27 + $0x1a] sm:$0xff]  ;;  %v672_v20 = vmul.f32 %v1712_v4, %v1446_v13  ;;  %v424_v23 = vld [vmem:[%s1702_s27 + $0xa] sm:$0xff]  ;;  %v360_v28 = vmul.f32 %v1692_v1, %v320_v22  ;;  %v361_v31 = vmul.f32 %v1446_v13, %v1692_v1 }
  0x15   : > { %v463_v11 = vmul.f32 %v1697_v2, %v423_v7  ;;  %v1514_v25 = vld [vmem:[%s1702_s27 + $0x30] sm:$0xff]  ;;  %v464_v29 = vmul.f32 %v1697_v2, %v424_v23  ;;  %v1413_v30 = vld [vmem:[%s1702_s27 + $0x20] sm:$0xff]  ;;  %v776_v33 = vmul.f32 %v1720_v8, %v1480_v15  ;;  %v1515_v44 = vld [vmem:[%s1702_s27 + $0x38] sm:$0xff]  ;;  %v465_v47 = vmul.f32 %v1480_v15, %v1697_v2 }
  0x16   : > { %v391_v18 = vadd.f32 %v359_v10, %v255_v9  ;;  %v1548_v26 = vld [vmem:[%s1702_s27 + $0x31] sm:$0xff]  ;;  %v881_v34 = vmul.f32 %v1730_v14, %v1514_v25  ;;  %v1447_v37 = vld [vmem:[%s1702_s27 + $0x21] sm:$0xff]  ;;  %v392_v39 = vadd.f32 %v360_v28, %v256_v27  ;;  %v569_v40 = vmul.f32 %v1707_v3, %v1413_v30  ;;  %v1774_v45 = vld [vmem:[%s1702_s27 + $0x39] sm:$0xff] }
  0x17   : > { %v985_v35 = vmul.f32 %v1737_v16, %v1548_v26  ;;  %v1582_v36 = vld [vmem:[%s1702_s27 + $0x32] sm:$0xff]  ;;  %v673_v41 = vmul.f32 %v1712_v4, %v1447_v37  ;;  %v1481_v43 = vld [vmem:[%s1702_s27 + $0x22] sm:$0xff]  ;;  %v393_v46 = vadd.f32 %v361_v31, %v257_v24  ;;  %v570_v48 = vmul.f32 %v1514_v25, %v1707_v3  ;;  %v1783_v53 = vld [vmem:[%s1702_s27 + $0x3a] sm:$0xff] }
  0x18   : > { %v495_v32 = vadd.f32 %v463_v11, %v391_v18  ;;  %v1089_v38 = vmul.f32 %v1742_v17, %v1582_v36  ;;  %v496_v49 = vadd.f32 %v464_v29, %v392_v39  ;;  %v777_v50 = vmul.f32 %v1720_v8, %v1481_v43  ;;  %v1795_v59 = vld [vmem:[%s1702_s27 + $0x48] sm:$0xff] }
  0x19   : > { %v882_v51 = vmul.f32 %v1730_v14, %v1515_v44  ;;  %v986_v52 = vmul.f32 %v1737_v16, %v1774_v45  ;;  %v1090_v55 = vmul.f32 %v1742_v17, %v1783_v53  ;;  %v497_v56 = vadd.f32 %v465_v47, %v393_v46  ;;  %v1804_v9 = vld [vmem:[%s1702_s27 + $0x49] sm:$0xff] }
  0x1a   : > { %v600_v42 = vadd.f32 %v568_v19, %v495_v32  ;;  %v674_v57 = vmul.f32 %v1548_v26, %v1712_v4  ;;  %v601_v58 = vadd.f32 %v569_v40, %v496_v49  ;;  %v258_v60 = vmul.f32 %v1413_v30, %v1687_v0  ;;  %v1809_v12 = vld [vmem:[%s1702_s27 + $0x4a] sm:$0xff] }
  0x1b   : > { %v362_v61 = vmul.f32 %v1447_v37, %v1692_v1  ;;  %v466_v62 = vmul.f32 %v1481_v43, %v1697_v2  ;;  %v602_v5 = vadd.f32 %v570_v48, %v497_v56  ;;  %v778_v6 = vmul.f32 %v1582_v36, %v1720_v8  ;;  %v1847_v56 = vld [vmem:[%s1702_s27 + $0x60] sm:$0xff] }
  0x1c   : > { %v704_v54 = vadd.f32 %v672_v20, %v600_v42  ;;  %v883_v7 = vmul.f32 %v1730_v14, %v1795_v59  ;;  %v705_v10 = vadd.f32 %v673_v41, %v601_v58  ;;  %v987_v11 = vmul.f32 %v1737_v16, %v1804_v9 }
  0x1d   : > { %v394_v13 = vadd.f32 %v362_v61, %v258_v60  ;;  %v571_v15 = vmul.f32 %v1515_v44, %v1707_v3  ;;  %v706_v19 = vadd.f32 %v674_v57, %v602_v5  ;;  %v1091_v20 = vmul.f32 %v1742_v17, %v1809_v12 }
  0x1e   : > { %v808_v63 = vadd.f32 %v776_v33, %v704_v54  ;;  %v675_v21 = vmul.f32 %v1774_v45, %v1712_v4  ;;  %v809_v22 = vadd.f32 %v777_v50, %v705_v10  ;;  %v259_v24 = vmul.f32 %v1514_v25, %v1687_v0  ;;  %v1831_v25 = vld [vmem:[%s1702_s27 + $0x51] sm:$0xff] }
  0x1f   : > { %v498_v23 = vadd.f32 %v466_v62, %v394_v13  ;;  %v363_v27 = vmul.f32 %v1548_v26, %v1692_v1  ;;  %v810_v29 = vadd.f32 %v778_v6, %v706_v19  ;;  %v779_v30 = vmul.f32 %v1783_v53, %v1720_v8  ;;  %v1585_v54 = vld [vmem:[%s1702_s27 + $0x52] sm:$0xff]  ;;  %v1858_v6 = vld [vmem:[%s1702_s27 + $0x61] sm:$0xff] }
  0x20   : > { %v913_v18 = vadd.f32 %v881_v34, %v808_v63  ;;  %v467_v31 = vmul.f32 %v1582_v36, %v1697_v2  ;;  %v914_v32 = vadd.f32 %v882_v51, %v809_v22  ;;  %v1828_v34 = vld [vmem:[%s1702_s27 + $0x50] sm:$0xff]  ;;  %v988_v40 = vmul.f32 %v1737_v16, %v1831_v25  ;;  %v1586_v19 = vld [vmem:[%s1702_s27 + $0x62] sm:$0xff] }
  0x21   : > { %v603_v33 = vadd.f32 %v571_v15, %v498_v23  ;;  %v395_v26 = vadd.f32 %v363_v27, %v259_v24  ;;  %v915_v39 = vadd.f32 %v883_v7, %v810_v29  ;;  %v884_v36 = vmul.f32 %v1730_v14, %v1828_v34 }
  0x22   : > { %v1017_v28 = vadd.f32 %v985_v35, %v913_v18  ;;  %v572_v35 = vmul.f32 %v1795_v59, %v1707_v3  ;;  %v1018_v41 = vadd.f32 %v986_v52, %v914_v32  ;;  %v676_v46 = vmul.f32 %v1804_v9, %v1712_v4 }
  0x23   : > { %v707_v42 = vadd.f32 %v675_v21, %v603_v33  ;;  %v499_v43 = vadd.f32 %v467_v31, %v395_v26  ;;  %v1019_v48 = vadd.f32 %v987_v11, %v915_v39  ;;  %v260_v49 = vmul.f32 %v1515_v44, %v1687_v0  ;;  %v1553_v39 = vld [vmem:[%s1702_s27 + $0x69] sm:$0xff] }
  0x24   : > { %v1121_v37 = vadd.f32 %v1089_v38, %v1017_v28  ;;  %v780_v38 = vmul.f32 %v1809_v12, %v1720_v8  ;;  %v1122_v50 = vadd.f32 %v1090_v55, %v1018_v41  ;;  %v364_v57 = vmul.f32 %v1774_v45, %v1692_v1 }
  0x25   : > { %v811_v51 = vadd.f32 %v779_v30, %v707_v42  ;;  %v604_v52 = vadd.f32 %v572_v35, %v499_v43  ;;  %v1123_v58 = vadd.f32 %v1091_v20, %v1019_v48  ;;  %v1092_v60 = vmul.f32 %v1742_v17, %v1585_v54 }
  0x26   : > { %1153 = vst [vmem:[%s1825_s21] sm:$0xff] %v1121_v37  ;;  %v1223_v47 = vmul.f32 %v1121_v37, %v1121_v37  ;;  %v885_v61 = vmul.f32 %v1730_v14, %v1847_v56  ;;  %v468_v44 = vmul.f32 %v1783_v53, %v1697_v2  ;;  %1154 = vst [vmem:[%s1825_s21 + $0x8] sm:$0xff] %v1122_v50 }
  0x27   : > { %v1185_v55 = vadd.f32 %v1122_v50, %v1121_v37  ;;  %v1224_v62 = vmul.f32 %v1122_v50, %v1122_v50  ;;  %v916_v63 = vadd.f32 %v884_v36, %v811_v51  ;;  %v708_v5 = vadd.f32 %v676_v46, %v604_v52  ;;  %1155 = vst [vmem:[%s1825_s21 + $0x10] sm:$0xff] %v1123_v58  ;;  %v1587_v36 = vld [vmem:[%s1702_s27 + $0x6a] sm:$0xff] }
  0x28   : > { %v1225_v7 = vmul.f32 %v1123_v58, %v1123_v58  ;;  %v989_v45 = vmul.f32 %v1737_v16, %v1858_v6  ;;  %v396_v10 = vadd.f32 %v364_v57, %v260_v49  ;;  %v573_v11 = vmul.f32 %v1828_v34, %v1707_v3 }
  0x29   : > { %v1255_v13 = vadd.f32 %v1224_v62, %v1223_v47  ;;  %v1186_v15 = vadd.f32 %v1185_v55, %v1123_v58  ;;  %v1020_v53 = vadd.f32 %v988_v40, %v916_v63  ;;  %v812_v18 = vadd.f32 %v780_v38, %v708_v5  ;;  %v1554_v62 = vld [vmem:[%s1702_s27 + $0x79] sm:$0xff] }
  0x2a   : > { %v1093_v20 = vmul.f32 %v1742_v17, %v1586_v19  ;;  %v500_v21 = vadd.f32 %v468_v44, %v396_v10  ;;  %v677_v22 = vmul.f32 %v1831_v25, %v1712_v4  ;;  %v261_v23 = vmul.f32 %v1795_v59, %v1687_v0  ;;  %v1519_v59 = vld [vmem:[%s1702_s27 + $0x68] sm:$0xff]  ;;  %v1588_v63 = vld [vmem:[%s1702_s27 + $0x7a] sm:$0xff] }
  0x2b   : > { %v1256_v24 = vadd.f32 %v1255_v13, %v1225_v7  ;;  %v1124_v27 = vadd.f32 %v1092_v60, %v1020_v53  ;;  %v917_v28 = vadd.f32 %v885_v61, %v812_v18  ;;  %v365_v29 = vmul.f32 %v1804_v9, %v1692_v1  ;;  %v1520_v61 = vld [vmem:[%s1702_s27 + $0x78] sm:$0xff] }
  0x2c   : > { %v605_v30 = vadd.f32 %v573_v11, %v500_v21  ;;  %v781_v31 = vmul.f32 %v1585_v54, %v1720_v8  ;;  %v469_v32 = vmul.f32 %v1809_v12, %v1697_v2  ;;  %v574_v33 = vmul.f32 %v1847_v56, %v1707_v3  ;;  %v1909_v21 = vld [vmem:[%s1702_s27 + $0x81] sm:$0xff] }
  0x2d   : > { %1156 = vst [vmem:[%s1825_s21 + $0x18] sm:$0xff] %v1124_v27  ;;  %v1187_v26 = vadd.f32 %v1186_v15, %v1124_v27  ;;  %v1226_v35 = vmul.f32 %v1124_v27, %v1124_v27  ;;  %v1021_v37 = vadd.f32 %v989_v45, %v917_v28  ;;  %v397_v40 = vadd.f32 %v365_v29, %v261_v23  ;;  %v1919_v29 = vld [vmem:[%s1702_s27 + $0x82] sm:$0xff] }
  0x2e   : > { %v709_v41 = vadd.f32 %v677_v22, %v605_v30  ;;  %v886_v9 = vmul.f32 %v1730_v14, %v1519_v59  ;;  %v990_v42 = vmul.f32 %v1737_v16, %v1553_v39  ;;  %v1094_v12 = vmul.f32 %v1742_v17, %v1587_v36 }
  0x2f   : > { %v1257_v43 = vadd.f32 %v1256_v24, %v1226_v35  ;;  %v1125_v46 = vadd.f32 %v1093_v20, %v1021_v37  ;;  %v501_v47 = vadd.f32 %v469_v32, %v397_v40  ;;  %v678_v48 = vmul.f32 %v1858_v6, %v1712_v4  ;;  %v1906_v20 = vld [vmem:[%s1702_s27 + $0x80] sm:$0xff] }
  0x30   : > { %v813_v38 = vadd.f32 %v781_v31, %v709_v41  ;;  %v262_v49 = vmul.f32 %v1828_v34, %v1687_v0  ;;  %v366_v50 = vmul.f32 %v1831_v25, %v1692_v1  ;;  %v470_v51 = vmul.f32 %v1585_v54, %v1697_v2 }
  0x31   : > { %1157 = vst [vmem:[%s1825_s21 + $0x20] sm:$0xff] %v1125_v46  ;;  %v1188_v52 = vadd.f32 %v1187_v26, %v1125_v46  ;;  %v1227_v57 = vmul.f32 %v1125_v46, %v1125_v46  ;;  %v606_v58 = vadd.f32 %v574_v33, %v501_v47  ;;  %v782_v60 = vmul.f32 %v1586_v19, %v1720_v8 }
  0x32   : > { %v918_v44 = vadd.f32 %v886_v9, %v813_v38  ;;  %v887_v55 = vmul.f32 %v1730_v14, %v1520_v61  ;;  %v398_v34 = vadd.f32 %v366_v50, %v262_v49  ;;  %v575_v5 = vmul.f32 %v1519_v59, %v1707_v3  ;;  %v1931_v38 = vld [vmem:[%s1702_s27 + $0x90] sm:$0xff] }
  0x33   : > { %v1258_v25 = vadd.f32 %v1257_v43, %v1227_v57  ;;  %v710_v7 = vadd.f32 %v678_v48, %v606_v58  ;;  %v991_v54 = vmul.f32 %v1737_v16, %v1554_v62  ;;  %v1095_v45 = vmul.f32 %v1742_v17, %v1588_v63  ;;  %v1934_v49 = vld [vmem:[%s1702_s27 + $0x91] sm:$0xff] }
  0x34   : > { %v1022_v10 = vadd.f32 %v990_v42, %v918_v44  ;;  %v502_v11 = vadd.f32 %v470_v51, %v398_v34  ;;  %v679_v13 = vmul.f32 %v1553_v39, %v1712_v4  ;;  %v263_v15 = vmul.f32 %v1847_v56, %v1687_v0 }
  0x35   : > { %v814_v53 = vadd.f32 %v782_v60, %v710_v7  ;;  %v783_v18 = vmul.f32 %v1587_v36, %v1720_v8  ;;  %v367_v22 = vmul.f32 %v1858_v6, %v1692_v1  ;;  %v471_v23 = vmul.f32 %v1586_v19, %v1697_v2 }
  0x36   : > { %v1126_v24 = vadd.f32 %v1094_v12, %v1022_v10  ;;  %v607_v27 = vadd.f32 %v575_v5, %v502_v11  ;;  %v888_v28 = vmul.f32 %v1730_v14, %v1906_v20  ;;  %v992_v56 = vmul.f32 %v1737_v16, %v1909_v21 }
  0x37   : > { %v919_v30 = vadd.f32 %v887_v55, %v814_v53  ;;  %v1096_v31 = vmul.f32 %v1742_v17, %v1919_v29  ;;  %v399_v32 = vadd.f32 %v367_v22, %v263_v15  ;;  %v576_v33 = vmul.f32 %v1520_v61, %v1707_v3  ;;  %v1953_v53 = vld [vmem:[%s1702_s27 + $0x98] sm:$0xff] }
  0x38   : > { %1158 = vst [vmem:[%s1825_s21 + $0x28] sm:$0xff] %v1126_v24  ;;  %v1189_v6 = vadd.f32 %v1188_v52, %v1126_v24  ;;  %v1228_v19 = vmul.f32 %v1126_v24, %v1126_v24  ;;  %v711_v26 = vadd.f32 %v679_v13, %v607_v27  ;;  %v680_v35 = vmul.f32 %v1554_v62, %v1712_v4 }
  0x39   : > { %v1023_v37 = vadd.f32 %v991_v54, %v919_v30  ;;  %v503_v40 = vadd.f32 %v471_v23, %v399_v32  ;;  %v264_v41 = vmul.f32 %v1519_v59, %v1687_v0  ;;  %v368_v9 = vmul.f32 %v1553_v39, %v1692_v1 }
  0x3a   : > { %v1259_v42 = vadd.f32 %v1258_v25, %v1228_v19  ;;  %v815_v12 = vadd.f32 %v783_v18, %v711_v26  ;;  %v784_v43 = vmul.f32 %v1588_v63, %v1720_v8  ;;  %v472_v46 = vmul.f32 %v1587_v36, %v1697_v2  ;;  %v1956_v18 = vld [vmem:[%s1702_s27 + $0x99] sm:$0xff] }
  0x3b   : > { %v1127_v47 = vadd.f32 %v1095_v45, %v1023_v37  ;;  %v608_v48 = vadd.f32 %v576_v33, %v503_v40  ;;  %v400_v50 = vadd.f32 %v368_v9, %v264_v41  ;;  %v577_v51 = vmul.f32 %v1906_v20, %v1707_v3  ;;  %v1590_v45 = vld [vmem:[%s1702_s27 + $0x92] sm:$0xff]  ;;  %v1591_v26 = vld [vmem:[%s1702_s27 + $0x9a] sm:$0xff]  ;;  %v1972_v37 = vld [vmem:[%s1702_s27 + $0xa8] sm:$0xff] }
  0x3c   : > { %v920_v59 = vadd.f32 %v888_v28, %v815_v12  ;;  %v889_v39 = vmul.f32 %v1730_v14, %v1931_v38  ;;  %v993_v52 = vmul.f32 %v1737_v16, %v1934_v49  ;;  %v681_v36 = vmul.f32 %v1909_v21, %v1712_v4 }
  0x3d   : > { %1159 = vst [vmem:[%s1825_s21 + $0x30] sm:$0xff] %v1127_v47  ;;  %v1190_v57 = vadd.f32 %v1189_v6, %v1127_v47  ;;  %v1229_v58 = vmul.f32 %v1127_v47, %v1127_v47  ;;  %v712_v60 = vadd.f32 %v680_v35, %v608_v48  ;;  %v504_v44 = vadd.f32 %v472_v46, %v400_v50  ;;  %v1987_v48 = vld [vmem:[%s1702_s27 + $0xaa] sm:$0xff] }
  0x3e   : > { %v1024_v55 = vadd.f32 %v992_v56, %v920_v59  ;;  %v785_v34 = vmul.f32 %v1919_v29, %v1720_v8  ;;  %v265_v5 = vmul.f32 %v1520_v61, %v1687_v0  ;;  %v369_v25 = vmul.f32 %v1554_v62, %v1692_v1 }
  0x3f   : > { %v1260_v7 = vadd.f32 %v1259_v42, %v1229_v58  ;;  %v816_v54 = vadd.f32 %v784_v43, %v712_v60  ;;  %v609_v10 = vadd.f32 %v577_v51, %v504_v44  ;;  %v473_v11 = vmul.f32 %v1588_v63, %v1697_v2 }
  0x40   : > { %v1128_v13 = vadd.f32 %v1096_v31, %v1024_v55  ;;  %v1097_v15 = vmul.f32 %v1742_v17, %v1590_v45  ;;  %v401_v22 = vadd.f32 %v369_v25, %v265_v5  ;;  %v578_v61 = vmul.f32 %v1931_v38, %v1707_v3  ;;  %v1999_v55 = vld [vmem:[%s1702_s27 + $0xb0] sm:$0xff] }
  0x41   : > { %v921_v62 = vadd.f32 %v889_v39, %v816_v54  ;;  %v713_v23 = vadd.f32 %v681_v36, %v609_v10  ;;  %v890_v24 = vmul.f32 %v1730_v14, %v1953_v53  ;;  %v994_v63 = vmul.f32 %v1737_v16, %v1956_v18 }
  0x42   : > { %1160 = vst [vmem:[%s1825_s21 + $0x38] sm:$0xff] %v1128_v13  ;;  %v1191_v27 = vadd.f32 %v1190_v57, %v1128_v13  ;;  %v1230_v28 = vmul.f32 %v1128_v13, %v1128_v13  ;;  %v505_v56 = vadd.f32 %v473_v11, %v401_v22  ;;  %v682_v30 = vmul.f32 %v1934_v49, %v1712_v4  ;;  %v1559_v13 = vld [vmem:[%s1702_s27 + $0xb1] sm:$0xff] }
  0x43   : > { %v1025_v31 = vadd.f32 %v993_v52, %v921_v62  ;;  %v817_v32 = vadd.f32 %v785_v34, %v713_v23  ;;  %v786_v33 = vmul.f32 %v1590_v45, %v1720_v8  ;;  %v266_v6 = vmul.f32 %v1906_v20, %v1687_v0  ;;  %v1982_v20 = vld [vmem:[%s1702_s27 + $0xa9] sm:$0xff] }
  0x44   : > { %v1261_v19 = vadd.f32 %v1260_v7, %v1230_v28  ;;  %v610_v35 = vadd.f32 %v578_v61, %v505_v56  ;;  %v370_v40 = vmul.f32 %v1909_v21, %v1692_v1  ;;  %v474_v41 = vmul.f32 %v1919_v29, %v1697_v2 }
  0x45   : > { %v1129_v9 = vadd.f32 %v1097_v15, %v1025_v31  ;;  %v922_v42 = vadd.f32 %v890_v24, %v817_v32  ;;  %v1098_v12 = vmul.f32 %v1742_v17, %v1591_v26  ;;  %v891_v43 = vmul.f32 %v1730_v14, %v1972_v37  ;;  %v1593_v15 = vld [vmem:[%s1702_s27 + $0xb2] sm:$0xff]  ;;  %v2019_v31 = vld [vmem:[%s1702_s27 + $0xc0] sm:$0xff] }
  0x46   : > { %v714_v46 = vadd.f32 %v682_v30, %v610_v35  ;;  %v995_v47 = vmul.f32 %v1737_v16, %v1982_v20  ;;  %v402_v21 = vadd.f32 %v370_v40, %v266_v6  ;;  %v579_v29 = vmul.f32 %v1953_v53, %v1707_v3 }
  0x47   : > { %1161 = vst [vmem:[%s1825_s21 + $0x40] sm:$0xff] %v1129_v9  ;;  %v1192_v50 = vadd.f32 %v1191_v27, %v1129_v9  ;;  %v1231_v51 = vmul.f32 %v1129_v9, %v1129_v9  ;;  %v1026_v59 = vadd.f32 %v994_v63, %v922_v42  ;;  %v1099_v39 = vmul.f32 %v1742_v17, %v1987_v48  ;;  %v1560_v42 = vld [vmem:[%s1702_s27 + $0xc1] sm:$0xff] }
  0x48   : > { %v818_v52 = vadd.f32 %v786_v33, %v714_v46  ;;  %v506_v36 = vadd.f32 %v474_v41, %v402_v21  ;;  %v683_v57 = vmul.f32 %v1956_v18, %v1712_v4  ;;  %v267_v58 = vmul.f32 %v1931_v38, %v1687_v0 }
  0x49   : > { %v1262_v60 = vadd.f32 %v1261_v19, %v1231_v51  ;;  %v1130_v44 = vadd.f32 %v1098_v12, %v1026_v59  ;;  %v371_v34 = vmul.f32 %v1934_v49, %v1692_v1  ;;  %v475_v5 = vmul.f32 %v1590_v45, %v1697_v2 }
  0x4a   : > { %v923_v25 = vadd.f32 %v891_v43, %v818_v52  ;;  %v611_v7 = vadd.f32 %v579_v29, %v506_v36  ;;  %v787_v54 = vmul.f32 %v1591_v26, %v1720_v8  ;;  %v892_v10 = vmul.f32 %v1730_v14, %v1999_v55  ;;  %v2040_v52 = vld [vmem:[%s1702_s27 + $0xc8] sm:$0xff] }
  0x4b   : > { %1162 = vst [vmem:[%s1825_s21 + $0x48] sm:$0xff] %v1130_v44  ;;  %v1193_v11 = vadd.f32 %v1192_v50, %v1130_v44  ;;  %v1232_v38 = vmul.f32 %v1130_v44, %v1130_v44  ;;  %v403_v22 = vadd.f32 %v371_v34, %v267_v58  ;;  %v580_v61 = vmul.f32 %v1972_v37, %v1707_v3  ;;  %v2043_v36 = vld [vmem:[%s1702_s27 + $0xc9] sm:$0xff] }
  0x4c   : > { %v1027_v49 = vadd.f32 %v995_v47, %v923_v25  ;;  %v715_v62 = vadd.f32 %v683_v57, %v611_v7  ;;  %v996_v45 = vmul.f32 %v1737_v16, %v1559_v13  ;;  %v1100_v23 = vmul.f32 %v1742_v17, %v1593_v15 }
  0x4d   : > { %v1263_v24 = vadd.f32 %v1262_v60, %v1232_v38  ;;  %v507_v63 = vadd.f32 %v475_v5, %v403_v22  ;;  %v684_v27 = vmul.f32 %v1982_v20, %v1712_v4  ;;  %v268_v28 = vmul.f32 %v1953_v53, %v1687_v0  ;;  %v2054_v5 = vld [vmem:[%s1702_s27 + $0xca] sm:$0xff] }
  0x4e   : > { %v1131_v56 = vadd.f32 %v1099_v39, %v1027_v49  ;;  %v819_v30 = vadd.f32 %v787_v54, %v715_v62  ;;  %v372_v32 = vmul.f32 %v1956_v18, %v1692_v1  ;;  %v476_v33 = vmul.f32 %v1591_v26, %v1697_v2  ;;  %v1594_v18 = vld [vmem:[%s1702_s27 + $0xc2] sm:$0xff] }
  0x4f   : > { %v612_v6 = vadd.f32 %v580_v61, %v507_v63  ;;  %v788_v19 = vmul.f32 %v1987_v48, %v1720_v8  ;;  %v893_v35 = vmul.f32 %v1730_v14, %v2019_v31  ;;  %v581_v40 = vmul.f32 %v1999_v55, %v1707_v3 }
  0x50   : > { %1163 = vst [vmem:[%s1825_s21 + $0x50] sm:$0xff] %v1131_v56  ;;  %v1194_v53 = vadd.f32 %v1193_v11, %v1131_v56  ;;  %v1233_v41 = vmul.f32 %v1131_v56, %v1131_v56  ;;  %v924_v9 = vadd.f32 %v892_v10, %v819_v30  ;;  %v404_v12 = vadd.f32 %v372_v32, %v268_v28  ;;  %v2068_v56 = vld [vmem:[%s1702_s27 + $0xd8] sm:$0xff] }
  0x51   : > { %v716_v26 = vadd.f32 %v684_v27, %v612_v6  ;;  %v997_v43 = vmul.f32 %v1737_v16, %v1560_v42  ;;  %v1101_v46 = vmul.f32 %v1742_v17, %v1594_v18  ;;  %v685_v47 = vmul.f32 %v1559_v13, %v1712_v4  ;;  %v2071_v30 = vld [vmem:[%s1702_s27 + $0xd9] sm:$0xff] }
  0x52   : > { %v1264_v21 = vadd.f32 %v1263_v24, %v1233_v41  ;;  %v1028_v29 = vadd.f32 %v996_v45, %v924_v9  ;;  %v508_v50 = vadd.f32 %v476_v33, %v404_v12  ;;  %v269_v51 = vmul.f32 %v1972_v37, %v1687_v0 }
  0x53   : > { %v820_v59 = vadd.f32 %v788_v19, %v716_v26  ;;  %v789_v39 = vmul.f32 %v1593_v15, %v1720_v8  ;;  %v373_v57 = vmul.f32 %v1982_v20, %v1692_v1  ;;  %v477_v58 = vmul.f32 %v1987_v48, %v1697_v2 }
  0x54   : > { %v1132_v60 = vadd.f32 %v1100_v23, %v1028_v29  ;;  %v613_v44 = vadd.f32 %v581_v40, %v508_v50  ;;  %v894_v34 = vmul.f32 %v1730_v14, %v2040_v52  ;;  %v998_v37 = vmul.f32 %v1737_v16, %v2043_v36 }
  0x55   : > { %v925_v25 = vadd.f32 %v893_v35, %v820_v59  ;;  %v1102_v7 = vmul.f32 %v1742_v17, %v2054_v5  ;;  %v405_v54 = vadd.f32 %v373_v57, %v269_v51  ;;  %v582_v20 = vmul.f32 %v2019_v31, %v1707_v3  ;;  %v2091_v59 = vld [vmem:[%s1702_s27 + $0xe0] sm:$0xff] }
  0x56   : > { %1164 = vst [vmem:[%s1825_s21 + $0x58] sm:$0xff] %v1132_v60  ;;  %v1195_v48 = vadd.f32 %v1194_v53, %v1132_v60  ;;  %v1234_v10 = vmul.f32 %v1132_v60, %v1132_v60  ;;  %v717_v11 = vadd.f32 %v685_v47, %v613_v44  ;;  %v686_v38 = vmul.f32 %v1560_v42, %v1712_v4  ;;  %v1596_v47 = vld [vmem:[%s1702_s27 + $0xda] sm:$0xff] }
  0x57   : > { %v1029_v22 = vadd.f32 %v997_v43, %v925_v25  ;;  %v509_v61 = vadd.f32 %v477_v58, %v405_v54  ;;  %v270_v49 = vmul.f32 %v1999_v55, %v1687_v0  ;;  %v374_v62 = vmul.f32 %v1559_v13, %v1692_v1 }
  0x58   : > { %v1265_v45 = vadd.f32 %v1264_v21, %v1234_v10  ;;  %v821_v23 = vadd.f32 %v789_v39, %v717_v11  ;;  %v790_v24 = vmul.f32 %v1594_v18, %v1720_v8  ;;  %v478_v63 = vmul.f32 %v1593_v15, %v1697_v2  ;;  %v2094_v39 = vld [vmem:[%s1702_s27 + $0xe1] sm:$0xff] }
  0x59   : > { %v1133_v27 = vadd.f32 %v1101_v46, %v1029_v22  ;;  %v614_v28 = vadd.f32 %v582_v20, %v509_v61  ;;  %v406_v32 = vadd.f32 %v374_v62, %v270_v49  ;;  %v583_v33 = vmul.f32 %v2040_v52, %v1707_v3  ;;  %v1597_v11 = vld [vmem:[%s1702_s27 + $0xe2] sm:$0xff]  ;;  %v2110_v22 = vld [vmem:[%s1702_s27 + $0xf0] sm:$0xff] }
  0x5a   : > { %v926_v55 = vadd.f32 %v894_v34, %v821_v23  ;;  %v895_v13 = vmul.f32 %v1730_v14, %v2068_v56  ;;  %v999_v6 = vmul.f32 %v1737_v16, %v2071_v30  ;;  %v687_v15 = vmul.f32 %v2043_v36, %v1712_v4 }
  0x5b   : > { %1165 = vst [vmem:[%s1825_s21 + $0x60] sm:$0xff] %v1133_v27  ;;  %v1196_v19 = vadd.f32 %v1195_v48, %v1133_v27  ;;  %v1235_v35 = vmul.f32 %v1133_v27, %v1133_v27  ;;  %v718_v40 = vadd.f32 %v686_v38, %v614_v28  ;;  %v510_v53 = vadd.f32 %v478_v63, %v406_v32  ;;  %v2125_v28 = vld [vmem:[%s1702_s27 + $0xf2] sm:$0xff] }
  0x5c   : > { %v1030_v41 = vadd.f32 %v998_v37, %v926_v55  ;;  %v791_v9 = vmul.f32 %v2054_v5, %v1720_v8  ;;  %v271_v12 = vmul.f32 %v2019_v31, %v1687_v0  ;;  %v375_v26 = vmul.f32 %v1560_v42, %v1692_v1 }
  0x5d   : > { %v1266_v43 = vadd.f32 %v1265_v45, %v1235_v35  ;;  %v822_v46 = vadd.f32 %v790_v24, %v718_v40  ;;  %v615_v21 = vadd.f32 %v583_v33, %v510_v53  ;;  %v479_v29 = vmul.f32 %v1594_v18, %v1697_v2 }
  0x5e   : > { %v1134_v50 = vadd.f32 %v1102_v7, %v1030_v41  ;;  %v1103_v51 = vmul.f32 %v1742_v17, %v1596_v47  ;;  %v407_v57 = vadd.f32 %v375_v26, %v271_v12  ;;  %v584_v31 = vmul.f32 %v2068_v56, %v1707_v3  ;;  %v2137_v41 = vld [vmem:[%s1702_s27 + $0xf8] sm:$0xff] }
  0x5f   : > { %v927_v42 = vadd.f32 %v895_v13, %v822_v46  ;;  %v719_v58 = vadd.f32 %v687_v15, %v615_v21  ;;  %v896_v60 = vmul.f32 %v1730_v14, %v2091_v59  ;;  %v1000_v18 = vmul.f32 %v1737_v16, %v2094_v39 }
  0x60   : > { %1166 = vst [vmem:[%s1825_s21 + $0x68] sm:$0xff] %v1134_v50  ;;  %v1197_v44 = vadd.f32 %v1196_v19, %v1134_v50  ;;  %v1236_v34 = vmul.f32 %v1134_v50, %v1134_v50  ;;  %v511_v37 = vadd.f32 %v479_v29, %v407_v57  ;;  %v688_v25 = vmul.f32 %v2071_v30, %v1712_v4  ;;  %v1565_v50 = vld [vmem:[%s1702_s27 + $0xf9] sm:$0xff] }
  0x61   : > { %v1031_v7 = vadd.f32 %v999_v6, %v927_v42  ;;  %v823_v54 = vadd.f32 %v791_v9, %v719_v58  ;;  %v792_v20 = vmul.f32 %v1596_v47, %v1720_v8  ;;  %v272_v48 = vmul.f32 %v2040_v52, %v1687_v0  ;;  %v2120_v52 = vld [vmem:[%s1702_s27 + $0xf1] sm:$0xff] }
  0x62   : > { %v1267_v10 = vadd.f32 %v1266_v43, %v1236_v34  ;;  %v616_v38 = vadd.f32 %v584_v31, %v511_v37  ;;  %v376_v61 = vmul.f32 %v2043_v36, %v1692_v1  ;;  %v480_v49 = vmul.f32 %v2054_v5, %v1697_v2 }
  0x63   : > { %v1135_v62 = vadd.f32 %v1103_v51, %v1031_v7  ;;  %v928_v45 = vadd.f32 %v896_v60, %v823_v54  ;;  %v1104_v23 = vmul.f32 %v1742_v17, %v1597_v11  ;;  %v897_v24 = vmul.f32 %v1730_v14, %v2110_v22  ;;  %v1599_v51 = vld [vmem:[%s1702_s27 + $0xfa] sm:$0xff]  ;;  %v2157_v7 = vld [vmem:[%s1702_s27 + $0x108] sm:$0xff] }
  0x64   : > { %v720_v63 = vadd.f32 %v688_v25, %v616_v38  ;;  %v1001_v27 = vmul.f32 %v1737_v16, %v2120_v52  ;;  %v408_v36 = vadd.f32 %v376_v61, %v272_v48  ;;  %v585_v5 = vmul.f32 %v2091_v59, %v1707_v3 }
  0x65   : > { %1167 = vst [vmem:[%s1825_s21 + $0x70] sm:$0xff] %v1135_v62  ;;  %v1198_v32 = vadd.f32 %v1197_v44, %v1135_v62  ;;  %v1237_v33 = vmul.f32 %v1135_v62, %v1135_v62  ;;  %v1032_v55 = vadd.f32 %v1000_v18, %v928_v45  ;;  %v1105_v13 = vmul.f32 %v1742_v17, %v2125_v28  ;;  %v1566_v45 = vld [vmem:[%s1702_s27 + $0x109] sm:$0xff] }
  0x66   : > { %v824_v6 = vadd.f32 %v792_v20, %v720_v63  ;;  %v512_v15 = vadd.f32 %v480_v49, %v408_v36  ;;  %v689_v19 = vmul.f32 %v2094_v39, %v1712_v4  ;;  %v273_v35 = vmul.f32 %v2068_v56, %v1687_v0 }
  0x67   : > { %v1268_v40 = vadd.f32 %v1267_v10, %v1237_v33  ;;  %v1136_v53 = vadd.f32 %v1104_v23, %v1032_v55  ;;  %v377_v9 = vmul.f32 %v2071_v30, %v1692_v1  ;;  %v481_v12 = vmul.f32 %v1596_v47, %v1697_v2 }
  0x68   : > { %v929_v26 = vadd.f32 %v897_v24, %v824_v6  ;;  %v617_v43 = vadd.f32 %v585_v5, %v512_v15  ;;  %v793_v46 = vmul.f32 %v1597_v11, %v1720_v8  ;;  %v898_v21 = vmul.f32 %v1730_v14, %v2137_v41  ;;  %v2181_v6 = vld [vmem:[%s1702_s27 + $0x110] sm:$0xff] }
  0x69   : > { %1168 = vst [vmem:[%s1825_s21 + $0x78] sm:$0xff] %v1136_v53  ;;  %v1199_v29 = vadd.f32 %v1198_v32, %v1136_v53  ;;  %v1238_v56 = vmul.f32 %v1136_v53, %v1136_v53  ;;  %v409_v57 = vadd.f32 %v377_v9, %v273_v35  ;;  %v586_v31 = vmul.f32 %v2110_v22, %v1707_v3  ;;  %v2184_v15 = vld [vmem:[%s1702_s27 + $0x111] sm:$0xff] }
  0x6a   : > { %v1033_v30 = vadd.f32 %v1001_v27, %v929_v26  ;;  %v721_v42 = vadd.f32 %v689_v19, %v617_v43  ;;  %v1002_v47 = vmul.f32 %v1737_v16, %v1565_v50  ;;  %v1106_v58 = vmul.f32 %v1742_v17, %v1599_v51 }
  0x6b   : > { %v1269_v60 = vadd.f32 %v1268_v40, %v1238_v56  ;;  %v513_v18 = vadd.f32 %v481_v12, %v409_v57  ;;  %v690_v44 = vmul.f32 %v2120_v52, %v1712_v4  ;;  %v274_v34 = vmul.f32 %v2091_v59, %v1687_v0  ;;  %v2195_v12 = vld [vmem:[%s1702_s27 + $0x112] sm:$0xff] }
  0x6c   : > { %v1137_v37 = vadd.f32 %v1105_v13, %v1033_v30  ;;  %v825_v25 = vadd.f32 %v793_v46, %v721_v42  ;;  %v378_v54 = vmul.f32 %v2094_v39, %v1692_v1  ;;  %v482_v20 = vmul.f32 %v1597_v11, %v1697_v2  ;;  %v2171_v39 = vld [vmem:[%s1702_s27 + $0x10a] sm:$0xff] }
  0x6d   : > { %v618_v48 = vadd.f32 %v586_v31, %v513_v18  ;;  %v794_v10 = vmul.f32 %v2125_v28, %v1720_v8  ;;  %v899_v38 = vmul.f32 %v1730_v14, %v2157_v7  ;;  %v587_v61 = vmul.f32 %v2137_v41, %v1707_v3 }
  0x6e   : > { %1169 = vst [vmem:[%s1825_s21 + $0x80] sm:$0xff] %v1137_v37  ;;  %v1200_v59 = vadd.f32 %v1199_v29, %v1137_v37  ;;  %v1239_v49 = vmul.f32 %v1137_v37, %v1137_v37  ;;  %v930_v62 = vadd.f32 %v898_v21, %v825_v25  ;;  %v410_v11 = vadd.f32 %v378_v54, %v274_v34  ;;  %v2210_v37 = vld [vmem:[%s1702_s27 + $0x120] sm:$0xff] }
  0x6f   : > { %v722_v23 = vadd.f32 %v690_v44, %v618_v48  ;;  %v1003_v24 = vmul.f32 %v1737_v16, %v1566_v45  ;;  %v1107_v63 = vmul.f32 %v1742_v17, %v2171_v39  ;;  %v691_v27 = vmul.f32 %v1565_v50, %v1712_v4  ;;  %v2213_v25 = vld [vmem:[%s1702_s27 + $0x121] sm:$0xff] }
  0x70   : > { %v1270_v36 = vadd.f32 %v1269_v60, %v1239_v49  ;;  %v1034_v5 = vadd.f32 %v1002_v47, %v930_v62  ;;  %v514_v32 = vadd.f32 %v482_v20, %v410_v11  ;;  %v275_v33 = vmul.f32 %v2110_v22, %v1687_v0  ;;  %v1602_v62 = vld [vmem:[%s1702_s27 + $0x122] sm:$0xff] }
  0x71   : > { %v826_v55 = vadd.f32 %v794_v10, %v722_v23  ;;  %v795_v13 = vmul.f32 %v1599_v51, %v1720_v8  ;;  %v379_v19 = vmul.f32 %v2120_v52, %v1692_v1  ;;  %v483_v35 = vmul.f32 %v2125_v28, %v1697_v2 }
  0x72   : > { %v1138_v40 = vadd.f32 %v1106_v58, %v1034_v5  ;;  %v619_v53 = vadd.f32 %v587_v61, %v514_v32  ;;  %v900_v9 = vmul.f32 %v1730_v14, %v2181_v6  ;;  %v1004_v22 = vmul.f32 %v1737_v16, %v2184_v15 }
  0x73   : > { %v931_v26 = vadd.f32 %v899_v38, %v826_v55  ;;  %v1108_v43 = vmul.f32 %v1742_v17, %v2195_v12  ;;  %v411_v46 = vadd.f32 %v379_v19, %v275_v33  ;;  %v588_v52 = vmul.f32 %v2157_v7, %v1707_v3  ;;  %v2271_v55 = vld [vmem:[%s2503_s1 + $0x7] ss:$0 sm:$0xff] }
  0x74   : > { %1170 = vst [vmem:[%s1825_s21 + $0x88] sm:$0xff] %v1138_v40  ;;  %v1201_v28 = vadd.f32 %v1200_v59, %v1138_v40  ;;  %v1240_v21 = vmul.f32 %v1138_v40, %v1138_v40  ;;  %v723_v29 = vadd.f32 %v691_v27, %v619_v53  ;;  %v692_v56 = vmul.f32 %v1566_v45, %v1712_v4  ;;  %v2252_v27 = vld [vmem:[%s1702_s27 + $0x129] sm:$0xff]  ;;  %v2279_v53 = vld [vmem:[%s2503_s1 + $0x4] ss:$0 sm:$0xff] }
  0x75   : > { %v1035_v57 = vadd.f32 %v1003_v24, %v931_v26  ;;  %v515_v31 = vadd.f32 %v483_v35, %v411_v46  ;;  %v276_v30 = vmul.f32 %v2137_v41, %v1687_v0  ;;  %v380_v42 = vmul.f32 %v1565_v50, %v1692_v1 }
  0x76   : > { %v1271_v47 = vadd.f32 %v1270_v36, %v1240_v21  ;;  %v827_v58 = vadd.f32 %v795_v13, %v723_v29  ;;  %v796_v60 = vmul.f32 %v2171_v39, %v1720_v8  ;;  %v484_v18 = vmul.f32 %v1599_v51, %v1697_v2  ;;  %v2257_v36 = vld [vmem:[%s2503_s1 + $0x3] ss:$0 sm:$0xff]  ;;  %v1603_v21 = vld [vmem:[%s1702_s27 + $0x12a] sm:$0xff] }
  0x77   : > { %v1139_v44 = vadd.f32 %v1107_v63, %v1035_v57  ;;  %v620_v34 = vadd.f32 %v588_v52, %v515_v31  ;;  %v412_v54 = vadd.f32 %v380_v42, %v276_v30  ;;  %v589_v0 = vmul.f32 %v2181_v6, %v1707_v3  ;;  %v2249_v63 = vld [vmem:[%s1702_s27 + $0x128] sm:$0xff] }
  0x78   : > { %v932_v41 = vadd.f32 %v900_v9, %v827_v58  ;;  %v901_v1 = vmul.f32 %v1730_v14, %v2210_v37  ;;  %v1005_v50 = vmul.f32 %v1737_v16, %v2213_v25  ;;  %v693_v2 = vmul.f32 %v2184_v15, %v1712_v4  ;;  %v2229_v14 = vld [vmem:[%s2503_s1] ss:$0 sm:$0xff]  ;;  %v2236_v4 = vld [vmem:[%s2503_s1 + $0x1] ss:$0 sm:$0xff] }
  0x79   : > { %1171 = vst [vmem:[%s1825_s21 + $0x90] sm:$0xff] %v1139_v44  ;;  %v1202_v51 = vadd.f32 %v1201_v28, %v1139_v44  ;;  %v1241_v20 = vmul.f32 %v1139_v44, %v1139_v44  ;;  %v724_v48 = vadd.f32 %v692_v56, %v620_v34  ;;  %v516_v10 = vadd.f32 %v484_v18, %v412_v54  ;;  %v2293_v56 = vld [vmem:[%s1702_s27 + $0x138] sm:$0xff] }
  0x7a   : > { %v1036_v38 = vadd.f32 %v1004_v22, %v932_v41  ;;  %v797_v3 = vmul.f32 %v2195_v12, %v1720_v8  ;;  %v277_v16 = vmul.f32 %v2229_v14, %v2157_v7  ;;  %v381_v61 = vmul.f32 %v2236_v4, %v1566_v45  ;;  %v2243_v8 = vld [vmem:[%s2503_s1 + $0x2] ss:$0 sm:$0xff] }
  0x7b   : > { %v1272_v59 = vadd.f32 %v1271_v47, %v1241_v20  ;;  %v828_v49 = vadd.f32 %v796_v60, %v724_v48  ;;  %v621_v11 = vadd.f32 %v589_v0, %v516_v10  ;;  %v485_v7 = vmul.f32 %v2243_v8, %v2171_v39  ;;  %v2264_v39 = vld [vmem:[%s2503_s1 + $0x6] ss:$0 sm:$0xff]  ;;  %v2302_v47 = vld [vmem:[%s2503_s1 + $0x8] ss:$0 sm:$0xff]  ;;  %v2308_v60 = vld [vmem:[%s1702_s27 + $0x139] sm:$0xff] }
  0x7c   : > { %v1140_v23 = vadd.f32 %v1108_v43, %v1036_v38  ;;  %v1109_v24 = vmul.f32 %v1742_v17, %v1602_v62  ;;  %v413_v45 = vadd.f32 %v381_v61, %v277_v16  ;;  %v590_v5 = vmul.f32 %v2257_v36, %v2210_v37  ;;  %v2286_v43 = vld [vmem:[%s2503_s1 + $0x5] ss:$0 sm:$0xff] }
  0x7d   : > { %v933_v32 = vadd.f32 %v901_v1, %v828_v49  ;;  %v725_v33 = vadd.f32 %v693_v2, %v621_v11  ;;  %v902_v17 = vmul.f32 %v2264_v39, %v2249_v63  ;;  %v1006_v13 = vmul.f32 %v2271_v55, %v2252_v27  ;;  %v2325_v38 = vld [vmem:[%s1702_s27 + $0x140] sm:$0xff] }
  0x7e   : > { %1172 = vst [vmem:[%s1825_s21 + $0x98] sm:$0xff] %v1140_v23  ;;  %v1203_v19 = vadd.f32 %v1202_v51, %v1140_v23  ;;  %v1242_v35 = vmul.f32 %v1140_v23, %v1140_v23  ;;  %v517_v40 = vadd.f32 %v485_v7, %v413_v45  ;;  %v694_v9 = vmul.f32 %v2279_v53, %v2213_v25  ;;  %v1571_v23 = vld [vmem:[%s1702_s27 + $0x141] sm:$0xff] }
  0x7f   : > { %v1037_v22 = vadd.f32 %v1005_v50, %v933_v32  ;;  %v829_v26 = vadd.f32 %v797_v3, %v725_v33  ;;  %v798_v46 = vmul.f32 %v2286_v43, %v1602_v62  ;;  %v278_v52 = vmul.f32 %v2229_v14, %v2181_v6 }
  0x80   : > { %v1273_v28 = vadd.f32 %v1272_v59, %v1242_v35  ;;  %v622_v29 = vadd.f32 %v590_v5, %v517_v40  ;;  %v382_v57 = vmul.f32 %v2236_v4, %v2184_v15  ;;  %v486_v31 = vmul.f32 %v2243_v8, %v2195_v12  ;;  %v2313_v12 = vld [vmem:[%s1702_s27 + $0x13a] sm:$0xff] }
  0x81   : > { %v1141_v30 = vadd.f32 %v1109_v24, %v1037_v22  ;;  %v934_v42 = vadd.f32 %v902_v17, %v829_v26  ;;  %v1110_v6 = vmul.f32 %v2302_v47, %v1603_v21  ;;  %v903_v58 = vmul.f32 %v2264_v39, %v2293_v56  ;;  %v1605_v24 = vld [vmem:[%s1702_s27 + $0x142] sm:$0xff]  ;;  %v2345_v22 = vld [vmem:[%s1702_s27 + $0x150] sm:$0xff] }
  0x82   : > { %v726_v18 = vadd.f32 %v694_v9, %v622_v29  ;;  %v1007_v15 = vmul.f32 %v2271_v55, %v2308_v60  ;;  %v414_v44 = vadd.f32 %v382_v57, %v278_v52  ;;  %v591_v34 = vmul.f32 %v2257_v36, %v2249_v63 }
  0x83   : > { %1173 = vst [vmem:[%s1825_s21 + $0xa0] sm:$0xff] %v1141_v30  ;;  %v1204_v54 = vadd.f32 %v1203_v19, %v1141_v30  ;;  %v1243_v0 = vmul.f32 %v1141_v30, %v1141_v30  ;;  %v1038_v41 = vadd.f32 %v1006_v13, %v934_v42  ;;  %v1111_v1 = vmul.f32 %v2302_v47, %v2313_v12  ;;  %v1572_v42 = vld [vmem:[%s1702_s27 + $0x151] sm:$0xff] }
  0x84   : > { %v830_v50 = vadd.f32 %v798_v46, %v726_v18  ;;  %v518_v2 = vadd.f32 %v486_v31, %v414_v44  ;;  %v695_v51 = vmul.f32 %v2279_v53, %v2252_v27  ;;  %v279_v20 = vmul.f32 %v2229_v14, %v2210_v37 }
  0x85   : > { %v1274_v48 = vadd.f32 %v1273_v28, %v1243_v0  ;;  %v1142_v10 = vadd.f32 %v1110_v6, %v1038_v41  ;;  %v383_v3 = vmul.f32 %v2236_v4, %v2213_v25  ;;  %v487_v16 = vmul.f32 %v2243_v8, %v1602_v62 }
  0x86   : > { %v935_v61 = vadd.f32 %v903_v58, %v830_v50  ;;  %v623_v59 = vadd.f32 %v591_v34, %v518_v2  ;;  %v799_v49 = vmul.f32 %v2286_v43, %v1603_v21  ;;  %v904_v11 = vmul.f32 %v2264_v39, %v2325_v38  ;;  %v2366_v50 = vld [vmem:[%s1702_s27 + $0x158] sm:$0xff] }
  0x87   : > { %1174 = vst [vmem:[%s1825_s21 + $0xa8] sm:$0xff] %v1142_v10  ;;  %v1205_v7 = vadd.f32 %v1204_v54, %v1142_v10  ;;  %v1244_v37 = vmul.f32 %v1142_v10, %v1142_v10  ;;  %v415_v45 = vadd.f32 %v383_v3, %v279_v20  ;;  %v592_v5 = vmul.f32 %v2257_v36, %v2293_v56  ;;  %v2369_v2 = vld [vmem:[%s1702_s27 + $0x159] sm:$0xff] }
  0x88   : > { %v1039_v25 = vadd.f32 %v1007_v15, %v935_v61  ;;  %v727_v32 = vadd.f32 %v695_v51, %v623_v59  ;;  %v1008_v62 = vmul.f32 %v2271_v55, %v1571_v23  ;;  %v1112_v33 = vmul.f32 %v2302_v47, %v1605_v24 }
  0x89   : > { %v1275_v17 = vadd.f32 %v1274_v48, %v1244_v37  ;;  %v519_v13 = vadd.f32 %v487_v16, %v415_v45  ;;  %v696_v19 = vmul.f32 %v2279_v53, %v2308_v60  ;;  %v280_v35 = vmul.f32 %v2229_v14, %v2249_v63  ;;  %v2380_v16 = vld [vmem:[%s1702_s27 + $0x15a] sm:$0xff] }
  0x8a   : > { %v1143_v40 = vadd.f32 %v1111_v1, %v1039_v25  ;;  %v831_v9 = vadd.f32 %v799_v49, %v727_v32  ;;  %v384_v26 = vmul.f32 %v2236_v4, %v2252_v27  ;;  %v488_v46 = vmul.f32 %v2243_v8, %v1603_v21  ;;  %v1606_v27 = vld [vmem:[%s1702_s27 + $0x152] sm:$0xff] }
  0x8b   : > { %v624_v52 = vadd.f32 %v592_v5, %v519_v13  ;;  %v800_v28 = vmul.f32 %v2286_v43, %v2313_v12  ;;  %v905_v29 = vmul.f32 %v2264_v39, %v2345_v22  ;;  %v593_v57 = vmul.f32 %v2257_v36, %v2325_v38 }
  0x8c   : > { %1175 = vst [vmem:[%s1825_s21 + $0xb0] sm:$0xff] %v1143_v40  ;;  %v1206_v63 = vadd.f32 %v1205_v7, %v1143_v40  ;;  %v1245_v31 = vmul.f32 %v1143_v40, %v1143_v40  ;;  %v936_v30 = vadd.f32 %v904_v11, %v831_v9  ;;  %v416_v6 = vadd.f32 %v384_v26, %v280_v35  ;;  %v2394_v40 = vld [vmem:[%s1702_s27 + $0x168] sm:$0xff] }
  0x8d   : > { %v728_v21 = vadd.f32 %v696_v19, %v624_v52  ;;  %v1009_v58 = vmul.f32 %v2271_v55, %v1572_v42  ;;  %v1113_v18 = vmul.f32 %v2302_v47, %v1606_v27  ;;  %v697_v15 = vmul.f32 %v2279_v53, %v1571_v23  ;;  %v2397_v9 = vld [vmem:[%s1702_s27 + $0x169] sm:$0xff] }
  0x8e   : > { %v1276_v44 = vadd.f32 %v1275_v17, %v1245_v31  ;;  %v1040_v34 = vadd.f32 %v1008_v62, %v936_v30  ;;  %v520_v54 = vadd.f32 %v488_v46, %v416_v6  ;;  %v281_v0 = vmul.f32 %v2229_v14, %v2293_v56 }
  0x8f   : > { %v832_v41 = vadd.f32 %v800_v28, %v728_v21  ;;  %v801_v1 = vmul.f32 %v2286_v43, %v1605_v24  ;;  %v385_v51 = vmul.f32 %v2236_v4, %v2308_v60  ;;  %v489_v20 = vmul.f32 %v2243_v8, %v2313_v12 }
  0x90   : > { %v1144_v48 = vadd.f32 %v1112_v33, %v1040_v34  ;;  %v625_v10 = vadd.f32 %v593_v57, %v520_v54  ;;  %v906_v3 = vmul.f32 %v2264_v39, %v2366_v50  ;;  %v1010_v56 = vmul.f32 %v2271_v55, %v2369_v2 }
  0x91   : > { %v937_v61 = vadd.f32 %v905_v29, %v832_v41  ;;  %v1114_v59 = vmul.f32 %v2302_v47, %v2380_v16  ;;  %v417_v49 = vadd.f32 %v385_v51, %v281_v0  ;;  %v594_v60 = vmul.f32 %v2257_v36, %v2345_v22  ;;  %v2417_v41 = vld [vmem:[%s1702_s27 + $0x170] sm:$0xff] }
  0x92   : > { %1176 = vst [vmem:[%s1825_s21 + $0xb8] sm:$0xff] %v1144_v48  ;;  %v1207_v12 = vadd.f32 %v1206_v63, %v1144_v48  ;;  %v1246_v11 = vmul.f32 %v1144_v48, %v1144_v48  ;;  %v729_v7 = vadd.f32 %v697_v15, %v625_v10  ;;  %v698_v37 = vmul.f32 %v2279_v53, %v1572_v42  ;;  %v1608_v15 = vld [vmem:[%s1702_s27 + $0x16a] sm:$0xff] }
  0x93   : > { %v1041_v45 = vadd.f32 %v1009_v58, %v937_v61  ;;  %v521_v5 = vadd.f32 %v489_v20, %v417_v49  ;;  %v282_v25 = vmul.f32 %v2229_v14, %v2325_v38  ;;  %v386_v32 = vmul.f32 %v2236_v4, %v1571_v23 }
  0x94   : > { %v1277_v62 = vadd.f32 %v1276_v44, %v1246_v11  ;;  %v833_v33 = vadd.f32 %v801_v1, %v729_v7  ;;  %v802_v17 = vmul.f32 %v2286_v43, %v1606_v27  ;;  %v490_v13 = vmul.f32 %v2243_v8, %v1605_v24  ;;  %v2420_v1 = vld [vmem:[%s1702_s27 + $0x171] sm:$0xff] }
  0x95   : > { %v1145_v19 = vadd.f32 %v1113_v18, %v1041_v45  ;;  %v626_v35 = vadd.f32 %v594_v60, %v521_v5  ;;  %v418_v26 = vadd.f32 %v386_v32, %v282_v25  ;;  %v595_v46 = vmul.f32 %v2257_v36, %v2366_v50  ;;  %v1609_v7 = vld [vmem:[%s1702_s27 + $0x172] sm:$0xff] }
  0x96   : > { %v938_v38 = vadd.f32 %v906_v3, %v833_v33  ;;  %v907_v23 = vmul.f32 %v2264_v39, %v2394_v40  ;;  %v1011_v52 = vmul.f32 %v2271_v55, %v2397_v9  ;;  %v699_v24 = vmul.f32 %v2279_v53, %v2369_v2  ;;  %v1542_v33 = vld [vmem:[%s1702_s27 + $0x180] sm:$0xff] }
  0x97   : > { %1177 = vst [vmem:[%s1825_s21 + $0xc0] sm:$0xff] %v1145_v19  ;;  %v1208_v28 = vadd.f32 %v1207_v12, %v1145_v19  ;;  %v1247_v29 = vmul.f32 %v1145_v19, %v1145_v19  ;;  %v730_v57 = vadd.f32 %v698_v37, %v626_v35  ;;  %v522_v63 = vadd.f32 %v490_v13, %v418_v26  ;;  %v1576_v19 = vld [vmem:[%s1702_s27 + $0x181] sm:$0xff] }
  0x98   : > { %v1042_v31 = vadd.f32 %v1010_v56, %v938_v38  ;;  %v803_v30 = vmul.f32 %v2286_v43, %v2380_v16  ;;  %v283_v6 = vmul.f32 %v2229_v14, %v2345_v22  ;;  %v387_v21 = vmul.f32 %v2236_v4, %v1572_v42 }
  0x99   : > { %v1278_v58 = vadd.f32 %v1277_v62, %v1247_v29  ;;  %v834_v18 = vadd.f32 %v802_v17, %v730_v57  ;;  %v627_v44 = vadd.f32 %v595_v46, %v522_v63  ;;  %v491_v34 = vmul.f32 %v2243_v8, %v1606_v27  ;;  %v1610_v57 = vld [vmem:[%s1702_s27 + $0x182] sm:$0xff] }
  0x9a   : > { %v1146_v54 = vadd.f32 %v1114_v59, %v1042_v31  ;;  %v1115_v0 = vmul.f32 %v2302_v47, %v1608_v15  ;;  %v419_v51 = vadd.f32 %v387_v21, %v283_v6  ;;  %v596_v22 = vmul.f32 %v2257_v36, %v2394_v40 }
  0x9b   : > { %v939_v42 = vadd.f32 %v907_v23, %v834_v18  ;;  %v731_v20 = vadd.f32 %v699_v24, %v627_v44  ;;  %v908_v48 = vmul.f32 %v2264_v39, %v2417_v41  ;;  %v1012_v27 = vmul.f32 %v2271_v55, %v2420_v1 }
  0x9c   : > { %1178 = vst [vmem:[%s1825_s21 + $0xc8] sm:$0xff] %v1146_v54  ;;  %v1209_v10 = vadd.f32 %v1208_v28, %v1146_v54  ;;  %v1248_v3 = vmul.f32 %v1146_v54, %v1146_v54  ;;  %v523_v56 = vadd.f32 %v491_v34, %v419_v51  ;;  %v700_v61 = vmul.f32 %v2279_v53, %v2397_v9  ;;  %v1577_v34 = vld [vmem:[%s1702_s27 + $0x189] sm:$0xff] }
  0x9d   : > { %v1043_v59 = vadd.f32 %v1011_v52, %v939_v42  ;;  %v835_v49 = vadd.f32 %v803_v30, %v731_v20  ;;  %v804_v60 = vmul.f32 %v2286_v43, %v1608_v15  ;;  %v284_v12 = vmul.f32 %v2229_v14, %v2366_v50 }
  0x9e   : > { %v1279_v11 = vadd.f32 %v1278_v58, %v1248_v3  ;;  %v628_v37 = vadd.f32 %v596_v22, %v523_v56  ;;  %v388_v45 = vmul.f32 %v2236_v4, %v2369_v2  ;;  %v492_v5 = vmul.f32 %v2243_v8, %v2380_v16  ;;  %v1611_v56 = vld [vmem:[%s1702_s27 + $0x18a] sm:$0xff] }
  0x9f   : > { %v1147_v25 = vadd.f32 %v1115_v0, %v1043_v59  ;;  %v940_v32 = vadd.f32 %v908_v48, %v835_v49  ;;  %v1116_v62 = vmul.f32 %v2302_v47, %v1609_v7  ;;  %v909_v13 = vmul.f32 %v2264_v39, %v1542_v33 }
  0xa0   : > { %v732_v17 = vadd.f32 %v700_v61, %v628_v37  ;;  %v420_v50 = vadd.f32 %v388_v45, %v284_v12  ;;  %v597_v35 = vmul.f32 %v2257_v36, %v2417_v41  ;;  %v1013_v16 = vmul.f32 %v2271_v55, %v1576_v19  ;;  %v1544_v61 = vld [vmem:[%s1702_s27 + $0x198] sm:$0xff] }
  0xa1   : > { %1179 = vst [vmem:[%s1825_s21 + $0xd0] sm:$0xff] %v1147_v25  ;;  %v1210_v26 = vadd.f32 %v1209_v10, %v1147_v25  ;;  %v1249_v2 = vmul.f32 %v1147_v25, %v1147_v25  ;;  %v1044_v46 = vadd.f32 %v1012_v27, %v940_v32  ;;  %v701_v52 = vmul.f32 %v2279_v53, %v2420_v1 }
  0xa2   : > { %v836_v38 = vadd.f32 %v804_v60, %v732_v17  ;;  %v524_v23 = vadd.f32 %v492_v5, %v420_v50  ;;  %v285_v24 = vmul.f32 %v2229_v14, %v2394_v40  ;;  %v389_v63 = vmul.f32 %v2236_v4, %v2397_v9  ;;  %v1543_v40 = vld [vmem:[%s1702_s27 + $0x188] sm:$0xff]  ;;  %v1578_v5 = vld [vmem:[%s1702_s27 + $0x199] sm:$0xff] }
  0xa3   : > { %v1280_v28 = vadd.f32 %v1279_v11, %v1249_v2  ;;  %v1148_v29 = vadd.f32 %v1116_v62, %v1044_v46  ;;  %v493_v31 = vmul.f32 %v2243_v8, %v1608_v15  ;;  %v1117_v6 = vmul.f32 %v2302_v47, %v1610_v57  ;;  %v1579_v46 = vld [vmem:[%s1702_s27 + $0x1a1] sm:$0xff] }
  0xa4   : > { %v941_v30 = vadd.f32 %v909_v13, %v836_v38  ;;  %v629_v21 = vadd.f32 %v597_v35, %v524_v23  ;;  %v805_v58 = vmul.f32 %v2286_v43, %v1609_v7  ;;  %v421_v54 = vadd.f32 %v389_v63, %v285_v24  ;;  %v1545_v13 = vld [vmem:[%s1702_s27 + $0x1a0] sm:$0xff] }
  0xa5   : > { %1180 = vst [vmem:[%s1825_s21 + $0xd8] sm:$0xff] %v1148_v29  ;;  %v1211_v18 = vadd.f32 %v1210_v26, %v1148_v29  ;;  %v1250_v44 = vmul.f32 %v1148_v29, %v1148_v29  ;;  %v598_v0 = vmul.f32 %v2257_v36, %v1542_v33  ;;  %v910_v15 = vmul.f32 %v2264_v39, %v1543_v40  ;;  %v1613_v24 = vld [vmem:[%s1702_s27 + $0x1a2] sm:$0xff] }
  0xa6   : > { %v1045_v51 = vadd.f32 %v1013_v16, %v941_v30  ;;  %v733_v9 = vadd.f32 %v701_v52, %v629_v21  ;;  %v1014_v22 = vmul.f32 %v2271_v55, %v1577_v34  ;;  %v525_v20 = vadd.f32 %v493_v31, %v421_v54 }
  0xa7   : > { %v1281_v42 = vadd.f32 %v1280_v28, %v1250_v44  ;;  %v702_v48 = vmul.f32 %v2279_v53, %v1576_v19  ;;  %v286_v27 = vmul.f32 %v2229_v14, %v2417_v41  ;;  %v390_v59 = vmul.f32 %v2236_v4, %v2420_v1 }
  0xa8   : > { %v1149_v10 = vadd.f32 %v1117_v6, %v1045_v51  ;;  %v837_v3 = vadd.f32 %v805_v58, %v733_v9  ;;  %v494_v49 = vmul.f32 %v2243_v8, %v1609_v7  ;;  %v1118_v60 = vmul.f32 %v2302_v47, %v1611_v56  ;;  %v1612_v7 = vld [vmem:[%s1702_s27 + $0x19a] sm:$0xff] }
  0xa9   : > { %v630_v12 = vadd.f32 %v598_v0, %v525_v20  ;;  %v806_v11 = vmul.f32 %v2286_v43, %v1610_v57  ;;  %v599_v37 = vmul.f32 %v2257_v36, %v1543_v40  ;;  %v422_v25 = vadd.f32 %v390_v59, %v286_v27 }
  0xaa   : > { %1181 = vst [vmem:[%s1825_s21 + $0xe0] sm:$0xff] %v1149_v10  ;;  %v1212_v14 = vadd.f32 %v1211_v18, %v1149_v10  ;;  %v1251_v41 = vmul.f32 %v1149_v10, %v1149_v10  ;;  %v942_v45 = vadd.f32 %v910_v15, %v837_v3  ;;  %v911_v4 = vmul.f32 %v2264_v39, %v1544_v61 }
  0xab   : > { %v734_v32 = vadd.f32 %v702_v48, %v630_v12  ;;  %v526_v62 = vadd.f32 %v494_v49, %v422_v25  ;;  %v703_v33 = vmul.f32 %v2279_v53, %v1577_v34  ;;  %v1015_v17 = vmul.f32 %v2271_v55, %v1578_v5 }
  0xac   : > { %v1282_v8 = vadd.f32 %v1281_v42, %v1251_v41  ;;  %v1046_v1 = vadd.f32 %v1014_v22, %v942_v45  ;;  %v807_v35 = vmul.f32 %v2286_v43, %v1611_v56  ;;  %v1119_v2 = vmul.f32 %v2302_v47, %v1612_v7 }
  0xad   : > { %v838_v36 = vadd.f32 %v806_v11, %v734_v32  ;;  %v631_v50 = vadd.f32 %v599_v37, %v526_v62  ;;  %v912_v53 = vmul.f32 %v2264_v39, %v1545_v13  ;;  %v1016_v57 = vmul.f32 %v2271_v55, %v1579_v46 }
  0xae   : > { %v1150_v19 = vadd.f32 %v1118_v60, %v1046_v1  ;;  %v1120_v31 = vmul.f32 %v2302_v47, %v1613_v24 }
  0xaf   : > { %v943_v26 = vadd.f32 %v911_v4, %v838_v36  ;;  %v735_v23 = vadd.f32 %v703_v33, %v631_v50 }
  0xb0   : > { %1182 = vst [vmem:[%s1825_s21 + $0xe8] sm:$0xff] %v1150_v19  ;;  %v1213_v16 = vadd.f32 %v1212_v14, %v1150_v19  ;;  %v1252_v38 = vmul.f32 %v1150_v19, %v1150_v19 }
  0xb1   : > { %v1047_v52 = vadd.f32 %v1015_v17, %v943_v26  ;;  %v839_v29 = vadd.f32 %v807_v35, %v735_v23 }
  0xb2   : > { %v1283_v28 = vadd.f32 %v1282_v8, %v1252_v38 }
  0xb3   : > { %v1151_v63 = vadd.f32 %v1119_v2, %v1047_v52  ;;  %v944_v43 = vadd.f32 %v912_v53, %v839_v29 }
  0xb5   : > { %1183 = vst [vmem:[%s1825_s21 + $0xf0] sm:$0xff] %v1151_v63  ;;  %v1214_v30 = vadd.f32 %v1213_v16, %v1151_v63  ;;  %v1253_v6 = vmul.f32 %v1151_v63, %v1151_v63  ;;  %v1048_v21 = vadd.f32 %v1016_v57, %v944_v43 }
  0xb7   : > { %v1284_v58 = vadd.f32 %v1283_v28, %v1253_v6  ;;  %v1152_v18 = vadd.f32 %v1120_v31, %v1048_v21 }
  0xb9   : > { %1184 = vst [vmem:[%s1825_s21 + $0xf8] sm:$0xff] %v1152_v18  ;;  %v1254_v39 = vmul.f32 %v1152_v18, %v1152_v18  ;;  %v1215_v44 = vadd.f32 %v1214_v30, %v1152_v18  ;;  %s215_s21 = scalar_lea.vmem %s2506_s4, %s1681_s17 }
  0xbb   : > { %v1216_v40 = vrot.slane %v1215_v44, 4  ;;  %v1285_v34 = vadd.f32 %v1284_v58, %v1254_v39 }
  0xbd   : > { %v1217_v54 = vadd.f32 %v1216_v40, %v1215_v44  ;;  %v1286_v0 = vrot.slane %v1285_v34, 4 }
  0xbf   : > { %v1218_v55 = vrot.slane %v1217_v54, 2  ;;  %v1287_v51 = vadd.f32 %v1286_v0, %v1285_v34 }
  0xc1   : > { %v1219_v9 = vadd.f32 %v1218_v55, %v1217_v54  ;;  %v1288_v15 = vrot.slane %v1287_v51, 2 }
  0xc3   : > { %v1220_v47 = vrot.slane %v1219_v9, 1  ;;  %v1289_v22 = vadd.f32 %v1288_v15, %v1287_v51 }
  0xc5   : > { %v1221_v42 = vadd.f32 %v1220_v47, %v1219_v9  ;;  %v1290_v20 = vrot.slane %v1289_v22, 1 }
  0xc7   : > { %1222 = vst [vmem:[%s212_s16] sm:$0x1] %v1221_v42  ;;  %v1291_v48 = vadd.f32 %v1290_v20, %v1289_v22 }
  0xc9   : > { %1292 = vst [vmem:[%s215_s21] sm:$0x1] %v1291_v48 }
  0xca PF: > { %s15_s15 = sadd.s32 1, %s1642_s15  }
  0xcb   : > { %p12_p5 = scmp.ge.s32.totalorder %s15_s15, 4  }
  0xcd   :  { %14 = sbr.rel (!%p12_p5) target bundleno = 1 (0x1), region = 92 }

// kernel: inverted_residual_forward.10
= control target key start
LH: loop header
LB: loop body
LE: loop exit
PB: predicated region body
PF: predicated region fallthrough
CT: control target
= control target key end

     0   :  { %s1126_s18 = smov 0   ;;  %s1128_s19 = smov 0   ;;  %s1382_s0 = inlined_call_operand.vmem [shape: f32[2,256,128], index: 0, kind: input, shape index: {}]   ;;  %s1383_s1 = inlined_call_operand.vmem [shape: f32[2,1,128], index: 1, kind: input, shape index: {}]   ;;  %s1384_s2 = inlined_call_operand.vmem [shape: bf16[128,128], index: 2, kind: input, shape index: {}]   ;;  %s1385_s3 = inlined_call_operand.vmem [shape: f32[2,256,128], index: 3, kind: output, shape index: {0}]   ;;  %s1386_s4 = inlined_call_operand.vmem [shape: f32[2,1,1,128], index: 4, kind: output, shape index: {1}]   ;;  %s1387_s5 = inlined_call_operand.vmem [shape: f32[2,1,1,128], index: 5, kind: output, shape index: {2}]  }
   0x1   :  { %s1130_s20 = smov 0  }
   0x2 LB: > { %s28_s21 = sadd.s32 1, %s1090_s19  ;;  %p934_p0 = scmp.ge.s32.totalorder %s1094_s20, 1  ;;  %s1094_s20 = sphi %s1130_s20, %s16_s20   ;;  %s1090_s19 = sphi %s1128_s19, %s1389_s19   ;;  %s1086_s18 = sphi %s1126_s18, %s1388_s18  }
   0x3   : > { %p30_p1 = scmp.ge.s32.totalorder %s28_s21, 2  ;;  %p225_p2 = scmp.lt.s32.totalorder %s1094_s20, 3 }
   0x5   : > { %s1391_s21 = smov (%p30_p1, %s28_s21), 0  ;;  %p226_p3 = pnand %p934_p0, %p225_p2 }
   0x6   : > { %v1064_v0 = vld [vmem:[%s1384_s2] sm:$0xff] (!%p226_p3)   ;;  %p277_p4 = scmp.lt.s32.totalorder (!%p226_p3), %s1086_s18, 1  ;;  %v1065_v1 = vld [vmem:[%s1384_s2 + $0x8] sm:$0xff] (!%p226_p3)   ;;  %v1066_v2 = vld [vmem:[%s1384_s2 + $0x10] sm:$0xff] (!%p226_p3)  }
   0x7   : > { %229 = sbr.rel (%p226_p3) target bundleno = 331 (0x14b), region = 32  ;;  %976 = vmatprep.subr.bf16.mxu0 (!%p226_p3), %v1064_v0  ;;  %1024 = vmatprep.subr.bf16.mxu1 (!%p226_p3), %v1064_v0  ;;  %v1067_v3 = vld [vmem:[%s1384_s2 + $0x18] sm:$0xff] (!%p226_p3)   ;;  %v1068_v10 = vld [vmem:[%s1384_s2 + $0x20] sm:$0xff] (!%p226_p3)   ;;  %v1069_v13 = vld [vmem:[%s1384_s2 + $0x28] sm:$0xff] (!%p226_p3)  }
   0x8   : > { %977 = vmatpush3.bf16.msra.mxu0 (!%p226_p3), %v1064_v0  ;;  %1032 = vmatpush3.bf16.msra.mxu1 (!%p226_p3), %v1064_v0  ;;  %v1070_v17 = vld [vmem:[%s1384_s2 + $0x30] sm:$0xff] (!%p226_p3)   ;;  %v1071_v18 = vld [vmem:[%s1384_s2 + $0x38] sm:$0xff] (!%p226_p3)  }
   0x9   : > { %978 = vmatprep.subr.bf16.mxu0 (!%p226_p3), %v1065_v1  ;;  %1025 = vmatprep.subr.bf16.mxu1 (!%p226_p3), %v1065_v1 }
   0xc   : > { %979 = vmatpush3.bf16.msra.mxu0 (!%p226_p3), %v1065_v1  ;;  %1033 = vmatpush3.bf16.msra.mxu1 (!%p226_p3), %v1065_v1 }
   0xd   : > { %980 = vmatprep.subr.bf16.mxu0 (!%p226_p3), %v1066_v2  ;;  %1026 = vmatprep.subr.bf16.mxu1 (!%p226_p3), %v1066_v2 }
   0xe   : > { %s1393_s18 = smov (!%p277_p4, %s1086_s18), 1 }
   0xf   : > { %s950_s28 = sshll.u32 %s1393_s18, 8  ;;  %s288_s9 = scalar_lea.vmem %s1383_s1, %s1393_s18 }
  0x10   : > { %s1161_s6 = scalar_lea.vmem %s1382_s0, %s950_s28  ;;  %v1172_v6 = vld [vmem:[%s288_s9] ss:$0 sm:$0xff]  ;;  %981 = vmatpush3.bf16.msra.mxu0 %v1066_v2  ;;  %1034 = vmatpush3.bf16.msra.mxu1 %v1066_v2  ;;  %s1253_s26 = scalar_lea.vmem %s1385_s3, %s950_s28 }
  0x11   : > { %v312_v4 = vld [vmem:[%s1161_s6] sm:$0xff]  ;;  %v313_v5 = vld [vmem:[%s1161_s6 + $0x8] sm:$0xff]  ;;  %982 = vmatprep.subr.bf16.mxu0 %v1067_v3  ;;  %1027 = vmatprep.subr.bf16.mxu1 %v1067_v3  ;;  %v314_v19 = vld [vmem:[%s1161_s6 + $0x10] sm:$0xff]  ;;  %s304_s29 = scalar_lea.vmem %s1386_s4, %s1393_s18  ;;  %s310_s7 = scalar_lea.vmem %s1387_s5, %s1393_s18 }
  0x12   : > { %v351_v7 = vmul.f32 %v1172_v6, %v312_v4  ;;  %v352_v8 = vmul.f32 %v1172_v6, %v313_v5  ;;  %v328_v11 = vld [vmem:[%s1161_s6 + $0x80] sm:$0xff]  ;;  %v329_v12 = vld [vmem:[%s1161_s6 + $0x88] sm:$0xff]  ;;  %v315_v20 = vld [vmem:[%s1161_s6 + $0x18] sm:$0xff]  ;;  %v353_v27 = vmul.f32 %v1172_v6, %v314_v19 }
  0x13   : > { %v367_v14 = vmul.f32 %v1172_v6, %v328_v11  ;;  %v368_v15 = vmul.f32 %v1172_v6, %v329_v12  ;;  %v316_v21 = vld [vmem:[%s1161_s6 + $0x20] sm:$0xff]  ;;  %v330_v22 = vld [vmem:[%s1161_s6 + $0x90] sm:$0xff]  ;;  %v331_v23 = vld [vmem:[%s1161_s6 + $0x98] sm:$0xff]  ;;  %v354_v28 = vmul.f32 %v1172_v6, %v315_v20 }
  0x14   : > { %v383_v9 = vpack.c.bf16 %v352_v8, %v351_v7  ;;  %983 = vmatpush3.bf16.msra.mxu0 %v1067_v3  ;;  %1035 = vmatpush3.bf16.msra.mxu1 %v1067_v3  ;;  %v317_v24 = vld [vmem:[%s1161_s6 + $0x28] sm:$0xff]  ;;  %v332_v25 = vld [vmem:[%s1161_s6 + $0xa0] sm:$0xff]  ;;  %v355_v29 = vmul.f32 %v1172_v6, %v316_v21  ;;  %v369_v30 = vmul.f32 %v1172_v6, %v330_v22  ;;  %v318_v36 = vld [vmem:[%s1161_s6 + $0x30] sm:$0xff] }
  0x15   : > { %984 = vmatprep.subr.bf16.mxu0 %v1068_v10  ;;  %1028 = vmatprep.subr.bf16.mxu1 %v1068_v10  ;;  %v391_v16 = vpack.c.bf16 %v368_v15, %v367_v14  ;;  %v333_v26 = vld [vmem:[%s1161_s6 + $0xa8] sm:$0xff]  ;;  %v370_v31 = vmul.f32 %v1172_v6, %v331_v23  ;;  %v356_v32 = vmul.f32 %v1172_v6, %v317_v24  ;;  %v319_v37 = vld [vmem:[%s1161_s6 + $0x38] sm:$0xff]  ;;  %v320_v40 = vld [vmem:[%s1161_s6 + $0x40] sm:$0xff] }
  0x16   : > { %992 = vmatprep.mubr.bf16.mxu0 %v383_v9  ;;  %v371_v33 = vmul.f32 %v1172_v6, %v332_v25  ;;  %v372_v34 = vmul.f32 %v1172_v6, %v333_v26  ;;  %v384_v35 = vpack.c.bf16 %v354_v28, %v353_v27  ;;  %v334_v42 = vld [vmem:[%s1161_s6 + $0xb0] sm:$0xff]  ;;  %v335_v43 = vld [vmem:[%s1161_s6 + $0xb8] sm:$0xff]  ;;  %v321_v44 = vld [vmem:[%s1161_s6 + $0x48] sm:$0xff]  ;;  %v357_v47 = vmul.f32 %v1172_v6, %v318_v36 }
  0x17   : > { %1008 = vmatprep.mubr.bf16.mxu1 %v391_v16  ;;  %v392_v38 = vpack.c.bf16 %v370_v31, %v369_v30  ;;  %v385_v39 = vpack.c.bf16 %v356_v32, %v355_v29  ;;  %v336_v45 = vld [vmem:[%s1161_s6 + $0xc0] sm:$0xff]  ;;  %v337_v46 = vld [vmem:[%s1161_s6 + $0xc8] sm:$0xff]  ;;  %v358_v48 = vmul.f32 %v1172_v6, %v319_v37  ;;  %v359_v49 = vmul.f32 %v1172_v6, %v320_v40  ;;  %v322_v56 = vld [vmem:[%s1161_s6 + $0x50] sm:$0xff] }
  0x18   : > { %985 = vmatpush3.bf16.msra.mxu0 %v1068_v10  ;;  %1036 = vmatpush3.bf16.msra.mxu1 %v1068_v10  ;;  %v393_v41 = vpack.c.bf16 %v372_v34, %v371_v33  ;;  %v373_v50 = vmul.f32 %v1172_v6, %v334_v42  ;;  %v374_v51 = vmul.f32 %v1172_v6, %v335_v43  ;;  %v323_v57 = vld [vmem:[%s1161_s6 + $0x58] sm:$0xff]  ;;  %v324_v60 = vld [vmem:[%s1161_s6 + $0x60] sm:$0xff]  ;;  %v338_v62 = vld [vmem:[%s1161_s6 + $0xd0] sm:$0xff] }
  0x19   : > { %986 = vmatprep.subr.bf16.mxu0 %v1069_v13  ;;  %1029 = vmatprep.subr.bf16.mxu1 %v1069_v13  ;;  %v360_v52 = vmul.f32 %v1172_v6, %v321_v44  ;;  %v375_v53 = vmul.f32 %v1172_v6, %v336_v45  ;;  %v376_v54 = vmul.f32 %v1172_v6, %v337_v46  ;;  %v339_v63 = vld [vmem:[%s1161_s6 + $0xd8] sm:$0xff]  ;;  %v325_v0 = vld [vmem:[%s1161_s6 + $0x68] sm:$0xff]  ;;  %v340_v1 = vld [vmem:[%s1161_s6 + $0xe0] sm:$0xff] }
  0x1a   : > { %v386_v55 = vpack.c.bf16 %v358_v48, %v357_v47  ;;  %v394_v58 = vpack.c.bf16 %v374_v51, %v373_v50  ;;  %v341_v2 = vld [vmem:[%s1161_s6 + $0xe8] sm:$0xff]  ;;  %v361_v3 = vmul.f32 %v1172_v6, %v322_v56  ;;  %v362_v4 = vmul.f32 %v1172_v6, %v323_v57  ;;  %v327_v16 = vld [vmem:[%s1161_s6 + $0x78] sm:$0xff] }
  0x1b   : > { %v387_v59 = vpack.c.bf16 %v360_v52, %v359_v49  ;;  %v395_v61 = vpack.c.bf16 %v376_v54, %v375_v53  ;;  %v363_v5 = vmul.f32 %v1172_v6, %v324_v60  ;;  %v377_v7 = vmul.f32 %v1172_v6, %v338_v62  ;;  %v343_v19 = vld [vmem:[%s1161_s6 + $0xf8] sm:$0xff] }
  0x1c   : > { %987 = vmatpush3.bf16.msra.mxu0 %v1069_v13  ;;  %1037 = vmatpush3.bf16.msra.mxu1 %v1069_v13  ;;  %v378_v8 = vmul.f32 %v1172_v6, %v339_v63  ;;  %v364_v9 = vmul.f32 %v1172_v6, %v325_v0  ;;  %v379_v10 = vmul.f32 %v1172_v6, %v340_v1  ;;  %v326_v13 = vld [vmem:[%s1161_s6 + $0x70] sm:$0xff] }
  0x1d   : > { %988 = vmatprep.subr.bf16.mxu0 %v1070_v17  ;;  %1030 = vmatprep.subr.bf16.mxu1 %v1070_v17  ;;  %v380_v11 = vmul.f32 %v1172_v6, %v341_v2  ;;  %v388_v12 = vpack.c.bf16 %v362_v4, %v361_v3  ;;  %v365_v20 = vmul.f32 %v1172_v6, %v326_v13 }
  0x1e   : > { %v396_v14 = vpack.c.bf16 %v378_v8, %v377_v7  ;;  %v389_v15 = vpack.c.bf16 %v364_v9, %v363_v5  ;;  %v366_v21 = vmul.f32 %v1172_v6, %v327_v16  ;;  %v382_v23 = vmul.f32 %v1172_v6, %v343_v19 }
  0x20   : > { %989 = vmatpush3.bf16.msra.mxu0 %v1070_v17  ;;  %1038 = vmatpush3.bf16.msra.mxu1 %v1070_v17  ;;  %v397_v17 = vpack.c.bf16 %v380_v11, %v379_v10  ;;  %v390_v24 = vpack.c.bf16 %v366_v21, %v365_v20 }
  0x21   : > { %990 = vmatprep.subr.bf16.mxu0 %v1071_v18  ;;  %1031 = vmatprep.subr.bf16.mxu1 %v1071_v18 }
  0x24   : > { %991 = vmatpush3.bf16.msra.mxu0 %v1071_v18  ;;  %1039 = vmatpush3.bf16.msra.mxu1 %v1071_v18  ;;  %v342_v18 = vld [vmem:[%s1161_s6 + $0xf0] sm:$0xff] }
  0x25   : > { %v381_v22 = vmul.f32 %v1172_v6, %v342_v18 }
  0x27   : > { %993 = vmatmul.mubr.bf16.vlgmr.msra.gmra.mrb[0].mxu0 %v384_v35  ;;  %1009 = vmatmul.mubr.bf16.vlgmr.msra.gmra.mrb[0].mxu1 %v392_v38  ;;  %v398_v25 = vpack.c.bf16 %v382_v23, %v381_v22 }
  0x28   : > { %996 = vmatprep.mubr.bf16.mxu0 %v385_v39  ;;  %1012 = vmatprep.mubr.bf16.mxu1 %v393_v41 }
  0x2f   : > { %997 = vmatmul.mubr.bf16.gmra.mrb[4].mxu0 %v386_v55  ;;  %1013 = vmatmul.mubr.bf16.gmra.mrb[4].mxu1 %v394_v58 }
  0x30   : > { %1000 = vmatprep.mubr.bf16.mxu0 %v387_v59  ;;  %1016 = vmatprep.mubr.bf16.mxu1 %v395_v61 }
  0x37   : > { %1001 = vmatmul.mubr.bf16.gmra.mrb[8].mxu0 %v388_v12  ;;  %1017 = vmatmul.mubr.bf16.gmra.mrb[8].mxu1 %v396_v14 }
  0x38   : > { %1004 = vmatprep.mubr.bf16.mxu0 %v389_v15  ;;  %1020 = vmatprep.mubr.bf16.mxu1 %v397_v17 }
  0x3f   : > { %1005 = vmatmul.mubr.bf16.gmra.mrb[12].mxu0 %v390_v24  ;;  %1021 = vmatmul.mubr.bf16.gmra.mrb[12].mxu1 %v398_v25 }
  0xfa   : > { %v994_v6 = vpop.f32.mrb[0].mxu0  ;;  %v1255_v26 = vpop.f32.mrb[0].mxu1 }
  0xfb   : > { %626 = vst [vmem:[%s1253_s26 + $0x10] sm:$0xff] %v994_v6  ;;  %v497_v27 = vpop.f32.mrb[1].mxu0  ;;  %642 = vst [vmem:[%s1253_s26 + $0x90] sm:$0xff] %v1255_v26  ;;  %v1260_v28 = vpop.f32.mrb[1].mxu1  ;;  %v696_v36 = vmul.f32 %v994_v6, %v994_v6 }
  0xfc   : > { %624 = vst [vmem:[%s1253_s26] sm:$0xff] %v497_v27  ;;  %v995_v29 = vpop.f32.mrb[2].mxu0  ;;  %640 = vst [vmem:[%s1253_s26 + $0x80] sm:$0xff] %v1260_v28  ;;  %v1265_v30 = vpop.f32.mrb[2].mxu1  ;;  %v694_v33 = vmul.f32 %v497_v27, %v497_v27 }
  0xfd   : > { %627 = vst [vmem:[%s1253_s26 + $0x18] sm:$0xff] %v995_v29  ;;  %v500_v31 = vpop.f32.mrb[3].mxu0  ;;  %643 = vst [vmem:[%s1253_s26 + $0x98] sm:$0xff] %v1265_v30  ;;  %v1270_v32 = vpop.f32.mrb[3].mxu1  ;;  %v697_v39 = vmul.f32 %v995_v29, %v995_v29 }
  0xfe   : > { %625 = vst [vmem:[%s1253_s26 + $0x8] sm:$0xff] %v500_v31  ;;  %v656_v34 = vadd.f32 %v500_v31, %v497_v27  ;;  %v695_v35 = vmul.f32 %v500_v31, %v500_v31  ;;  %641 = vst [vmem:[%s1253_s26 + $0x88] sm:$0xff] %v1270_v32 }
 0x100   : > { %v657_v37 = vadd.f32 %v994_v6, %v656_v34  ;;  %v726_v38 = vadd.f32 %v695_v35, %v694_v33 }
 0x102   : > { %v727_v40 = vadd.f32 %v726_v38, %v696_v36  ;;  %v998_v41 = vpop.f32.mrb[4].mxu0  ;;  %v658_v42 = vadd.f32 %v995_v29, %v657_v37  ;;  %v1275_v43 = vpop.f32.mrb[4].mxu1 }
 0x103   : > { %630 = vst [vmem:[%s1253_s26 + $0x30] sm:$0xff] %v998_v41  ;;  %v513_v44 = vpop.f32.mrb[5].mxu0  ;;  %646 = vst [vmem:[%s1253_s26 + $0xb0] sm:$0xff] %v1275_v43  ;;  %v1280_v45 = vpop.f32.mrb[5].mxu1  ;;  %v700_v56 = vmul.f32 %v998_v41, %v998_v41 }
 0x104   : > { %628 = vst [vmem:[%s1253_s26 + $0x20] sm:$0xff] %v513_v44  ;;  %v659_v46 = vadd.f32 %v658_v42, %v513_v44  ;;  %v698_v47 = vmul.f32 %v513_v44, %v513_v44  ;;  %v728_v48 = vadd.f32 %v727_v40, %v697_v39  ;;  %v999_v49 = vpop.f32.mrb[6].mxu0  ;;  %644 = vst [vmem:[%s1253_s26 + $0xa0] sm:$0xff] %v1280_v45  ;;  %v1285_v50 = vpop.f32.mrb[6].mxu1 }
 0x105   : > { %631 = vst [vmem:[%s1253_s26 + $0x38] sm:$0xff] %v999_v49  ;;  %v516_v51 = vpop.f32.mrb[7].mxu0  ;;  %647 = vst [vmem:[%s1253_s26 + $0xb8] sm:$0xff] %v1285_v50  ;;  %v1290_v52 = vpop.f32.mrb[7].mxu1  ;;  %v701_v59 = vmul.f32 %v999_v49, %v999_v49  ;;  %v710_v42 = vmul.f32 %v1260_v28, %v1260_v28 }
 0x106   : > { %v729_v53 = vadd.f32 %v728_v48, %v698_v47  ;;  %629 = vst [vmem:[%s1253_s26 + $0x28] sm:$0xff] %v516_v51  ;;  %v660_v54 = vadd.f32 %v659_v46, %v516_v51  ;;  %v699_v55 = vmul.f32 %v516_v51, %v516_v51  ;;  %645 = vst [vmem:[%s1253_s26 + $0xa8] sm:$0xff] %v1290_v52 }
 0x107   : > { %v712_v51 = vmul.f32 %v1255_v26, %v1255_v26 }
 0x108   : > { %v661_v57 = vadd.f32 %v998_v41, %v660_v54  ;;  %v730_v58 = vadd.f32 %v729_v53, %v699_v55  ;;  %v713_v55 = vmul.f32 %v1265_v30, %v1265_v30 }
 0x10a   : > { %v731_v60 = vadd.f32 %v730_v58, %v700_v56  ;;  %v1002_v61 = vpop.f32.mrb[8].mxu0  ;;  %v662_v62 = vadd.f32 %v999_v49, %v661_v57  ;;  %v1295_v63 = vpop.f32.mrb[8].mxu1  ;;  %v711_v49 = vmul.f32 %v1270_v32, %v1270_v32 }
 0x10b   : > { %634 = vst [vmem:[%s1253_s26 + $0x50] sm:$0xff] %v1002_v61  ;;  %v529_v0 = vpop.f32.mrb[9].mxu0  ;;  %650 = vst [vmem:[%s1253_s26 + $0xd0] sm:$0xff] %v1295_v63  ;;  %v1300_v1 = vpop.f32.mrb[9].mxu1  ;;  %v704_v13 = vmul.f32 %v1002_v61, %v1002_v61 }
 0x10c   : > { %632 = vst [vmem:[%s1253_s26 + $0x40] sm:$0xff] %v529_v0  ;;  %v663_v2 = vadd.f32 %v662_v62, %v529_v0  ;;  %v702_v3 = vmul.f32 %v529_v0, %v529_v0  ;;  %v732_v4 = vadd.f32 %v731_v60, %v701_v59  ;;  %v1003_v5 = vpop.f32.mrb[10].mxu0  ;;  %648 = vst [vmem:[%s1253_s26 + $0xc0] sm:$0xff] %v1300_v1  ;;  %v1305_v7 = vpop.f32.mrb[10].mxu1 }
 0x10d   : > { %635 = vst [vmem:[%s1253_s26 + $0x58] sm:$0xff] %v1003_v5  ;;  %v532_v8 = vpop.f32.mrb[11].mxu0  ;;  %651 = vst [vmem:[%s1253_s26 + $0xd8] sm:$0xff] %v1305_v7  ;;  %v1310_v9 = vpop.f32.mrb[11].mxu1  ;;  %v705_v16 = vmul.f32 %v1003_v5, %v1003_v5 }
 0x10e   : > { %v733_v10 = vadd.f32 %v732_v4, %v702_v3  ;;  %633 = vst [vmem:[%s1253_s26 + $0x48] sm:$0xff] %v532_v8  ;;  %v664_v11 = vadd.f32 %v663_v2, %v532_v8  ;;  %v703_v12 = vmul.f32 %v532_v8, %v532_v8  ;;  %649 = vst [vmem:[%s1253_s26 + $0xc8] sm:$0xff] %v1310_v9 }
 0x110   : > { %v665_v14 = vadd.f32 %v1002_v61, %v664_v11  ;;  %v734_v15 = vadd.f32 %v733_v10, %v703_v12  ;;  %v715_v61 = vmul.f32 %v1290_v52, %v1290_v52  ;;  %v719_v10 = vmul.f32 %v1310_v9, %v1310_v9 }
 0x112   : > { %v735_v17 = vadd.f32 %v734_v15, %v704_v13  ;;  %v1006_v18 = vpop.f32.mrb[12].mxu0  ;;  %v666_v19 = vadd.f32 %v1003_v5, %v665_v14  ;;  %v1315_v20 = vpop.f32.mrb[12].mxu1 }
 0x113   : > { %638 = vst [vmem:[%s1253_s26 + $0x70] sm:$0xff] %v1006_v18  ;;  %v545_v21 = vpop.f32.mrb[13].mxu0  ;;  %654 = vst [vmem:[%s1253_s26 + $0xf0] sm:$0xff] %v1315_v20  ;;  %v609_v22 = vpop.f32.mrb[13].mxu1  ;;  %v708_v36 = vmul.f32 %v1006_v18, %v1006_v18 }
 0x114   : > { %636 = vst [vmem:[%s1253_s26 + $0x60] sm:$0xff] %v545_v21  ;;  %v667_v23 = vadd.f32 %v666_v19, %v545_v21  ;;  %v706_v24 = vmul.f32 %v545_v21, %v545_v21  ;;  %v736_v25 = vadd.f32 %v735_v17, %v705_v16  ;;  %v1007_v6 = vpop.f32.mrb[14].mxu0  ;;  %652 = vst [vmem:[%s1253_s26 + $0xe0] sm:$0xff] %v609_v22  ;;  %v1023_v27 = vpop.f32.mrb[14].mxu1 }
 0x115   : > { %639 = vst [vmem:[%s1253_s26 + $0x78] sm:$0xff] %v1007_v6  ;;  %v548_v29 = vpop.f32.mrb[15].mxu0  ;;  %655 = vst [vmem:[%s1253_s26 + $0xf8] sm:$0xff] %v1023_v27  ;;  %v612_v31 = vpop.f32.mrb[15].mxu1  ;;  %v709_v39 = vmul.f32 %v1007_v6, %v1007_v6 }
 0x116   : > { %v737_v33 = vadd.f32 %v736_v25, %v706_v24  ;;  %637 = vst [vmem:[%s1253_s26 + $0x68] sm:$0xff] %v548_v29  ;;  %v668_v34 = vadd.f32 %v667_v23, %v548_v29  ;;  %v707_v35 = vmul.f32 %v548_v29, %v548_v29  ;;  %653 = vst [vmem:[%s1253_s26 + $0xe8] sm:$0xff] %v612_v31 }
 0x117   : > { %v723_v19 = vmul.f32 %v612_v31, %v612_v31  ;;  %v725_v23 = vmul.f32 %v1023_v27, %v1023_v27 }
 0x118   : > { %v669_v37 = vadd.f32 %v1006_v18, %v668_v34  ;;  %v738_v38 = vadd.f32 %v737_v33, %v707_v35 }
 0x11a   : > { %v739_v40 = vadd.f32 %v738_v38, %v708_v36  ;;  %v670_v41 = vadd.f32 %v1007_v6, %v669_v37 }
 0x11c   : > { %v671_v44 = vadd.f32 %v670_v41, %v1260_v28  ;;  %v740_v46 = vadd.f32 %v739_v40, %v709_v39  ;;  %v714_v28 = vmul.f32 %v1280_v45, %v1280_v45 }
 0x11e   : > { %v741_v47 = vadd.f32 %v740_v46, %v710_v42  ;;  %v672_v48 = vadd.f32 %v671_v44, %v1270_v32 }
 0x120   : > { %v673_v53 = vadd.f32 %v1255_v26, %v672_v48  ;;  %v742_v54 = vadd.f32 %v741_v47, %v711_v49  ;;  %v716_v26 = vmul.f32 %v1275_v43, %v1275_v43 }
 0x122   : > { %v743_v56 = vadd.f32 %v742_v54, %v712_v51  ;;  %v674_v57 = vadd.f32 %v1265_v30, %v673_v53  ;;  %v717_v30 = vmul.f32 %v1285_v50, %v1285_v50 }
 0x124   : > { %v675_v58 = vadd.f32 %v674_v57, %v1280_v45  ;;  %v744_v59 = vadd.f32 %v743_v56, %v713_v55  ;;  %v718_v45 = vmul.f32 %v1300_v1, %v1300_v1 }
 0x126   : > { %v745_v60 = vadd.f32 %v744_v59, %v714_v28  ;;  %v676_v32 = vadd.f32 %v675_v58, %v1290_v52 }
 0x128   : > { %v677_v62 = vadd.f32 %v1275_v43, %v676_v32  ;;  %v746_v0 = vadd.f32 %v745_v60, %v715_v61  ;;  %v720_v43 = vmul.f32 %v1295_v63, %v1295_v63 }
 0x12a   : > { %v747_v2 = vadd.f32 %v746_v0, %v716_v26  ;;  %v678_v3 = vadd.f32 %v1285_v50, %v677_v62  ;;  %v721_v50 = vmul.f32 %v1305_v7, %v1305_v7 }
 0x12c   : > { %v679_v4 = vadd.f32 %v678_v3, %v1300_v1  ;;  %v748_v5 = vadd.f32 %v747_v2, %v717_v30  ;;  %v722_v1 = vmul.f32 %v609_v22, %v609_v22 }
 0x12e   : > { %v749_v8 = vadd.f32 %v748_v5, %v718_v45  ;;  %v680_v52 = vadd.f32 %v679_v4, %v1310_v9  ;;  %v724_v9 = vmul.f32 %v1315_v20, %v1315_v20 }
 0x130   : > { %v681_v11 = vadd.f32 %v1295_v63, %v680_v52  ;;  %v750_v12 = vadd.f32 %v749_v8, %v719_v10 }
 0x132   : > { %v751_v13 = vadd.f32 %v750_v12, %v720_v43  ;;  %v682_v14 = vadd.f32 %v1305_v7, %v681_v11 }
 0x134   : > { %v683_v15 = vadd.f32 %v682_v14, %v609_v22  ;;  %v752_v16 = vadd.f32 %v751_v13, %v721_v50 }
 0x136   : > { %v753_v17 = vadd.f32 %v752_v16, %v722_v1  ;;  %v684_v18 = vadd.f32 %v683_v15, %v612_v31 }
 0x138   : > { %v685_v21 = vadd.f32 %v1315_v20, %v684_v18  ;;  %v754_v63 = vadd.f32 %v753_v17, %v723_v19 }
 0x13a   : > { %v686_v24 = vadd.f32 %v1023_v27, %v685_v21  ;;  %v755_v25 = vadd.f32 %v754_v63, %v724_v9 }
 0x13c   : > { %v687_v6 = vrot.slane %v686_v24, 4  ;;  %v756_v29 = vadd.f32 %v755_v25, %v725_v23 }
 0x13e   : > { %v688_v7 = vadd.f32 %v687_v6, %v686_v24  ;;  %v757_v33 = vrot.slane %v756_v29, 4 }
 0x140   : > { %v689_v22 = vrot.slane %v688_v7, 2  ;;  %v758_v34 = vadd.f32 %v757_v33, %v756_v29 }
 0x142   : > { %v690_v35 = vadd.f32 %v689_v22, %v688_v7  ;;  %v759_v36 = vrot.slane %v758_v34, 2 }
 0x144   : > { %v691_v31 = vrot.slane %v690_v35, 1  ;;  %v760_v37 = vadd.f32 %v759_v36, %v758_v34 }
 0x146   : > { %v692_v20 = vadd.f32 %v691_v31, %v690_v35  ;;  %v761_v38 = vrot.slane %v760_v37, 1 }
 0x148   : > { %693 = vst [vmem:[%s304_s29] sm:$0x1] %v692_v20  ;;  %v762_v27 = vadd.f32 %v761_v38, %v760_v37 }
 0x14a   : > { %763 = vst [vmem:[%s310_s7] sm:$0x1] %v762_v27 }
 0x14b PF: > { %s16_s20 = sadd.s32 1, %s1094_s20   ;;  %s1388_s18 = smov %s1090_s19 }
 0x14c   : > { %p13_p5 = scmp.ge.s32.totalorder %s16_s20, 4   ;;  %s1389_s19 = smov %s1391_s21 }
 0x14e   :  { %15 = sbr.rel (!%p13_p5) target bundleno = 2 (0x2), region = 89 }

// kernel: inverted_residual_forward.11
= control target key start
LH: loop header
LB: loop body
LE: loop exit
PB: predicated region body
PF: predicated region fallthrough
CT: control target
= control target key end

     0   :  { %s721_s15 = smov 0   ;;  %s723_s16 = smov 0   ;;  %s933_s0 = inlined_call_operand.vmem [shape: f32[2,256,128], index: 0, kind: input, shape index: {}]   ;;  %s934_s1 = inlined_call_operand.vmem [shape: f32[2,1,128], index: 1, kind: input, shape index: {}]   ;;  %s935_s2 = inlined_call_operand.vmem [shape: f32[2,1,128], index: 2, kind: input, shape index: {}]   ;;  %s936_s3 = inlined_call_operand.vmem [shape: f32[2,256,128], index: 3, kind: input, shape index: {}]   ;;  %s937_s4 = inlined_call_operand.vmem [shape: f32[2,256,128], index: 4, kind: output, shape index: {}]  }
   0x1   :  { %s725_s17 = smov 0  }
   0x2 LB: > { %s26_s18 = sadd.s32 1, %s690_s16  ;;  %p634_p0 = scmp.ge.s32.totalorder %s694_s17, 1  ;;  %s694_s17 = sphi %s725_s17, %s14_s17   ;;  %s690_s16 = sphi %s723_s16, %s939_s16   ;;  %s686_s15 = sphi %s721_s15, %s938_s15  }
   0x3   : > { %p28_p1 = scmp.ge.s32.totalorder %s26_s18, 2  ;;  %p216_p2 = scmp.lt.s32.totalorder %s694_s17, 3 }
   0x5   : > { %s941_s18 = smov (%p28_p1, %s26_s18), 0  ;;  %p217_p3 = pnand %p634_p0, %p216_p2 }
   0x6   : > { %p266_p4 = scmp.lt.s32.totalorder (!%p217_p3), %s686_s15, 1 }
   0x7   : > { %220 = sbr.rel (%p217_p3) target bundleno = 49 (0x31), region = 36 }
   0xe   : > { %s943_s15 = smov (!%p266_p4, %s686_s15), 1 }
   0xf   : > { %s645_s19 = sshll.u32 %s943_s15, 8  ;;  %s277_s22 = scalar_lea.vmem %s934_s1, %s943_s15 }
  0x10   : > { %s745_s25 = scalar_lea.vmem %s933_s0, %s645_s19  ;;  %s280_s28 = scalar_lea.vmem %s935_s2, %s943_s15  ;;  %v750_v0 = vld [vmem:[%s277_s22] ss:$0 sm:$0xff] }
  0x11   : > { %s755_s5 = scalar_lea.vmem %s936_s3, %s645_s19  ;;  %v301_v1 = vld [vmem:[%s745_s25] sm:$0xff]  ;;  %v302_v3 = vld [vmem:[%s745_s25 + $0x8] sm:$0xff]  ;;  %v303_v6 = vld [vmem:[%s745_s25 + $0x10] sm:$0xff]  ;;  %s777_s8 = scalar_lea.vmem %s937_s4, %s645_s19 }
  0x12   : > { %v758_v2 = vld [vmem:[%s280_s28] ss:$0 sm:$0xff]  ;;  %v340_v4 = vmul.f32 %v750_v0, %v301_v1  ;;  %v341_v5 = vmul.f32 %v750_v0, %v302_v3  ;;  %v412_v8 = vld [vmem:[%s755_s5 + $0x8] sm:$0xff]  ;;  %v342_v9 = vmul.f32 %v750_v0, %v303_v6  ;;  %v304_v10 = vld [vmem:[%s745_s25 + $0x18] sm:$0xff] }
  0x13   : > { %v411_v7 = vld [vmem:[%s755_s5] sm:$0xff]  ;;  %v413_v13 = vld [vmem:[%s755_s5 + $0x10] sm:$0xff]  ;;  %v343_v14 = vmul.f32 %v750_v0, %v304_v10  ;;  %v306_v16 = vld [vmem:[%s745_s25 + $0x28] sm:$0xff] }
  0x14   : > { %v379_v11 = vadd.f32 %v758_v2, %v340_v4  ;;  %v380_v12 = vadd.f32 %v758_v2, %v341_v5  ;;  %v305_v15 = vld [vmem:[%s745_s25 + $0x20] sm:$0xff]  ;;  %v381_v17 = vadd.f32 %v758_v2, %v342_v9  ;;  %v414_v18 = vld [vmem:[%s755_s5 + $0x18] sm:$0xff]  ;;  %v345_v21 = vmul.f32 %v750_v0, %v306_v16  ;;  %v307_v22 = vld [vmem:[%s745_s25 + $0x30] sm:$0xff] }
  0x15   : > { %v344_v19 = vmul.f32 %v750_v0, %v305_v15  ;;  %v415_v20 = vld [vmem:[%s755_s5 + $0x20] sm:$0xff]  ;;  %v382_v25 = vadd.f32 %v758_v2, %v343_v14  ;;  %v416_v26 = vld [vmem:[%s755_s5 + $0x28] sm:$0xff]  ;;  %v346_v27 = vmul.f32 %v750_v0, %v307_v22  ;;  %v308_v28 = vld [vmem:[%s745_s25 + $0x38] sm:$0xff] }
  0x16   : > { %v443_v23 = vadd.f32 %v411_v7, %v379_v11  ;;  %v444_v24 = vadd.f32 %v412_v8, %v380_v12  ;;  %v309_v29 = vld [vmem:[%s745_s25 + $0x40] sm:$0xff]  ;;  %v445_v30 = vadd.f32 %v413_v13, %v381_v17  ;;  %v384_v32 = vadd.f32 %v758_v2, %v345_v21  ;;  %v417_v33 = vld [vmem:[%s755_s5 + $0x30] sm:$0xff]  ;;  %v310_v35 = vld [vmem:[%s745_s25 + $0x48] sm:$0xff] }
  0x17   : > { %v383_v31 = vadd.f32 %v758_v2, %v344_v19  ;;  %v347_v34 = vmul.f32 %v750_v0, %v308_v28  ;;  %v446_v36 = vadd.f32 %v414_v18, %v382_v25  ;;  %v385_v37 = vadd.f32 %v758_v2, %v346_v27  ;;  %v418_v38 = vld [vmem:[%s755_s5 + $0x38] sm:$0xff]  ;;  %v311_v41 = vld [vmem:[%s745_s25 + $0x50] sm:$0xff]  ;;  %v419_v46 = vld [vmem:[%s755_s5 + $0x40] sm:$0xff] }
  0x18   : > { %475 = vst [vmem:[%s777_s8] sm:$0xff] %v443_v23  ;;  %476 = vst [vmem:[%s777_s8 + $0x8] sm:$0xff] %v444_v24  ;;  %v348_v39 = vmul.f32 %v750_v0, %v309_v29  ;;  %v349_v40 = vmul.f32 %v750_v0, %v310_v35  ;;  %v312_v42 = vld [vmem:[%s745_s25 + $0x58] sm:$0xff]  ;;  %v448_v44 = vadd.f32 %v416_v26, %v384_v32  ;;  %v420_v47 = vld [vmem:[%s755_s5 + $0x48] sm:$0xff] }
  0x19   : > { %477 = vst [vmem:[%s777_s8 + $0x10] sm:$0xff] %v445_v30  ;;  %v447_v43 = vadd.f32 %v415_v20, %v383_v31  ;;  %v386_v45 = vadd.f32 %v758_v2, %v347_v34  ;;  %v350_v48 = vmul.f32 %v750_v0, %v311_v41  ;;  %v313_v49 = vld [vmem:[%s745_s25 + $0x60] sm:$0xff]  ;;  %478 = vst [vmem:[%s777_s8 + $0x18] sm:$0xff] %v446_v36  ;;  %v421_v53 = vld [vmem:[%s755_s5 + $0x50] sm:$0xff] }
  0x1a   : > { %v449_v50 = vadd.f32 %v417_v33, %v385_v37  ;;  %v387_v51 = vadd.f32 %v758_v2, %v348_v39  ;;  %v388_v52 = vadd.f32 %v758_v2, %v349_v40  ;;  %v351_v54 = vmul.f32 %v750_v0, %v312_v42  ;;  %v314_v55 = vld [vmem:[%s745_s25 + $0x68] sm:$0xff]  ;;  %v315_v56 = vld [vmem:[%s745_s25 + $0x70] sm:$0xff]  ;;  %480 = vst [vmem:[%s777_s8 + $0x28] sm:$0xff] %v448_v44  ;;  %v422_v59 = vld [vmem:[%s755_s5 + $0x58] sm:$0xff] }
  0x1b   : > { %479 = vst [vmem:[%s777_s8 + $0x20] sm:$0xff] %v447_v43  ;;  %v450_v57 = vadd.f32 %v418_v38, %v386_v45  ;;  %v389_v58 = vadd.f32 %v758_v2, %v350_v48  ;;  %v352_v60 = vmul.f32 %v750_v0, %v313_v49  ;;  %v423_v61 = vld [vmem:[%s755_s5 + $0x60] sm:$0xff]  ;;  %v353_v62 = vmul.f32 %v750_v0, %v314_v55  ;;  %v316_v63 = vld [vmem:[%s745_s25 + $0x78] sm:$0xff]  ;;  %v424_v5 = vld [vmem:[%s755_s5 + $0x68] sm:$0xff] }
  0x1c   : > { %481 = vst [vmem:[%s777_s8 + $0x30] sm:$0xff] %v449_v50  ;;  %v451_v1 = vadd.f32 %v419_v46, %v387_v51  ;;  %v452_v3 = vadd.f32 %v420_v47, %v388_v52  ;;  %v390_v4 = vadd.f32 %v758_v2, %v351_v54  ;;  %v354_v6 = vmul.f32 %v750_v0, %v315_v56  ;;  %v317_v7 = vld [vmem:[%s745_s25 + $0x80] sm:$0xff]  ;;  %v318_v8 = vld [vmem:[%s745_s25 + $0x88] sm:$0xff]  ;;  %v425_v12 = vld [vmem:[%s755_s5 + $0x70] sm:$0xff] }
  0x1d   : > { %482 = vst [vmem:[%s777_s8 + $0x38] sm:$0xff] %v450_v57  ;;  %v453_v9 = vadd.f32 %v421_v53, %v389_v58  ;;  %v391_v10 = vadd.f32 %v758_v2, %v352_v60  ;;  %v392_v11 = vadd.f32 %v758_v2, %v353_v62  ;;  %v355_v13 = vmul.f32 %v750_v0, %v316_v63  ;;  %v319_v14 = vld [vmem:[%s745_s25 + $0x90] sm:$0xff]  ;;  %v426_v17 = vld [vmem:[%s755_s5 + $0x78] sm:$0xff]  ;;  %v321_v21 = vld [vmem:[%s745_s25 + $0xa0] sm:$0xff] }
  0x1e   : > { %483 = vst [vmem:[%s777_s8 + $0x40] sm:$0xff] %v451_v1  ;;  %484 = vst [vmem:[%s777_s8 + $0x48] sm:$0xff] %v452_v3  ;;  %v454_v15 = vadd.f32 %v422_v59, %v390_v4  ;;  %v393_v16 = vadd.f32 %v758_v2, %v354_v6  ;;  %v356_v18 = vmul.f32 %v750_v0, %v317_v7  ;;  %v320_v20 = vld [vmem:[%s745_s25 + $0x98] sm:$0xff]  ;;  %v427_v25 = vld [vmem:[%s755_s5 + $0x80] sm:$0xff] }
  0x1f   : > { %v357_v19 = vmul.f32 %v750_v0, %v318_v8  ;;  %485 = vst [vmem:[%s777_s8 + $0x50] sm:$0xff] %v453_v9  ;;  %v455_v22 = vadd.f32 %v423_v61, %v391_v10  ;;  %v456_v23 = vadd.f32 %v424_v5, %v392_v11  ;;  %v394_v24 = vadd.f32 %v758_v2, %v355_v13  ;;  %v428_v26 = vld [vmem:[%s755_s5 + $0x88] sm:$0xff]  ;;  %v429_v32 = vld [vmem:[%s755_s5 + $0x90] sm:$0xff]  ;;  %v324_v35 = vld [vmem:[%s745_s25 + $0xb8] sm:$0xff] }
  0x20   : > { %v358_v27 = vmul.f32 %v750_v0, %v319_v14  ;;  %v322_v28 = vld [vmem:[%s745_s25 + $0xa8] sm:$0xff]  ;;  %486 = vst [vmem:[%s777_s8 + $0x58] sm:$0xff] %v454_v15  ;;  %v457_v29 = vadd.f32 %v425_v12, %v393_v16  ;;  %v395_v30 = vadd.f32 %v758_v2, %v356_v18  ;;  %v359_v33 = vmul.f32 %v750_v0, %v320_v20  ;;  %v323_v34 = vld [vmem:[%s745_s25 + $0xb0] sm:$0xff]  ;;  %v430_v38 = vld [vmem:[%s755_s5 + $0x98] sm:$0xff] }
  0x21   : > { %v396_v31 = vadd.f32 %v758_v2, %v357_v19  ;;  %487 = vst [vmem:[%s777_s8 + $0x60] sm:$0xff] %v455_v22  ;;  %488 = vst [vmem:[%s777_s8 + $0x68] sm:$0xff] %v456_v23  ;;  %v458_v36 = vadd.f32 %v426_v17, %v394_v24  ;;  %v360_v39 = vmul.f32 %v750_v0, %v321_v21  ;;  %v431_v40 = vld [vmem:[%s755_s5 + $0xa0] sm:$0xff]  ;;  %v432_v46 = vld [vmem:[%s755_s5 + $0xa8] sm:$0xff] }
  0x22   : > { %v397_v37 = vadd.f32 %v758_v2, %v358_v27  ;;  %v361_v41 = vmul.f32 %v750_v0, %v322_v28  ;;  %v325_v42 = vld [vmem:[%s745_s25 + $0xc0] sm:$0xff]  ;;  %489 = vst [vmem:[%s777_s8 + $0x70] sm:$0xff] %v457_v29  ;;  %v459_v43 = vadd.f32 %v427_v25, %v395_v30  ;;  %v398_v45 = vadd.f32 %v758_v2, %v359_v33  ;;  %v326_v48 = vld [vmem:[%s745_s25 + $0xc8] sm:$0xff]  ;;  %v327_v49 = vld [vmem:[%s745_s25 + $0xd0] sm:$0xff] }
  0x23   : > { %v460_v44 = vadd.f32 %v428_v26, %v396_v31  ;;  %v362_v47 = vmul.f32 %v750_v0, %v323_v34  ;;  %490 = vst [vmem:[%s777_s8 + $0x78] sm:$0xff] %v458_v36  ;;  %v399_v51 = vadd.f32 %v758_v2, %v360_v39  ;;  %v433_v53 = vld [vmem:[%s755_s5 + $0xb0] sm:$0xff]  ;;  %v363_v54 = vmul.f32 %v750_v0, %v324_v35  ;;  %v328_v55 = vld [vmem:[%s745_s25 + $0xd8] sm:$0xff]  ;;  %v329_v61 = vld [vmem:[%s745_s25 + $0xe0] sm:$0xff] }
  0x24   : > { %v461_v50 = vadd.f32 %v429_v32, %v397_v37  ;;  %v400_v52 = vadd.f32 %v758_v2, %v361_v41  ;;  %491 = vst [vmem:[%s777_s8 + $0x80] sm:$0xff] %v459_v43  ;;  %v462_v56 = vadd.f32 %v430_v38, %v398_v45  ;;  %v434_v58 = vld [vmem:[%s755_s5 + $0xb8] sm:$0xff]  ;;  %v364_v59 = vmul.f32 %v750_v0, %v325_v42  ;;  %v330_v62 = vld [vmem:[%s745_s25 + $0xe8] sm:$0xff]  ;;  %v435_v4 = vld [vmem:[%s755_s5 + $0xc0] sm:$0xff] }
  0x25   : > { %492 = vst [vmem:[%s777_s8 + $0x88] sm:$0xff] %v460_v44  ;;  %v401_v57 = vadd.f32 %v758_v2, %v362_v47  ;;  %v365_v60 = vmul.f32 %v750_v0, %v326_v48  ;;  %v463_v63 = vadd.f32 %v431_v40, %v399_v51  ;;  %v402_v3 = vadd.f32 %v758_v2, %v363_v54  ;;  %v436_v5 = vld [vmem:[%s755_s5 + $0xc8] sm:$0xff]  ;;  %v331_v7 = vld [vmem:[%s745_s25 + $0xf0] sm:$0xff]  ;;  %v332_v13 = vld [vmem:[%s745_s25 + $0xf8] sm:$0xff] }
  0x26   : > { %493 = vst [vmem:[%s777_s8 + $0x90] sm:$0xff] %v461_v50  ;;  %v464_v1 = vadd.f32 %v432_v46, %v400_v52  ;;  %v366_v6 = vmul.f32 %v750_v0, %v327_v49  ;;  %494 = vst [vmem:[%s777_s8 + $0x98] sm:$0xff] %v462_v56  ;;  %v403_v9 = vadd.f32 %v758_v2, %v364_v59  ;;  %v437_v11 = vld [vmem:[%s755_s5 + $0xd0] sm:$0xff]  ;;  %v438_v16 = vld [vmem:[%s755_s5 + $0xd8] sm:$0xff] }
  0x27   : > { %v465_v8 = vadd.f32 %v433_v53, %v401_v57  ;;  %v404_v10 = vadd.f32 %v758_v2, %v365_v60  ;;  %v367_v12 = vmul.f32 %v750_v0, %v328_v55  ;;  %495 = vst [vmem:[%s777_s8 + $0xa0] sm:$0xff] %v463_v63  ;;  %v466_v14 = vadd.f32 %v434_v58, %v402_v3  ;;  %v439_v22 = vld [vmem:[%s755_s5 + $0xe0] sm:$0xff]  ;;  %v440_v23 = vld [vmem:[%s755_s5 + $0xe8] sm:$0xff]  ;;  %v441_v28 = vld [vmem:[%s755_s5 + $0xf0] sm:$0xff] }
  0x28   : > { %496 = vst [vmem:[%s777_s8 + $0xa8] sm:$0xff] %v464_v1  ;;  %v405_v15 = vadd.f32 %v758_v2, %v366_v6  ;;  %v368_v17 = vmul.f32 %v750_v0, %v329_v61  ;;  %v369_v18 = vmul.f32 %v750_v0, %v330_v62  ;;  %v467_v19 = vadd.f32 %v435_v4, %v403_v9  ;;  %v442_v32 = vld [vmem:[%s755_s5 + $0xf8] sm:$0xff] }
  0x29   : > { %497 = vst [vmem:[%s777_s8 + $0xb0] sm:$0xff] %v465_v8  ;;  %v468_v20 = vadd.f32 %v436_v5, %v404_v10  ;;  %v406_v21 = vadd.f32 %v758_v2, %v367_v12  ;;  %v370_v24 = vmul.f32 %v750_v0, %v331_v7  ;;  %498 = vst [vmem:[%s777_s8 + $0xb8] sm:$0xff] %v466_v14 }
  0x2a   : > { %v469_v25 = vadd.f32 %v437_v11, %v405_v15  ;;  %v407_v26 = vadd.f32 %v758_v2, %v368_v17  ;;  %v408_v27 = vadd.f32 %v758_v2, %v369_v18  ;;  %v371_v29 = vmul.f32 %v750_v0, %v332_v13  ;;  %499 = vst [vmem:[%s777_s8 + $0xc0] sm:$0xff] %v467_v19 }
  0x2b   : > { %500 = vst [vmem:[%s777_s8 + $0xc8] sm:$0xff] %v468_v20  ;;  %v470_v30 = vadd.f32 %v438_v16, %v406_v21  ;;  %v409_v31 = vadd.f32 %v758_v2, %v370_v24 }
  0x2c   : > { %501 = vst [vmem:[%s777_s8 + $0xd0] sm:$0xff] %v469_v25  ;;  %v471_v33 = vadd.f32 %v439_v22, %v407_v26  ;;  %v472_v34 = vadd.f32 %v440_v23, %v408_v27  ;;  %v410_v35 = vadd.f32 %v758_v2, %v371_v29 }
  0x2d   : > { %502 = vst [vmem:[%s777_s8 + $0xd8] sm:$0xff] %v470_v30  ;;  %v473_v36 = vadd.f32 %v441_v28, %v409_v31 }
  0x2e   : > { %503 = vst [vmem:[%s777_s8 + $0xe0] sm:$0xff] %v471_v33  ;;  %504 = vst [vmem:[%s777_s8 + $0xe8] sm:$0xff] %v472_v34  ;;  %v474_v37 = vadd.f32 %v442_v32, %v410_v35 }
  0x2f   : > { %505 = vst [vmem:[%s777_s8 + $0xf0] sm:$0xff] %v473_v36 }
  0x30   : > { %506 = vst [vmem:[%s777_s8 + $0xf8] sm:$0xff] %v474_v37 }
  0x31 PF: > { %s14_s17 = sadd.s32 1, %s694_s17   ;;  %s938_s15 = smov %s690_s16 }
  0x32   : > { %p11_p5 = scmp.ge.s32.totalorder %s14_s17, 4   ;;  %s939_s16 = smov %s941_s18 }
  0x34   :  { %13 = sbr.rel (!%p11_p5) target bundleno = 2 (0x2), region = 75 }

// kernel: inverted_residual_forward.6
= control target key start
LH: loop header
LB: loop body
LE: loop exit
PB: predicated region body
PF: predicated region fallthrough
CT: control target
= control target key end

     0   :  { %s7018_s15 = smov 0   ;;  %s8858_s0 = inlined_call_operand.vmem [shape: bf16[2,18,18,128], index: 0, kind: input, shape index: {}]   ;;  %s8859_s1 = inlined_call_operand.vmem [shape: bf16[9,128,128], index: 1, kind: input, shape index: {}]   ;;  %s8860_s2 = inlined_call_operand.vmem [shape: f32[512,128], index: 2, kind: output, shape index: {0}]   ;;  %s8861_s3 = inlined_call_operand.vmem [shape: f32[2,1,128], index: 3, kind: output, shape index: {1}]   ;;  %s8862_s4 = inlined_call_operand.vmem [shape: f32[2,1,128], index: 4, kind: output, shape index: {2}]  }
   0x1 LB: > { %s7024_s16 = sadd.s32 4294967295, %s6991_s15   ;;  %p5276_p0 = scmp.ge.s32.totalorder %s6991_s15, 1  ;;  %s6991_s15 = sphi %s7018_s15, %s15_s15  }
   0x2   : > { %p167_p1 = scmp.lt.s32.totalorder %s6991_s15, 3 }
   0x4   : > { %p168_p2 = pnand %p5276_p0, %p167_p1 }
   0x6   : > { %171 = sbr.rel (%p168_p2) target bundleno = 604 (0x25c), region = 28 }
   0xd   : > { %v6795_v0 = vld [vmem:[%s8859_s1 + $0x40] sm:$0xff]   ;;  %p199_p3 = scmp.lt.s32.totalorder %s7024_s16, 1  ;;  %v6797_v2 = vld [vmem:[%s8859_s1 + $0x48] sm:$0xff]   ;;  %v6799_v4 = vld [vmem:[%s8859_s1 + $0x50] sm:$0xff]   ;;  %vm281_vm0 = vsmask.f32 3328 }
   0xe   : > { %v6796_v1 = vld [vmem:[%s8859_s1 + $0x100] sm:$0xff]   ;;  %6082 = vmatprep.subr.bf16.mxu1 %v6795_v0  ;;  %v6798_v3 = vld [vmem:[%s8859_s1 + $0x108] sm:$0xff]   ;;  %v6800_v5 = vld [vmem:[%s8859_s1 + $0x110] sm:$0xff]   ;;  %vm282_vm1 = vsmask.f32 7440  ;;  %vm1311_vm3 = vcmask 1042432  }
   0xf   : > { %6274 = vmatprep.subr.bf16.mxu0 %v6796_v1  ;;  %6083 = vmatpush3.bf16.msra.mxu1 %v6795_v0  ;;  %s7048_s29 = scalar_select %p199_p3, %s7024_s16, 1  ;;  %v6801_v6 = vld [vmem:[%s8859_s1 + $0x58] sm:$0xff]   ;;  %v6803_v8 = vld [vmem:[%s8859_s1 + $0x60] sm:$0xff]   ;;  %v6805_v10 = vld [vmem:[%s8859_s1 + $0x68] sm:$0xff]   ;;  %vm1312_vm4 = vcmask 1046532  }
  0x10   : > { %6275 = vmatpush3.bf16.msra.mxu0 %v6796_v1  ;;  %6084 = vmatprep.subr.bf16.mxu1 %v6797_v2  ;;  %v6802_v7 = vld [vmem:[%s8859_s1 + $0x118] sm:$0xff]   ;;  %v6804_v9 = vld [vmem:[%s8859_s1 + $0x120] sm:$0xff]   ;;  %v6806_v11 = vld [vmem:[%s8859_s1 + $0x128] sm:$0xff]  }
  0x11   : > { %6276 = vmatprep.subr.bf16.mxu0 %v6798_v3  ;;  %s6786_s8 = smul.u32 216, %s7048_s29  ;;  %v6807_v25 = vld [vmem:[%s8859_s1 + $0x70] sm:$0xff]   ;;  %v6809_v36 = vld [vmem:[%s8859_s1 + $0x78] sm:$0xff]   ;;  %vm7098_vm2 = vmor %vm281_vm0, %vm282_vm1  ;;  %s212_s6 = scalar_lea.vmem %s8861_s3, %s7048_s29 }
  0x12   : > { %v6808_v30 = vld [vmem:[%s8859_s1 + $0x130] sm:$0xff]   ;;  %v6810_v51 = vld [vmem:[%s8859_s1 + $0x138] sm:$0xff]   ;;  %vm7344_vm5 = vmor %vm1311_vm3, %vm1312_vm4  ;;  %s215_s9 = scalar_lea.vmem %s8862_s4, %s7048_s29 }
  0x13   : > { %6085 = vmatpush3.bf16.msra.mxu1 %v6797_v2  ;;  %s7066_s17 = scalar_lea.vmem %s8858_s0, %s6786_s8 }
  0x14   : > { %6277 = vmatpush3.bf16.msra.mxu0 %v6798_v3  ;;  %6086 = vmatprep.subr.bf16.mxu1 %v6799_v4  ;;  %v217_v12 = vld [vmem:[%s7066_s17] sm:$0xf]  ;;  %v218_v13 = vld [vmem:[%s7066_s17 + $0x4] sm:$0xf]  ;;  %v265_v14 = vld [vmem:[%s7066_s17 + $0x8] sm:$0x1] }
  0x15   : > { %6278 = vmatprep.subr.bf16.mxu0 %v6800_v5  ;;  %v285_v15 = vshrl.u32 %v217_v12, 16  ;;  %v288_v16 = vshll.u32 %v217_v12, 16  ;;  %v294_v17 = vshll.u32 %v218_v13, 16  ;;  %v298_v18 = vshrl.u32 %v218_v13, 16  ;;  %v5472_v20 = vld [vmem:[%s7066_s17 + $0xc] sm:$0xf] }
  0x16   : > { %v304_v19 = vshll.u32 %v265_v14, 16  ;;  %v7079_v23 = vld [vmem:[%s7066_s17 + $0x10] sm:$0xf]  ;;  %v7082_v24 = vld [vmem:[%s7066_s17 + $0x14] sm:$0x1]  ;;  %v2184_v29 = vshrl.u32 %v5472_v20, 16 }
  0x17   : > { %6087 = vmatpush3.bf16.msra.mxu1 %v6799_v4  ;;  %v287_v21 = vrot.slane %v285_v15, 4  ;;  %v290_v22 = vrot.slane %v288_v16, 5  ;;  %v296_v26 = vrot.slane %v294_v17, 5  ;;  %v300_v27 = vrot.slane %v298_v18, 4  ;;  %v219_v35 = vld [vmem:[%s7066_s17 + $0xc] sm:$0xf] }
  0x18   : > { %6279 = vmatpush3.bf16.msra.mxu0 %v6800_v5  ;;  %6088 = vmatprep.subr.bf16.mxu1 %v6801_v6  ;;  %v306_v28 = vrot.slane %v304_v19, 5  ;;  %v2187_v32 = vshll.u32 %v5472_v20, 16  ;;  %v2193_v33 = vshll.u32 %v7079_v23, 16  ;;  %v2197_v34 = vshrl.u32 %v7079_v23, 16  ;;  %v220_v42 = vld [vmem:[%s7066_s17 + $0x10] sm:$0xf] }
  0x19   : > { %6280 = vmatprep.subr.bf16.mxu0 %v6802_v7  ;;  %v291_v31 = vor.u32 %v290_v22, %v287_v21  ;;  %v301_v38 = vor.u32 %v300_v27, %v296_v26  ;;  %v2186_v39 = vrot.slane %v2184_v29, 4  ;;  %v2203_v40 = vshll.u32 %v7082_v24, 16  ;;  %v266_v55 = vld [vmem:[%s7066_s17 + $0x14] sm:$0x1]  ;;  %v5475_v57 = vld [vmem:[%s7066_s17 + $0x18] sm:$0xf] }
  0x1a   : > { %v2958_v41 = vrot.slane %v7082_v24, 5  ;;  %v2189_v44 = vrot.slane %v2187_v32, 5  ;;  %v2195_v45 = vrot.slane %v2193_v33, 5  ;;  %v2199_v46 = vrot.slane %v2197_v34, 4  ;;  %v7115_v62 = vld [vmem:[%s7066_s17 + $0x1c] sm:$0xf] }
  0x1b   : > { %6089 = vmatpush3.bf16.msra.mxu1 %v6801_v6  ;;  %v292_v43 = vrot.slane %v291_v31, 4  ;;  %v302_v47 = vrot.slane %v301_v38, 4  ;;  %v2205_v48 = vrot.slane %v2203_v40, 5  ;;  %v309_v49 = vshrl.u32 %v219_v35, 16  ;;  %v6811_v3 = vld [vmem:[%s8859_s1] sm:$0xff]  }
  0x1c   : > { %6281 = vmatpush3.bf16.msra.mxu0 %v6802_v7  ;;  %6090 = vmatprep.subr.bf16.mxu1 %v6803_v8  ;;  %v312_v50 = vshll.u32 %v219_v35, 16  ;;  %v2190_v53 = vor.u32 %v2189_v44, %v2186_v39  ;;  %v2200_v54 = vor.u32 %v2199_v46, %v2195_v45  ;;  %v318_v56 = vshll.u32 %v220_v42, 16  ;;  %v7123_v4 = vld [vmem:[%s8859_s1 + $0x140] sm:$0xff]   ;;  %v221_v21 = vld [vmem:[%s7066_s17 + $0x18] sm:$0xf]  ;;  %v6814_v46 = vld [vmem:[%s8859_s1 + $0x8] sm:$0xff]  }
  0x1d   : > { %6282 = vmatprep.subr.bf16.mxu0 %v6804_v9  ;;  %v297_v52 = vsel %vm7098_vm2, %v292_v43, %v296_v26  ;;  %v307_v58 = vsel %vm7098_vm2, %v302_v47, %v306_v28  ;;  %v311_v59 = vrot.slane %v309_v49, 4  ;;  %v322_v61 = vshrl.u32 %v220_v42, 16  ;;  %v222_v28 = vld [vmem:[%s7066_s17 + $0x1c] sm:$0xf]  ;;  %v267_v33 = vld [vmem:[%s7066_s17 + $0x20] sm:$0x1] }
  0x1e   : > { %v314_v60 = vrot.slane %v312_v50, 5  ;;  %v5296_v63 = vcombine.low %v297_v52, %v307_v58  ;;  %v2191_v0 = vrot.slane %v2190_v53, 4  ;;  %v2201_v1 = vrot.slane %v2200_v54, 4  ;;  %v5478_v39 = vld [vmem:[%s7066_s17 + $0x24] sm:$0xf] }
  0x1f   : > { %6091 = vmatpush3.bf16.msra.mxu1 %v6803_v8  ;;  %v320_v2 = vrot.slane %v318_v56, 5  ;;  %v324_v6 = vrot.slane %v322_v61, 4  ;;  %v328_v7 = vshll.u32 %v266_v55, 16  ;;  %v7126_v8 = vld [vmem:[%s7066_s17 + $0x20] sm:$0x1]  ;;  %v2211_v12 = vshll.u32 %v5475_v57, 16 }
  0x20   : > { %6283 = vmatpush3.bf16.msra.mxu0 %v6804_v9  ;;  %6092 = vmatprep.subr.bf16.mxu1 %v6805_v10  ;;  %v315_v5 = vor.u32 %v314_v60, %v311_v59  ;;  %v2196_v9 = vsel %vm7098_vm2, %v2191_v0, %v2195_v45  ;;  %v2217_v19 = vshll.u32 %v7115_v62, 16  ;;  %v2221_v20 = vshrl.u32 %v7115_v62, 16  ;;  %v7151_v45 = vld [vmem:[%s7066_s17 + $0x28] sm:$0xf]  ;;  %v223_v52 = vld [vmem:[%s7066_s17 + $0x24] sm:$0xf] }
  0x21   : > { %6284 = vmatprep.subr.bf16.mxu0 %v6806_v11  ;;  %6098 = vmatprep.mubr.bf16.mxu1 %v5296_v63  ;;  %v325_v15 = vor.u32 %v324_v6, %v320_v2  ;;  %v330_v16 = vrot.slane %v328_v7, 5  ;;  %v2213_v18 = vrot.slane %v2211_v12, 5  ;;  %v2227_v26 = vshll.u32 %v7126_v8, 16  ;;  %v6813_v63 = vld [vmem:[%s8859_s1 + $0x148] sm:$0xff]  }
  0x22   : > { %v316_v14 = vrot.slane %v315_v5, 4  ;;  %v2962_v27 = vrot.slane %v7115_v62, 5  ;;  %v2223_v31 = vrot.slane %v2221_v20, 4  ;;  %v2965_v32 = vrot.slane %v7126_v8, 5  ;;  %v224_v5 = vld [vmem:[%s7066_s17 + $0x28] sm:$0xf] }
  0x23   : > { %6093 = vmatpush3.bf16.msra.mxu1 %v6805_v10  ;;  %v2206_v10 = vsel %vm7098_vm2, %v2201_v1, %v2205_v48  ;;  %v2229_v35 = vrot.slane %v2227_v26, 5  ;;  %v333_v38 = vshrl.u32 %v221_v21, 16  ;;  %v336_v44 = vshll.u32 %v221_v21, 16 }
  0x24   : > { %6285 = vmatpush3.bf16.msra.mxu0 %v6806_v11  ;;  %6094 = vmatprep.subr.bf16.mxu1 %v6807_v25  ;;  %v2208_v11 = vshrl.u32 %v5475_v57, 16  ;;  %v5536_v13 = vcombine.low %v2196_v9, %v2206_v10  ;;  %v321_v22 = vsel %vm7098_vm2, %v316_v14, %v320_v2  ;;  %v342_v48 = vshll.u32 %v222_v28, 16 }
  0x25   : > { %6286 = vmatprep.subr.bf16.mxu0 %v6808_v30  ;;  %v335_v47 = vrot.slane %v333_v38, 4  ;;  %v346_v49 = vshrl.u32 %v222_v28, 16  ;;  %v352_v50 = vshll.u32 %v267_v33, 16  ;;  %v338_v55 = vrot.slane %v336_v44, 5  ;;  %v7182_v33 = vld [vmem:[%s7066_s17 + $0x34] sm:$0xf] }
  0x26   : > { %v2210_v17 = vrot.slane %v2208_v11, 4  ;;  %6290 = vmatprep.mubr.bf16.mxu0 %v5536_v13  ;;  %v2232_v56 = vshrl.u32 %v5478_v39, 16  ;;  %v344_v57 = vrot.slane %v342_v48, 5  ;;  %v2235_v60 = vshll.u32 %v5478_v39, 16  ;;  %v268_v11 = vld [vmem:[%s7066_s17 + $0x2c] sm:$0x1] }
  0x27   : > { %6095 = vmatpush3.bf16.msra.mxu1 %v6807_v25  ;;  %v326_v25 = vrot.slane %v325_v15, 4  ;;  %v348_v58 = vrot.slane %v346_v49, 4  ;;  %v354_v59 = vrot.slane %v352_v50, 5  ;;  %v339_v0 = vor.u32 %v338_v55, %v335_v47  ;;  %v6816_v48 = vld [vmem:[%s8859_s1 + $0x158] sm:$0xff]  }
  0x28   : > { %6287 = vmatpush3.bf16.msra.mxu0 %v6808_v30  ;;  %6096 = vmatprep.subr.bf16.mxu1 %v6809_v36  ;;  %v2214_v29 = vor.u32 %v2213_v18, %v2210_v17  ;;  %v2219_v30 = vrot.slane %v2217_v19, 5  ;;  %v2234_v1 = vrot.slane %v2232_v56, 4  ;;  %v2241_v2 = vshll.u32 %v7151_v45, 16 }
  0x29   : > { %6288 = vmatprep.subr.bf16.mxu0 %v6810_v51  ;;  %v331_v34 = vsel %vm7098_vm2, %v326_v25, %v330_v16  ;;  %v349_v7 = vor.u32 %v348_v58, %v344_v57  ;;  %v2237_v9 = vrot.slane %v2235_v60, 5  ;;  %v2245_v10 = vshrl.u32 %v7151_v45, 16  ;;  %v5481_v16 = vld [vmem:[%s7066_s17 + $0x30] sm:$0xf]  ;;  %v6823_v60 = vld [vmem:[%s8859_s1 + $0x20] sm:$0xff]  }
  0x2a   : > { %v5297_v40 = vcombine.low %v321_v22, %v331_v34  ;;  %v2215_v42 = vrot.slane %v2214_v29, 4  ;;  %v2224_v43 = vor.u32 %v2223_v31, %v2219_v30  ;;  %v340_v12 = vrot.slane %v339_v0, 4  ;;  %v6820_v34 = vld [vmem:[%s8859_s1 + $0x18] sm:$0xff]  }
  0x2b   : > { %6097 = vmatpush3.bf16.msra.mxu1 %v6809_v36  ;;  %v7147_v36 = vrot.slane %v2962_v27, 4  ;;  %v2243_v13 = vrot.slane %v2241_v2, 5  ;;  %v357_v15 = vshrl.u32 %v223_v52, 16  ;;  %v350_v17 = vrot.slane %v349_v7, 4  ;;  %v269_v2 = vld [vmem:[%s7066_s17 + $0x38] sm:$0x1] }
  0x2c   : > { %6289 = vmatpush3.bf16.msra.mxu0 %v6810_v51  ;;  %6130 = vmatprep.subr.bf16.mxu1 %v6811_v3  ;;  %v7157_v51 = vld [vmem:[%s7066_s17 + $0x2c] sm:$0x1]  ;;  %v2220_v53 = vsel %vm7098_vm2, %v2215_v42, %v2219_v30  ;;  %v2225_v54 = vrot.slane %v2224_v43, 4  ;;  %v2238_v18 = vor.u32 %v2237_v9, %v2234_v1  ;;  %v2247_v19 = vrot.slane %v2245_v10, 4  ;;  %v5484_v9 = vld [vmem:[%s7066_s17 + $0x3c] sm:$0xf] }
  0x2d   : > { %6322 = vmatprep.subr.bf16.mxu0 %v7123_v4  ;;  %v2251_v14 = vshll.u32 %v7157_v51, 16  ;;  %v360_v20 = vshll.u32 %v223_v52, 16  ;;  %v345_v21 = vsel %vm7098_vm2, %v340_v12, %v344_v57  ;;  %v359_v25 = vrot.slane %v357_v15, 4 }
  0x2e   : > { %6099 = vmatmul.mubr.bf16.vlgmr.msra.gmra.mrb[0].mxu1 %v5297_v40  ;;  %v2230_v61 = vsel %vm7098_vm2, %v2225_v54, %v2229_v35  ;;  %v366_v26 = vshll.u32 %v224_v5, 16  ;;  %v355_v28 = vsel %vm7098_vm2, %v350_v17, %v354_v59  ;;  %v2239_v29 = vrot.slane %v2238_v18, 4  ;;  %v225_v54 = vld [vmem:[%s7066_s17 + $0x30] sm:$0xf]  ;;  %v226_v59 = vld [vmem:[%s7066_s17 + $0x34] sm:$0xf] }
  0x2f   : > { %6131 = vmatpush3.bf16.msra.mxu1 %v6811_v3  ;;  %v6817_v3 = vld [vmem:[%s8859_s1 + $0x10] sm:$0xff]   ;;  %v5537_v6 = vcombine.low %v2220_v53, %v2230_v61  ;;  %v2253_v22 = vrot.slane %v2251_v14, 5  ;;  %v2248_v30 = vor.u32 %v2247_v19, %v2243_v13  ;;  %v362_v31 = vrot.slane %v360_v20, 5  ;;  %v6825_v14 = vld [vmem:[%s8859_s1 + $0x28] sm:$0xff]   ;;  %v7216_v19 = vld [vmem:[%s7066_s17 + $0x40] sm:$0xf] }
  0x30   : > { %6132 = vmatprep.subr.bf16.mxu1 %v6814_v46  ;;  %v5298_v35 = vcombine.low %v345_v21, %v355_v28  ;;  %v368_v38 = vrot.slane %v366_v26, 5  ;;  %v370_v39 = vshrl.u32 %v224_v5, 16  ;;  %v376_v40 = vshll.u32 %v268_v11, 16  ;;  %v6818_v20 = vld [vmem:[%s8859_s1 + $0x160] sm:$0xff]  }
  0x31   : > { %6291 = vmatmul.mubr.bf16.vlgmr.msra.gmra.mrb[0].mxu0 %v5537_v6  ;;  %v2244_v42 = vsel %vm7098_vm2, %v2239_v29, %v2243_v13  ;;  %v2249_v43 = vrot.slane %v2248_v30, 4  ;;  %v363_v44 = vor.u32 %v362_v31, %v359_v25  ;;  %v2256_v47 = vshrl.u32 %v5481_v16, 16  ;;  %v7224_v28 = vld [vmem:[%s7066_s17 + $0x44] sm:$0x1] }
  0x32   : > { %6323 = vmatpush3.bf16.msra.mxu0 %v7123_v4  ;;  %v6815_v4 = vld [vmem:[%s8859_s1 + $0x150] sm:$0xff]   ;;  %6102 = vmatprep.mubr.bf16.mxu1 %v5298_v35  ;;  %v372_v49 = vrot.slane %v370_v39, 4  ;;  %v378_v50 = vrot.slane %v376_v40, 5  ;;  %v2259_v52 = vshll.u32 %v5481_v16, 16  ;;  %v2265_v53 = vshll.u32 %v7182_v33, 16 }
  0x33   : > { %6133 = vmatpush3.bf16.msra.mxu1 %v6814_v46  ;;  %6324 = vmatprep.subr.bf16.mxu0 %v6813_v63  ;;  %v7193_v46 = vld [vmem:[%s7066_s17 + $0x38] sm:$0x1]  ;;  %v2254_v55 = vsel %vm7098_vm2, %v2249_v43, %v2253_v22  ;;  %v364_v56 = vrot.slane %v363_v44, 4  ;;  %v2258_v57 = vrot.slane %v2256_v47, 4  ;;  %v2269_v58 = vshrl.u32 %v7182_v33, 16  ;;  %v6827_v35 = vld [vmem:[%s8859_s1 + $0x30] sm:$0xff]  }
  0x34   : > { %6134 = vmatprep.subr.bf16.mxu1 %v6817_v3  ;;  %v5538_v61 = vcombine.low %v2244_v42, %v2254_v55  ;;  %v2261_v0 = vrot.slane %v2259_v52, 5  ;;  %v2267_v1 = vrot.slane %v2265_v53, 5  ;;  %v2275_v6 = vshll.u32 %v7193_v46, 16  ;;  %v228_v55 = vld [vmem:[%s7066_s17 + $0x40] sm:$0xf] }
  0x35   : > { %v369_v5 = vsel %vm7098_vm2, %v364_v56, %v368_v38  ;;  %v381_v7 = vshrl.u32 %v225_v54, 16  ;;  %v384_v12 = vshll.u32 %v225_v54, 16  ;;  %v390_v13 = vshll.u32 %v226_v59, 16 }
  0x36   : > { %6325 = vmatpush3.bf16.msra.mxu0 %v6813_v63  ;;  %v373_v63 = vor.u32 %v372_v49, %v368_v38  ;;  %6294 = vmatprep.mubr.bf16.mxu0 %v5538_v61  ;;  %v2262_v11 = vor.u32 %v2261_v0, %v2258_v57  ;;  %v2277_v16 = vrot.slane %v2275_v6, 5  ;;  %v394_v18 = vshrl.u32 %v226_v59, 16 }
  0x37   : > { %6135 = vmatpush3.bf16.msra.mxu1 %v6817_v3  ;;  %6326 = vmatprep.subr.bf16.mxu0 %v6815_v4  ;;  %v2271_v3 = vrot.slane %v2269_v58, 4  ;;  %v383_v17 = vrot.slane %v381_v7, 4  ;;  %v386_v25 = vrot.slane %v384_v12, 5  ;;  %v392_v26 = vrot.slane %v390_v13, 5 }
  0x38   : > { %6136 = vmatprep.subr.bf16.mxu1 %v6820_v34  ;;  %v374_v10 = vrot.slane %v373_v63, 4  ;;  %v2263_v22 = vrot.slane %v2262_v11, 4  ;;  %v396_v31 = vrot.slane %v394_v18, 4  ;;  %v2280_v40 = vshrl.u32 %v5484_v9, 16  ;;  %v270_v63 = vld [vmem:[%s7066_s17 + $0x44] sm:$0x1] }
  0x39   : > { %v2272_v15 = vor.u32 %v2271_v3, %v2267_v1  ;;  %v387_v39 = vor.u32 %v386_v25, %v383_v17  ;;  %v2283_v42 = vshll.u32 %v5484_v9, 16  ;;  %v2289_v49 = vshll.u32 %v7216_v19, 16  ;;  %v5487_v9 = vld [vmem:[%s7066_s17 + $0x48] sm:$0xf] }
  0x3a   : > { %6327 = vmatpush3.bf16.msra.mxu0 %v6815_v4  ;;  %v379_v21 = vsel %vm7098_vm2, %v374_v10, %v378_v50  ;;  %v400_v4 = vshll.u32 %v269_v2, 16  ;;  %v2268_v38 = vsel %vm7098_vm2, %v2263_v22, %v2267_v1  ;;  %v397_v44 = vor.u32 %v396_v31, %v392_v26  ;;  %v6829_v2 = vld [vmem:[%s8859_s1 + $0x38] sm:$0xff]   ;;  %v7257_v22 = vld [vmem:[%s7066_s17 + $0x50] sm:$0x1] }
  0x3b   : > { %6137 = vmatpush3.bf16.msra.mxu1 %v6820_v34  ;;  %6328 = vmatprep.subr.bf16.mxu0 %v6816_v48  ;;  %v5299_v29 = vcombine.low %v369_v5, %v379_v21  ;;  %v2273_v30 = vrot.slane %v2272_v15, 4  ;;  %v227_v34 = vld [vmem:[%s7066_s17 + $0x3c] sm:$0xf]  ;;  %v388_v52 = vrot.slane %v387_v39, 4  ;;  %v2282_v53 = vrot.slane %v2280_v40, 4  ;;  %v6821_v15 = vld [vmem:[%s8859_s1 + $0x170] sm:$0xff]  }
  0x3c   : > { %6138 = vmatprep.subr.bf16.mxu1 %v6823_v60  ;;  %v402_v47 = vrot.slane %v400_v4, 5  ;;  %v2285_v54 = vrot.slane %v2283_v42, 5  ;;  %v398_v56 = vrot.slane %v397_v44, 4  ;;  %v2291_v57 = vrot.slane %v2289_v49, 5  ;;  %v6822_v31 = vld [vmem:[%s8859_s1 + $0x178] sm:$0xff]   ;;  %v7268_v4 = vld [vmem:[%s8859_s1 + $0x80] sm:$0xff]  }
  0x3d   : > { %6103 = vmatmul.mubr.bf16.gmra.mrb[4].mxu1 %v5299_v29  ;;  %v2278_v43 = vsel %vm7098_vm2, %v2273_v30, %v2277_v16  ;;  %v2293_v58 = vshrl.u32 %v7216_v19, 16  ;;  %v2299_v59 = vshll.u32 %v7224_v28, 16  ;;  %v405_v0 = vshrl.u32 %v227_v34, 16  ;;  %v229_v30 = vld [vmem:[%s7066_s17 + $0x48] sm:$0xf] }
  0x3e   : > { %6329 = vmatpush3.bf16.msra.mxu0 %v6816_v48  ;;  %v5539_v50 = vcombine.low %v2268_v38, %v2278_v43  ;;  %v6819_v48 = vld [vmem:[%s8859_s1 + $0x168] sm:$0xff]   ;;  %v2286_v61 = vor.u32 %v2285_v54, %v2282_v53  ;;  %v408_v1 = vshll.u32 %v227_v34, 16  ;;  %v403_v5 = vsel %vm7098_vm2, %v398_v56, %v402_v47  ;;  %v271_v54 = vld [vmem:[%s7066_s17 + $0x50] sm:$0x1] }
  0x3f   : > { %6139 = vmatpush3.bf16.msra.mxu1 %v6823_v60  ;;  %6330 = vmatprep.subr.bf16.mxu0 %v6818_v20  ;;  %v393_v60 = vsel %vm7098_vm2, %v388_v52, %v392_v26  ;;  %v2295_v3 = vrot.slane %v2293_v58, 4  ;;  %v2301_v6 = vrot.slane %v2299_v59, 5  ;;  %v414_v7 = vshll.u32 %v228_v55, 16  ;;  %v230_v53 = vld [vmem:[%s7066_s17 + $0x4c] sm:$0xf] }
  0x40   : > { %6140 = vmatprep.subr.bf16.mxu1 %v6825_v14  ;;  %6295 = vmatmul.mubr.bf16.gmra.mrb[4].mxu0 %v5539_v50  ;;  %v5300_v10 = vcombine.low %v393_v60, %v403_v5  ;;  %v2287_v11 = vrot.slane %v2286_v61, 4  ;;  %v407_v12 = vrot.slane %v405_v0, 4  ;;  %v410_v13 = vrot.slane %v408_v1, 5  ;;  %v5490_v58 = vld [vmem:[%s7066_s17 + $0x54] sm:$0xf] }
  0x41   : > { %v2296_v16 = vor.u32 %v2295_v3, %v2291_v57  ;;  %v416_v17 = vrot.slane %v414_v7, 5  ;;  %v418_v18 = vshrl.u32 %v228_v55, 16  ;;  %v424_v21 = vshll.u32 %v270_v63, 16  ;;  %v7282_v0 = vld [vmem:[%s7066_s17 + $0x58] sm:$0xf] }
  0x42   : > { %6331 = vmatpush3.bf16.msra.mxu0 %v6818_v20  ;;  %6106 = vmatprep.mubr.bf16.mxu1 %v5300_v10  ;;  %v2292_v20 = vsel %vm7098_vm2, %v2287_v11, %v2291_v57  ;;  %v411_v25 = vor.u32 %v410_v13, %v407_v12  ;;  %v2304_v26 = vshrl.u32 %v5487_v9, 16  ;;  %v2307_v29 = vshll.u32 %v5487_v9, 16 }
  0x43   : > { %6141 = vmatpush3.bf16.msra.mxu1 %v6825_v14  ;;  %v7251_v14 = vld [vmem:[%s7066_s17 + $0x4c] sm:$0xf]  ;;  %6332 = vmatprep.subr.bf16.mxu0 %v6819_v48  ;;  %v2297_v34 = vrot.slane %v2296_v16, 4  ;;  %v426_v38 = vrot.slane %v424_v21, 5  ;;  %v2323_v52 = vshll.u32 %v7257_v22, 16  ;;  %v429_v61 = vshrl.u32 %v229_v30, 16 }
  0x44   : > { %6142 = vmatprep.subr.bf16.mxu1 %v6827_v35  ;;  %v2313_v39 = vshll.u32 %v7251_v14, 16  ;;  %v412_v40 = vrot.slane %v411_v25, 4  ;;  %v2306_v42 = vrot.slane %v2304_v26, 4  ;;  %v2309_v43 = vrot.slane %v2307_v29, 5 }
  0x45   : > { %v2317_v44 = vshrl.u32 %v7251_v14, 16  ;;  %v2302_v47 = vsel %vm7098_vm2, %v2297_v34, %v2301_v6  ;;  %v2325_v60 = vrot.slane %v2323_v52, 5  ;;  %v432_v63 = vshll.u32 %v229_v30, 16  ;;  %v7287_v6 = vld [vmem:[%s8859_s1 + $0x180] sm:$0xff]  }
  0x46   : > { %6333 = vmatpush3.bf16.msra.mxu0 %v6819_v48  ;;  %v2315_v50 = vrot.slane %v2313_v39, 5  ;;  %v5540_v55 = vcombine.low %v2292_v20, %v2302_v47  ;;  %v417_v48 = vsel %vm7098_vm2, %v412_v40, %v416_v17  ;;  %v2310_v56 = vor.u32 %v2309_v43, %v2306_v42  ;;  %v7294_v20 = vld [vmem:[%s7066_s17 + $0x5c] sm:$0x1]  ;;  %v232_v43 = vld [vmem:[%s7066_s17 + $0x58] sm:$0xf] }
  0x47   : > { %6143 = vmatpush3.bf16.msra.mxu1 %v6827_v35  ;;  %v420_v35 = vrot.slane %v418_v18, 4  ;;  %6334 = vmatprep.subr.bf16.mxu0 %v6821_v15  ;;  %v2319_v57 = vrot.slane %v2317_v44, 4  ;;  %v442_v3 = vshrl.u32 %v230_v53, 16  ;;  %v431_v9 = vrot.slane %v429_v61, 4  ;;  %v5493_v52 = vld [vmem:[%s7066_s17 + $0x60] sm:$0xf] }
  0x48   : > { %6144 = vmatprep.subr.bf16.mxu1 %v6829_v2  ;;  %6298 = vmatprep.mubr.bf16.mxu0 %v5540_v55  ;;  %v2311_v1 = vrot.slane %v2310_v56, 4  ;;  %v434_v10 = vrot.slane %v432_v63, 5  ;;  %v448_v11 = vshll.u32 %v271_v54, 16  ;;  %v2328_v25 = vshrl.u32 %v5490_v58, 16 }
  0x49   : > { %v421_v49 = vor.u32 %v420_v35, %v416_v17  ;;  %v2320_v5 = vor.u32 %v2319_v57, %v2315_v50  ;;  %v444_v18 = vrot.slane %v442_v3, 4  ;;  %v2331_v29 = vshll.u32 %v5490_v58, 16  ;;  %v231_v35 = vld [vmem:[%s7066_s17 + $0x54] sm:$0xf] }
  0x4a   : > { %6335 = vmatpush3.bf16.msra.mxu0 %v6821_v15  ;;  %v2316_v13 = vsel %vm7098_vm2, %v2311_v1, %v2315_v50  ;;  %v435_v17 = vor.u32 %v434_v10, %v431_v9  ;;  %v450_v21 = vrot.slane %v448_v11, 5  ;;  %v2337_v30 = vshll.u32 %v7282_v0, 16  ;;  %v272_v50 = vld [vmem:[%s7066_s17 + $0x5c] sm:$0x1] }
  0x4b   : > { %6145 = vmatpush3.bf16.msra.mxu1 %v6829_v2  ;;  %v422_v59 = vrot.slane %v421_v49, 4  ;;  %v438_v2 = vshll.u32 %v230_v53, 16  ;;  %6336 = vmatprep.subr.bf16.mxu0 %v6822_v31  ;;  %v2321_v15 = vrot.slane %v2320_v5, 4  ;;  %v2341_v34 = vshrl.u32 %v7282_v0, 16 }
  0x4c   : > { %6178 = vmatprep.subr.bf16.mxu1 %v7268_v4  ;;  %v436_v39 = vrot.slane %v435_v17, 4  ;;  %v2330_v42 = vrot.slane %v2328_v25, 4  ;;  %v2339_v44 = vrot.slane %v2337_v30, 5  ;;  %v2347_v49 = vshll.u32 %v7294_v20, 16  ;;  %v7318_v17 = vld [vmem:[%s7066_s17 + $0x68] sm:$0x1] }
  0x4d   : > { %v427_v7 = vsel %vm7098_vm2, %v422_v59, %v426_v38  ;;  %v440_v16 = vrot.slane %v438_v2, 5  ;;  %v2326_v26 = vsel %vm7098_vm2, %v2321_v15, %v2325_v60  ;;  %v2343_v47 = vrot.slane %v2341_v34, 4  ;;  %v7309_v60 = vld [vmem:[%s7066_s17 + $0x64] sm:$0xf]  ;;  %v7322_v25 = vld [vmem:[%s7066_s17 + $0x60] sm:$0xf] }
  0x4e   : > { %v5301_v12 = vcombine.low %v417_v48, %v427_v7  ;;  %6337 = vmatpush3.bf16.msra.mxu0 %v6822_v31  ;;  %v5541_v38 = vcombine.low %v2316_v13, %v2326_v26  ;;  %v2333_v31 = vrot.slane %v2331_v29, 5  ;;  %v453_v55 = vshrl.u32 %v231_v35, 16 }
  0x4f   : > { %6370 = vmatprep.subr.bf16.mxu0 %v7287_v6  ;;  %v445_v40 = vor.u32 %v444_v18, %v440_v16  ;;  %v441_v53 = vsel %vm7098_vm2, %v436_v39, %v440_v16  ;;  %v456_v48 = vshll.u32 %v231_v35, 16  ;;  %v2344_v57 = vor.u32 %v2343_v47, %v2339_v44  ;;  %v7325_v35 = vld [vmem:[%s7066_s17 + $0x64] sm:$0xf] }
  0x50   : > { %6107 = vmatmul.mubr.bf16.gmra.mrb[8].mxu1 %v5301_v12  ;;  %6299 = vmatmul.mubr.bf16.gmra.mrb[8].mxu0 %v5541_v38  ;;  %v2334_v56 = vor.u32 %v2333_v31, %v2330_v42  ;;  %v2349_v58 = vrot.slane %v2347_v49, 5  ;;  %v462_v59 = vshll.u32 %v232_v43, 16  ;;  %v455_v63 = vrot.slane %v453_v55, 4 }
  0x51   : > { %v446_v54 = vrot.slane %v445_v40, 4  ;;  %v458_v1 = vrot.slane %v456_v48, 5  ;;  %v466_v5 = vshrl.u32 %v232_v43, 16  ;;  %v2345_v7 = vrot.slane %v2344_v57, 4  ;;  %v273_v43 = vld [vmem:[%s7066_s17 + $0x68] sm:$0x1] }
  0x52   : > { %v2335_v3 = vrot.slane %v2334_v56, 4  ;;  %v464_v9 = vrot.slane %v462_v59, 5  ;;  %v472_v12 = vshll.u32 %v272_v50, 16  ;;  %v2352_v13 = vshrl.u32 %v5493_v52, 16  ;;  %v5560_v50 = vld [vmem:[%s7066_s17 + $0xc] sm:$0xe] }
  0x53   : > { %v451_v61 = vsel %vm7098_vm2, %v446_v54, %v450_v21  ;;  %v459_v10 = vor.u32 %v458_v1, %v455_v63  ;;  %v468_v11 = vrot.slane %v466_v5, 4  ;;  %v2350_v16 = vsel %vm7098_vm2, %v2345_v7, %v2349_v58  ;;  %v7340_v5 = vld [vmem:[%s7066_s17 + $0x6c] sm:$0xf] }
  0x54   : > { %v5302_v2 = vcombine.low %v441_v53, %v451_v61  ;;  %v2340_v15 = vsel %vm7098_vm2, %v2335_v3, %v2339_v44  ;;  %v2355_v18 = vshll.u32 %v5493_v52, 16  ;;  %v2361_v21 = vshll.u32 %v7309_v60, 16 }
  0x55   : > { %v5542_v26 = vcombine.low %v2340_v15, %v2350_v16  ;;  %v460_v29 = vrot.slane %v459_v10, 4  ;;  %v469_v30 = vor.u32 %v468_v11, %v464_v9  ;;  %v474_v34 = vrot.slane %v472_v12, 5 }
  0x56   : > { %6110 = vmatprep.mubr.bf16.mxu1 %v5302_v2  ;;  %v2354_v38 = vrot.slane %v2352_v13, 4  ;;  %v2357_v39 = vrot.slane %v2355_v18, 5  ;;  %v2363_v40 = vrot.slane %v2361_v21, 5  ;;  %v2365_v42 = vshrl.u32 %v7309_v60, 16  ;;  %v7352_v21 = vld [vmem:[%s7066_s17 + $0x70] sm:$0xf] }
  0x57   : > { %6302 = vmatprep.mubr.bf16.mxu0 %v5542_v26  ;;  %v465_v31 = vsel %vm7098_vm2, %v460_v29, %v464_v9  ;;  %v470_v44 = vrot.slane %v469_v30, 4  ;;  %v2371_v47 = vshll.u32 %v7318_v17, 16  ;;  %v477_v49 = vshrl.u32 %v7322_v25, 16  ;;  %v6913_v9 = vld [vmem:[%s7066_s17 + $0xb4] sm:$0xff]  }
  0x58   : > { %v2358_v52 = vor.u32 %v2357_v39, %v2354_v38  ;;  %v2367_v53 = vrot.slane %v2365_v42, 4  ;;  %v480_v54 = vshll.u32 %v7322_v25, 16  ;;  %v486_v55 = vshll.u32 %v7325_v35, 16 }
  0x59   : > { %v475_v48 = vsel %vm7098_vm2, %v470_v44, %v474_v34  ;;  %v2373_v56 = vrot.slane %v2371_v47, 5  ;;  %v479_v57 = vrot.slane %v477_v49, 4  ;;  %v490_v58 = vshrl.u32 %v7325_v35, 16  ;;  %v7363_v47 = vld [vmem:[%s7066_s17 + $0x78] sm:$0xf] }
  0x5a   : > { %v5303_v59 = vcombine.low %v465_v31, %v475_v48  ;;  %v2359_v61 = vrot.slane %v2358_v52, 4  ;;  %v2368_v63 = vor.u32 %v2367_v53, %v2363_v40  ;;  %v482_v1 = vrot.slane %v480_v54, 5  ;;  %v7374_v54 = vld [vmem:[%s7066_s17 + $0x7c] sm:$0xf] }
  0x5b   : > { %v488_v2 = vrot.slane %v486_v55, 5  ;;  %v492_v3 = vrot.slane %v490_v58, 4  ;;  %v496_v7 = vshll.u32 %v273_v43, 16  ;;  %v5576_v10 = vrot.slane %v5560_v50, 9  ;;  %v275_v58 = vld [vmem:[%s7066_s17 + $0x80] sm:$0x1] }
  0x5c   : > { %6111 = vmatmul.mubr.bf16.gmra.mrb[12].mxu1 %v5303_v59  ;;  %v2364_v11 = vsel %vm7098_vm2, %v2359_v61, %v2363_v40  ;;  %v2369_v12 = vrot.slane %v2368_v63, 4  ;;  %v483_v13 = vor.u32 %v482_v1, %v479_v57  ;;  %v2955_v15 = vrot.slane %v7079_v23, 5  ;;  %v274_v40 = vld [vmem:[%s7066_s17 + $0x74] sm:$0x1]  ;;  %v5561_v23 = vld [vmem:[%s7066_s17 + $0x18] sm:$0xe] }
  0x5d   : > { %v493_v16 = vor.u32 %v492_v3, %v488_v2  ;;  %v498_v18 = vrot.slane %v496_v7, 5  ;;  %v501_v26 = vshrl.u32 %v7340_v5, 16  ;;  %v504_v29 = vshll.u32 %v7340_v5, 16 }
  0x5e   : > { %v2374_v30 = vsel %vm7098_vm2, %v2369_v12, %v2373_v56  ;;  %v484_v34 = vrot.slane %v483_v13, 4  ;;  %v2956_v38 = vsel %vm7344_vm5, %v5576_v10, %v2955_v15  ;;  %v2957_v39 = vrot.slane %v2955_v15, 4  ;;  %v5562_v13 = vld [vmem:[%s7066_s17 + $0x24] sm:$0xe] }
  0x5f   : > { %v5543_v42 = vcombine.low %v2364_v11, %v2374_v30  ;;  %v494_v43 = vrot.slane %v493_v16, 4  ;;  %v503_v31 = vrot.slane %v501_v26, 4  ;;  %v506_v44 = vrot.slane %v504_v29, 5  ;;  %v7396_v16 = vld [vmem:[%s7066_s17 + $0x84] sm:$0xf]  ;;  %v6826_v29 = vld [vmem:[%s8859_s1 + $0x188] sm:$0xff]  }
  0x60   : > { %v489_v49 = vsel %vm7098_vm2, %v484_v34, %v488_v2  ;;  %v2959_v50 = vsel %vm7344_vm5, %v2957_v39, %v2958_v41  ;;  %v510_v52 = vshll.u32 %v7352_v21, 16  ;;  %v514_v53 = vshrl.u32 %v7352_v21, 16 }
  0x61   : > { %6303 = vmatmul.mubr.bf16.gmra.mrb[12].mxu0 %v5543_v42  ;;  %v499_v55 = vsel %vm7098_vm2, %v494_v43, %v498_v18  ;;  %v5608_v48 = vcombine.low %v2956_v38, %v2959_v50  ;;  %v507_v56 = vor.u32 %v506_v44, %v503_v31  ;;  %v520_v57 = vshll.u32 %v274_v40, 16  ;;  %v7404_v40 = vld [vmem:[%s7066_s17 + $0x88] sm:$0xf]  ;;  %v276_v31 = vld [vmem:[%s7066_s17 + $0x8c] sm:$0x1] }
  0x62   : > { %v5304_v59 = vcombine.low %v489_v49, %v499_v55  ;;  %v512_v24 = vrot.slane %v510_v52, 5  ;;  %v516_v61 = vrot.slane %v514_v53, 4  ;;  %v5577_v63 = vrot.slane %v5561_v23, 9 }
  0x63   : > { %6338 = vmatprep.mubr.bf16.mxu0 %v5608_v48  ;;  %v508_v41 = vrot.slane %v507_v56, 4  ;;  %v522_v1 = vrot.slane %v520_v57, 5  ;;  %v2966_v2 = vsel %vm7344_vm5, %v7147_v36, %v2965_v32  ;;  %v525_v3 = vshrl.u32 %v7363_v47, 16 }
  0x64   : > { %6114 = vmatprep.mubr.bf16.mxu1 %v5304_v59  ;;  %v517_v7 = vor.u32 %v516_v61, %v512_v24  ;;  %v2963_v10 = vsel %vm7344_vm5, %v5577_v63, %v2962_v27  ;;  %v528_v11 = vshll.u32 %v7363_v47, 16  ;;  %v534_v12 = vshll.u32 %v7374_v54, 16 }
  0x65   : > { %v513_v8 = vsel %vm7098_vm2, %v508_v41, %v512_v24  ;;  %v5609_v15 = vcombine.low %v2963_v10, %v2966_v2  ;;  %v527_v32 = vrot.slane %v525_v3, 4  ;;  %v538_v36 = vshrl.u32 %v7374_v54, 16  ;;  %v7425_v2 = vld [vmem:[%s7066_s17 + $0x90] sm:$0xf]  ;;  %v7428_v3 = vld [vmem:[%s7066_s17 + $0x94] sm:$0xf] }
  0x66   : > { %v518_v62 = vrot.slane %v517_v7, 4  ;;  %v530_v18 = vrot.slane %v528_v11, 5  ;;  %v536_v26 = vrot.slane %v534_v12, 5  ;;  %v544_v27 = vshll.u32 %v275_v58, 16 }
  0x67   : > { %v540_v30 = vrot.slane %v538_v36, 4  ;;  %v5578_v34 = vrot.slane %v5562_v13, 9  ;;  %v2969_v38 = vrot.slane %v7151_v45, 5  ;;  %v2972_v39 = vrot.slane %v7157_v51, 5  ;;  %v5563_v45 = vld [vmem:[%s7066_s17 + $0x30] sm:$0xe] }
  0x68   : > { %v523_v23 = vsel %vm7098_vm2, %v518_v62, %v522_v1  ;;  %v531_v42 = vor.u32 %v530_v18, %v527_v32  ;;  %v546_v43 = vrot.slane %v544_v27, 5  ;;  %v549_v44 = vshrl.u32 %v7396_v16, 16  ;;  %v277_v62 = vld [vmem:[%s7066_s17 + $0x98] sm:$0x1] }
  0x69   : > { %v5305_v49 = vcombine.low %v513_v8, %v523_v23  ;;  %6339 = vmatmul.mubr.bf16.vlgmr.msra.gmra.mrb[0].mxu0 %v5609_v15  ;;  %v541_v50 = vor.u32 %v540_v30, %v536_v26  ;;  %v2970_v52 = vsel %vm7344_vm5, %v5578_v34, %v2969_v38  ;;  %v2971_v53 = vrot.slane %v2969_v38, 4  ;;  %v6830_v30 = vld [vmem:[%s8859_s1 + $0x198] sm:$0xff]  }
  0x6a   : > { %6371 = vmatpush3.bf16.msra.mxu0 %v7287_v6  ;;  %v532_v51 = vrot.slane %v531_v42, 4  ;;  %v551_v55 = vrot.slane %v549_v44, 4  ;;  %v552_v48 = vshll.u32 %v7396_v16, 16  ;;  %v558_v56 = vshll.u32 %v7404_v40, 16  ;;  %v6828_v6 = vld [vmem:[%s8859_s1 + $0x190] sm:$0xff]  }
  0x6b   : > { %6115 = vmatmul.mubr.bf16.gmra.mrb[16].mxu1 %v5305_v49  ;;  %v542_v57 = vrot.slane %v541_v50, 4  ;;  %v2973_v58 = vsel %vm7344_vm5, %v2971_v53, %v2972_v39  ;;  %v562_v59 = vshrl.u32 %v7404_v40, 16  ;;  %v568_v24 = vshll.u32 %v276_v31, 16  ;;  %6372 = vmatprep.subr.bf16.mxu0 %v6826_v29  ;;  %v5564_v38 = vld [vmem:[%s7066_s17 + $0x3c] sm:$0xe] }
  0x6c   : > { %v537_v61 = vsel %vm7098_vm2, %v532_v51, %v536_v26  ;;  %v5610_v63 = vcombine.low %v2970_v52, %v2973_v58  ;;  %v554_v41 = vrot.slane %v552_v48, 5  ;;  %v560_v1 = vrot.slane %v558_v56, 5  ;;  %v7446_v31 = vld [vmem:[%s7066_s17 + $0x9c] sm:$0xf]  ;;  %v7455_v48 = vld [vmem:[%s7066_s17 + $0xa0] sm:$0xf] }
  0x6d   : > { %v547_v7 = vsel %vm7098_vm2, %v542_v57, %v546_v43  ;;  %v564_v10 = vrot.slane %v562_v59, 4  ;;  %v570_v11 = vrot.slane %v568_v24, 5  ;;  %v5579_v12 = vrot.slane %v5563_v45, 9  ;;  %v6834_v56 = vld [vmem:[%s8859_s1 + $0x1a0] sm:$0xff]  }
  0x6e   : > { %v5306_v13 = vcombine.low %v537_v61, %v547_v7  ;;  %6342 = vmatprep.mubr.bf16.mxu0 %v5610_v63  ;;  %v555_v8 = vor.u32 %v554_v41, %v551_v55  ;;  %v2976_v15 = vrot.slane %v7182_v33, 5  ;;  %v2979_v32 = vrot.slane %v7193_v46, 5  ;;  %6373 = vmatpush3.bf16.msra.mxu0 %v6826_v29  ;;  %v278_v61 = vld [vmem:[%s7066_s17 + $0xa4] sm:$0x1] }
  0x6f   : > { %v565_v36 = vor.u32 %v564_v10, %v560_v1  ;;  %v573_v18 = vshrl.u32 %v7425_v2, 16  ;;  %v576_v26 = vshll.u32 %v7425_v2, 16  ;;  %v582_v27 = vshll.u32 %v7428_v3, 16  ;;  %6374 = vmatprep.subr.bf16.mxu0 %v6828_v6 }
  0x70   : > { %6118 = vmatprep.mubr.bf16.mxu1 %v5306_v13  ;;  %v556_v34 = vrot.slane %v555_v8, 4  ;;  %v2977_v33 = vsel %vm7344_vm5, %v5579_v12, %v2976_v15  ;;  %v2978_v46 = vrot.slane %v2976_v15, 4  ;;  %v586_v29 = vshrl.u32 %v7428_v3, 16  ;;  %v5565_v15 = vld [vmem:[%s7066_s17 + $0x48] sm:$0xe] }
  0x71   : > { %v566_v39 = vrot.slane %v565_v36, 4  ;;  %v575_v23 = vrot.slane %v573_v18, 4  ;;  %v578_v42 = vrot.slane %v576_v26, 5  ;;  %v584_v43 = vrot.slane %v582_v27, 5  ;;  %v7480_v27 = vld [vmem:[%s7066_s17 + $0xa8] sm:$0xf] }
  0x72   : > { %v561_v44 = vsel %vm7098_vm2, %v556_v34, %v560_v1  ;;  %v2980_v49 = vsel %vm7344_vm5, %v2978_v46, %v2979_v32  ;;  %v588_v50 = vrot.slane %v586_v29, 4  ;;  %v592_v52 = vshll.u32 %v277_v62, 16  ;;  %6375 = vmatpush3.bf16.msra.mxu0 %v6828_v6  ;;  %v6838_v32 = vld [vmem:[%s8859_s1 + $0x1a8] sm:$0xff]  }
  0x73   : > { %v571_v53 = vsel %vm7098_vm2, %v566_v39, %v570_v11  ;;  %v5611_v45 = vcombine.low %v2977_v33, %v2980_v49  ;;  %v579_v51 = vor.u32 %v578_v42, %v575_v23  ;;  %v5580_v55 = vrot.slane %v5564_v38, 9  ;;  %6376 = vmatprep.subr.bf16.mxu0 %v6830_v30  ;;  %v7483_v29 = vld [vmem:[%s7066_s17 + $0xac] sm:$0xf] }
  0x74   : > { %v5307_v57 = vcombine.low %v561_v44, %v571_v53  ;;  %v589_v58 = vor.u32 %v588_v50, %v584_v43  ;;  %v594_v59 = vrot.slane %v592_v52, 5  ;;  %v2983_v24 = vrot.slane %v7216_v19, 5  ;;  %v5566_v53 = vld [vmem:[%s7066_s17 + $0x54] sm:$0xe] }
  0x75   : > { %6343 = vmatmul.mubr.bf16.gmra.mrb[4].mxu0 %v5611_v45  ;;  %v580_v6 = vrot.slane %v579_v51, 4  ;;  %v2986_v63 = vrot.slane %v7224_v28, 5  ;;  %v597_v41 = vshrl.u32 %v7446_v31, 16  ;;  %v600_v1 = vshll.u32 %v7446_v31, 16  ;;  %v6842_v45 = vld [vmem:[%s8859_s1 + $0x1b0] sm:$0xff]  }
  0x76   : > { %6119 = vmatmul.mubr.bf16.gmra.mrb[20].mxu1 %v5307_v57  ;;  %v590_v7 = vrot.slane %v589_v58, 4  ;;  %v2984_v10 = vsel %vm7344_vm5, %v5580_v55, %v2983_v24  ;;  %v2985_v11 = vrot.slane %v2983_v24, 4  ;;  %v606_v12 = vshll.u32 %v7455_v48, 16  ;;  %6377 = vmatpush3.bf16.msra.mxu0 %v6830_v30 }
  0x77   : > { %v585_v19 = vsel %vm7098_vm2, %v580_v6, %v584_v43  ;;  %v599_v13 = vrot.slane %v597_v41, 4  ;;  %v602_v28 = vrot.slane %v600_v1, 5  ;;  %v610_v8 = vshrl.u32 %v7455_v48, 16  ;;  %6378 = vmatprep.subr.bf16.mxu0 %v6834_v56  ;;  %v279_v43 = vld [vmem:[%s7066_s17 + $0xb0] sm:$0x1] }
  0x78   : > { %v595_v36 = vsel %vm7098_vm2, %v590_v7, %v594_v59  ;;  %v2987_v62 = vsel %vm7344_vm5, %v2985_v11, %v2986_v63  ;;  %v608_v18 = vrot.slane %v606_v12, 5  ;;  %v616_v26 = vshll.u32 %v278_v61, 16  ;;  %v7503_v41 = vld [vmem:[%s7066_s17 + $0xb4] sm:$0xf]  ;;  %v7508_v12 = vld [vmem:[%s7066_s17 + $0xb8] sm:$0xf] }
  0x79   : > { %v5308_v30 = vcombine.low %v585_v19, %v595_v36  ;;  %v5612_v34 = vcombine.low %v2984_v10, %v2987_v62  ;;  %v603_v33 = vor.u32 %v602_v28, %v599_v13  ;;  %v612_v46 = vrot.slane %v610_v8, 4  ;;  %v280_v19 = vld [vmem:[%s7066_s17 + $0xbc] sm:$0x1] }
  0x7a   : > { %v618_v38 = vrot.slane %v616_v26, 5  ;;  %v5581_v39 = vrot.slane %v5565_v15, 9  ;;  %v2990_v23 = vrot.slane %v7251_v14, 5  ;;  %v2993_v42 = vrot.slane %v7257_v22, 5  ;;  %6379 = vmatpush3.bf16.msra.mxu0 %v6834_v56  ;;  %v6846_v13 = vld [vmem:[%s8859_s1 + $0x1b8] sm:$0xff]  }
  0x7b   : > { %6122 = vmatprep.mubr.bf16.mxu1 %v5308_v30  ;;  %6346 = vmatprep.mubr.bf16.mxu0 %v5612_v34  ;;  %v604_v44 = vrot.slane %v603_v33, 4  ;;  %v613_v49 = vor.u32 %v612_v46, %v608_v18  ;;  %v621_v50 = vshrl.u32 %v7480_v27, 16  ;;  %v624_v52 = vshll.u32 %v7480_v27, 16  ;;  %v5567_v30 = vld [vmem:[%s7066_s17 + $0x60] sm:$0xe] }
  0x7c   : > { %v2991_v14 = vsel %vm7344_vm5, %v5581_v39, %v2990_v23  ;;  %v2992_v22 = vrot.slane %v2990_v23, 4  ;;  %v630_v51 = vshll.u32 %v7483_v29, 16  ;;  %v634_v55 = vshrl.u32 %v7483_v29, 16  ;;  %6380 = vmatprep.subr.bf16.mxu0 %v6838_v32  ;;  %v5497_v39 = vld [vmem:[%s7066_s17 + $0x70] sm:$0xf] }
  0x7d   : > { %v609_v56 = vsel %vm7098_vm2, %v604_v44, %v608_v18  ;;  %v614_v57 = vrot.slane %v613_v49, 4  ;;  %v623_v58 = vrot.slane %v621_v50, 4  ;;  %v626_v59 = vrot.slane %v624_v52, 5  ;;  %v7530_v44 = vld [vmem:[%s8859_s1 + $0x1c0] sm:$0xff]  }
  0x7e   : > { %v2994_v24 = vsel %vm7344_vm5, %v2992_v22, %v2993_v42  ;;  %v632_v61 = vrot.slane %v630_v51, 5  ;;  %v636_v6 = vrot.slane %v634_v55, 4  ;;  %v640_v63 = vshll.u32 %v279_v43, 16  ;;  %6381 = vmatpush3.bf16.msra.mxu0 %v6838_v32  ;;  %v5568_v43 = vld [vmem:[%s7066_s17 + $0x6c] sm:$0xe] }
  0x7f   : > { %v619_v1 = vsel %vm7098_vm2, %v614_v57, %v618_v38  ;;  %v5613_v7 = vcombine.low %v2991_v14, %v2994_v24  ;;  %v627_v10 = vor.u32 %v626_v59, %v623_v58  ;;  %v5582_v11 = vrot.slane %v5566_v53, 9  ;;  %6382 = vmatprep.subr.bf16.mxu0 %v6842_v45  ;;  %v5498_v55 = vld [vmem:[%s7066_s17 + $0x74] sm:$0x1]  ;;  %v5569_v24 = vld [vmem:[%s7066_s17 + $0x78] sm:$0xe] }
  0x80   : > { %v5309_v28 = vcombine.low %v609_v56, %v619_v1  ;;  %v637_v8 = vor.u32 %v636_v6, %v632_v61  ;;  %v642_v15 = vrot.slane %v640_v63, 5  ;;  %v2997_v32 = vrot.slane %v7282_v0, 5 }
  0x81   : > { %6347 = vmatmul.mubr.bf16.gmra.mrb[8].mxu0 %v5613_v7  ;;  %v628_v36 = vrot.slane %v627_v10, 4  ;;  %v3000_v62 = vrot.slane %v7294_v20, 5  ;;  %v645_v18 = vshrl.u32 %v7503_v41, 16  ;;  %v648_v26 = vshll.u32 %v7503_v41, 16 }
  0x82   : > { %6123 = vmatmul.mubr.bf16.gmra.mrb[24].mxu1 %v5309_v28  ;;  %v638_v34 = vrot.slane %v637_v8, 4  ;;  %v2998_v33 = vsel %vm7344_vm5, %v5582_v11, %v2997_v32  ;;  %v2999_v46 = vrot.slane %v2997_v32, 4  ;;  %v654_v38 = vshll.u32 %v7508_v12, 16  ;;  %6383 = vmatpush3.bf16.msra.mxu0 %v6842_v45  ;;  %v7543_v11 = vld [vmem:[%s7066_s17 + $0x7c] sm:$0xf] }
  0x83   : > { %v633_v0 = vsel %vm7098_vm2, %v628_v36, %v632_v61  ;;  %v647_v20 = vrot.slane %v645_v18, 4  ;;  %v650_v23 = vrot.slane %v648_v26, 5  ;;  %v658_v42 = vshrl.u32 %v7508_v12, 16  ;;  %6384 = vmatprep.subr.bf16.mxu0 %v6846_v13  ;;  %v6915_v36 = vld [vmem:[%s7066_s17] sm:$0xf] }
  0x84   : > { %v643_v49 = vsel %vm7098_vm2, %v638_v34, %v642_v15  ;;  %v3001_v50 = vsel %vm7344_vm5, %v2999_v46, %v3000_v62  ;;  %v656_v52 = vrot.slane %v654_v38, 5  ;;  %v664_v53 = vshll.u32 %v280_v19, 16  ;;  %v5503_v15 = vld [vmem:[%s7066_s17 + $0x88] sm:$0xf]  ;;  %v7558_v62 = vld [vmem:[%s7066_s17 + $0x4] sm:$0xf] }
  0x85   : > { %v5310_v45 = vcombine.low %v633_v0, %v643_v49  ;;  %v5614_v14 = vcombine.low %v2998_v33, %v3001_v50  ;;  %v651_v22 = vor.u32 %v650_v23, %v647_v20  ;;  %v660_v51 = vrot.slane %v658_v42, 4  ;;  %v5504_v26 = vld [vmem:[%s7066_s17 + $0x8c] sm:$0x1]  ;;  %v5507_v23 = vld [vmem:[%s7066_s17 + $0x98] sm:$0x1] }
  0x86   : > { %v666_v56 = vrot.slane %v664_v53, 5  ;;  %v5583_v57 = vrot.slane %v5567_v30, 9  ;;  %v3004_v58 = vrot.slane %v7309_v60, 5  ;;  %v3007_v59 = vrot.slane %v7318_v17, 5  ;;  %6385 = vmatpush3.bf16.msra.mxu0 %v6846_v13  ;;  %v7546_v17 = vld [vmem:[%s7066_s17 + $0x80] sm:$0x1] }
  0x87   : > { %6126 = vmatprep.mubr.bf16.mxu1 %v5310_v45  ;;  %6350 = vmatprep.mubr.bf16.mxu0 %v5614_v14  ;;  %v652_v61 = vrot.slane %v651_v22, 4  ;;  %v661_v6 = vor.u32 %v660_v51, %v656_v52  ;;  %v5584_v63 = vrot.slane %v5568_v43, 9  ;;  %v3011_v1 = vrot.slane %v5497_v39, 5  ;;  %v5570_v30 = vld [vmem:[%s7066_s17 + $0x84] sm:$0xe] }
  0x88   : > { %v3005_v7 = vsel %vm7344_vm5, %v5583_v57, %v3004_v58  ;;  %v3006_v10 = vrot.slane %v3004_v58, 4  ;;  %v3014_v60 = vrot.slane %v5498_v55, 5  ;;  %6418 = vmatprep.subr.bf16.mxu0 %v7530_v44  ;;  %v5320_v18 = vcombine.low %v6915_v36, %v7558_v62  ;;  %v5506_v39 = vld [vmem:[%s7066_s17 + $0x94] sm:$0xf]  ;;  %v5571_v42 = vld [vmem:[%s7066_s17 + $0x90] sm:$0xe] }
  0x89   : > { %v657_v19 = vsel %vm7098_vm2, %v652_v61, %v656_v52  ;;  %v662_v13 = vrot.slane %v661_v6, 4  ;;  %v3012_v28 = vsel %vm7344_vm5, %v5584_v63, %v3011_v1  ;;  %v3013_v8 = vrot.slane %v3011_v1, 4  ;;  %v5572_v50 = vld [vmem:[%s7066_s17 + $0x9c] sm:$0xe]  ;;  %v5509_v14 = vld [vmem:[%s7066_s17 + $0xa0] sm:$0xf] }
  0x8a   : > { %v3008_v32 = vsel %vm7344_vm5, %v3006_v10, %v3007_v59  ;;  %v5585_v38 = vrot.slane %v5569_v24, 9  ;;  %v3018_v43 = vrot.slane %v7543_v11, 5  ;;  %v3021_v49 = vrot.slane %v7546_v17, 5  ;;  %v5510_v22 = vld [vmem:[%s7066_s17 + $0xa4] sm:$0x1] }
  0x8b   : > { %v667_v34 = vsel %vm7098_vm2, %v662_v13, %v666_v56  ;;  %v5615_v33 = vcombine.low %v3005_v7, %v3008_v32  ;;  %v3015_v46 = vsel %vm7344_vm5, %v3013_v8, %v3014_v60  ;;  %v5586_v52 = vrot.slane %v5570_v30, 9  ;;  %v5512_v59 = vld [vmem:[%s7066_s17 + $0xac] sm:$0xf]  ;;  %v7582_v61 = vld [vmem:[%s7066_s17 + $0x10] sm:$0xf] }
  0x8c   : > { %v5311_v0 = vcombine.low %v657_v19, %v667_v34  ;;  %v5616_v20 = vcombine.low %v3012_v28, %v3015_v46  ;;  %v3025_v53 = vrot.slane %v5503_v15, 5  ;;  %v3028_v45 = vrot.slane %v5504_v26, 5  ;;  %v6917_v24 = vld [vmem:[%s7066_s17 + $0xc] sm:$0xf]  ;;  %v6919_v8 = vld [vmem:[%s7066_s17 + $0x18] sm:$0xf] }
  0x8d   : > { %6351 = vmatmul.mubr.bf16.gmra.mrb[12].mxu0 %v5615_v33  ;;  %v3019_v51 = vsel %vm7344_vm5, %v5585_v38, %v3018_v43  ;;  %v3020_v55 = vrot.slane %v3018_v43, 4  ;;  %v3032_v58 = vrot.slane %v5506_v39, 5  ;;  %v5321_v6 = vcombine.low %v6917_v24, %v7582_v61  ;;  %v6837_v19 = vld [vmem:[%s8859_s1 + $0x88] sm:$0xff]   ;;  %v7594_v15 = vld [vmem:[%s7066_s17 + $0x1c] sm:$0xf] }
  0x8e   : > { %6127 = vmatmul.mubr.bf16.gmra.mrb[28].mxu1 %v5311_v0  ;;  %6354 = vmatprep.mubr.bf16.mxu0 %v5616_v20  ;;  %v3026_v56 = vsel %vm7344_vm5, %v5586_v52, %v3025_v53  ;;  %v3027_v57 = vrot.slane %v3025_v53, 4  ;;  %v5587_v1 = vrot.slane %v5571_v42, 9  ;;  %v3035_v7 = vrot.slane %v5507_v23, 5  ;;  %v5513_v30 = vld [vmem:[%s7066_s17 + $0xb0] sm:$0x1] }
  0x8f   : > { %6146 = vmatprep.mubr.bf16.mxu1 %v5320_v18  ;;  %v3022_v63 = vsel %vm7344_vm5, %v3020_v55, %v3021_v49  ;;  %v3034_v13 = vrot.slane %v3032_v58, 4  ;;  %v5588_v28 = vrot.slane %v5572_v50, 9  ;;  %v5322_v32 = vcombine.low %v6919_v8, %v7594_v15  ;;  %v5573_v34 = vld [vmem:[%s7066_s17 + $0xa8] sm:$0xe]  ;;  %v5515_v33 = vld [vmem:[%s7066_s17 + $0xb8] sm:$0xf] }
  0x90   : > { %v5617_v10 = vcombine.low %v3019_v51, %v3022_v63  ;;  %v3029_v60 = vsel %vm7344_vm5, %v3027_v57, %v3028_v45  ;;  %v3039_v18 = vrot.slane %v5509_v14, 5  ;;  %v3042_v26 = vrot.slane %v5510_v22, 5  ;;  %v5516_v20 = vld [vmem:[%s7066_s17 + $0xbc] sm:$0x1]  ;;  %v5574_v23 = vld [vmem:[%s7066_s17 + $0xb4] sm:$0xe] }
  0x91   : > { %v5618_v36 = vcombine.low %v3026_v56, %v3029_v60  ;;  %v3046_v38 = vrot.slane %v5512_v59, 5  ;;  %v3033_v39 = vsel %vm7344_vm5, %v5587_v1, %v3032_v58  ;;  %v3036_v0 = vsel %vm7344_vm5, %v3034_v13, %v3035_v7  ;;  %v6841_v50 = vld [vmem:[%s8859_s1 + $0x90] sm:$0xff]   ;;  %v5518_v53 = vld [vmem:[%s7066_s17 + $0xc4] sm:$0xf]  ;;  %v7617_v51 = vld [vmem:[%s7066_s17 + $0x28] sm:$0xf] }
  0x92   : > { %v3041_v46 = vrot.slane %v3039_v18, 4  ;;  %v3040_v42 = vsel %vm7344_vm5, %v5588_v28, %v3039_v18  ;;  %v3053_v49 = vrot.slane %v5515_v33, 5  ;;  %v5589_v52 = vrot.slane %v5573_v34, 9  ;;  %v6921_v22 = vld [vmem:[%s7066_s17 + $0x24] sm:$0xf]  ;;  %v6845_v1 = vld [vmem:[%s8859_s1 + $0x98] sm:$0xff]  }
  0x93   : > { %v5619_v45 = vcombine.low %v3033_v39, %v3036_v0  ;;  %v3048_v14 = vrot.slane %v3046_v38, 4  ;;  %v5323_v55 = vcombine.low %v6921_v22, %v7617_v51  ;;  %v6923_v57 = vld [vmem:[%s7066_s17 + $0x30] sm:$0xf]  ;;  %v7622_v58 = vld [vmem:[%s7066_s17 + $0x34] sm:$0xf]  ;;  %v5590_v24 = vrot.slane %v5574_v23, 9 }
  0x94   : > { %v3043_v43 = vsel %vm7344_vm5, %v3041_v46, %v3042_v26  ;;  %v5324_v59 = vcombine.low %v6923_v57, %v7622_v58  ;;  %v3056_v63 = vrot.slane %v5516_v20, 5  ;;  %v5575_v7 = vld [vmem:[%s7066_s17 + $0xc0] sm:$0xe]  ;;  %v3047_v60 = vsel %vm7344_vm5, %v5589_v52, %v3046_v38  ;;  %v5519_v8 = vld [vmem:[%s7066_s17 + $0xc8] sm:$0x1]  ;;  %v6848_v22 = vld [vmem:[%s7066_s17 + $0x18] sm:$0xff]  }
  0x95   : > { %6355 = vmatmul.mubr.bf16.gmra.mrb[16].mxu0 %v5617_v10  ;;  %v5620_v56 = vcombine.low %v3040_v42, %v3043_v43  ;;  %v3060_v10 = vrot.slane %v5518_v53, 5  ;;  %v3054_v13 = vsel %vm7344_vm5, %v5590_v24, %v3053_v49  ;;  %v5591_v18 = vrot.slane %v5575_v7, 9  ;;  %v6925_v26 = vld [vmem:[%s7066_s17 + $0x3c] sm:$0xf]  ;;  %v6927_v39 = vld [vmem:[%s7066_s17 + $0x48] sm:$0xf] }
  0x96   : > { %6147 = vmatmul.mubr.bf16.vlgmr.msra.gmra.mrb[0].mxu1 %v5321_v6  ;;  %6358 = vmatprep.mubr.bf16.mxu0 %v5618_v36  ;;  %v3055_v6 = vrot.slane %v3053_v49, 4  ;;  %v3063_v38 = vrot.slane %v5519_v8, 5  ;;  %v7648_v0 = vld [vmem:[%s7066_s17 + $0x4c] sm:$0xf]  ;;  %v6862_v49 = vld [vmem:[%s8859_s1 + $0xb0] sm:$0xff]   ;;  %v2413_v52 = vshrl.u32 %v7543_v11, 16 }
  0x97   : > { %6179 = vmatpush3.bf16.msra.mxu1 %v7268_v4  ;;  %6150 = vmatprep.mubr.bf16.mxu1 %v5322_v32  ;;  %v3049_v4 = vrot.slane %v5513_v30, 5  ;;  %v6850_v32 = vld [vmem:[%s8859_s1 + $0xa0] sm:$0xff]   ;;  %v3062_v46 = vrot.slane %v3060_v10, 4  ;;  %v5326_v20 = vcombine.low %v6927_v39, %v7648_v0  ;;  %v6856_v23 = vld [vmem:[%s8859_s1 + $0xa8] sm:$0xff]   ;;  %v3061_v42 = vsel %vm7344_vm5, %v5591_v18, %v3060_v10  ;;  %v6854_v18 = vld [vmem:[%s7066_s17 + $0x30] sm:$0xff]  }
  0x98   : > { %6180 = vmatprep.subr.bf16.mxu1 %v6837_v19  ;;  %v3057_v28 = vsel %vm7344_vm5, %v3055_v6, %v3056_v63  ;;  %v7643_v30 = vld [vmem:[%s7066_s17 + $0x40] sm:$0xf]  ;;  %v7676_v57 = vrot.slane %v2413_v52, 4  ;;  %v6851_v6 = vld [vmem:[%s7066_s17 + $0x24] sm:$0xff]   ;;  %v1323_v7 = vrot.slane %v7582_v61, 5  ;;  %v2419_v8 = vshll.u32 %v7546_v17, 16 }
  0x99   : > { %v5325_v34 = vcombine.low %v6925_v26, %v7643_v30  ;;  %v5622_v33 = vcombine.low %v3054_v13, %v3057_v28  ;;  %v3064_v43 = vsel %vm7344_vm5, %v3062_v46, %v3063_v38  ;;  %v1263_v63 = vld [vmem:[%s7066_s17] sm:$0xe]  ;;  %v1264_v10 = vld [vmem:[%s7066_s17 + $0xc] sm:$0xe]  ;;  %v1330_v13 = vrot.slane %v7594_v15, 5 }
  0x9a   : > { %v5623_v53 = vcombine.low %v3061_v42, %v3064_v43  ;;  %v1266_v61 = vld [vmem:[%s7066_s17 + $0x24] sm:$0xe]  ;;  %v5331_v15 = vcombine.low %v7396_v16, %v7404_v40  ;;  %v5332_v26 = vcombine.low %v7425_v2, %v7428_v3  ;;  %v5344_v17 = vrot.slane %v1263_v63, 9  ;;  %v6933_v38 = vld [vmem:[%s7066_s17 + $0x20] sm:$0x1]  ;;  %v6863_v2 = vld [vmem:[%s7066_s17 + $0x54] sm:$0xff]  }
  0x9b   : > { %6181 = vmatpush3.bf16.msra.mxu1 %v6837_v19  ;;  %v3050_v19 = vsel %vm7344_vm5, %v3048_v14, %v3049_v4  ;;  %v7665_v14 = vld [vmem:[%s7066_s17 + $0x58] sm:$0xf]  ;;  %v1332_v46 = vrot.slane %v1330_v13, 4  ;;  %v1333_v39 = vrot.slane %v6933_v38, 5  ;;  %v6934_v43 = vld [vmem:[%s7066_s17 + $0x2c] sm:$0x1] }
  0x9c   : > { %6182 = vmatprep.subr.bf16.mxu1 %v6841_v50  ;;  %v5621_v36 = vcombine.low %v3047_v60, %v3050_v19  ;;  %v7691_v60 = vld [vmem:[%s8859_s1 + $0xc0] sm:$0xff]   ;;  %v1265_v19 = vld [vmem:[%s7066_s17 + $0x18] sm:$0xe]  ;;  %v6937_v38 = vld [vmem:[%s7066_s17 + $0x50] sm:$0x1]  ;;  %v1365_v16 = vrot.slane %v7665_v14, 5 }
  0x9d   : > { %6359 = vmatmul.mubr.bf16.gmra.mrb[20].mxu0 %v5619_v45  ;;  %v6929_v45 = vld [vmem:[%s7066_s17 + $0x54] sm:$0xf]  ;;  %v7814_v40 = vld [vmem:[%s7066_s17 + $0x64] sm:$0xf] }
  0x9e   : > { %6151 = vmatmul.mubr.bf16.gmra.mrb[4].mxu1 %v5323_v55  ;;  %6362 = vmatprep.mubr.bf16.mxu0 %v5620_v56  ;;  %v5327_v4 = vcombine.low %v6929_v45, %v7665_v14  ;;  %v5328_v55 = vcombine.low %v7322_v25, %v7325_v35  ;;  %v6868_v56 = vld [vmem:[%s8859_s1 + $0xb8] sm:$0xff]   ;;  %v6932_v25 = vld [vmem:[%s7066_s17 + $0x14] sm:$0x1]  ;;  %v6866_v3 = vld [vmem:[%s7066_s17 + $0x60] sm:$0xff]  }
  0x9f   : > { %6154 = vmatprep.mubr.bf16.mxu1 %v5324_v59  ;;  %6183 = vmatpush3.bf16.msra.mxu1 %v6841_v50  ;;  %v2409_v50 = vshll.u32 %v7543_v11, 16  ;;  %v7679_v59 = vld [vmem:[%s7066_s17 + $0x8] sm:$0x1]  ;;  %v1326_v35 = vrot.slane %v6932_v25, 5 }
  0xa0   : > { %6184 = vmatprep.subr.bf16.mxu1 %v6845_v1  ;;  %v1319_v24 = vrot.slane %v7679_v59, 5 }
  0xa1   : > { %v7674_v11 = vrot.slane %v2409_v50, 5 }
  0xa3   : > { %6185 = vmatpush3.bf16.msra.mxu1 %v6845_v1  ;;  %v1316_v1 = vrot.slane %v7558_v62, 5  ;;  %v5329_v62 = vcombine.low %v7340_v5, %v7352_v21  ;;  %v5345_v21 = vrot.slane %v1264_v10, 9  ;;  %v5704_v10 = vld [vmem:[%s7066_s17 + $0x18] sm:$0xf] }
  0xa4   : > { %6186 = vmatprep.subr.bf16.mxu1 %v6850_v32 }
  0xa5   : > { %6363 = vmatmul.mubr.bf16.gmra.mrb[24].mxu0 %v5621_v36  ;;  %v5330_v36 = vcombine.low %v7363_v47, %v7374_v54  ;;  %v1318_v5 = vrot.slane %v1316_v1, 4  ;;  %v6858_v47 = vld [vmem:[%s8859_s1 + $0x1c8] sm:$0xff]   ;;  %v5346_v54 = vrot.slane %v1265_v19, 9  ;;  %v7734_v59 = vsel %vm7344_vm5, %v5344_v17, %v1316_v1  ;;  %v5705_v19 = vld [vmem:[%s7066_s17 + $0x1c] sm:$0xf] }
  0xa6   : > { %6155 = vmatmul.mubr.bf16.gmra.mrb[8].mxu1 %v5325_v34  ;;  %6366 = vmatprep.mubr.bf16.mxu0 %v5622_v33  ;;  %v1344_v34 = vrot.slane %v7622_v58, 5  ;;  %v1325_v33 = vrot.slane %v1323_v7, 4  ;;  %v5347_v58 = vrot.slane %v1266_v61, 9  ;;  %v1358_v1 = vrot.slane %v7648_v0, 5  ;;  %v6860_v0 = vld [vmem:[%s7066_s17 + $0x48] sm:$0xff]  }
  0xa7   : > { %6158 = vmatprep.mubr.bf16.mxu1 %v5326_v20  ;;  %6187 = vmatpush3.bf16.msra.mxu1 %v6850_v32  ;;  %v1337_v32 = vrot.slane %v7617_v51, 5  ;;  %v1267_v51 = vld [vmem:[%s7066_s17 + $0x30] sm:$0xe]  ;;  %v5333_v20 = vcombine.low %v7446_v31, %v7455_v48  ;;  %v7742_v25 = vsel %vm7344_vm5, %v1318_v5, %v1319_v24  ;;  %v7750_v63 = vsel %vm7344_vm5, %v5346_v54, %v1330_v13  ;;  %v1269_v13 = vld [vmem:[%s7066_s17 + $0x48] sm:$0xe] }
  0xa8   : > { %6188 = vmatprep.subr.bf16.mxu1 %v6856_v23  ;;  %v5348_v50 = vrot.slane %v1267_v51, 9  ;;  %v1346_v52 = vrot.slane %v1344_v34, 4  ;;  %v3823_v5 = vshrl.u32 %v5704_v10, 16  ;;  %v3836_v51 = vshrl.u32 %v5705_v19, 16  ;;  %v6869_v48 = vld [vmem:[%s7066_s17 + $0x6c] sm:$0xff]  }
  0xa9   : > { %v1339_v42 = vrot.slane %v1337_v32, 4  ;;  %v7762_v24 = vsel %vm7344_vm5, %v5347_v58, %v1337_v32  ;;  %v6936_v32 = vld [vmem:[%s7066_s17 + $0x44] sm:$0x1]  ;;  %v5350_v54 = vrot.slane %v1269_v13, 9  ;;  %v5708_v13 = vld [vmem:[%s7066_s17 + $0x28] sm:$0xf] }
  0xaa   : > { %v7772_v61 = vsel %vm7344_vm5, %v5348_v50, %v1344_v34  ;;  %v1354_v17 = vrot.slane %v6936_v32, 5  ;;  %v5706_v50 = vld [vmem:[%s7066_s17 + $0x20] sm:$0x1]  ;;  %v1271_v32 = vld [vmem:[%s7066_s17 + $0x60] sm:$0xe] }
  0xab   : > { %6189 = vmatpush3.bf16.msra.mxu1 %v6856_v23  ;;  %v5334_v23 = vcombine.low %v7480_v27, %v7483_v29 }
  0xac   : > { %6190 = vmatprep.subr.bf16.mxu1 %v6862_v49 }
  0xad   : > { %6367 = vmatmul.mubr.bf16.gmra.mrb[28].mxu0 %v5623_v53  ;;  %v6935_v53 = vld [vmem:[%s7066_s17 + $0x38] sm:$0x1] }
  0xae   : > { %6159 = vmatmul.mubr.bf16.gmra.mrb[12].mxu1 %v5327_v4  ;;  %6386 = vmatprep.mubr.bf16.mxu0 %v6848_v22  ;;  %v1347_v45 = vrot.slane %v6935_v53, 5  ;;  %v1268_v4 = vld [vmem:[%s7066_s17 + $0x3c] sm:$0xe]  ;;  %v1351_v22 = vrot.slane %v7643_v30, 5  ;;  %v7738_v30 = vsel %vm7344_vm5, %v5345_v21, %v1323_v7  ;;  %v3826_v21 = vshll.u32 %v5704_v10, 16  ;;  %v6874_v53 = vld [vmem:[%s8859_s1 + $0x1e0] sm:$0xff]  }
  0xaf   : > { %6162 = vmatprep.mubr.bf16.mxu1 %v5328_v55  ;;  %6191 = vmatpush3.bf16.msra.mxu1 %v6862_v49  ;;  %v1340_v49 = vrot.slane %v6934_v43, 5  ;;  %v7725_v55 = vrot.slane %v2419_v8, 5  ;;  %v6857_v7 = vld [vmem:[%s7066_s17 + $0x3c] sm:$0xff]   ;;  %v7758_v8 = vsel %vm7344_vm5, %v1332_v46, %v1333_v39  ;;  %v1360_v46 = vrot.slane %v1358_v1, 4  ;;  %v5710_v43 = vld [vmem:[%s7066_s17 + $0x30] sm:$0xf] }
  0xb0   : > { %6192 = vmatprep.subr.bf16.mxu1 %v6868_v56  ;;  %v1361_v39 = vrot.slane %v6937_v38, 5  ;;  %v3825_v10 = vrot.slane %v3823_v5, 4 }
  0xb1   : > { %8881 = vst [vmem:[#allocation2_spill] sm:$0xff] %v7725_v55 }
  0xb3   : > { %6193 = vmatpush3.bf16.msra.mxu1 %v6868_v56  ;;  %v6864_v56 = vld [vmem:[%s8859_s1 + $0x1d0] sm:$0xff]  }
  0xb4   : > { %6226 = vmatprep.subr.bf16.mxu1 %v7691_v60 }
  0xb5   : > { %6387 = vmatmul.mubr.bf16.vlgmr.msra.gmra.mrb[0].mxu0 %v6851_v6  ;;  %v7746_v6 = vsel %vm7344_vm5, %v1325_v33, %v1326_v35  ;;  %v7766_v35 = vsel %vm7344_vm5, %v1339_v42, %v1340_v49  ;;  %v3832_v33 = vshll.u32 %v5705_v19, 16  ;;  %v3828_v19 = vrot.slane %v3826_v21, 5  ;;  %v1272_v21 = vld [vmem:[%s7066_s17 + $0x6c] sm:$0xe] }
  0xb6   : > { %6163 = vmatmul.mubr.bf16.gmra.mrb[16].mxu1 %v5329_v62  ;;  %6419 = vmatpush3.bf16.msra.mxu0 %v7530_v44  ;;  %v5349_v62 = vrot.slane %v1268_v4, 9  ;;  %v5353_v58 = vrot.slane %v1272_v21, 9 }
  0xb7   : > { %6166 = vmatprep.mubr.bf16.mxu1 %v5330_v36  ;;  %6390 = vmatprep.mubr.bf16.mxu0 %v6854_v18  ;;  %v7776_v36 = vsel %vm7344_vm5, %v1346_v52, %v1347_v45  ;;  %v1353_v18 = vrot.slane %v1351_v22, 4  ;;  %v5707_v52 = vld [vmem:[%s7066_s17 + $0x24] sm:$0xf]  ;;  %v3860_v45 = vshrl.u32 %v5708_v13, 16 }
  0xb8   : > { %6420 = vmatprep.subr.bf16.mxu0 %v6858_v47  ;;  %v7793_v49 = vsel %vm7344_vm5, %v5349_v62, %v1351_v22  ;;  %v7810_v22 = vld [vmem:[%s7066_s17 + $0x54] sm:$0xe]  ;;  %v3838_v62 = vrot.slane %v3836_v51, 4  ;;  %v3847_v38 = vshrl.u32 %v5707_v52, 16  ;;  %v3850_v28 = vshll.u32 %v5707_v52, 16 }
  0xb9   : > { %v7807_v4 = vsel %vm7344_vm5, %v1353_v18, %v1354_v17  ;;  %v3842_v17 = vshll.u32 %v5706_v50, 16  ;;  %v5351_v5 = vrot.slane %v7810_v22, 9  ;;  %v6878_v50 = vld [vmem:[%s8859_s1 + $0x1e8] sm:$0xff]   ;;  %v1367_v52 = vrot.slane %v1365_v16, 4 }
  0xba   : > { %6421 = vmatpush3.bf16.msra.mxu0 %v6858_v47  ;;  %v6870_v47 = vld [vmem:[%s8859_s1 + $0x1d8] sm:$0xff]   ;;  %v3829_v22 = vor.u32 %v3828_v19, %v3825_v10  ;;  %v3849_v34 = vrot.slane %v3847_v38, 4  ;;  %v3852_v44 = vrot.slane %v3850_v28, 5  ;;  %v6942_v10 = vld [vmem:[%s7066_s17 + $0x74] sm:$0x1]  ;;  %v3862_v28 = vrot.slane %v3860_v45, 4 }
  0xbb   : > { %6422 = vmatprep.subr.bf16.mxu0 %v6864_v56  ;;  %v7848_v42 = vrot.slane %v3842_v17, 5  ;;  %v1382_v19 = vrot.slane %v6942_v10, 5  ;;  %v3871_v38 = vshrl.u32 %v5710_v43, 16  ;;  %v7873_v27 = vsel %vm7344_vm5, %v5351_v5, %v1365_v16 }
  0xbc   : > { %v3830_v21 = vrot.slane %v3829_v22, 4 }
  0xbd   : > { %6391 = vmatmul.mubr.bf16.gmra.mrb[4].mxu0 %v6857_v7  ;;  %v7820_v7 = vrot.slane %v3832_v33, 5  ;;  %v6940_v33 = vld [vmem:[%s7066_s17 + $0x70] sm:$0xf] }
  0xbe   : > { %6167 = vmatmul.mubr.bf16.gmra.mrb[20].mxu1 %v5331_v15  ;;  %6394 = vmatprep.mubr.bf16.mxu0 %v6860_v0  ;;  %v1372_v15 = vrot.slane %v7814_v40, 5  ;;  %v6939_v0 = vld [vmem:[%s7066_s17 + $0x5c] sm:$0x1]  ;;  %v1379_v51 = vrot.slane %v6940_v33, 5 }
  0xbf   : > { %6170 = vmatprep.mubr.bf16.mxu1 %v5332_v26  ;;  %6423 = vmatpush3.bf16.msra.mxu0 %v6864_v56  ;;  %v1368_v18 = vrot.slane %v6939_v0, 5  ;;  %v7829_v26 = vsel %vm7344_vm5, %v5350_v54, %v1358_v1  ;;  %v7833_v56 = vsel %vm7344_vm5, %v1360_v46, %v1361_v39  ;;  %v6941_v1 = vld [vmem:[%s7066_s17 + $0x68] sm:$0x1]  ;;  %v3856_v0 = vshll.u32 %v5708_v13, 16  ;;  %v6886_v40 = vld [vmem:[%s8859_s1 + $0x1f8] sm:$0xff]  }
  0xc0   : > { %6424 = vmatprep.subr.bf16.mxu0 %v6870_v47  ;;  %v1375_v54 = vrot.slane %v6941_v1, 5  ;;  %v5352_v46 = vrot.slane %v1271_v32, 9  ;;  %v1374_v39 = vrot.slane %v1372_v15, 4  ;;  %v3839_v33 = vor.u32 %v3838_v62, %v7820_v7  ;;  %v5711_v1 = vld [vmem:[%s7066_s17 + $0x34] sm:$0xf] }
  0xc1   : > { %v1381_v32 = vrot.slane %v1379_v51, 4  ;;  %v5709_v62 = vld [vmem:[%s7066_s17 + $0x2c] sm:$0x1]  ;;  %v7860_v17 = vrot.slane %v3856_v0, 5  ;;  %v3880_v13 = vshll.u32 %v5711_v1, 16  ;;  %v3884_v31 = vshrl.u32 %v5711_v1, 16 }
  0xc2   : > { %v3840_v10 = vrot.slane %v3839_v33, 4  ;;  %v7877_v29 = vsel %vm7344_vm5, %v1367_v52, %v1368_v18  ;;  %v7884_v45 = vsel %vm7344_vm5, %v5352_v46, %v1372_v15  ;;  %v7888_v14 = vsel %vm7344_vm5, %v1374_v39, %v1375_v54  ;;  %v1273_v18 = vld [vmem:[%s7066_s17 + $0x78] sm:$0xe] }
  0xc3   : > { %6425 = vmatpush3.bf16.msra.mxu0 %v6870_v47  ;;  %v7892_v16 = vsel %vm7344_vm5, %v5353_v58, %v1379_v51  ;;  %v7902_v15 = vsel %vm7344_vm5, %v1381_v32, %v1382_v19  ;;  %v3863_v5 = vor.u32 %v3862_v28, %v7860_v17  ;;  %v3873_v52 = vrot.slane %v3871_v38, 4  ;;  %v5713_v58 = vld [vmem:[%s7066_s17 + $0x3c] sm:$0xf]  ;;  %v5714_v51 = vld [vmem:[%s7066_s17 + $0x40] sm:$0xf] }
  0xc4   : > { %6426 = vmatprep.subr.bf16.mxu0 %v6874_v53  ;;  %v3835_v0 = vsel %vm7098_vm2, %v3830_v21, %v7820_v7  ;;  %v3845_v46 = vsel %vm7098_vm2, %v3840_v10, %v7848_v42  ;;  %v7913_v39 = vrot.slane %v3880_v13, 5  ;;  %v3886_v22 = vrot.slane %v3884_v31, 4  ;;  %v6944_v19 = vld [vmem:[%s7066_s17 + $0x80] sm:$0x1]  ;;  %v8072_v47 = vld [vmem:[%s7066_s17 + $0x68] sm:$0x1] }
  0xc5   : > { %6395 = vmatmul.mubr.bf16.gmra.mrb[8].mxu0 %v6863_v2  ;;  %v3874_v2 = vshll.u32 %v5710_v43, 16  ;;  %v3866_v43 = vshll.u32 %v5709_v62, 16  ;;  %v5354_v32 = vrot.slane %v1273_v18, 9  ;;  %v1274_v62 = vld [vmem:[%s7066_s17 + $0x84] sm:$0xe]  ;;  %v3895_v28 = vshrl.u32 %v5713_v58, 16 }
  0xc6   : > { %6171 = vmatmul.mubr.bf16.gmra.mrb[24].mxu1 %v5333_v20  ;;  %6398 = vmatprep.mubr.bf16.mxu0 %v6866_v3  ;;  %v6882_v20 = vld [vmem:[%s8859_s1 + $0x1f0] sm:$0xff]   ;;  %v6943_v3 = vld [vmem:[%s7066_s17 + $0x7c] sm:$0xf]  ;;  %v3898_v7 = vshll.u32 %v5713_v58, 16  ;;  %v3904_v38 = vshll.u32 %v5714_v51, 16  ;;  %v8882_v42 = vcombine.low %v7503_v41, %v7508_v12  ;;  %v7924_v13 = vrot.slane %v3863_v5, 4 }
  0xc7   : > { %6174 = vmatprep.mubr.bf16.mxu1 %v5334_v23  ;;  %6427 = vmatpush3.bf16.msra.mxu0 %v6874_v53  ;;  %v3853_v23 = vor.u32 %v3852_v44, %v3849_v34  ;;  %v6871_v53 = vld [vmem:[%s7066_s17 + $0x78] sm:$0xff]   ;;  %v1386_v44 = vrot.slane %v6943_v3, 5  ;;  %v3876_v54 = vrot.slane %v3874_v2, 5  ;;  %v7917_v1 = vrot.slane %v3866_v43, 5  ;;  %v7929_v21 = vld [vmem:[%s8859_s1 + $0x200] sm:$0xff]   ;;  %8890 = vst [vmem:[#allocation5_spill] sm:$0xff] %v8072_v47 }
  0xc8   : > { %6428 = vmatprep.subr.bf16.mxu0 %v6878_v50  ;;  %v5712_v34 = vld [vmem:[%s7066_s17 + $0x38] sm:$0x1]  ;;  %v3908_v2 = vshrl.u32 %v5714_v51, 16  ;;  %v6873_v43 = vld [vmem:[%s7066_s17 + $0x84] sm:$0xff]   ;;  %v3887_v12 = vor.u32 %v3886_v22, %v7913_v39  ;;  %v3900_v58 = vrot.slane %v3898_v7, 5  ;;  %v7951_v51 = vrot.slane %v3904_v38, 5 }
  0xc9   : > { %v7915_v33 = vrot.slane %v3853_v23, 4  ;;  %v1388_v10 = vrot.slane %v1386_v44, 4  ;;  %v3877_v31 = vor.u32 %v3876_v54, %v3873_v52  ;;  %v8883_v23 = vcombine.low %v7734_v59, %v7742_v25  ;;  %v6945_v18 = vld [vmem:[%s7066_s17 + $0x88] sm:$0xf]  ;;  %v5715_v5 = vld [vmem:[%s7066_s17 + $0x44] sm:$0x1] }
  0xca   : > { %v1393_v3 = vrot.slane %v6945_v18, 5  ;;  %v7942_v59 = vcombine.low %v3835_v0, %v3845_v46  ;;  %v5716_v52 = vld [vmem:[%s7066_s17 + $0x48] sm:$0xf]  ;;  %v3897_v54 = vrot.slane %v3895_v28, 4  ;;  %v3910_v22 = vrot.slane %v3908_v2, 4 }
  0xcb   : > { %6429 = vmatpush3.bf16.msra.mxu0 %v6878_v50  ;;  %v1389_v50 = vrot.slane %v6944_v19, 5  ;;  %v6875_v19 = vld [vmem:[%s7066_s17 + $0x90] sm:$0xff]   ;;  %v3859_v0 = vsel %vm7098_vm2, %v7915_v33, %v7860_v17  ;;  %v3878_v46 = vrot.slane %v3877_v31, 4  ;;  %v3869_v28 = vsel %vm7098_vm2, %v7924_v13, %v7917_v1  ;;  %v7973_v33 = vld [vmem:[%s7066_s17 + $0x58] sm:$0xf]  ;;  %v6876_v31 = vld [vmem:[%s8859_s1 + $0xc8] sm:$0xff]  }
  0xcc   : > { %6430 = vmatprep.subr.bf16.mxu0 %v6882_v20  ;;  %v3888_v38 = vrot.slane %v3887_v12, 4  ;;  %v1395_v2 = vrot.slane %v1393_v3, 4  ;;  %v5719_v17 = vld [vmem:[%s7066_s17 + $0x54] sm:$0xf]  ;;  %v3914_v1 = vshll.u32 %v5715_v5, 16  ;;  %v3919_v13 = vshrl.u32 %v5716_v52, 16 }
  0xcd   : > { %6399 = vmatmul.mubr.bf16.gmra.mrb[12].mxu0 %v6869_v48  ;;  %v3890_v48 = vshll.u32 %v5712_v34, 16  ;;  %v7969_v7 = vsel %vm7344_vm5, %v1388_v10, %v1389_v50  ;;  %v3922_v50 = vshll.u32 %v5716_v52, 16  ;;  %v3901_v10 = vor.u32 %v3900_v58, %v3897_v54  ;;  %v6877_v54 = vld [vmem:[%s7066_s17 + $0x9c] sm:$0xff]   ;;  %v6951_v41 = vld [vmem:[%s7066_s17 + $0xac] sm:$0xf] }
  0xce   : > { %6175 = vmatmul.mubr.bf16.gmra.mrb[28].mxu1 %v8882_v42  ;;  %6402 = vmatprep.mubr.bf16.mxu0 %v6871_v53  ;;  %v5355_v53 = vrot.slane %v1274_v62, 9  ;;  %v6946_v42 = vld [vmem:[%s7066_s17 + $0x8c] sm:$0x1]  ;;  %v3952_v5 = vshll.u32 %v7973_v33, 16  ;;  %v8885_v52 = vcombine.low %v7750_v63, %v7758_v8  ;;  %v8009_v63 = vld [vmem:[%s7066_s17 + $0x50] sm:$0x1] }
  0xcf   : > { %6194 = vmatprep.mubr.bf16.mxu1 %v8883_v23  ;;  %6431 = vmatpush3.bf16.msra.mxu0 %v6882_v20  ;;  %v7948_v20 = vsel %vm7344_vm5, %v5354_v32, %v1386_v44  ;;  %v3892_v62 = vrot.slane %v3890_v48, 5  ;;  %v1396_v23 = vrot.slane %v6946_v42, 5  ;;  %v1275_v44 = vld [vmem:[%s7066_s17 + $0x90] sm:$0xe]  ;;  %v7961_v32 = vld [vmem:[%s7066_s17 + $0x4c] sm:$0xf]  ;;  %v3911_v48 = vor.u32 %v3910_v22, %v7951_v51 }
  0xd0   : > { %6432 = vmatprep.subr.bf16.mxu0 %v6886_v40  ;;  %v3928_v12 = vshll.u32 %v7961_v32, 16  ;;  %v3932_v18 = vshrl.u32 %v7961_v32, 16  ;;  %v8884_v42 = vcombine.low %v7738_v30, %v7746_v6  ;;  %v6880_v30 = vld [vmem:[%s8859_s1 + $0xd0] sm:$0xff]   ;;  %v3883_v6 = vsel %vm7098_vm2, %v3878_v46, %v7913_v39  ;;  %v6879_v8 = vld [vmem:[%s7066_s17 + $0xa8] sm:$0xff]   ;;  %v8016_v39 = vld [vmem:[%s7066_s17 + $0x5c] sm:$0x1] }
  0xd1   : > { %v3893_v58 = vsel %vm7098_vm2, %v3888_v38, %v3892_v62  ;;  %v5356_v22 = vrot.slane %v1275_v44, 9  ;;  %v3924_v25 = vrot.slane %v3922_v50, 5  ;;  %8886 = vst [vmem:[#allocation3_spill] sm:$0xff] %v8016_v39  ;;  %v3902_v46 = vrot.slane %v3901_v10, 4 }
  0xd2   : > { %v3912_v62 = vrot.slane %v3911_v48, 4  ;;  %v8018_v38 = vrot.slane %v3928_v12, 5  ;;  %v8020_v34 = vrot.slane %v3952_v5, 5  ;;  %v8025_v50 = vcombine.low %v3859_v0, %v3869_v28  ;;  %v5722_v28 = vld [vmem:[%s7066_s17 + $0x60] sm:$0xf] }
  0xd3   : > { %6433 = vmatpush3.bf16.msra.mxu0 %v6886_v40  ;;  %v7981_v40 = vsel %vm7344_vm5, %v5355_v53, %v1393_v3  ;;  %v3943_v53 = vshrl.u32 %v5719_v17, 16  ;;  %v3946_v3 = vshll.u32 %v5719_v17, 16  ;;  %v6947_v17 = vld [vmem:[%s7066_s17 + $0x94] sm:$0xf]  ;;  %v8029_v48 = vcombine.low %v3883_v6, %v3893_v58 }
  0xd4   : > { %6466 = vmatprep.subr.bf16.mxu0 %v7929_v21  ;;  %v3938_v0 = vshll.u32 %v8009_v63, 16  ;;  %v3907_v6 = vsel %vm7098_vm2, %v3902_v46, %v7951_v51  ;;  %v8889_v46 = vcombine.low %v7772_v61, %v7776_v36 }
  0xd5   : > { %6403 = vmatmul.mubr.bf16.gmra.mrb[16].mxu0 %v6873_v43  ;;  %v3956_v43 = vshrl.u32 %v7973_v33, 16  ;;  %v3945_v44 = vrot.slane %v3943_v53, 4  ;;  %v6948_v53 = vld [vmem:[%s7066_s17 + $0x98] sm:$0x1] }
  0xd6   : > { %6195 = vmatmul.mubr.bf16.vlgmr.msra.gmra.mrb[0].mxu1 %v8884_v42  ;;  %6406 = vmatprep.mubr.bf16.mxu0 %v6875_v19  ;;  %v8012_v19 = vrot.slane %v3914_v1, 5  ;;  %v1400_v42 = vrot.slane %v6947_v17, 5  ;;  %v6949_v17 = vld [vmem:[%s7066_s17 + $0xa0] sm:$0xf]  ;;  %v3940_v36 = vrot.slane %v3938_v0, 5 }
  0xd7   : > { %6227 = vmatpush3.bf16.msra.mxu1 %v7691_v60  ;;  %6198 = vmatprep.mubr.bf16.mxu1 %v8885_v52  ;;  %v8006_v60 = vsel %vm7344_vm5, %v1395_v2, %v1396_v23  ;;  %v3921_v52 = vrot.slane %v3919_v13, 4  ;;  %v3934_v23 = vrot.slane %v3932_v18, 4  ;;  %v3948_v2 = vrot.slane %v3946_v3, 5  ;;  %v6884_v13 = vld [vmem:[%s8859_s1 + $0xd8] sm:$0xff]  }
  0xd8   : > { %6228 = vmatprep.subr.bf16.mxu1 %v6876_v31  ;;  %v3958_v1 = vrot.slane %v3956_v43, 4  ;;  %v1276_v18 = vld [vmem:[%s7066_s17 + $0x9c] sm:$0xe]  ;;  %v1403_v3 = vrot.slane %v6948_v53, 5  ;;  %v8042_v43 = vld [vmem:[%s7066_s17 + $0x64] sm:$0xf] }
  0xd9   : > { %v3925_v5 = vor.u32 %v3924_v25, %v3921_v52  ;;  %8887 = vst [vmem:[#allocation4_spill] sm:$0xff] %v8042_v43  ;;  %v3935_v58 = vor.u32 %v3934_v23, %v8018_v38  ;;  %v1407_v12 = vrot.slane %v6949_v17, 5  ;;  %v8888_v25 = vcombine.low %v7762_v24, %v7766_v35  ;;  %v6881_v23 = vld [vmem:[%s7066_s17 + $0xb4] sm:$0xff]   ;;  %v6887_v24 = vld [vmem:[%s8859_s1 + $0xe0] sm:$0xff]   ;;  %v5725_v17 = vld [vmem:[%s7066_s17 + $0x6c] sm:$0xf] }
  0xda   : > { %v1402_v52 = vrot.slane %v1400_v42, 4  ;;  %v3949_v53 = vor.u32 %v3948_v2, %v3945_v44  ;;  %v3959_v51 = vor.u32 %v3958_v1, %v8020_v34  ;;  %v3967_v35 = vshrl.u32 %v5722_v28, 16  ;;  %v6950_v2 = vld [vmem:[%s7066_s17 + $0xa4] sm:$0x1] }
  0xdb   : > { %6229 = vmatpush3.bf16.msra.mxu1 %v6876_v31  ;;  %v8036_v31 = vsel %vm7344_vm5, %v5356_v22, %v1400_v42  ;;  %v3962_v22 = vshll.u32 %v8016_v39, 16  ;;  %v3980_v42 = vshrl.u32 %v8042_v43, 16  ;;  %v3926_v61 = vrot.slane %v3925_v5, 4  ;;  %v8211_v39 = vld [vmem:[%s7066_s17 + $0x98] sm:$0x1] }
  0xdc   : > { %6230 = vmatprep.subr.bf16.mxu1 %v6880_v30  ;;  %v5357_v44 = vrot.slane %v1276_v18, 9  ;;  %v1410_v1 = vrot.slane %v6950_v2, 5  ;;  %v3950_v5 = vrot.slane %v3949_v53, 4  ;;  %v3960_v18 = vrot.slane %v3959_v51, 4  ;;  %8903 = vst [vmem:[#allocation14_spill] sm:$0xff] %v8211_v39 }
  0xdd   : > { %6407 = vmatmul.mubr.bf16.gmra.mrb[20].mxu0 %v6877_v54  ;;  %v3917_v54 = vsel %vm7098_vm2, %v3912_v62, %v8012_v19  ;;  %v3976_v19 = vshll.u32 %v8042_v43, 16  ;;  %v6883_v62 = vld [vmem:[%s7066_s17 + $0xc0] sm:$0xff]   ;;  %v3964_v10 = vrot.slane %v3962_v22, 5  ;;  %v8078_v43 = vsel %vm7344_vm5, %v1402_v52, %v1403_v3 }
  0xde   : > { %6199 = vmatmul.mubr.bf16.gmra.mrb[4].mxu1 %v8888_v25  ;;  %6410 = vmatprep.mubr.bf16.mxu0 %v6879_v8  ;;  %v3970_v8 = vshll.u32 %v5722_v28, 16  ;;  %v3936_v25 = vrot.slane %v3935_v58, 4  ;;  %v1414_v28 = vrot.slane %v6951_v41, 5  ;;  %v8074_v55 = vcombine.low %v3907_v6, %v3917_v54  ;;  %v6889_v41 = vld [vmem:[%s8859_s1 + $0xe8] sm:$0xff]  }
  0xdf   : > { %6202 = vmatprep.mubr.bf16.mxu1 %v8889_v46  ;;  %6231 = vmatpush3.bf16.msra.mxu1 %v6880_v30  ;;  %v1277_v30 = vld [vmem:[%s7066_s17 + $0xa8] sm:$0xe]  ;;  %v1409_v46 = vrot.slane %v1407_v12, 4  ;;  %v3969_v0 = vrot.slane %v3967_v35, 4  ;;  %v8080_v58 = vrot.slane %v3976_v19, 5  ;;  %v3982_v22 = vrot.slane %v3980_v42, 4 }
  0xe0   : > { %6232 = vmatprep.subr.bf16.mxu1 %v6884_v13  ;;  %v3972_v2 = vrot.slane %v3970_v8, 5  ;;  %v3931_v3 = vsel %vm7098_vm2, %v3926_v61, %v8018_v38  ;;  %v8090_v6 = vsel %vm7344_vm5, %v5357_v44, %v1407_v12  ;;  %v3991_v54 = vshrl.u32 %v5725_v17, 16  ;;  %v6952_v38 = vld [vmem:[%s7066_s17 + $0xb0] sm:$0x1]  ;;  %v1278_v19 = vld [vmem:[%s7066_s17 + $0xb4] sm:$0xe] }
  0xe1   : > { %v3994_v52 = vshll.u32 %v5725_v17, 16  ;;  %v3941_v53 = vsel %vm7098_vm2, %v3936_v25, %v3940_v36  ;;  %v8099_v51 = vsel %vm7344_vm5, %v1409_v46, %v1410_v1  ;;  %v5358_v35 = vrot.slane %v1277_v30, 9  ;;  %v8121_v30 = vld [vmem:[%s7066_s17 + $0x74] sm:$0x1]  ;;  %v6953_v25 = vld [vmem:[%s7066_s17 + $0xb8] sm:$0xf] }
  0xe2   : > { %v1417_v8 = vrot.slane %v6952_v38, 5  ;;  %v8892_v12 = vcombine.low %v7793_v49, %v7807_v4  ;;  %v3955_v42 = vsel %vm7098_vm2, %v3950_v5, %v8020_v34  ;;  %v3965_v61 = vsel %vm7098_vm2, %v3960_v18, %v3964_v10  ;;  %v6885_v4 = vld [vmem:[%s7066_s17 + $0xcc] sm:$0xff]   ;;  %8894 = vst [vmem:[#allocation7_spill] sm:$0xff] %v8121_v30  ;;  %v5731_v38 = vld [vmem:[%s7066_s17 + $0x84] sm:$0xf] }
  0xe3   : > { %6233 = vmatpush3.bf16.msra.mxu1 %v6884_v13  ;;  %v8093_v13 = vld [vmem:[%s7066_s17 + $0x70] sm:$0xf]  ;;  %v1416_v36 = vrot.slane %v1414_v28, 4  ;;  %v3986_v44 = vshll.u32 %v8072_v47, 16  ;;  %v8893_v49 = vcombine.low %v7829_v26, %v7833_v56  ;;  %v3983_v1 = vor.u32 %v3982_v22, %v8080_v58  ;;  %v8138_v22 = vld [vmem:[%s7066_s17 + $0x7c] sm:$0xf] }
  0xe4   : > { %6234 = vmatprep.subr.bf16.mxu1 %v6887_v24  ;;  %8891 = vst [vmem:[#allocation6_spill] sm:$0xff] %v8093_v13  ;;  %v4000_v34 = vshll.u32 %v8093_v13, 16  ;;  %v4004_v10 = vshrl.u32 %v8093_v13, 16  ;;  %v5359_v17 = vrot.slane %v1278_v19, 9  ;;  %v1421_v46 = vrot.slane %v6953_v25, 5  ;;  %8895 = vst [vmem:[#allocation8_spill] sm:$0xff] %v8138_v22 }
  0xe5   : > { %6411 = vmatmul.mubr.bf16.gmra.mrb[24].mxu0 %v6881_v23  ;;  %v6891_v23 = vld [vmem:[%s8859_s1 + $0xf0] sm:$0xff]   ;;  %v3993_v26 = vrot.slane %v3991_v54, 4  ;;  %v3996_v56 = vrot.slane %v3994_v52, 5  ;;  %v8129_v18 = vcombine.low %v3931_v3, %v3941_v53  ;;  %v8141_v19 = vcombine.low %v3955_v42, %v3965_v61  ;;  %v6954_v3 = vld [vmem:[%s7066_s17 + $0xbc] sm:$0x1] }
  0xe6   : > { %6203 = vmatmul.mubr.bf16.gmra.mrb[8].mxu1 %v8892_v12  ;;  %6414 = vmatprep.mubr.bf16.mxu0 %v6883_v62  ;;  %v3973_v62 = vor.u32 %v3972_v2, %v3969_v0  ;;  %v8135_v2 = vsel %vm7344_vm5, %v5358_v35, %v1414_v28  ;;  %v8145_v54 = vsel %vm7344_vm5, %v1416_v36, %v1417_v8  ;;  %v8147_v52 = vrot.slane %v3986_v44, 5  ;;  %v6893_v12 = vld [vmem:[%s8859_s1 + $0xf8] sm:$0xff]   ;;  %v8154_v28 = vld [vmem:[%s7066_s17 + $0x88] sm:$0xf] }
  0xe7   : > { %6206 = vmatprep.mubr.bf16.mxu1 %v8893_v49  ;;  %6235 = vmatpush3.bf16.msra.mxu1 %v6887_v24  ;;  %v5728_v24 = vld [vmem:[%s7066_s17 + $0x78] sm:$0xf]  ;;  %v1424_v53 = vrot.slane %v6954_v3, 5  ;;  %8896 = vst [vmem:[#allocation9_spill] sm:$0xff] %v8154_v28  ;;  %v8158_v42 = vrot.slane %v3983_v1, 4  ;;  %v8160_v61 = vrot.slane %v4000_v34, 5  ;;  %v8164_v36 = vsel %vm7344_vm5, %v5359_v17, %v1421_v46 }
  0xe8   : > { %6236 = vmatprep.subr.bf16.mxu1 %v6889_v41  ;;  %v8156_v35 = vrot.slane %v3973_v62, 4  ;;  %v4006_v8 = vrot.slane %v4004_v10, 4  ;;  %v1423_v44 = vrot.slane %v1421_v46, 4  ;;  %v3997_v49 = vor.u32 %v3996_v56, %v3993_v26  ;;  %v5734_v3 = vld [vmem:[%s7066_s17 + $0x90] sm:$0xf] }
  0xe9   : > { %v4010_v25 = vshll.u32 %v8121_v30, 16  ;;  %v4018_v0 = vshll.u32 %v5728_v24, 16  ;;  %v4024_v62 = vshll.u32 %v8138_v22, 16  ;;  %v4028_v1 = vshrl.u32 %v8138_v22, 16  ;;  %v8171_v34 = vld [vmem:[%s7066_s17 + $0x94] sm:$0xf] }
  0xea   : > { %8897 = vst [vmem:[#allocation10_spill] sm:$0xff] %v8171_v34  ;;  %v8898_v10 = vcombine.low %v7873_v27, %v7877_v29  ;;  %v4039_v17 = vshrl.u32 %v5731_v38, 16  ;;  %v4042_v46 = vshll.u32 %v5731_v38, 16  ;;  %v4052_v26 = vshrl.u32 %v8154_v28, 16  ;;  %v5737_v38 = vld [vmem:[%s7066_s17 + $0x9c] sm:$0xf] }
  0xeb   : > { %6237 = vmatpush3.bf16.msra.mxu1 %v6889_v41  ;;  %v4015_v41 = vshrl.u32 %v5728_v24, 16  ;;  %v8899_v56 = vcombine.low %v7884_v45, %v7888_v14  ;;  %v4007_v29 = vor.u32 %v4006_v8, %v8160_v61  ;;  %v4066_v24 = vshll.u32 %v5734_v3, 16  ;;  %v8193_v45 = vld [vmem:[%s7066_s17 + $0x80] sm:$0x1] }
  0xec   : > { %6238 = vmatprep.subr.bf16.mxu1 %v6891_v23  ;;  %v8190_v5 = vrot.slane %v4010_v25, 5  ;;  %8900 = vst [vmem:[#allocation11_spill] sm:$0xff] %v8193_v45  ;;  %v4072_v14 = vshll.u32 %v8171_v34, 16  ;;  %v4020_v27 = vrot.slane %v4018_v0, 5  ;;  %v4030_v8 = vrot.slane %v4028_v1, 4 }
  0xed   : > { %6415 = vmatmul.mubr.bf16.gmra.mrb[28].mxu0 %v6885_v4  ;;  %v4048_v4 = vshll.u32 %v8154_v28, 16  ;;  %v8197_v28 = vrot.slane %v4024_v62, 5  ;;  %v8203_v22 = vld [vmem:[%s7066_s17 + $0xa0] sm:$0xf]  ;;  %v4041_v25 = vrot.slane %v4039_v17, 4  ;;  %v4044_v30 = vrot.slane %v4042_v46, 5 }
  0xee   : > { %6207 = vmatmul.mubr.bf16.gmra.mrb[12].mxu1 %v8898_v10  ;;  %6434 = vmatprep.mubr.bf16.mxu0 %v7942_v59  ;;  %v4063_v59 = vshrl.u32 %v5734_v3, 16  ;;  %v8188_v10 = vrot.slane %v3997_v49, 4  ;;  %v8200_v3 = vld [vmem:[%s7066_s17 + $0x8c] sm:$0x1]  ;;  %8902 = vst [vmem:[#allocation13_spill] sm:$0xff] %v8203_v22  ;;  %v4054_v47 = vrot.slane %v4052_v26, 4  ;;  %v8220_v62 = vsel %vm7344_vm5, %v1423_v44, %v1424_v53 }
  0xef   : > { %6210 = vmatprep.mubr.bf16.mxu1 %v8899_v56  ;;  %6239 = vmatpush3.bf16.msra.mxu1 %v6891_v23  ;;  %v4076_v23 = vshrl.u32 %v8171_v34, 16  ;;  %v4017_v56 = vrot.slane %v4015_v41, 4  ;;  %8901 = vst [vmem:[#allocation12_spill] sm:$0xff] %v8200_v3  ;;  %v6890_v49 = vld [vmem:[%s8859_s1 + $0x208] sm:$0xff]   ;;  %v8208_v13 = vrot.slane %v4048_v4, 5  ;;  %v4068_v34 = vrot.slane %v4066_v24, 5 }
  0xf0   : > { %6240 = vmatprep.subr.bf16.mxu1 %v6893_v12  ;;  %v5740_v41 = vld [vmem:[%s7066_s17 + $0xa8] sm:$0xf]  ;;  %v4065_v1 = vrot.slane %v4063_v59, 4  ;;  %v8225_v17 = vld [vmem:[%s8859_s1 + $0x100] sm:$0xff]   ;;  %v8228_v46 = vrot.slane %v4072_v14, 5  ;;  %v4087_v26 = vshrl.u32 %v5737_v38, 16  ;;  %v8905_v24 = vcombine.low %v7892_v16, %v7902_v15 }
  0xf1   : > { %8904 = vst [vmem:[#allocation15_spill] sm:$0xff] %v8225_v17  ;;  %v4078_v4 = vrot.slane %v4076_v23, 4  ;;  %v4090_v0 = vshll.u32 %v5737_v38, 16  ;;  %v8231_v53 = vrot.slane %v4007_v29, 4  ;;  %v4096_v44 = vshll.u32 %v8203_v22, 16  ;;  %v6892_v16 = vld [vmem:[%s8859_s1 + $0x210] sm:$0xff]  }
  0xf2   : > { %v4100_v59 = vshrl.u32 %v8203_v22, 16  ;;  %v4021_v14 = vor.u32 %v4020_v27, %v4017_v56  ;;  %v4031_v38 = vor.u32 %v4030_v8, %v8197_v28  ;;  %v4045_v23 = vor.u32 %v4044_v30, %v4041_v25  ;;  %v8243_v29 = vld [vmem:[%s7066_s17 + $0xac] sm:$0xf]  ;;  %v8256_v25 = vld [vmem:[%s7066_s17 + $0xa4] sm:$0x1] }
  0xf3   : > { %6241 = vmatpush3.bf16.msra.mxu1 %v6893_v12  ;;  %v4034_v12 = vshll.u32 %v8193_v45, 16  ;;  %8906 = vst [vmem:[#allocation16_spill] sm:$0xff] %v8243_v29  ;;  %v4055_v15 = vor.u32 %v4054_v47, %v8208_v13  ;;  %v4111_v27 = vshrl.u32 %v5740_v41, 16  ;;  %v4114_v30 = vshll.u32 %v5740_v41, 16 }
  0xf4   : > { %6514 = vmatprep.subr.bf16.mxu1 %v8225_v17  ;;  %v8907_v17 = vcombine.low %v7948_v20, %v7969_v7  ;;  %v4069_v56 = vor.u32 %v4068_v34, %v4065_v1  ;;  %v4079_v8 = vor.u32 %v4078_v4, %v8228_v46  ;;  %v4089_v20 = vrot.slane %v4087_v26, 4 }
  0xf5   : > { %6435 = vmatmul.mubr.bf16.vlgmr.msra.gmra.mrb[0].mxu0 %v8025_v50  ;;  %v4058_v50 = vshll.u32 %v8200_v3, 16  ;;  %v4092_v7 = vrot.slane %v4090_v0, 5  ;;  %v4124_v22 = vshrl.u32 %v8243_v29, 16  ;;  %v4022_v47 = vrot.slane %v4021_v14, 4  ;;  %v6894_v0 = vld [vmem:[%s8859_s1 + $0x218] sm:$0xff]  }
  0xf6   : > { %6211 = vmatmul.mubr.bf16.gmra.mrb[16].mxu1 %v8905_v24  ;;  %6467 = vmatpush3.bf16.msra.mxu0 %v7929_v21  ;;  %v4082_v21 = vshll.u32 %v8211_v39, 16  ;;  %v4120_v24 = vshll.u32 %v8243_v29, 16  ;;  %v4032_v39 = vrot.slane %v4031_v38, 4  ;;  %v4036_v3 = vrot.slane %v4034_v12, 5 }
  0xf7   : > { %6214 = vmatprep.mubr.bf16.mxu1 %v8907_v17  ;;  %6438 = vmatprep.mubr.bf16.mxu0 %v8029_v48  ;;  %v8258_v17 = vrot.slane %v4096_v44, 5  ;;  %v4102_v48 = vrot.slane %v4100_v59, 4  ;;  %v4060_v41 = vrot.slane %v4058_v50, 5  ;;  %v4046_v34 = vrot.slane %v4045_v23, 4 }
  0xf8   : > { %6468 = vmatprep.subr.bf16.mxu0 %v6890_v49  ;;  %v4056_v1 = vrot.slane %v4055_v15, 4  ;;  %v4113_v4 = vrot.slane %v4111_v27, 4  ;;  %v4116_v45 = vrot.slane %v4114_v30, 5  ;;  %v4070_v26 = vrot.slane %v4069_v56, 4  ;;  %v8324_v27 = vld [vmem:[%s7066_s17 + $0xbc] sm:$0x1] }
  0xf9   : > { %v4084_v44 = vrot.slane %v4082_v21, 5  ;;  %v4093_v59 = vor.u32 %v4092_v7, %v4089_v20  ;;  %v4106_v29 = vshll.u32 %v8256_v25, 16  ;;  %v4103_v12 = vor.u32 %v4102_v48, %v8258_v17  ;;  %v8291_v21 = vld [vmem:[%s7066_s17 + $0xb0] sm:$0x1] }
  0xfa   : > { %6469 = vmatpush3.bf16.msra.mxu0 %v6890_v49  ;;  %v4080_v49 = vrot.slane %v4079_v8, 4  ;;  %v8268_v14 = vrot.slane %v4120_v24, 5  ;;  %v4126_v38 = vrot.slane %v4124_v22, 4  ;;  %v8908_v23 = vor.u32 %v7676_v57, %v7674_v11 }
  0xfb   : > { %6470 = vmatprep.subr.bf16.mxu0 %v6892_v16  ;;  %v8909_v15 = vcombine.low %v7981_v40, %v8006_v60  ;;  %v4013_v22 = vsel %vm7098_vm2, %v8231_v53, %v8190_v5  ;;  %v4027_v57 = vsel %vm7098_vm2, %v4022_v47, %v8197_v28  ;;  %v8910_v40 = vcombine.low %v8036_v31, %v8078_v43  ;;  %v6897_v31 = vld [vmem:[%s8859_s1 + $0x220] sm:$0xff]  }
  0xfc   : > { %v8273_v50 = vrot.slane %v8908_v23, 4  ;;  %v4037_v60 = vsel %vm7098_vm2, %v4032_v39, %v4036_v3  ;;  %v4117_v5 = vor.u32 %v4116_v45, %v4113_v4  ;;  %v4061_v28 = vsel %vm7098_vm2, %v4056_v1, %v4060_v41  ;;  %v5796_v41 = vld [vmem:[%s7066_s17 + $0x48] sm:$0xe] }
  0xfd   : > { %6439 = vmatmul.mubr.bf16.gmra.mrb[4].mxu0 %v8074_v55  ;;  %v4003_v55 = vsel %vm7098_vm2, %v8188_v10, %v8160_v61  ;;  %v5743_v61 = vld [vmem:[%s7066_s17 + $0xb4] sm:$0xf]  ;;  %v8303_v10 = vld [vmem:[%s7066_s17 + $0xb8] sm:$0xf]  ;;  %v4075_v39 = vsel %vm7098_vm2, %v4070_v26, %v8228_v46  ;;  %v8313_v43 = vrot.slane %v4093_v59, 4  ;;  %v8315_v3 = vrot.slane %v4106_v29, 5 }
  0xfe   : > { %6215 = vmatmul.mubr.bf16.gmra.mrb[20].mxu1 %v8909_v15  ;;  %6442 = vmatprep.mubr.bf16.mxu0 %v8129_v18  ;;  %v4051_v18 = vsel %vm7098_vm2, %v4046_v34, %v8208_v13  ;;  %v4085_v13 = vsel %vm7098_vm2, %v4080_v49, %v4084_v44  ;;  %v8319_v45 = vrot.slane %v4103_v12, 4  ;;  %v4127_v53 = vor.u32 %v4126_v38, %v8268_v14  ;;  %v5797_v26 = vld [vmem:[%s7066_s17 + $0x54] sm:$0xe] }
  0xff   : > { %6218 = vmatprep.mubr.bf16.mxu1 %v8910_v40  ;;  %6471 = vmatpush3.bf16.msra.mxu0 %v6892_v16  ;;  %v4130_v16 = vshll.u32 %v8291_v21, 16  ;;  %v8911_v46 = vsel %vm7098_vm2, %v8158_v42, %v8147_v52  ;;  %v8912_v29 = vsel %vm7098_vm2, %v8156_v35, %v8080_v58  ;;  %v4135_v56 = vshrl.u32 %v5743_v61, 16 }
 0x100   : > { %6472 = vmatprep.subr.bf16.mxu0 %v6894_v0  ;;  %v5774_v30 = vcombine.low %v8912_v29, %v8911_v46  ;;  %v4138_v8 = vshll.u32 %v5743_v61, 16  ;;  %v4144_v20 = vshll.u32 %v8303_v10, 16  ;;  %v5390_v7 = vcombine.low %v8135_v2, %v8145_v54  ;;  %v6900_v2 = vld [vmem:[%s8859_s1 + $0x228] sm:$0xff]   ;;  %v5746_v54 = vld [vmem:[%s7066_s17 + $0xc0] sm:$0xf]  ;;  %v8916_v29 = vld [vmem:[#allocation5_spill] sm:$0xff] }
 0x101   : > { %v5391_v48 = vcombine.low %v8164_v36, %v8220_v62  ;;  %v5775_v24 = vcombine.low %v4003_v55, %v4013_v22  ;;  %v8341_v52 = vrot.slane %v4117_v5, 4  ;;  %v5776_v42 = vcombine.low %v4027_v57, %v4037_v60 }
 0x102   : > { %v8343_v58 = vcombine.low %v4051_v18, %v4061_v28  ;;  %v8345_v35 = vcombine.low %v4075_v39, %v4085_v13  ;;  %v4099_v47 = vsel %vm7098_vm2, %v8313_v43, %v8258_v17  ;;  %v4109_v34 = vsel %vm7098_vm2, %v8319_v45, %v8315_v3  ;;  %v5799_v28 = vld [vmem:[%s7066_s17 + $0x6c] sm:$0xe] }
 0x103   : > { %6473 = vmatpush3.bf16.msra.mxu0 %v6894_v0  ;;  %v8361_v1 = vrot.slane %v4127_v53, 4  ;;  %v8363_v4 = vrot.slane %v4130_v16, 5  ;;  %v4148_v0 = vshrl.u32 %v8303_v10, 16  ;;  %v8913_v44 = vcombine.low %v8090_v6, %v8099_v51  ;;  %v6903_v6 = vld [vmem:[%s8859_s1 + $0x230] sm:$0xff]   ;;  %v8385_v51 = vld [vmem:[%s7066_s17 + $0xc4] sm:$0xf] }
 0x104   : > { %6474 = vmatprep.subr.bf16.mxu0 %v6897_v31  ;;  %v8370_v59 = vrot.slane %v4135_v56, 4  ;;  %v8374_v49 = vrot.slane %v4144_v20, 5  ;;  %v4154_v12 = vshll.u32 %v8324_v27, 16  ;;  %v4123_v38 = vsel %vm7098_vm2, %v8341_v52, %v8268_v14  ;;  %v5798_v14 = vld [vmem:[%s7066_s17 + $0x60] sm:$0xe]  ;;  %v8914_v39 = vld [vmem:[#allocation3_spill] sm:$0xff] }
 0x105   : > { %6443 = vmatmul.mubr.bf16.gmra.mrb[8].mxu0 %v8141_v19  ;;  %v8372_v19 = vrot.slane %v4138_v8, 5  ;;  %v4159_v23 = vshrl.u32 %v5746_v54, 16  ;;  %v5812_v15 = vrot.slane %v5796_v41, 9  ;;  %v4622_v55 = vrot.slane %v7961_v32, 5  ;;  %v6895_v13 = vld [vmem:[%s7066_s17 + $0xc] sm:$0xff]   ;;  %v6906_v56 = vld [vmem:[%s8859_s1 + $0x238] sm:$0xff]  }
 0x106   : > { %6219 = vmatmul.mubr.bf16.gmra.mrb[24].mxu1 %v8913_v44  ;;  %6446 = vmatprep.mubr.bf16.mxu0 %v5774_v30  ;;  %v4162_v22 = vshll.u32 %v5746_v54, 16  ;;  %v4625_v57 = vrot.slane %v8009_v63, 5  ;;  %v5813_v40 = vrot.slane %v5797_v26, 9  ;;  %v4629_v60 = vrot.slane %v7973_v33, 5  ;;  %v8915_v16 = vld [vmem:[#allocation4_spill] sm:$0xff]  ;;  %v8917_v52 = vld [vmem:[#allocation6_spill] sm:$0xff] }
 0x107   : > { %6222 = vmatprep.mubr.bf16.mxu1 %v5390_v7  ;;  %6475 = vmatpush3.bf16.msra.mxu0 %v6897_v31  ;;  %v4133_v18 = vsel %vm7098_vm2, %v8361_v1, %v8363_v4  ;;  %v8395_v5 = vrot.slane %v4148_v0, 4  ;;  %v8399_v61 = vsel %vm7344_vm5, %v5812_v15, %v4622_v55  ;;  %v4624_v32 = vrot.slane %v4622_v55, 4  ;;  %v8918_v4 = vld [vmem:[#allocation7_spill] sm:$0xff] }
 0x108   : > { %6476 = vmatprep.subr.bf16.mxu0 %v6900_v2  ;;  %v4168_v31 = vshll.u32 %v8385_v51, 16  ;;  %v8405_v63 = vsel %vm7344_vm5, %v5813_v40, %v4629_v60  ;;  %v4631_v33 = vrot.slane %v4629_v60, 4  ;;  %v4632_v3 = vrot.slane %v8914_v39, 5  ;;  %v8436_v26 = vld [vmem:[%s7066_s17 + $0xc8] sm:$0x1]  ;;  %v6896_v40 = vld [vmem:[%s7066_s17 + $0x18] sm:$0xff]  }
 0x109   : > { %v8411_v45 = vsel %vm7344_vm5, %v4624_v32, %v4625_v57  ;;  %v5814_v53 = vrot.slane %v5798_v14, 9  ;;  %v4636_v46 = vrot.slane %v8915_v16, 5  ;;  %v4639_v30 = vrot.slane %v8916_v29, 5  ;;  %v6898_v39 = vld [vmem:[%s7066_s17 + $0x24] sm:$0xff]  }
 0x10a   : > { %v5844_v8 = vcombine.low %v8399_v61, %v8411_v45  ;;  %v8422_v20 = vsel %vm7344_vm5, %v4631_v33, %v4632_v3  ;;  %v5815_v7 = vrot.slane %v5799_v28, 9  ;;  %v4646_v0 = vrot.slane %v8918_v4, 5  ;;  %v8920_v28 = vld [vmem:[#allocation11_spill] sm:$0xff]  ;;  %v5505_v61 = vld [vmem:[%s7066_s17 + $0x90] sm:$0xf] }
 0x10b   : > { %6477 = vmatpush3.bf16.msra.mxu0 %v6900_v2  ;;  %v4643_v2 = vrot.slane %v8917_v52, 5  ;;  %v5845_v54 = vcombine.low %v8405_v63, %v8422_v20  ;;  %v8429_v41 = vsel %vm7344_vm5, %v5814_v53, %v4636_v46  ;;  %v4638_v1 = vrot.slane %v4636_v46, 4  ;;  %v8921_v53 = vld [vmem:[#allocation2_spill] sm:$0xff]  ;;  %v6912_v45 = vld [vmem:[%s7066_s17 + $0xa8] sm:$0xff]  }
 0x10c   : > { %6478 = vmatprep.subr.bf16.mxu0 %v6903_v6  ;;  %v8438_v44 = vrot.slane %v4159_v23, 4  ;;  %v8451_v36 = vcombine.low %v4099_v47, %v4109_v34  ;;  %v4141_v62 = vor.u32 %v8372_v19, %v8370_v59  ;;  %v5800_v23 = vld [vmem:[%s7066_s17 + $0x78] sm:$0xe]  ;;  %v8463_v57 = vrot.slane %v4154_v12, 5  ;;  %v5749_v12 = vld [vmem:[%s7066_s17 + $0xcc] sm:$0xf] }
 0x10d   : > { %6447 = vmatmul.mubr.bf16.gmra.mrb[12].mxu0 %v5775_v24  ;;  %v8440_v24 = vrot.slane %v4162_v22, 5  ;;  %v8444_v15 = vsel %vm7344_vm5, %v5815_v7, %v4643_v2  ;;  %v4645_v55 = vrot.slane %v4643_v2, 4  ;;  %v8461_v22 = vcombine.low %v4123_v38, %v4133_v18  ;;  %v5499_v47 = vld [vmem:[%s7066_s17 + $0x78] sm:$0xf]  ;;  %v8919_v18 = vld [vmem:[#allocation8_spill] sm:$0xff] }
 0x10e   : > { %6223 = vmatmul.mubr.bf16.gmra.mrb[28].mxu1 %v5391_v48  ;;  %6450 = vmatprep.mubr.bf16.mxu0 %v5776_v42  ;;  %v4172_v48 = vshrl.u32 %v8385_v51, 16  ;;  %v8458_v42 = vsel %vm7344_vm5, %v4638_v1, %v4639_v30  ;;  %v4151_v34 = vor.u32 %v8395_v5, %v8374_v49  ;;  %v8474_v59 = vrot.slane %v4168_v31, 5  ;;  %v8488_v31 = vld [vmem:[%s7066_s17 + $0xd0] sm:$0xf]  ;;  %v8922_v1 = vld [vmem:[#allocation9_spill] sm:$0xff] }
 0x10f   : > { %6242 = vmatprep.mubr.bf16.mxu1 %v6895_v13  ;;  %6479 = vmatpush3.bf16.msra.mxu0 %v6903_v6  ;;  %v5846_v17 = vcombine.low %v8429_v41, %v8458_v42  ;;  %v8469_v43 = vsel %vm7344_vm5, %v4645_v55, %v4646_v0  ;;  %v4178_v19 = vshll.u32 %v8436_v26, 16  ;;  %v5801_v6 = vld [vmem:[%s7066_s17 + $0x84] sm:$0xe]  ;;  %v4165_v60 = vor.u32 %v8440_v24, %v8438_v44  ;;  %v8923_v24 = vld [vmem:[#allocation12_spill] sm:$0xff]  ;;  %v6976_v63 = vld [vmem:[%s7066_s17 + $0x8c] sm:$0x1] }
 0x110   : > { %6480 = vmatprep.subr.bf16.mxu0 %v6906_v56  ;;  %v5847_v38 = vcombine.low %v8444_v15, %v8469_v43  ;;  %v5816_v14 = vrot.slane %v5800_v23, 9  ;;  %v4650_v32 = vrot.slane %v8919_v18, 5  ;;  %v4653_v33 = vrot.slane %v8920_v28, 5 }
 0x111   : > { %v4174_v5 = vrot.slane %v4172_v48, 4  ;;  %v2400_v3 = vshrl.u32 %v5499_v47, 16  ;;  %v2403_v13 = vshll.u32 %v5499_v47, 16  ;;  %v2422_v16 = vsel %vm7098_vm2, %v8273_v50, %v8921_v53 }
 0x112   : > { %v4183_v46 = vshrl.u32 %v5749_v12, 16  ;;  %v8496_v29 = vsel %vm7344_vm5, %v5816_v14, %v4650_v32  ;;  %v4652_v30 = vrot.slane %v4650_v32, 4  ;;  %v5817_v7 = vrot.slane %v5801_v6, 9  ;;  %v6956_v6 = vld [vmem:[%s8859_s1 + $0x108] sm:$0xff]  }
 0x113   : > { %6481 = vmatpush3.bf16.msra.mxu0 %v6906_v56  ;;  %v4186_v52 = vshll.u32 %v5749_v12, 16  ;;  %v2402_v2 = vrot.slane %v2400_v3, 4  ;;  %v2405_v56 = vrot.slane %v2403_v13, 5  ;;  %v4657_v4 = vrot.slane %v8922_v1, 5  ;;  %v5802_v12 = vld [vmem:[%s7066_s17 + $0x90] sm:$0xe] }
 0x114   : > { %v4192_v50 = vshll.u32 %v8488_v31, 16  ;;  %v4196_v0 = vshrl.u32 %v8488_v31, 16  ;;  %v8505_v44 = vsel %vm7344_vm5, %v4652_v30, %v4653_v33  ;;  %v4660_v55 = vrot.slane %v8923_v24, 5  ;;  %v6899_v3 = vld [vmem:[%s7066_s17 + $0x30] sm:$0xff]  }
 0x115   : > { %6451 = vmatmul.mubr.bf16.gmra.mrb[16].mxu0 %v8343_v58  ;;  %v8924_v58 = vld [vmem:[#allocation15_spill] sm:$0xff]  ;;  %v4175_v48 = vor.u32 %v4174_v5, %v8474_v59  ;;  %v2406_v23 = vor.u32 %v2405_v56, %v2402_v2  ;;  %v4659_v47 = vrot.slane %v4657_v4, 4  ;;  %v4152_v14 = vrot.slane %v4151_v34, 4  ;;  %v8526_v13 = vld [vmem:[%s7066_s17 + $0xd4] sm:$0x1]  ;;  %v8925_v2 = vld [vmem:[#allocation10_spill] sm:$0xff] }
 0x116   : > { %6243 = vmatmul.mubr.bf16.vlgmr.msra.gmra.mrb[0].mxu1 %v6896_v40  ;;  %6454 = vmatprep.mubr.bf16.mxu0 %v8345_v35  ;;  %v5848_v35 = vcombine.low %v8496_v29, %v8505_v44  ;;  %v4142_v40 = vrot.slane %v4141_v62, 4  ;;  %v4180_v18 = vrot.slane %v4178_v19, 5  ;;  %v8518_v32 = vsel %vm7344_vm5, %v5817_v7, %v4657_v4  ;;  %v6901_v19 = vld [vmem:[%s7066_s17 + $0x3c] sm:$0xff]   ;;  %v6957_v1 = vld [vmem:[%s8859_s1 + $0x110] sm:$0xff]  }
 0x117   : > { %6522 = vmatpush3.bf16.msra.mxu1 %v8924_v58  ;;  %6246 = vmatprep.mubr.bf16.mxu1 %v6898_v39  ;;  %v4185_v28 = vrot.slane %v4183_v46, 4  ;;  %v4188_v33 = vrot.slane %v4186_v52, 5  ;;  %v2407_v39 = vrot.slane %v2406_v23, 4  ;;  %v8522_v5 = vsel %vm7344_vm5, %v4659_v47, %v4660_v55  ;;  %v6958_v47 = vld [vmem:[%s7066_s17 + $0x1c] sm:$0xf] }
 0x118   : > { %6515 = vmatprep.subr.bf16.mxu1 %v6956_v6  ;;  %v8528_v53 = vrot.slane %v4192_v50, 5  ;;  %v4198_v30 = vrot.slane %v4196_v0, 4  ;;  %v5849_v62 = vcombine.low %v8518_v32, %v8522_v5  ;;  %v5818_v34 = vrot.slane %v5802_v12, 9 }
 0x119   : > { %v4166_v7 = vrot.slane %v4165_v60, 4  ;;  %v4176_v46 = vrot.slane %v4175_v48, 4  ;;  %v2412_v52 = vsel %vm7098_vm2, %v2407_v39, %v7674_v11  ;;  %v4664_v56 = vrot.slane %v8925_v2, 5  ;;  %v8926_v11 = vld [vmem:[#allocation14_spill] sm:$0xff]  ;;  %v6902_v39 = vld [vmem:[%s7066_s17 + $0x48] sm:$0xff]  }
 0x11a   : > { %v4147_v4 = vsel %vm7098_vm2, %v4142_v40, %v8374_v49  ;;  %v4157_v60 = vsel %vm7098_vm2, %v4152_v14, %v8463_v57  ;;  %v8546_v50 = vcombine.low %v2412_v52, %v2422_v16  ;;  %v4667_v0 = vrot.slane %v8926_v11, 5  ;;  %v5792_v57 = vld [vmem:[%s7066_s17 + $0x18] sm:$0xe]  ;;  %v5803_v16 = vld [vmem:[%s7066_s17 + $0x9c] sm:$0xe] }
 0x11b   : > { %6523 = vmatpush3.bf16.msra.mxu1 %v6956_v6  ;;  %v4189_v24 = vor.u32 %v4188_v33, %v4185_v28  ;;  %v4202_v55 = vshll.u32 %v8526_v13, 16  ;;  %v8553_v58 = vsel %vm7344_vm5, %v5818_v34, %v4664_v56  ;;  %v4666_v48 = vrot.slane %v4664_v56, 4  ;;  %v6959_v40 = vld [vmem:[%s8859_s1 + $0x118] sm:$0xff]   ;;  %v6960_v2 = vld [vmem:[%s7066_s17 + $0x20] sm:$0x1] }
 0x11c   : > { %6516 = vmatprep.subr.bf16.mxu1 %v6957_v1  ;;  %v4199_v49 = vor.u32 %v4198_v30, %v8528_v53  ;;  %v4181_v23 = vsel %vm7098_vm2, %v4176_v46, %v4180_v18  ;;  %v4594_v12 = vrot.slane %v6958_v47, 5  ;;  %v5781_v6 = vcombine.low %v4147_v4, %v4157_v60  ;;  %v8927_v34 = vld [vmem:[#allocation13_spill] sm:$0xff]  ;;  %v5804_v11 = vld [vmem:[%s7066_s17 + $0xa8] sm:$0xe] }
 0x11d   : > { %6455 = vmatmul.mubr.bf16.gmra.mrb[20].mxu0 %v8451_v36  ;;  %v4171_v36 = vsel %vm7098_vm2, %v4166_v7, %v8474_v59  ;;  %v4190_v14 = vrot.slane %v4189_v24, 4  ;;  %v4204_v28 = vrot.slane %v4202_v55, 5  ;;  %v5808_v18 = vrot.slane %v5792_v57, 9  ;;  %v6904_v46 = vld [vmem:[%s7066_s17 + $0x54] sm:$0xff]   ;;  %v5793_v55 = vld [vmem:[%s7066_s17 + $0x24] sm:$0xe] }
 0x11e   : > { %6247 = vmatmul.mubr.bf16.gmra.mrb[4].mxu1 %v6899_v3  ;;  %6458 = vmatprep.mubr.bf16.mxu0 %v8461_v22  ;;  %v8567_v22 = vsel %vm7344_vm5, %v4666_v48, %v4667_v0  ;;  %v5819_v33 = vrot.slane %v5803_v16, 9  ;;  %v5782_v3 = vcombine.low %v4171_v36, %v4181_v23  ;;  %v4200_v30 = vrot.slane %v4199_v49, 4  ;;  %v6962_v48 = vld [vmem:[%s7066_s17 + $0x28] sm:$0xf]  ;;  %v6963_v36 = vld [vmem:[%s7066_s17 + $0x34] sm:$0xf] }
 0x11f   : > { %6250 = vmatprep.mubr.bf16.mxu1 %v6901_v19  ;;  %6524 = vmatpush3.bf16.msra.mxu1 %v6957_v1  ;;  %v5850_v59 = vcombine.low %v8553_v58, %v8567_v22  ;;  %v4671_v19 = vrot.slane %v8927_v34, 5  ;;  %v4674_v7 = vrot.slane %v8256_v25, 5  ;;  %v4596_v52 = vrot.slane %v4594_v12, 4  ;;  %v6961_v1 = vld [vmem:[%s8859_s1 + $0x120] sm:$0xff]  }
 0x120   : > { %6517 = vmatprep.subr.bf16.mxu1 %v6959_v40  ;;  %v4597_v56 = vrot.slane %v6960_v2, 5  ;;  %v4595_v25 = vsel %vm7344_vm5, %v5808_v18, %v4594_v12  ;;  %v4195_v0 = vsel %vm7098_vm2, %v4190_v14, %v8528_v53  ;;  %v4205_v24 = vsel %vm7098_vm2, %v4200_v30, %v4204_v28  ;;  %v5794_v12 = vld [vmem:[%s7066_s17 + $0x30] sm:$0xe]  ;;  %v6905_v30 = vld [vmem:[%s7066_s17 + $0x60] sm:$0xff]  }
 0x121   : > { %v8584_v4 = vsel %vm7344_vm5, %v5819_v33, %v4671_v19  ;;  %v4673_v60 = vrot.slane %v4671_v19, 4  ;;  %v4601_v49 = vrot.slane %v6962_v48, 5  ;;  %v4608_v23 = vrot.slane %v6963_v36, 5  ;;  %v6965_v33 = vld [vmem:[%s7066_s17 + $0x2c] sm:$0x1] }
 0x122   : > { %v4598_v16 = vsel %vm7344_vm5, %v4596_v52, %v4597_v56  ;;  %v5820_v47 = vrot.slane %v5804_v11, 9  ;;  %v5783_v28 = vcombine.low %v4195_v0, %v4205_v24  ;;  %v5809_v18 = vrot.slane %v5793_v55, 9  ;;  %v6907_v52 = vld [vmem:[%s7066_s17 + $0x6c] sm:$0xff]   ;;  %v5805_v11 = vld [vmem:[%s7066_s17 + $0xb4] sm:$0xe] }
 0x123   : > { %6525 = vmatpush3.bf16.msra.mxu1 %v6959_v40  ;;  %v8598_v57 = vsel %vm7344_vm5, %v4673_v60, %v4674_v7  ;;  %v8928_v40 = vld [vmem:[#allocation16_spill] sm:$0xff]  ;;  %v5840_v34 = vcombine.low %v4595_v25, %v4598_v16  ;;  %v4603_v19 = vrot.slane %v4601_v49, 4  ;;  %v5810_v2 = vrot.slane %v5794_v12, 9  ;;  %v5795_v0 = vld [vmem:[%s7066_s17 + $0x3c] sm:$0xe] }
 0x124   : > { %6518 = vmatprep.subr.bf16.mxu1 %v6961_v1  ;;  %v5851_v53 = vcombine.low %v8584_v4, %v8598_v57  ;;  %v4678_v14 = vrot.slane %v8928_v40, 5  ;;  %v4610_v56 = vrot.slane %v4608_v23, 4  ;;  %v6967_v24 = vld [vmem:[%s7066_s17 + $0x40] sm:$0xf]  ;;  %v4602_v48 = vsel %vm7344_vm5, %v5809_v18, %v4601_v49  ;;  %v6969_v18 = vld [vmem:[%s7066_s17 + $0x44] sm:$0x1] }
 0x125   : > { %6459 = vmatmul.mubr.bf16.gmra.mrb[24].mxu0 %v5781_v6  ;;  %v6964_v6 = vld [vmem:[%s8859_s1 + $0x128] sm:$0xff]   ;;  %v4615_v55 = vrot.slane %v6967_v24, 5  ;;  %v4685_v12 = vrot.slane %v8303_v10, 5  ;;  %v4609_v49 = vsel %vm7344_vm5, %v5810_v2, %v4608_v23  ;;  %v6970_v10 = vld [vmem:[%s8859_s1 + $0x138] sm:$0xff]   ;;  %v5806_v23 = vld [vmem:[%s7066_s17 + $0xc0] sm:$0xe] }
 0x126   : > { %6251 = vmatmul.mubr.bf16.gmra.mrb[8].mxu1 %v6902_v39  ;;  %6462 = vmatprep.mubr.bf16.mxu0 %v5782_v3  ;;  %v4604_v39 = vrot.slane %v6965_v33, 5  ;;  %v4681_v3 = vrot.slane %v8291_v21, 5  ;;  %v8615_v7 = vsel %vm7344_vm5, %v5820_v47, %v4678_v14  ;;  %v6968_v21 = vld [vmem:[%s8859_s1 + $0x130] sm:$0xff]   ;;  %v5821_v47 = vrot.slane %v5805_v11, 9 }
 0x127   : > { %6254 = vmatprep.mubr.bf16.mxu1 %v6904_v46  ;;  %6526 = vmatpush3.bf16.msra.mxu1 %v6961_v1  ;;  %v4680_v46 = vrot.slane %v4678_v14, 4  ;;  %v6966_v1 = vld [vmem:[%s7066_s17 + $0x38] sm:$0x1]  ;;  %v5811_v14 = vrot.slane %v5795_v0, 9  ;;  %v4618_v33 = vrot.slane %v6969_v18, 5  ;;  %v4692_v11 = vrot.slane %v8385_v51, 5 }
 0x128   : > { %6519 = vmatprep.subr.bf16.mxu1 %v6964_v6  ;;  %v4611_v60 = vrot.slane %v6966_v1, 5  ;;  %v4605_v36 = vsel %vm7344_vm5, %v4603_v19, %v4604_v39  ;;  %v4687_v39 = vrot.slane %v4685_v12, 4  ;;  %v5496_v19 = vld [vmem:[%s7066_s17 + $0x6c] sm:$0xf]  ;;  %v6910_v18 = vld [vmem:[%s7066_s17 + $0x90] sm:$0xff]   ;;  %v2443_v20 = vshll.u32 %v6976_v63, 16 }
 0x129   : > { %v8627_v25 = vsel %vm7344_vm5, %v4680_v46, %v4681_v3  ;;  %v5841_v3 = vcombine.low %v4602_v48, %v4605_v36  ;;  %v4616_v1 = vsel %vm7344_vm5, %v5811_v14, %v4615_v55  ;;  %v2376_v0 = vshrl.u32 %v5496_v19, 16  ;;  %v5807_v51 = vld [vmem:[%s7066_s17 + $0xcc] sm:$0xe] }
 0x12a   : > { %v5852_v16 = vcombine.low %v8615_v7, %v8627_v25  ;;  %v4612_v40 = vsel %vm7344_vm5, %v4610_v56, %v4611_v60  ;;  %v5822_v56 = vrot.slane %v5806_v23, 9  ;;  %v2379_v24 = vshll.u32 %v5496_v19, 16 }
 0x12b   : > { %6527 = vmatpush3.bf16.msra.mxu1 %v6964_v6  ;;  %v4688_v6 = vrot.slane %v8324_v27, 5  ;;  %v8647_v27 = vsel %vm7344_vm5, %v5821_v47, %v4685_v12  ;;  %v4695_v36 = vrot.slane %v8436_v26, 5  ;;  %v4694_v12 = vrot.slane %v4692_v11, 4 }
 0x12c   : > { %6520 = vmatprep.subr.bf16.mxu1 %v6968_v21  ;;  %v2381_v26 = vrot.slane %v2379_v24, 5  ;;  %v4702_v23 = vrot.slane %v8526_v13, 5 }
 0x12d   : > { %6463 = vmatmul.mubr.bf16.gmra.mrb[28].mxu0 %v5783_v28  ;;  %v4617_v28 = vrot.slane %v4615_v55, 4  ;;  %v8654_v46 = vsel %vm7344_vm5, %v4687_v39, %v4688_v6  ;;  %v8668_v55 = vsel %vm7344_vm5, %v5822_v56, %v4692_v11  ;;  %v4699_v39 = vrot.slane %v8488_v31, 5  ;;  %v6972_v56 = vld [vmem:[%s7066_s17 + $0x74] sm:$0x1] }
 0x12e   : > { %6255 = vmatmul.mubr.bf16.gmra.mrb[12].mxu1 %v6905_v30  ;;  %6482 = vmatprep.mubr.bf16.mxu0 %v5840_v34  ;;  %v6908_v30 = vld [vmem:[%s7066_s17 + $0x78] sm:$0xff]   ;;  %v5842_v34 = vcombine.low %v4609_v49, %v4612_v40  ;;  %v5853_v2 = vcombine.low %v8647_v27, %v8654_v46  ;;  %v8673_v49 = vsel %vm7344_vm5, %v4694_v12, %v4695_v36  ;;  %v2378_v40 = vrot.slane %v2376_v0, 4  ;;  %v6973_v0 = vld [vmem:[%s7066_s17 + $0x88] sm:$0xf] }
 0x12f   : > { %6258 = vmatprep.mubr.bf16.mxu1 %v6907_v52  ;;  %6528 = vmatpush3.bf16.msra.mxu1 %v6968_v21  ;;  %v6909_v52 = vld [vmem:[%s7066_s17 + $0x84] sm:$0xff]   ;;  %v4619_v60 = vsel %vm7344_vm5, %v4617_v28, %v4618_v33  ;;  %v6971_v21 = vld [vmem:[%s7066_s17 + $0x70] sm:$0xf]  ;;  %v5854_v28 = vcombine.low %v8668_v55, %v8673_v49  ;;  %v4701_v19 = vrot.slane %v4699_v39, 4  ;;  %v2433_v24 = vshll.u32 %v6973_v0, 16 }
 0x130   : > { %6521 = vmatprep.subr.bf16.mxu1 %v6970_v10  ;;  %v2385_v48 = vshll.u32 %v6971_v21, 16  ;;  %v2389_v47 = vshrl.u32 %v6971_v21, 16  ;;  %v5843_v6 = vcombine.low %v4616_v1, %v4619_v60  ;;  %v2395_v1 = vshll.u32 %v6972_v56, 16 }
 0x131   : > { %v8695_v11 = vsel %vm7344_vm5, %v4701_v19, %v4702_v23  ;;  %v2437_v21 = vshrl.u32 %v6973_v0, 16  ;;  %v6975_v19 = vld [vmem:[%s7066_s17 + $0xa0] sm:$0xf] }
 0x132   : > { %v8675_v14 = vrot.slane %v2385_v48, 5  ;;  %v2391_v33 = vrot.slane %v2389_v47, 4  ;;  %v2485_v56 = vshrl.u32 %v6975_v19, 16 }
 0x133   : > { %6529 = vmatpush3.bf16.msra.mxu1 %v6970_v10  ;;  %v5823_v10 = vrot.slane %v5807_v51, 9 }
 0x134   : > { %v2392_v31 = vor.u32 %v2391_v33, %v8675_v14  ;;  %v2451_v33 = vshll.u32 %v5505_v61, 16 }
 0x135   : > { %6483 = vmatmul.mubr.bf16.vlgmr.msra.gmra.mrb[0].mxu0 %v5841_v3  ;;  %v6911_v3 = vld [vmem:[%s7066_s17 + $0x9c] sm:$0xff]  }
 0x136   : > { %6259 = vmatmul.mubr.bf16.gmra.mrb[16].mxu1 %v6908_v30  ;;  %6486 = vmatprep.mubr.bf16.mxu0 %v5842_v34  ;;  %v5502_v30 = vld [vmem:[%s7066_s17 + $0x84] sm:$0xf]  ;;  %v8686_v34 = vsel %vm7344_vm5, %v5823_v10, %v4699_v39  ;;  %v2393_v47 = vrot.slane %v2392_v31, 4  ;;  %v6974_v10 = vld [vmem:[%s7066_s17 + $0x94] sm:$0xf]  ;;  %v2453_v0 = vrot.slane %v2451_v33, 5 }
 0x137   : > { %6262 = vmatprep.mubr.bf16.mxu1 %v6909_v52  ;;  %v2382_v52 = vor.u32 %v2381_v26, %v2378_v40  ;;  %v2424_v13 = vshrl.u32 %v5502_v30, 16  ;;  %v2427_v60 = vshll.u32 %v5502_v30, 16  ;;  %v5855_v48 = vcombine.low %v8686_v34, %v8695_v11 }
 0x138   : > { %v8704_v40 = vrot.slane %v2433_v24, 5  ;;  %v2439_v26 = vrot.slane %v2437_v21, 4  ;;  %v2457_v39 = vshll.u32 %v6974_v10, 16  ;;  %v2461_v23 = vshrl.u32 %v6974_v10, 16  ;;  %v6978_v10 = vld [vmem:[%s7066_s17 + $0xa4] sm:$0x1] }
 0x139   : > { %v2383_v36 = vrot.slane %v2382_v52, 4  ;;  %v2426_v12 = vrot.slane %v2424_v13, 4  ;;  %v2429_v51 = vrot.slane %v2427_v60, 5  ;;  %v2481_v52 = vshll.u32 %v6975_v19, 16  ;;  %v6979_v19 = vld [vmem:[%s7066_s17 + $0xac] sm:$0xf] }
 0x13a   : > { %v2440_v13 = vor.u32 %v2439_v26, %v8704_v40  ;;  %v8721_v41 = vrot.slane %v2457_v39, 5  ;;  %v2463_v42 = vrot.slane %v2461_v23, 4  ;;  %v2487_v21 = vrot.slane %v2485_v56, 4  ;;  %v5514_v23 = vld [vmem:[%s7066_s17 + $0xb4] sm:$0xf] }
 0x13b   : > { %v2491_v39 = vshll.u32 %v6978_v10, 16  ;;  %v2509_v15 = vshrl.u32 %v6979_v19, 16  ;;  %v2523_v63 = vshll.u32 %v5514_v23, 16 }
 0x13c   : > { %v2464_v26 = vor.u32 %v2463_v42, %v8721_v41 }
 0x13d   : > { %6487 = vmatmul.mubr.bf16.gmra.mrb[4].mxu0 %v5843_v6  ;;  %v5508_v6 = vld [vmem:[%s7066_s17 + $0x9c] sm:$0xf] }
 0x13e   : > { %6263 = vmatmul.mubr.bf16.gmra.mrb[20].mxu1 %v6910_v18  ;;  %6490 = vmatprep.mubr.bf16.mxu0 %v5844_v8  ;;  %v2397_v8 = vrot.slane %v2395_v1, 5  ;;  %v2448_v18 = vshrl.u32 %v5505_v61, 16  ;;  %v2475_v30 = vshll.u32 %v5508_v6, 16  ;;  %v2388_v1 = vsel %vm7098_vm2, %v2383_v36, %v8675_v14  ;;  %v6914_v61 = vld [vmem:[%s7066_s17 + $0xc0] sm:$0xff]  }
 0x13f   : > { %6266 = vmatprep.mubr.bf16.mxu1 %v6911_v3  ;;  %v2472_v3 = vshrl.u32 %v5508_v6, 16  ;;  %v8723_v14 = vrot.slane %v2481_v52, 5  ;;  %v2505_v52 = vshll.u32 %v6979_v19, 16 }
 0x140   : > { %v2398_v31 = vsel %vm7098_vm2, %v2393_v47, %v2397_v8  ;;  %v2450_v60 = vrot.slane %v2448_v18, 4  ;;  %v2477_v24 = vrot.slane %v2475_v30, 5  ;;  %v2445_v8 = vrot.slane %v2443_v20, 5  ;;  %v6980_v20 = vld [vmem:[%s7066_s17 + $0xb8] sm:$0xf] }
 0x141   : > { %v2441_v47 = vrot.slane %v2440_v13, 4  ;;  %v2488_v33 = vor.u32 %v2487_v21, %v8723_v14  ;;  %v2529_v29 = vshll.u32 %v6980_v20, 16  ;;  %v2533_v44 = vshrl.u32 %v6980_v20, 16 }
 0x143   : > { %v2489_v13 = vrot.slane %v2488_v33, 4 }
 0x145   : > { %6491 = vmatmul.mubr.bf16.gmra.mrb[8].mxu0 %v5845_v54  ;;  %v2430_v54 = vor.u32 %v2429_v51, %v2426_v12  ;;  %v2454_v12 = vor.u32 %v2453_v0, %v2450_v60  ;;  %v6977_v51 = vld [vmem:[%s7066_s17 + $0x98] sm:$0x1]  ;;  %v2493_v60 = vrot.slane %v2491_v39, 5 }
 0x146   : > { %6267 = vmatmul.mubr.bf16.gmra.mrb[24].mxu1 %v6912_v45  ;;  %6494 = vmatprep.mubr.bf16.mxu0 %v5846_v17  ;;  %v2474_v17 = vrot.slane %v2472_v3, 4  ;;  %v5544_v45 = vcombine.low %v2388_v1, %v2398_v31  ;;  %v2467_v6 = vshll.u32 %v6977_v51, 16  ;;  %v2520_v31 = vshrl.u32 %v5514_v23, 16 }
 0x147   : > { %6270 = vmatprep.mubr.bf16.mxu1 %v6913_v9  ;;  %v2431_v36 = vrot.slane %v2430_v54, 4  ;;  %v5511_v9 = vld [vmem:[%s7066_s17 + $0xa8] sm:$0xf]  ;;  %v2455_v56 = vrot.slane %v2454_v12, 4  ;;  %v2494_v32 = vsel %vm7098_vm2, %v2489_v13, %v2493_v60 }
 0x148   : > { %v2478_v18 = vor.u32 %v2477_v24, %v2474_v17  ;;  %v2496_v3 = vshrl.u32 %v5511_v9, 16  ;;  %v2499_v30 = vshll.u32 %v5511_v9, 16  ;;  %v2469_v1 = vrot.slane %v2467_v6, 5 }
 0x149   : > { %v2436_v43 = vsel %vm7098_vm2, %v2431_v36, %v8704_v40  ;;  %v2507_v17 = vrot.slane %v2505_v52, 5  ;;  %v2511_v24 = vrot.slane %v2509_v15, 4  ;;  %v2522_v21 = vrot.slane %v2520_v31, 4  ;;  %v5517_v36 = vld [vmem:[%s7066_s17 + $0xc0] sm:$0xf] }
 0x14a   : > { %v2479_v54 = vrot.slane %v2478_v18, 4  ;;  %v2498_v0 = vrot.slane %v2496_v3, 4  ;;  %v2501_v42 = vrot.slane %v2499_v30, 5  ;;  %v2544_v9 = vshrl.u32 %v5517_v36, 16  ;;  %v6982_v18 = vld [vmem:[%s7066_s17 + $0xc4] sm:$0xf] }
 0x14b   : > { %v2553_v33 = vshll.u32 %v6982_v18, 16 }
 0x14c   : > { %v2484_v51 = vsel %vm7098_vm2, %v2479_v54, %v8723_v14  ;;  %v2502_v5 = vor.u32 %v2501_v42, %v2498_v0  ;;  %v2557_v14 = vshrl.u32 %v6982_v18, 16  ;;  %v2546_v19 = vrot.slane %v2544_v9, 4 }
 0x14d   : > { %6495 = vmatmul.mubr.bf16.gmra.mrb[12].mxu0 %v5847_v38  ;;  %v2446_v38 = vsel %vm7098_vm2, %v2441_v47, %v2445_v8  ;;  %v2535_v8 = vrot.slane %v2533_v44, 4  ;;  %v2460_v47 = vsel %vm7098_vm2, %v2455_v56, %v8721_v41  ;;  %v6981_v41 = vld [vmem:[%s7066_s17 + $0xb0] sm:$0x1]  ;;  %v5548_v58 = vcombine.low %v2484_v51, %v2494_v32  ;;  %v6984_v44 = vld [vmem:[%s7066_s17 + $0xc8] sm:$0x1] }
 0x14e   : > { %6271 = vmatmul.mubr.bf16.gmra.mrb[28].mxu1 %v6914_v61  ;;  %6498 = vmatprep.mubr.bf16.mxu0 %v5848_v35  ;;  %v2465_v35 = vrot.slane %v2464_v26, 4  ;;  %v5546_v40 = vcombine.low %v2436_v43, %v2446_v38  ;;  %v2525_v61 = vrot.slane %v2523_v63, 5  ;;  %v2515_v6 = vshll.u32 %v6981_v41, 16 }
 0x14f   : > { %6306 = vmatprep.mubr.bf16.mxu1 %v5544_v45  ;;  %v2531_v45 = vrot.slane %v2529_v29, 5  ;;  %v2547_v26 = vshll.u32 %v5517_v36, 16  ;;  %v2503_v22 = vrot.slane %v2502_v5, 4  ;;  %v2555_v15 = vrot.slane %v2553_v33, 5 }
 0x150   : > { %v2470_v12 = vsel %vm7098_vm2, %v2465_v35, %v2469_v1  ;;  %v2526_v10 = vor.u32 %v2525_v61, %v2522_v21  ;;  %v2517_v30 = vrot.slane %v2515_v6, 5  ;;  %v2559_v43 = vrot.slane %v2557_v14, 4 }
 0x151   : > { %v2536_v39 = vor.u32 %v2535_v8, %v2531_v45  ;;  %v5547_v3 = vcombine.low %v2460_v47, %v2470_v12  ;;  %v2549_v52 = vrot.slane %v2547_v26, 5  ;;  %v2508_v31 = vsel %vm7098_vm2, %v2503_v22, %v2507_v17 }
 0x152   : > { %v2527_v38 = vrot.slane %v2526_v10, 4  ;;  %v2560_v29 = vor.u32 %v2559_v43, %v2555_v15  ;;  %v2563_v35 = vshll.u32 %v6984_v44, 16 }
 0x153   : > { %v2537_v56 = vrot.slane %v2536_v39, 4  ;;  %v2550_v20 = vor.u32 %v2549_v52, %v2546_v19 }
 0x154   : > { %v2532_v4 = vsel %vm7098_vm2, %v2527_v38, %v2531_v45  ;;  %v2565_v54 = vrot.slane %v2563_v35, 5 }
 0x155   : > { %6499 = vmatmul.mubr.bf16.gmra.mrb[16].mxu0 %v5849_v62  ;;  %v2512_v62 = vor.u32 %v2511_v24, %v2507_v17  ;;  %v2551_v25 = vrot.slane %v2550_v20, 4 }
 0x156   : > { %6307 = vmatmul.mubr.bf16.vlgmr.msra.gmra.mrb[16].mxu1 %v8546_v50  ;;  %6502 = vmatprep.mubr.bf16.mxu0 %v5850_v59  ;;  %v6983_v50 = vld [vmem:[%s7066_s17 + $0xbc] sm:$0x1]  ;;  %s5278_s17 = sshll.u32 %s7024_s16, 5 }
 0x157   : > { %6310 = vmatprep.mubr.bf16.mxu1 %v5546_v40  ;;  %v2539_v23 = vshll.u32 %v6983_v50, 16  ;;  %v2513_v59 = vrot.slane %v2512_v62, 4  ;;  %v2556_v13 = vsel %vm7098_vm2, %v2551_v25, %v2555_v15  ;;  %p205_p4 = scmp.lt.s32.totalorder %s5278_s17, 63 }
 0x159   : > { %v2541_v1 = vrot.slane %v2539_v23, 5  ;;  %v2518_v63 = vsel %vm7098_vm2, %v2513_v59, %v2517_v30  ;;  %s8930_s17 = smov (!%p205_p4, %s5278_s17), 63 }
 0x15a   : > { %s5279_s26 = sshll.u32 %s8930_s17, 3 }
 0x15b   : > { %v2542_v57 = vsel %vm7098_vm2, %v2537_v56, %v2541_v1  ;;  %s8808_s30 = scalar_lea.vmem %s8860_s2, %s5279_s26 }
 0x15c   : > { %v5550_v7 = vcombine.low %v2532_v4, %v2542_v57 }
 0x15d   : > { %6503 = vmatmul.mubr.bf16.gmra.mrb[20].mxu0 %v5851_v53  ;;  %v5549_v53 = vcombine.low %v2508_v31, %v2518_v63 }
 0x15e   : > { %6311 = vmatmul.mubr.bf16.gmra.mrb[20].mxu1 %v5547_v3  ;;  %6506 = vmatprep.mubr.bf16.mxu0 %v5852_v16  ;;  %v2561_v16 = vrot.slane %v2560_v29, 4 }
 0x15f   : > { %6314 = vmatprep.mubr.bf16.mxu1 %v5548_v58 }
 0x160   : > { %v2566_v60 = vsel %vm7098_vm2, %v2561_v16, %v2565_v54 }
 0x161   : > { %v5551_v0 = vcombine.low %v2556_v13, %v2566_v60 }
 0x165   : > { %6507 = vmatmul.mubr.bf16.gmra.mrb[24].mxu0 %v5853_v2 }
 0x166   : > { %6315 = vmatmul.mubr.bf16.gmra.mrb[24].mxu1 %v5549_v53  ;;  %6510 = vmatprep.mubr.bf16.mxu0 %v5854_v28 }
 0x167   : > { %6318 = vmatprep.mubr.bf16.mxu1 %v5550_v7 }
 0x16d   : > { %6511 = vmatmul.mubr.bf16.gmra.mrb[28].mxu0 %v5855_v48 }
 0x16e   : > { %6319 = vmatmul.mubr.bf16.gmra.mrb[28].mxu1 %v5551_v0 }
 0x1e9   : > { %v6244_v27 = vpop.f32.mrb[0].mxu1 }
 0x1ea   : > { %v1976_v46 = vpop.f32.mrb[1].mxu1 }
 0x1eb   : > { %v6245_v2 = vpop.f32.mrb[2].mxu1 }
 0x1ec   : > { %v1979_v42 = vpop.f32.mrb[3].mxu1 }
 0x1f1   : > { %v6248_v55 = vpop.f32.mrb[4].mxu1 }
 0x1f2   : > { %v1992_v49 = vpop.f32.mrb[5].mxu1 }
 0x1f3   : > { %v6249_v28 = vpop.f32.mrb[6].mxu1 }
 0x1f4   : > { %v1995_v17 = vpop.f32.mrb[7].mxu1 }
 0x1f9   : > { %v6252_v24 = vpop.f32.mrb[8].mxu1 }
 0x1fa   : > { %v2008_v40 = vpop.f32.mrb[9].mxu1 }
 0x1fb   : > { %v6253_v21 = vpop.f32.mrb[10].mxu1 }
 0x1fc   : > { %v8795_v37 = vpop.f32.mrb[11].mxu1 }
 0x201   : > { %v8797_v61 = vpop.f32.mrb[12].mxu1 }
 0x202   : > { %v8799_v34 = vpop.f32.mrb[13].mxu1 }
 0x203   : > { %v8801_v11 = vpop.f32.mrb[14].mxu1 }
 0x204   : > { %v8803_v48 = vpop.f32.mrb[15].mxu1 }
 0x208   : > { %v6484_v45 = vpop.f32.mrb[0].mxu0 }
 0x209   : > { %v6530_v8 = vadd.f32 %v6484_v45, %v6244_v27  ;;  %v4867_v36 = vpop.f32.mrb[1].mxu0 }
 0x20a   : > { %v6531_v47 = vadd.f32 %v4867_v36, %v1976_v46  ;;  %v6485_v12 = vpop.f32.mrb[2].mxu0 }
 0x20b   : > { %5028 = vst [vmem:[%s8808_s30 + $0x10] sm:$0xff] %v6530_v8  ;;  %v6532_v51 = vadd.f32 %v6485_v12, %v6245_v2  ;;  %v4870_v32 = vpop.f32.mrb[3].mxu0  ;;  %v5098_v9 = vmul.f32 %v6530_v8, %v6530_v8 }
 0x20c   : > { %5026 = vst [vmem:[%s8808_s30] sm:$0xff] %v6531_v47  ;;  %v6533_v5 = vadd.f32 %v4870_v32, %v1979_v42  ;;  %v5096_v62 = vmul.f32 %v6531_v47, %v6531_v47 }
 0x20d   : > { %5029 = vst [vmem:[%s8808_s30 + $0x18] sm:$0xff] %v6532_v51  ;;  %v5099_v39 = vmul.f32 %v6532_v51, %v6532_v51 }
 0x20e   : > { %5027 = vst [vmem:[%s8808_s30 + $0x8] sm:$0xff] %v6533_v5  ;;  %v5058_v41 = vadd.f32 %v6533_v5, %v6531_v47  ;;  %v5097_v6 = vmul.f32 %v6533_v5, %v6533_v5 }
 0x210   : > { %v5059_v26 = vadd.f32 %v6530_v8, %v5058_v41  ;;  %v5128_v18 = vadd.f32 %v5097_v6, %v5096_v62  ;;  %v6488_v33 = vpop.f32.mrb[4].mxu0 }
 0x211   : > { %v6534_v14 = vadd.f32 %v6488_v33, %v6248_v55  ;;  %v4883_v10 = vpop.f32.mrb[5].mxu0 }
 0x212   : > { %v5129_v50 = vadd.f32 %v5128_v18, %v5098_v9  ;;  %v6535_v23 = vadd.f32 %v4883_v10, %v1992_v49  ;;  %v5060_v3 = vadd.f32 %v6532_v51, %v5059_v26  ;;  %v6489_v58 = vpop.f32.mrb[6].mxu0 }
 0x213   : > { %5032 = vst [vmem:[%s8808_s30 + $0x30] sm:$0xff] %v6534_v14  ;;  %v6536_v22 = vadd.f32 %v6489_v58, %v6249_v28  ;;  %v4886_v59 = vpop.f32.mrb[7].mxu0  ;;  %v5102_v1 = vmul.f32 %v6534_v14, %v6534_v14 }
 0x214   : > { %5030 = vst [vmem:[%s8808_s30 + $0x20] sm:$0xff] %v6535_v23  ;;  %v5061_v30 = vadd.f32 %v6535_v23, %v5060_v3  ;;  %v5100_v19 = vmul.f32 %v6535_v23, %v6535_v23  ;;  %v5130_v52 = vadd.f32 %v5129_v50, %v5099_v39  ;;  %v6537_v15 = vadd.f32 %v4886_v59, %v1995_v17 }
 0x215   : > { %5033 = vst [vmem:[%s8808_s30 + $0x38] sm:$0xff] %v6536_v22  ;;  %v5103_v35 = vmul.f32 %v6536_v22, %v6536_v22 }
 0x216   : > { %v5131_v43 = vadd.f32 %v5130_v52, %v5100_v19  ;;  %5031 = vst [vmem:[%s8808_s30 + $0x28] sm:$0xff] %v6537_v15  ;;  %v5062_v38 = vadd.f32 %v6537_v15, %v5061_v30  ;;  %v5101_v56 = vmul.f32 %v6537_v15, %v6537_v15 }
 0x218   : > { %v5063_v31 = vadd.f32 %v6534_v14, %v5062_v38  ;;  %v5132_v63 = vadd.f32 %v5131_v43, %v5101_v56  ;;  %v6492_v20 = vpop.f32.mrb[8].mxu0 }
 0x219   : > { %v6538_v29 = vadd.f32 %v6492_v20, %v6252_v24  ;;  %v4899_v44 = vpop.f32.mrb[9].mxu0 }
 0x21a   : > { %v5133_v4 = vadd.f32 %v5132_v63, %v5102_v1  ;;  %v6539_v57 = vadd.f32 %v4899_v44, %v2008_v40  ;;  %v5064_v53 = vadd.f32 %v6536_v22, %v5063_v31  ;;  %v6493_v7 = vpop.f32.mrb[10].mxu0 }
 0x21b   : > { %5036 = vst [vmem:[%s8808_s30 + $0x50] sm:$0xff] %v6538_v29  ;;  %v6540_v25 = vadd.f32 %v6493_v7, %v6253_v21  ;;  %v4902_v16 = vpop.f32.mrb[11].mxu0  ;;  %v5106_v42 = vmul.f32 %v6538_v29, %v6538_v29 }
 0x21c   : > { %5034 = vst [vmem:[%s8808_s30 + $0x40] sm:$0xff] %v6539_v57  ;;  %v5065_v54 = vadd.f32 %v6539_v57, %v5064_v53  ;;  %v5104_v13 = vmul.f32 %v6539_v57, %v6539_v57  ;;  %v5134_v60 = vadd.f32 %v5133_v4, %v5103_v35  ;;  %v6541_v0 = vadd.f32 %v4902_v16, %v8795_v37 }
 0x21d   : > { %5037 = vst [vmem:[%s8808_s30 + $0x58] sm:$0xff] %v6540_v25  ;;  %v5107_v40 = vmul.f32 %v6540_v25, %v6540_v25 }
 0x21e   : > { %v5135_v27 = vadd.f32 %v5134_v60, %v5104_v13  ;;  %5035 = vst [vmem:[%s8808_s30 + $0x48] sm:$0xff] %v6541_v0  ;;  %v5066_v46 = vadd.f32 %v6541_v0, %v5065_v54  ;;  %v5105_v2 = vmul.f32 %v6541_v0, %v6541_v0 }
 0x220   : > { %v5067_v55 = vadd.f32 %v6538_v29, %v5066_v46  ;;  %v5136_v49 = vadd.f32 %v5135_v27, %v5105_v2  ;;  %v6496_v28 = vpop.f32.mrb[12].mxu0 }
 0x221   : > { %v6542_v17 = vadd.f32 %v6496_v28, %v8797_v61  ;;  %v4915_v24 = vpop.f32.mrb[13].mxu0 }
 0x222   : > { %v5137_v21 = vadd.f32 %v5136_v49, %v5106_v42  ;;  %v6543_v37 = vadd.f32 %v4915_v24, %v8799_v34  ;;  %v5068_v45 = vadd.f32 %v6540_v25, %v5067_v55  ;;  %v6497_v8 = vpop.f32.mrb[14].mxu0 }
 0x223   : > { %5040 = vst [vmem:[%s8808_s30 + $0x70] sm:$0xff] %v6542_v17  ;;  %v6544_v36 = vadd.f32 %v6497_v8, %v8801_v11  ;;  %v4918_v47 = vpop.f32.mrb[15].mxu0  ;;  %v5110_v6 = vmul.f32 %v6542_v17, %v6542_v17 }
 0x224   : > { %5038 = vst [vmem:[%s8808_s30 + $0x60] sm:$0xff] %v6543_v37  ;;  %v5069_v12 = vadd.f32 %v6543_v37, %v5068_v45  ;;  %v5108_v51 = vmul.f32 %v6543_v37, %v6543_v37  ;;  %v5138_v32 = vadd.f32 %v5137_v21, %v5107_v40  ;;  %v6545_v5 = vadd.f32 %v4918_v47, %v8803_v48 }
 0x225   : > { %5041 = vst [vmem:[%s8808_s30 + $0x78] sm:$0xff] %v6544_v36  ;;  %v5111_v33 = vmul.f32 %v6544_v36, %v6544_v36 }
 0x226   : > { %v5139_v61 = vadd.f32 %v5138_v32, %v5108_v51  ;;  %5039 = vst [vmem:[%s8808_s30 + $0x68] sm:$0xff] %v6545_v5  ;;  %v5070_v62 = vadd.f32 %v6545_v5, %v5069_v12  ;;  %v5109_v41 = vmul.f32 %v6545_v5, %v6545_v5 }
 0x228   : > { %v5071_v34 = vadd.f32 %v6542_v17, %v5070_v62  ;;  %v5140_v9 = vadd.f32 %v5139_v61, %v5109_v41  ;;  %v6500_v26 = vpop.f32.mrb[16].mxu0 }
 0x229   : > { %v6308_v18 = vpop.f32.mrb[16].mxu1  ;;  %v4931_v11 = vpop.f32.mrb[17].mxu0 }
 0x22a   : > { %v5141_v14 = vadd.f32 %v5140_v9, %v5110_v6  ;;  %v6546_v10 = vadd.f32 %v6500_v26, %v6308_v18  ;;  %v2794_v39 = vpop.f32.mrb[17].mxu1  ;;  %v5072_v48 = vadd.f32 %v6544_v36, %v5071_v34  ;;  %v6501_v50 = vpop.f32.mrb[18].mxu0 }
 0x22b   : > { %v6547_v23 = vadd.f32 %v4931_v11, %v2794_v39  ;;  %v6309_v3 = vpop.f32.mrb[18].mxu1  ;;  %v4934_v58 = vpop.f32.mrb[19].mxu0 }
 0x22c   : > { %5044 = vst [vmem:[%s8808_s30 + $0x90] sm:$0xff] %v6546_v10  ;;  %v5142_v22 = vadd.f32 %v5141_v14, %v5111_v33  ;;  %v6548_v59 = vadd.f32 %v6501_v50, %v6309_v3  ;;  %v2797_v30 = vpop.f32.mrb[19].mxu1  ;;  %v5114_v31 = vmul.f32 %v6546_v10, %v6546_v10 }
 0x22d   : > { %5042 = vst [vmem:[%s8808_s30 + $0x80] sm:$0xff] %v6547_v23  ;;  %v5073_v19 = vadd.f32 %v6547_v23, %v5072_v48  ;;  %v5112_v52 = vmul.f32 %v6547_v23, %v6547_v23  ;;  %v6549_v15 = vadd.f32 %v4934_v58, %v2797_v30 }
 0x22e   : > { %5045 = vst [vmem:[%s8808_s30 + $0x98] sm:$0xff] %v6548_v59  ;;  %v5115_v53 = vmul.f32 %v6548_v59, %v6548_v59 }
 0x22f   : > { %v5143_v43 = vadd.f32 %v5142_v22, %v5112_v52  ;;  %5043 = vst [vmem:[%s8808_s30 + $0x88] sm:$0xff] %v6549_v15  ;;  %v5074_v38 = vadd.f32 %v6549_v15, %v5073_v19  ;;  %v5113_v56 = vmul.f32 %v6549_v15, %v6549_v15 }
 0x230   : > { %v6504_v1 = vpop.f32.mrb[20].mxu0 }
 0x231   : > { %v5075_v63 = vadd.f32 %v6546_v10, %v5074_v38  ;;  %v5144_v20 = vadd.f32 %v5143_v43, %v5113_v56  ;;  %v6312_v29 = vpop.f32.mrb[20].mxu1  ;;  %v4947_v44 = vpop.f32.mrb[21].mxu0 }
 0x232   : > { %v6550_v35 = vadd.f32 %v6504_v1, %v6312_v29  ;;  %v2810_v4 = vpop.f32.mrb[21].mxu1  ;;  %v6505_v57 = vpop.f32.mrb[22].mxu0 }
 0x233   : > { %v5145_v7 = vadd.f32 %v5144_v20, %v5114_v31  ;;  %v6551_v25 = vadd.f32 %v4947_v44, %v2810_v4  ;;  %v5076_v16 = vadd.f32 %v6548_v59, %v5075_v63  ;;  %v6313_v54 = vpop.f32.mrb[22].mxu1  ;;  %v4950_v13 = vpop.f32.mrb[23].mxu0 }
 0x234   : > { %5048 = vst [vmem:[%s8808_s30 + $0xb0] sm:$0xff] %v6550_v35  ;;  %v6552_v60 = vadd.f32 %v6505_v57, %v6313_v54  ;;  %v2813_v0 = vpop.f32.mrb[23].mxu1  ;;  %v5118_v24 = vmul.f32 %v6550_v35, %v6550_v35 }
 0x235   : > { %5046 = vst [vmem:[%s8808_s30 + $0xa0] sm:$0xff] %v6551_v25  ;;  %v5077_v27 = vadd.f32 %v6551_v25, %v5076_v16  ;;  %v5116_v46 = vmul.f32 %v6551_v25, %v6551_v25  ;;  %v5146_v2 = vadd.f32 %v5145_v7, %v5115_v53  ;;  %v6553_v42 = vadd.f32 %v4950_v13, %v2813_v0 }
 0x236   : > { %5049 = vst [vmem:[%s8808_s30 + $0xb8] sm:$0xff] %v6552_v60  ;;  %v5119_v12 = vmul.f32 %v6552_v60, %v6552_v60 }
 0x237   : > { %v5147_v55 = vadd.f32 %v5146_v2, %v5116_v46  ;;  %5047 = vst [vmem:[%s8808_s30 + $0xa8] sm:$0xff] %v6553_v42  ;;  %v5078_v49 = vadd.f32 %v6553_v42, %v5077_v27  ;;  %v5117_v28 = vmul.f32 %v6553_v42, %v6553_v42 }
 0x238   : > { %v6508_v17 = vpop.f32.mrb[24].mxu0 }
 0x239   : > { %v5079_v40 = vadd.f32 %v6550_v35, %v5078_v49  ;;  %v5148_v21 = vadd.f32 %v5147_v55, %v5117_v28  ;;  %v6316_v37 = vpop.f32.mrb[24].mxu1  ;;  %v4963_v45 = vpop.f32.mrb[25].mxu0 }
 0x23a   : > { %v6554_v8 = vadd.f32 %v6508_v17, %v6316_v37  ;;  %v2826_v36 = vpop.f32.mrb[25].mxu1  ;;  %v6509_v47 = vpop.f32.mrb[26].mxu0 }
 0x23b   : > { %v5149_v51 = vadd.f32 %v5148_v21, %v5118_v24  ;;  %v6555_v32 = vadd.f32 %v4963_v45, %v2826_v36  ;;  %v5080_v5 = vadd.f32 %v6552_v60, %v5079_v40  ;;  %v6317_v61 = vpop.f32.mrb[26].mxu1  ;;  %v4966_v62 = vpop.f32.mrb[27].mxu0 }
 0x23c   : > { %5052 = vst [vmem:[%s8808_s30 + $0xd0] sm:$0xff] %v6554_v8  ;;  %v6556_v41 = vadd.f32 %v6509_v47, %v6317_v61  ;;  %v2829_v6 = vpop.f32.mrb[27].mxu1  ;;  %v5122_v39 = vmul.f32 %v6554_v8, %v6554_v8 }
 0x23d   : > { %5050 = vst [vmem:[%s8808_s30 + $0xc0] sm:$0xff] %v6555_v32  ;;  %v5081_v34 = vadd.f32 %v6555_v32, %v5080_v5  ;;  %v5120_v9 = vmul.f32 %v6555_v32, %v6555_v32  ;;  %v5150_v26 = vadd.f32 %v5149_v51, %v5119_v12  ;;  %v6557_v18 = vadd.f32 %v4966_v62, %v2829_v6 }
 0x23e   : > { %5053 = vst [vmem:[%s8808_s30 + $0xd8] sm:$0xff] %v6556_v41  ;;  %v5123_v30 = vmul.f32 %v6556_v41, %v6556_v41 }
 0x23f   : > { %v5151_v11 = vadd.f32 %v5150_v26, %v5120_v9  ;;  %5051 = vst [vmem:[%s8808_s30 + $0xc8] sm:$0xff] %v6557_v18  ;;  %v5082_v33 = vadd.f32 %v6557_v18, %v5081_v34  ;;  %v5121_v14 = vmul.f32 %v6557_v18, %v6557_v18 }
 0x240   : > { %v6512_v10 = vpop.f32.mrb[28].mxu0 }
 0x241   : > { %v5083_v48 = vadd.f32 %v6554_v8, %v5082_v33  ;;  %v5152_v50 = vadd.f32 %v5151_v11, %v5121_v14  ;;  %v6320_v23 = vpop.f32.mrb[28].mxu1  ;;  %v4979_v3 = vpop.f32.mrb[29].mxu0 }
 0x242   : > { %v6558_v58 = vadd.f32 %v6512_v10, %v6320_v23  ;;  %v2842_v22 = vpop.f32.mrb[29].mxu1  ;;  %v6513_v59 = vpop.f32.mrb[30].mxu0 }
 0x243   : > { %v5153_v19 = vadd.f32 %v5152_v50, %v5122_v39  ;;  %v6559_v52 = vadd.f32 %v4979_v3, %v2842_v22  ;;  %v5084_v15 = vadd.f32 %v6556_v41, %v5083_v48  ;;  %v6321_v43 = vpop.f32.mrb[30].mxu1  ;;  %v4982_v38 = vpop.f32.mrb[31].mxu0 }
 0x244   : > { %5056 = vst [vmem:[%s8808_s30 + $0xf0] sm:$0xff] %v6558_v58  ;;  %v6560_v56 = vadd.f32 %v6513_v59, %v6321_v43  ;;  %v2845_v1 = vpop.f32.mrb[31].mxu1  ;;  %v5126_v57 = vmul.f32 %v6558_v58, %v6558_v58 }
 0x245   : > { %5054 = vst [vmem:[%s8808_s30 + $0xe0] sm:$0xff] %v6559_v52  ;;  %v5085_v31 = vadd.f32 %v6559_v52, %v5084_v15  ;;  %v5124_v63 = vmul.f32 %v6559_v52, %v6559_v52  ;;  %v5154_v20 = vadd.f32 %v5153_v19, %v5123_v30  ;;  %v6561_v29 = vadd.f32 %v4982_v38, %v2845_v1 }
 0x246   : > { %5057 = vst [vmem:[%s8808_s30 + $0xf8] sm:$0xff] %v6560_v56  ;;  %v5127_v25 = vmul.f32 %v6560_v56, %v6560_v56 }
 0x247   : > { %v5155_v44 = vadd.f32 %v5154_v20, %v5124_v63  ;;  %5055 = vst [vmem:[%s8808_s30 + $0xe8] sm:$0xff] %v6561_v29  ;;  %v5086_v35 = vadd.f32 %v6561_v29, %v5085_v31  ;;  %v5125_v4 = vmul.f32 %v6561_v29, %v6561_v29 }
 0x249   : > { %v5087_v53 = vadd.f32 %v6558_v58, %v5086_v35  ;;  %v5156_v7 = vadd.f32 %v5155_v44, %v5125_v4 }
 0x24b   : > { %v5088_v16 = vadd.f32 %v6560_v56, %v5087_v53  ;;  %v5157_v54 = vadd.f32 %v5156_v7, %v5126_v57 }
 0x24d   : > { %v5089_v13 = vrot.slane %v5088_v16, 4  ;;  %v5158_v60 = vadd.f32 %v5157_v54, %v5127_v25 }
 0x24f   : > { %v5090_v0 = vadd.f32 %v5089_v13, %v5088_v16  ;;  %v5159_v27 = vrot.slane %v5158_v60, 4 }
 0x251   : > { %v5091_v46 = vrot.slane %v5090_v0, 2  ;;  %v5160_v2 = vadd.f32 %v5159_v27, %v5158_v60 }
 0x253   : > { %v5092_v42 = vadd.f32 %v5091_v46, %v5090_v0  ;;  %v5161_v55 = vrot.slane %v5160_v2, 2 }
 0x255   : > { %v5093_v49 = vrot.slane %v5092_v42, 1  ;;  %v5162_v28 = vadd.f32 %v5161_v55, %v5160_v2 }
 0x257   : > { %v5094_v17 = vadd.f32 %v5093_v49, %v5092_v42  ;;  %v5163_v24 = vrot.slane %v5162_v28, 1 }
 0x259   : > { %5095 = vst [vmem:[%s212_s6] sm:$0x1] %v5094_v17  ;;  %v5164_v40 = vadd.f32 %v5163_v24, %v5162_v28 }
 0x25b   : > { %5165 = vst [vmem:[%s215_s9] sm:$0x1] %v5164_v40 }
 0x25c PF: > { %s15_s15 = sadd.s32 1, %s6991_s15  }
 0x25d   : > { %p12_p5 = scmp.ge.s32.totalorder %s15_s15, 4  }
 0x25f   :  { %14 = sbr.rel (!%p12_p5) target bundleno = 1 (0x1), region = 92 }

</bundles_post_ra>
